<compile_context>
chip_gen: v7x
topology: tpu7x:2x2x1
jax: 0.10.0
libtpu: 0.0.40
codegen_flags: <defaults>
</compile_context>

<pallas_src>
import jax
import jax.numpy as jnp
from jax import lax
from jax.experimental import pallas as pl
from jax.experimental.pallas import tpu as pltpu


def make_convblock_kernel(Bt, H, W, Cpad):
    """Fused ConvBlock kernel for a tile of Bt images (NHWC, stride=1)."""
    M = Bt * H * W

    def im2col(ap):
        # ap: (Bt, H+2, W+2, Cpad) value.  Returns the 9 taps and the
        # (M, 9*Cpad) patch matrix (taps concatenated along K, 128-aligned).
        taps = [ap[:, kh:kh + H, kw:kw + W, :].reshape(M, Cpad)
                for kh in range(3) for kw in range(3)]
        return taps, jnp.concatenate(taps, axis=-1)

    def kernel(xp_ref, w1_ref, s1_ref, b1_ref, w2_ref, s2_ref, b2_ref,
               ws_ref, ss_ref, bs_ref, out_ref, mid_ref):
        # Zero the halo scratch only once: it persists across grid steps and
        # its interior is fully overwritten every step (grid axis is
        # "arbitrary"/sequential, so step 0 runs first on the same core).
        @pl.when(pl.program_id(0) == 0)
        def _init():
            mid_ref[...] = jnp.zeros(mid_ref.shape, mid_ref.dtype)

        xp = xp_ref[...]                                  # (Bt, H+2, W+2, Cpad) bf16

        # ---- conv1 (3x3): one im2col matmul, bf16 in / f32 accumulate ----
        taps1, p1 = im2col(xp)                            # p1: (M, 9*Cpad) bf16
        h1 = jnp.dot(p1, w1_ref[...], preferred_element_type=jnp.float32)
        h1 = jnp.maximum(h1 * s1_ref[...] + b1_ref[...], 0.0)   # BN + ReLU (f32)

        # ---- shortcut (1x1 conv + BN): reuse conv1's centre tap ----
        sc = jnp.dot(taps1[4], ws_ref[...], preferred_element_type=jnp.float32)
        sc = sc * ss_ref[...] + bs_ref[...]

        # ---- conv2 (3x3): halo via persistent scratch, one im2col matmul ----
        mid_ref[:, 1:H + 1, 1:W + 1, :] = (
            h1.astype(jnp.bfloat16).reshape(Bt, H, W, Cpad))
        _, p2 = im2col(mid_ref[...])                      # (M, 9*Cpad) bf16
        h2 = jnp.dot(p2, w2_ref[...], preferred_element_type=jnp.float32)
        h2 = h2 * s2_ref[...] + b2_ref[...]               # BN (f32)

        # ---- residual add + ReLU; lane-dense store (Cpad = multiple of 128) ----
        out = jnp.maximum(h2 + sc, 0.0)
        out_ref[...] = out.reshape(Bt, H, W, Cpad).astype(out_ref.dtype)

    return kernel


@jax.jit
def convblock_forward(x_nchw, w1, s1, b1, w2, s2, b2, ws, ss, bs):
    """x_nchw: (B, Cin, H, W) f32 -> (B, Cout, H, W) f32.

    w1: (3,3,Cin,Cout), w2: (3,3,Cout,Cout), ws: (1,1,Cin,Cout)  (HWIO)
    s*/b*: (Cout,) folded BatchNorm scale/bias (conv bias included).
    """
    B, Cin, H, W = x_nchw.shape
    Cout = w1.shape[-1]
    Cpad = max(128, ((Cout + 127) // 128) * 128)      # lane-dense channel dim

    # --- one fused prep pass over the (small) input: transpose + halo pad
    #     + channel pad + bf16 cast ---
    x = jnp.transpose(x_nchw, (0, 2, 3, 1))           # NHWC
    xp = jnp.pad(x, ((0, 0), (1, 1), (1, 1), (0, Cpad - Cin))).astype(jnp.bfloat16)

    # --- im2col weights: pad both channel dims to Cpad, flatten taps into K ---
    def prep_w(w):
        kh, kw, ci, co = w.shape
        wp = jnp.pad(w, ((0, 0), (0, 0), (0, Cpad - ci), (0, Cpad - co)))
        return wp.reshape(kh * kw * Cpad, Cpad).astype(jnp.bfloat16)

    w1k, w2k, wsk = prep_w(w1), prep_w(w2), prep_w(ws)

    def prep_sb(a):
        return jnp.pad(a, (0, Cpad - Cout)).reshape(1, Cpad)   # stays f32

    s1p, b1p, s2p, b2p, ssp, bsp = map(prep_sb, (s1, b1, s2, b2, ss, bs))

    # fold batch into the matmul M dimension; keep blocks modest for VMEM.
    Bt = B if B * (H + 2) * (W + 2) * Cpad * 4 <= (8 << 20) else 1
    assert B % Bt == 0

    kernel = make_convblock_kernel(Bt, H, W, Cpad)

    out = pl.pallas_call(
        kernel,
        out_shape=jax.ShapeDtypeStruct((B, H, W, Cpad), jnp.float32),
        grid_spec=pltpu.PrefetchScalarGridSpec(
            num_scalar_prefetch=0,
            grid=(B // Bt,),
            in_specs=[
                pl.BlockSpec((Bt, H + 2, W + 2, Cpad), lambda b: (b, 0, 0, 0)),
                pl.BlockSpec((9 * Cpad, Cpad), lambda b: (0, 0)),
                pl.BlockSpec((1, Cpad), lambda b: (0, 0)),
                pl.BlockSpec((1, Cpad), lambda b: (0, 0)),
                pl.BlockSpec((9 * Cpad, Cpad), lambda b: (0, 0)),
                pl.BlockSpec((1, Cpad), lambda b: (0, 0)),
                pl.BlockSpec((1, Cpad), lambda b: (0, 0)),
                pl.BlockSpec((Cpad, Cpad), lambda b: (0, 0)),
                pl.BlockSpec((1, Cpad), lambda b: (0, 0)),
                pl.BlockSpec((1, Cpad), lambda b: (0, 0)),
            ],
            out_specs=pl.BlockSpec((Bt, H, W, Cpad), lambda b: (b, 0, 0, 0)),
            scratch_shapes=[pltpu.VMEM((Bt, H + 2, W + 2, Cpad), jnp.bfloat16)],
        ),
        # "arbitrary": the init-once halo scratch needs sequential grid steps
        # on one core (measured parallel-vs-arbitrary delta is ~0 anyway).
        compiler_params=pltpu.CompilerParams(dimension_semantics=("arbitrary",)),
    )(xp, w1k, s1p, b1p, w2k, s2p, b2p, wsk, ssp, bsp)

    # drop channel padding, back to the PyTorch NCHW interface.
    return jnp.transpose(out[..., :Cout], (0, 3, 1, 2))


def fold_bn(conv_bias, gamma, beta, mean, var, eps=1e-5):
    scale = gamma / jnp.sqrt(var + eps)
    bias = beta + scale * (conv_bias - mean)
    return scale, bias


def reference_forward(x_nchw, w1, s1, b1, w2, s2, b2, ws, ss, bs):
    """Pure-JAX reference with the same numerics (bf16 MXU operands, f32 accum)."""
    dn = ("NHWC", "HWIO", "NHWC")
    bf = jnp.bfloat16

    def conv(a, w):
        return lax.conv_general_dilated(a.astype(bf), w.astype(bf), (1, 1),
                                        "SAME", dimension_numbers=dn,
                                        preferred_element_type=jnp.float32)

    x = jnp.transpose(x_nchw, (0, 2, 3, 1))
    h1 = jax.nn.relu(conv(x, w1) * s1 + b1)
    o2 = conv(h1, w2) * s2 + b2
    sc = conv(x, ws) * ss + bs
    return jnp.transpose(jax.nn.relu(o2 + sc), (0, 3, 1, 2))


if __name__ == "__main__":
    B, CIN, COUT, H, W = 2, 4, 8, 16, 16   # stride=1, Cin != Cout -> shortcut conv

    key = jax.random.PRNGKey(0)
    ks = jax.random.split(key, 16)

    # conv weights in HWIO layout (synthetic, deterministic)
    w1 = 0.1 * jax.random.normal(ks[0], (3, 3, CIN, COUT), jnp.float32)
    w2 = 0.1 * jax.random.normal(ks[1], (3, 3, COUT, COUT), jnp.float32)
    ws = 0.1 * jax.random.normal(ks[2], (1, 1, CIN, COUT), jnp.float32)
    cb1 = 0.1 * jax.random.normal(ks[3], (COUT,), jnp.float32)
    cb2 = 0.1 * jax.random.normal(ks[4], (COUT,), jnp.float32)
    cbs = 0.1 * jax.random.normal(ks[5], (COUT,), jnp.float32)

    def bn_params(k):
        kk = jax.random.split(k, 4)
        gamma = 1.0 + 0.1 * jax.random.normal(kk[0], (COUT,), jnp.float32)
        beta = 0.1 * jax.random.normal(kk[1], (COUT,), jnp.float32)
        mean = 0.1 * jax.random.normal(kk[2], (COUT,), jnp.float32)
        var = 1.0 + 0.1 * jnp.abs(jax.random.normal(kk[3], (COUT,), jnp.float32))
        return gamma, beta, mean, var

    s1, b1 = fold_bn(cb1, *bn_params(ks[6]))
    s2, b2 = fold_bn(cb2, *bn_params(ks[7]))
    ss, bs = fold_bn(cbs, *bn_params(ks[8]))

    x = jax.random.normal(ks[9], (B, CIN, H, W), jnp.float32)

    out = convblock_forward(x, w1, s1, b1, w2, s2, b2, ws, ss, bs)
    out = jax.block_until_ready(out)

    ref = reference_forward(x, w1, s1, b1, w2, s2, b2, ws, ss, bs)
    assert out.shape == (B, COUT, H, W)
    # both paths use bf16-rounded MXU operands with f32 accumulation
    assert jnp.allclose(out, ref, atol=2e-3, rtol=2e-3), "mismatch vs reference"

    print("KERNEL_OK")
</pallas_src>

<mosaic_0001>
module attributes {stable_mosaic.version = 11 : i64} {
  func.func @kernel(%arg0: i32, %arg1: memref<2x18x18x128xbf16, #tpu.memory_space<vmem>>, %arg2: memref<1152x128xbf16, #tpu.memory_space<vmem>>, %arg3: memref<1x128xf32, #tpu.memory_space<vmem>>, %arg4: memref<1x128xf32, #tpu.memory_space<vmem>>, %arg5: memref<1152x128xbf16, #tpu.memory_space<vmem>>, %arg6: memref<1x128xf32, #tpu.memory_space<vmem>>, %arg7: memref<1x128xf32, #tpu.memory_space<vmem>>, %arg8: memref<128x128xbf16, #tpu.memory_space<vmem>>, %arg9: memref<1x128xf32, #tpu.memory_space<vmem>>, %arg10: memref<1x128xf32, #tpu.memory_space<vmem>>, %arg11: memref<2x16x16x128xf32, #tpu.memory_space<vmem>>, %arg12: memref<2x18x18x128xbf16, #tpu.memory_space<vmem>>) attributes {dimension_semantics = [#tpu.dimension_semantics<arbitrary>], iteration_bounds = array<i64: 1>, scalar_prefetch = 0 : i64, scratch_operands = 1 : i64, tpu.core_type = #tpu.core_type<tc>, window_params = [{transform_indices = @transform_0, window_bounds = array<i64: 2, 18, 18, 128>}, {pipeline_mode = #tpu.pipeline_mode<synchronous>, transform_indices = @transform_1, window_bounds = array<i64: 1152, 128>}, {pipeline_mode = #tpu.pipeline_mode<synchronous>, transform_indices = @transform_2, window_bounds = array<i64: 1, 128>}, {pipeline_mode = #tpu.pipeline_mode<synchronous>, transform_indices = @transform_3, window_bounds = array<i64: 1, 128>}, {pipeline_mode = #tpu.pipeline_mode<synchronous>, transform_indices = @transform_4, window_bounds = array<i64: 1152, 128>}, {pipeline_mode = #tpu.pipeline_mode<synchronous>, transform_indices = @transform_5, window_bounds = array<i64: 1, 128>}, {pipeline_mode = #tpu.pipeline_mode<synchronous>, transform_indices = @transform_6, window_bounds = array<i64: 1, 128>}, {pipeline_mode = #tpu.pipeline_mode<synchronous>, transform_indices = @transform_7, window_bounds = array<i64: 128, 128>}, {pipeline_mode = #tpu.pipeline_mode<synchronous>, transform_indices = @transform_8, window_bounds = array<i64: 1, 128>}, {pipeline_mode = #tpu.pipeline_mode<synchronous>, transform_indices = @transform_9, window_bounds = array<i64: 1, 128>}, {transform_indices = @transform_10, window_bounds = array<i64: 2, 16, 16, 128>}]} {
    %c0_i32 = arith.constant 0 : i32
    %0 = arith.cmpi eq, %arg0, %c0_i32 : i32
    %1 = arith.extui %0 : i1 to i32
    %c0_i32_0 = arith.constant 0 : i32
    %2 = arith.cmpi ne, %1, %c0_i32_0 : i32
    scf.if %2 {
      %cst_37 = arith.constant 0.000000e+00 : bf16
      %77 = vector.broadcast %cst_37 : bf16 to vector<2x18x18x128xbf16>
      %c0_38 = arith.constant 0 : index
      %c0_39 = arith.constant 0 : index
      %c0_40 = arith.constant 0 : index
      %c0_41 = arith.constant 0 : index
      %78 = vector.load %arg12[%c0_38, %c0_39, %c0_40, %c0_41] : memref<2x18x18x128xbf16, #tpu.memory_space<vmem>>, vector<2x18x18x128xbf16>
      tpu.vector_store %arg12[%c0_38, %c0_39, %c0_40, %c0_41], %77 {strides = array<i32>} : memref<2x18x18x128xbf16, #tpu.memory_space<vmem>>, vector<2x18x18x128xbf16>,
    } else {
    }
    %c0 = arith.constant 0 : index
    %c0_1 = arith.constant 0 : index
    %c0_2 = arith.constant 0 : index
    %c0_3 = arith.constant 0 : index
    %3 = vector.load %arg1[%c0, %c0_1, %c0_2, %c0_3] : memref<2x18x18x128xbf16, #tpu.memory_space<vmem>>, vector<2x18x18x128xbf16>
    %4 = vector.extract_strided_slice %3 {offsets = [0, 0, 0, 0], sizes = [2, 16, 16, 128], strides = [1, 1, 1, 1]} : vector<2x18x18x128xbf16> to vector<2x16x16x128xbf16>
    %5 = vector.shape_cast %4 : vector<2x16x16x128xbf16> to vector<512x128xbf16>
    %6 = vector.extract_strided_slice %3 {offsets = [0, 0, 1, 0], sizes = [2, 16, 16, 128], strides = [1, 1, 1, 1]} : vector<2x18x18x128xbf16> to vector<2x16x16x128xbf16>
    %7 = vector.shape_cast %6 : vector<2x16x16x128xbf16> to vector<512x128xbf16>
    %8 = vector.extract_strided_slice %3 {offsets = [0, 0, 2, 0], sizes = [2, 16, 16, 128], strides = [1, 1, 1, 1]} : vector<2x18x18x128xbf16> to vector<2x16x16x128xbf16>
    %9 = vector.shape_cast %8 : vector<2x16x16x128xbf16> to vector<512x128xbf16>
    %10 = vector.extract_strided_slice %3 {offsets = [0, 1, 0, 0], sizes = [2, 16, 16, 128], strides = [1, 1, 1, 1]} : vector<2x18x18x128xbf16> to vector<2x16x16x128xbf16>
    %11 = vector.shape_cast %10 : vector<2x16x16x128xbf16> to vector<512x128xbf16>
    %12 = vector.extract_strided_slice %3 {offsets = [0, 1, 1, 0], sizes = [2, 16, 16, 128], strides = [1, 1, 1, 1]} : vector<2x18x18x128xbf16> to vector<2x16x16x128xbf16>
    %13 = vector.shape_cast %12 : vector<2x16x16x128xbf16> to vector<512x128xbf16>
    %14 = vector.extract_strided_slice %3 {offsets = [0, 1, 2, 0], sizes = [2, 16, 16, 128], strides = [1, 1, 1, 1]} : vector<2x18x18x128xbf16> to vector<2x16x16x128xbf16>
    %15 = vector.shape_cast %14 : vector<2x16x16x128xbf16> to vector<512x128xbf16>
    %16 = vector.extract_strided_slice %3 {offsets = [0, 2, 0, 0], sizes = [2, 16, 16, 128], strides = [1, 1, 1, 1]} : vector<2x18x18x128xbf16> to vector<2x16x16x128xbf16>
    %17 = vector.shape_cast %16 : vector<2x16x16x128xbf16> to vector<512x128xbf16>
    %18 = vector.extract_strided_slice %3 {offsets = [0, 2, 1, 0], sizes = [2, 16, 16, 128], strides = [1, 1, 1, 1]} : vector<2x18x18x128xbf16> to vector<2x16x16x128xbf16>
    %19 = vector.shape_cast %18 : vector<2x16x16x128xbf16> to vector<512x128xbf16>
    %20 = vector.extract_strided_slice %3 {offsets = [0, 2, 2, 0], sizes = [2, 16, 16, 128], strides = [1, 1, 1, 1]} : vector<2x18x18x128xbf16> to vector<2x16x16x128xbf16>
    %21 = vector.shape_cast %20 : vector<2x16x16x128xbf16> to vector<512x128xbf16>
    %22 = tpu.concatenate %5, %7, %9, %11, %13, %15, %17, %19, %21 in 1 : vector<512x128xbf16>, vector<512x128xbf16>, vector<512x128xbf16>, vector<512x128xbf16>, vector<512x128xbf16>, vector<512x128xbf16>, vector<512x128xbf16>, vector<512x128xbf16>, vector<512x128xbf16> -> vector<512x1152xbf16>
    %c0_4 = arith.constant 0 : index
    %c0_5 = arith.constant 0 : index
    %23 = vector.load %arg2[%c0_4, %c0_5] : memref<1152x128xbf16, #tpu.memory_space<vmem>>, vector<1152x128xbf16>
    %cst = arith.constant dense<0.000000e+00> : vector<512x128xf32>
    %24 = tpu.matmul %22, %23, %cst {dimension_numbers = #tpu.dot_dimension_numbers<[1], [0], [0], [1], [0, 0, 1, 1], [], []>} : vector<512x1152xbf16>, vector<1152x128xbf16>, vector<512x128xf32> -> vector<512x128xf32>
    %c0_6 = arith.constant 0 : index
    %c0_7 = arith.constant 0 : index
    %25 = vector.load %arg3[%c0_6, %c0_7] : memref<1x128xf32, #tpu.memory_space<vmem>>, vector<1x128xf32>
    %26 = vector.broadcast %25 : vector<1x128xf32> to vector<512x128xf32>
    %27 = arith.mulf %24, %26 : vector<512x128xf32>
    %c0_8 = arith.constant 0 : index
    %c0_9 = arith.constant 0 : index
    %28 = vector.load %arg4[%c0_8, %c0_9] : memref<1x128xf32, #tpu.memory_space<vmem>>, vector<1x128xf32>
    %29 = vector.broadcast %28 : vector<1x128xf32> to vector<512x128xf32>
    %30 = arith.addf %27, %29 : vector<512x128xf32>
    %cst_10 = arith.constant 0.000000e+00 : f32
    %31 = vector.broadcast %cst_10 : f32 to vector<512x128xf32>
    %32 = arith.maximumf %30, %31 : vector<512x128xf32>
    %c0_11 = arith.constant 0 : index
    %c0_12 = arith.constant 0 : index
    %33 = vector.load %arg8[%c0_11, %c0_12] : memref<128x128xbf16, #tpu.memory_space<vmem>>, vector<128x128xbf16>
    %cst_13 = arith.constant dense<0.000000e+00> : vector<512x128xf32>
    %34 = tpu.matmul %13, %33, %cst_13 {dimension_numbers = #tpu.dot_dimension_numbers<[1], [0], [0], [1], [0, 0, 1, 1], [], []>} : vector<512x128xbf16>, vector<128x128xbf16>, vector<512x128xf32> -> vector<512x128xf32>
    %c0_14 = arith.constant 0 : index
    %c0_15 = arith.constant 0 : index
    %35 = vector.load %arg9[%c0_14, %c0_15] : memref<1x128xf32, #tpu.memory_space<vmem>>, vector<1x128xf32>
    %36 = vector.broadcast %35 : vector<1x128xf32> to vector<512x128xf32>
    %37 = arith.mulf %34, %36 : vector<512x128xf32>
    %c0_16 = arith.constant 0 : index
    %c0_17 = arith.constant 0 : index
    %38 = vector.load %arg10[%c0_16, %c0_17] : memref<1x128xf32, #tpu.memory_space<vmem>>, vector<1x128xf32>
    %39 = vector.broadcast %38 : vector<1x128xf32> to vector<512x128xf32>
    %40 = arith.addf %37, %39 : vector<512x128xf32>
    %41 = arith.truncf %32 : vector<512x128xf32> to vector<512x128xbf16>
    %42 = vector.shape_cast %41 : vector<512x128xbf16> to vector<2x16x16x128xbf16>
    %c0_18 = arith.constant 0 : index
    %c1 = arith.constant 1 : index
    %c1_19 = arith.constant 1 : index
    %c0_20 = arith.constant 0 : index
    %43 = vector.load %arg12[%c0_18, %c1, %c1_19, %c0_20] : memref<2x18x18x128xbf16, #tpu.memory_space<vmem>>, vector<2x16x16x128xbf16>
    tpu.vector_store %arg12[%c0_18, %c1, %c1_19, %c0_20], %42 {strides = array<i32>} : memref<2x18x18x128xbf16, #tpu.memory_space<vmem>>, vector<2x16x16x128xbf16>,
    %c0_21 = arith.constant 0 : index
    %c0_22 = arith.constant 0 : index
    %c0_23 = arith.constant 0 : index
    %c0_24 = arith.constant 0 : index
    %44 = vector.load %arg12[%c0_21, %c0_22, %c0_23, %c0_24] : memref<2x18x18x128xbf16, #tpu.memory_space<vmem>>, vector<2x18x18x128xbf16>
    %45 = vector.extract_strided_slice %44 {offsets = [0, 0, 0, 0], sizes = [2, 16, 16, 128], strides = [1, 1, 1, 1]} : vector<2x18x18x128xbf16> to vector<2x16x16x128xbf16>
    %46 = vector.shape_cast %45 : vector<2x16x16x128xbf16> to vector<512x128xbf16>
    %47 = vector.extract_strided_slice %44 {offsets = [0, 0, 1, 0], sizes = [2, 16, 16, 128], strides = [1, 1, 1, 1]} : vector<2x18x18x128xbf16> to vector<2x16x16x128xbf16>
    %48 = vector.shape_cast %47 : vector<2x16x16x128xbf16> to vector<512x128xbf16>
    %49 = vector.extract_strided_slice %44 {offsets = [0, 0, 2, 0], sizes = [2, 16, 16, 128], strides = [1, 1, 1, 1]} : vector<2x18x18x128xbf16> to vector<2x16x16x128xbf16>
    %50 = vector.shape_cast %49 : vector<2x16x16x128xbf16> to vector<512x128xbf16>
    %51 = vector.extract_strided_slice %44 {offsets = [0, 1, 0, 0], sizes = [2, 16, 16, 128], strides = [1, 1, 1, 1]} : vector<2x18x18x128xbf16> to vector<2x16x16x128xbf16>
    %52 = vector.shape_cast %51 : vector<2x16x16x128xbf16> to vector<512x128xbf16>
    %53 = vector.extract_strided_slice %44 {offsets = [0, 1, 1, 0], sizes = [2, 16, 16, 128], strides = [1, 1, 1, 1]} : vector<2x18x18x128xbf16> to vector<2x16x16x128xbf16>
    %54 = vector.shape_cast %53 : vector<2x16x16x128xbf16> to vector<512x128xbf16>
    %55 = vector.extract_strided_slice %44 {offsets = [0, 1, 2, 0], sizes = [2, 16, 16, 128], strides = [1, 1, 1, 1]} : vector<2x18x18x128xbf16> to vector<2x16x16x128xbf16>
    %56 = vector.shape_cast %55 : vector<2x16x16x128xbf16> to vector<512x128xbf16>
    %57 = vector.extract_strided_slice %44 {offsets = [0, 2, 0, 0], sizes = [2, 16, 16, 128], strides = [1, 1, 1, 1]} : vector<2x18x18x128xbf16> to vector<2x16x16x128xbf16>
    %58 = vector.shape_cast %57 : vector<2x16x16x128xbf16> to vector<512x128xbf16>
    %59 = vector.extract_strided_slice %44 {offsets = [0, 2, 1, 0], sizes = [2, 16, 16, 128], strides = [1, 1, 1, 1]} : vector<2x18x18x128xbf16> to vector<2x16x16x128xbf16>
    %60 = vector.shape_cast %59 : vector<2x16x16x128xbf16> to vector<512x128xbf16>
    %61 = vector.extract_strided_slice %44 {offsets = [0, 2, 2, 0], sizes = [2, 16, 16, 128], strides = [1, 1, 1, 1]} : vector<2x18x18x128xbf16> to vector<2x16x16x128xbf16>
    %62 = vector.shape_cast %61 : vector<2x16x16x128xbf16> to vector<512x128xbf16>
    %63 = tpu.concatenate %46, %48, %50, %52, %54, %56, %58, %60, %62 in 1 : vector<512x128xbf16>, vector<512x128xbf16>, vector<512x128xbf16>, vector<512x128xbf16>, vector<512x128xbf16>, vector<512x128xbf16>, vector<512x128xbf16>, vector<512x128xbf16>, vector<512x128xbf16> -> vector<512x1152xbf16>
    %c0_25 = arith.constant 0 : index
    %c0_26 = arith.constant 0 : index
    %64 = vector.load %arg5[%c0_25, %c0_26] : memref<1152x128xbf16, #tpu.memory_space<vmem>>, vector<1152x128xbf16>
    %cst_27 = arith.constant dense<0.000000e+00> : vector<512x128xf32>
    %65 = tpu.matmul %63, %64, %cst_27 {dimension_numbers = #tpu.dot_dimension_numbers<[1], [0], [0], [1], [0, 0, 1, 1], [], []>} : vector<512x1152xbf16>, vector<1152x128xbf16>, vector<512x128xf32> -> vector<512x128xf32>
    %c0_28 = arith.constant 0 : index
    %c0_29 = arith.constant 0 : index
    %66 = vector.load %arg6[%c0_28, %c0_29] : memref<1x128xf32, #tpu.memory_space<vmem>>, vector<1x128xf32>
    %67 = vector.broadcast %66 : vector<1x128xf32> to vector<512x128xf32>
    %68 = arith.mulf %65, %67 : vector<512x128xf32>
    %c0_30 = arith.constant 0 : index
    %c0_31 = arith.constant 0 : index
    %69 = vector.load %arg7[%c0_30, %c0_31] : memref<1x128xf32, #tpu.memory_space<vmem>>, vector<1x128xf32>
    %70 = vector.broadcast %69 : vector<1x128xf32> to vector<512x128xf32>
    %71 = arith.addf %68, %70 : vector<512x128xf32>
    %72 = arith.addf %71, %40 : vector<512x128xf32>
    %cst_32 = arith.constant 0.000000e+00 : f32
    %73 = vector.broadcast %cst_32 : f32 to vector<512x128xf32>
    %74 = arith.maximumf %72, %73 : vector<512x128xf32>
    %75 = vector.shape_cast %74 : vector<512x128xf32> to vector<2x16x16x128xf32>
    %c0_33 = arith.constant 0 : index
    %c0_34 = arith.constant 0 : index
    %c0_35 = arith.constant 0 : index
    %c0_36 = arith.constant 0 : index
    %76 = vector.load %arg11[%c0_33, %c0_34, %c0_35, %c0_36] : memref<2x16x16x128xf32, #tpu.memory_space<vmem>>, vector<2x16x16x128xf32>
    tpu.vector_store %arg11[%c0_33, %c0_34, %c0_35, %c0_36], %75 {strides = array<i32>} : memref<2x16x16x128xf32, #tpu.memory_space<vmem>>, vector<2x16x16x128xf32>,
    return
  }
  func.func @transform_0(%arg0: i32) -> (i32, i32, i32, i32) {
    %c0_i32 = arith.constant 0 : i32
    %c0_i32_0 = arith.constant 0 : i32
    %c0_i32_1 = arith.constant 0 : i32
    %c0_i32_2 = arith.constant 0 : i32
    return %arg0, %c0_i32, %c0_i32_0, %c0_i32_1 : i32, i32, i32, i32
  }
  func.func @transform_1(%arg0: i32) -> (i32, i32) {
    %c0_i32 = arith.constant 0 : i32
    %c0_i32_0 = arith.constant 0 : i32
    %c0_i32_1 = arith.constant 0 : i32
    return %c0_i32, %c0_i32_0 : i32, i32
  }
  func.func @transform_2(%arg0: i32) -> (i32, i32) {
    %c0_i32 = arith.constant 0 : i32
    %c0_i32_0 = arith.constant 0 : i32
    %c0_i32_1 = arith.constant 0 : i32
    return %c0_i32, %c0_i32_0 : i32, i32
  }
  func.func @transform_3(%arg0: i32) -> (i32, i32) {
    %c0_i32 = arith.constant 0 : i32
    %c0_i32_0 = arith.constant 0 : i32
    %c0_i32_1 = arith.constant 0 : i32
    return %c0_i32, %c0_i32_0 : i32, i32
  }
  func.func @transform_4(%arg0: i32) -> (i32, i32) {
    %c0_i32 = arith.constant 0 : i32
    %c0_i32_0 = arith.constant 0 : i32
    %c0_i32_1 = arith.constant 0 : i32
    return %c0_i32, %c0_i32_0 : i32, i32
  }
  func.func @transform_5(%arg0: i32) -> (i32, i32) {
    %c0_i32 = arith.constant 0 : i32
    %c0_i32_0 = arith.constant 0 : i32
    %c0_i32_1 = arith.constant 0 : i32
    return %c0_i32, %c0_i32_0 : i32, i32
  }
  func.func @transform_6(%arg0: i32) -> (i32, i32) {
    %c0_i32 = arith.constant 0 : i32
    %c0_i32_0 = arith.constant 0 : i32
    %c0_i32_1 = arith.constant 0 : i32
    return %c0_i32, %c0_i32_0 : i32, i32
  }
  func.func @transform_7(%arg0: i32) -> (i32, i32) {
    %c0_i32 = arith.constant 0 : i32
    %c0_i32_0 = arith.constant 0 : i32
    %c0_i32_1 = arith.constant 0 : i32
    return %c0_i32, %c0_i32_0 : i32, i32
  }
  func.func @transform_8(%arg0: i32) -> (i32, i32) {
    %c0_i32 = arith.constant 0 : i32
    %c0_i32_0 = arith.constant 0 : i32
    %c0_i32_1 = arith.constant 0 : i32
    return %c0_i32, %c0_i32_0 : i32, i32
  }
  func.func @transform_9(%arg0: i32) -> (i32, i32) {
    %c0_i32 = arith.constant 0 : i32
    %c0_i32_0 = arith.constant 0 : i32
    %c0_i32_1 = arith.constant 0 : i32
    return %c0_i32, %c0_i32_0 : i32, i32
  }
  func.func @transform_10(%arg0: i32) -> (i32, i32, i32, i32) {
    %c0_i32 = arith.constant 0 : i32
    %c0_i32_0 = arith.constant 0 : i32
    %c0_i32_1 = arith.constant 0 : i32
    %c0_i32_2 = arith.constant 0 : i32
    return %arg0, %c0_i32, %c0_i32_0, %c0_i32_1 : i32, i32, i32, i32
  }
}

</mosaic_0001>

<bundles_post_ra>
// kernel: convblock_forward.1
= control target key start
LH: loop header
LB: loop body
LE: loop exit
PB: predicated region body
PF: predicated region fallthrough
CT: control target
= control target key end

     0   :  { %v17279_v0 = vmov 0   ;;  %vm256_vm0 = vsmask.f32 3328  ;;  %vm257_vm1 = vsmask.f32 7440  ;;  %vm1123_vm2 = vcmask 1042432   ;;  %s17261_s1 = inlined_call_operand.vmem [shape: bf16[1152,128], index: 1, kind: input, shape index: {}]   ;;  %s17262_s0 = inlined_call_operand.vmem [shape: bf16[2,18,18,128], index: 0, kind: input, shape index: {}]   ;;  %s17263_s7 = inlined_call_operand.vmem [shape: bf16[128,128], index: 7, kind: input, shape index: {}]   ;;  %s17264_s4 = inlined_call_operand.vmem [shape: bf16[1152,128], index: 4, kind: input, shape index: {}]   ;;  %s17265_s2 = inlined_call_operand.vmem [shape: f32[1,128], index: 2, kind: input, shape index: {}]   ;;  %s17266_s3 = inlined_call_operand.vmem [shape: f32[1,128], index: 3, kind: input, shape index: {}]   ;;  %s17267_s8 = inlined_call_operand.vmem [shape: f32[1,128], index: 8, kind: input, shape index: {}]   ;;  %s17268_s5 = inlined_call_operand.vmem [shape: f32[1,128], index: 5, kind: input, shape index: {}]   ;;  %s17269_s9 = inlined_call_operand.vmem [shape: f32[1,128], index: 9, kind: input, shape index: {}]   ;;  %s17270_s6 = inlined_call_operand.vmem [shape: f32[1,128], index: 6, kind: input, shape index: {}]   ;;  %s17271_s10 = inlined_call_operand.vmem [shape: f32[2,16,16,128], index: 10, kind: output, shape index: {}]  }
   0x1   :  { %2494 = vmatprep.subr.bf16.mxu0 %v17279_v0  ;;  %40 = vst [vmem:[#allocation2] sm:$0xf] %v17279_v0  ;;  %41 = vst [vmem:[#allocation2 + $0x4] sm:$0xf] %v17279_v0  ;;  %v11547_v1 = vld [vmem:[%s17261_s1] sm:$0xff]   ;;  %v11548_v2 = vld [vmem:[%s17261_s1 + $0x8] sm:$0xff]  }
   0x2   :  { %42 = vst [vmem:[#allocation2 + $0x8] sm:$0x1] %v17279_v0  ;;  %43 = vst [vmem:[#allocation2 + $0xc] sm:$0xf] %v17279_v0  ;;  %2495 = vmatpush1.bf16.msra.mxu0 %v11547_v1  ;;  %v11549_v3 = vld [vmem:[%s17261_s1 + $0x10] sm:$0xff]   ;;  %v11550_v4 = vld [vmem:[%s17261_s1 + $0x18] sm:$0xff]  }
   0x3   :  { %44 = vst [vmem:[#allocation2 + $0x10] sm:$0xf] %v17279_v0  ;;  %45 = vst [vmem:[#allocation2 + $0x14] sm:$0x1] %v17279_v0  ;;  %2496 = vmatprep.subr.bf16.mxu0 %v17279_v0  ;;  %v11551_v5 = vld [vmem:[%s17261_s1 + $0x20] sm:$0xff]   ;;  %vm1124_vm3 = vcmask 1046532  }
   0x4   :  { %46 = vst [vmem:[#allocation2 + $0x18] sm:$0xf] %v17279_v0  ;;  %47 = vst [vmem:[#allocation2 + $0x1c] sm:$0xf] %v17279_v0  ;;  %v12054_v6 = vld [vmem:[%s17262_s0] sm:$0xf] }
   0x5   :  { %48 = vst [vmem:[#allocation2 + $0x20] sm:$0x1] %v17279_v0  ;;  %49 = vst [vmem:[#allocation2 + $0x24] sm:$0xf] %v17279_v0  ;;  %v12059_v7 = vld [vmem:[%s17262_s0 + $0x4] sm:$0xf] }
   0x6   :  { %50 = vst [vmem:[#allocation2 + $0x28] sm:$0xf] %v17279_v0  ;;  %51 = vst [vmem:[#allocation2 + $0x2c] sm:$0x1] %v17279_v0  ;;  %2497 = vmatpush1.bf16.msra.mxu0 %v11548_v2  ;;  %v150_v8 = vld [vmem:[%s17262_s0 + $0x8] sm:$0x1] }
   0x7   :  { %52 = vst [vmem:[#allocation2 + $0x30] sm:$0xf] %v17279_v0  ;;  %53 = vst [vmem:[#allocation2 + $0x34] sm:$0xf] %v17279_v0  ;;  %2498 = vmatprep.subr.bf16.mxu0 %v17279_v0  ;;  %v260_v9 = vshrl.u32 %v12054_v6, 16  ;;  %v263_v10 = vshll.u32 %v12054_v6, 16 }
   0x8   :  { %54 = vst [vmem:[#allocation2 + $0x38] sm:$0x1] %v17279_v0  ;;  %55 = vst [vmem:[#allocation2 + $0x3c] sm:$0xf] %v17279_v0  ;;  %v269_v11 = vshll.u32 %v12059_v7, 16  ;;  %v273_v12 = vshrl.u32 %v12059_v7, 16 }
   0x9   :  { %56 = vst [vmem:[#allocation2 + $0x40] sm:$0xf] %v17279_v0  ;;  %57 = vst [vmem:[#allocation2 + $0x44] sm:$0x1] %v17279_v0  ;;  %v11552_v13 = vld [vmem:[%s17261_s1 + $0x28] sm:$0xff]   ;;  %v279_v14 = vshll.u32 %v150_v8, 16 }
   0xa   :  { %58 = vst [vmem:[#allocation2 + $0x48] sm:$0xf] %v17279_v0  ;;  %59 = vst [vmem:[#allocation2 + $0x4c] sm:$0xf] %v17279_v0  ;;  %2499 = vmatpush1.bf16.msra.mxu0 %v11549_v3  ;;  %v17272_v15 = vrot.slane %v12059_v7, 5  ;;  %v1131_v16 = vrot.slane %v150_v8, 5 }
   0xb   :  { %60 = vst [vmem:[#allocation2 + $0x50] sm:$0x1] %v17279_v0  ;;  %61 = vst [vmem:[#allocation2 + $0x54] sm:$0xf] %v17279_v0  ;;  %2500 = vmatprep.subr.bf16.mxu0 %v17279_v0  ;;  %v262_v17 = vrot.slane %v260_v9, 4  ;;  %v265_v18 = vrot.slane %v263_v10, 5 }
   0xc   :  { %62 = vst [vmem:[#allocation2 + $0x58] sm:$0xf] %v17279_v0  ;;  %63 = vst [vmem:[#allocation2 + $0x5c] sm:$0x1] %v17279_v0  ;;  %v271_v19 = vrot.slane %v269_v11, 5  ;;  %v275_v20 = vrot.slane %v273_v12, 4 }
   0xd   :  { %64 = vst [vmem:[#allocation2 + $0x60] sm:$0xf] %v17279_v0  ;;  %65 = vst [vmem:[#allocation2 + $0x64] sm:$0xf] %v17279_v0  ;;  %v17556_v21 = vmov 0  ;;  %v1130_v22 = vrot.slane %v17272_v15, 4  ;;  %v266_v23 = vor.u32 %v265_v18, %v262_v17 }
   0xe   :  { %66 = vst [vmem:[#allocation2 + $0x68] sm:$0x1] %v17279_v0  ;;  %67 = vst [vmem:[#allocation2 + $0x6c] sm:$0xf] %v17279_v0  ;;  %2501 = vmatpush1.bf16.msra.mxu0 %v11550_v4  ;;  %v276_v24 = vor.u32 %v275_v20, %v271_v19  ;;  %v281_v25 = vrot.slane %v279_v14, 5  ;;  %v11553_v26 = vld [vmem:[%s17261_s1 + $0x30] sm:$0xff]  }
   0xf   :  { %68 = vst [vmem:[#allocation2 + $0x70] sm:$0xf] %v17279_v0  ;;  %69 = vst [vmem:[#allocation2 + $0x74] sm:$0x1] %v17279_v0  ;;  %2502 = vmatprep.subr.bf16.mxu0 %v17279_v0  ;;  %v267_v29 = vrot.slane %v266_v23, 4  ;;  %v11554_v33 = vld [vmem:[%s17261_s1 + $0x38] sm:$0xff]   ;;  %v9864_v23 = vcombine.low %v12054_v6, %v12059_v7 }
  0x10   :  { %70 = vst [vmem:[#allocation2 + $0x78] sm:$0xf] %v17279_v0  ;;  %71 = vst [vmem:[#allocation2 + $0x7c] sm:$0xf] %v17279_v0  ;;  %v277_v30 = vrot.slane %v276_v24, 4  ;;  %v11555_v35 = vld [vmem:[%s17261_s1 + $0x40] sm:$0xff]  }
  0x11   :  { %72 = vst [vmem:[#allocation2 + $0x80] sm:$0x1] %v17279_v0  ;;  %73 = vst [vmem:[#allocation2 + $0x84] sm:$0xf] %v17279_v0  ;;  %v11556_v36 = vld [vmem:[%s17261_s1 + $0x48] sm:$0xff]   ;;  %v11557_v37 = vld [vmem:[%s17261_s1 + $0x50] sm:$0xff]  }
  0x12   :  { %74 = vst [vmem:[#allocation2 + $0x88] sm:$0xf] %v17279_v0  ;;  %75 = vst [vmem:[#allocation2 + $0x8c] sm:$0x1] %v17279_v0  ;;  %2503 = vmatpush1.bf16.msra.mxu0 %v11551_v5  ;;  %v12118_v38 = vld [vmem:[%s17262_s0 + $0xc] sm:$0xf] }
  0x13   :  { %76 = vst [vmem:[#allocation2 + $0x90] sm:$0xf] %v17279_v0  ;;  %77 = vst [vmem:[#allocation2 + $0x94] sm:$0xf] %v17279_v0  ;;  %2504 = vmatprep.subr.bf16.mxu0 %v17279_v0  ;;  %v12123_v39 = vld [vmem:[%s17262_s0 + $0x10] sm:$0xf] }
  0x14   :  { %78 = vst [vmem:[#allocation2 + $0x98] sm:$0x1] %v17279_v0  ;;  %79 = vst [vmem:[#allocation2 + $0x9c] sm:$0xf] %v17279_v0  ;;  %v11558_v40 = vld [vmem:[%s17261_s1 + $0x58] sm:$0xff]   ;;  %v284_v41 = vshrl.u32 %v12118_v38, 16 }
  0x15   :  { %80 = vst [vmem:[#allocation2 + $0xa0] sm:$0xf] %v17279_v0  ;;  %81 = vst [vmem:[#allocation2 + $0xa4] sm:$0x1] %v17279_v0  ;;  %v287_v42 = vshll.u32 %v12118_v38, 16  ;;  %v293_v43 = vshll.u32 %v12123_v39, 16 }
  0x16   :  { %82 = vst [vmem:[#allocation2 + $0xa8] sm:$0xf] %v17279_v0  ;;  %83 = vst [vmem:[#allocation2 + $0xac] sm:$0xf] %v17279_v0  ;;  %2505 = vmatpush1.bf16.msra.mxu0 %v11552_v13  ;;  %v297_v44 = vshrl.u32 %v12123_v39, 16  ;;  %v11559_v45 = vld [vmem:[%s17261_s1 + $0x60] sm:$0xff]  }
  0x17   :  { %84 = vst [vmem:[#allocation2 + $0xb0] sm:$0x1] %v17279_v0  ;;  %85 = vst [vmem:[#allocation2 + $0xb4] sm:$0xf] %v17279_v0  ;;  %2506 = vmatprep.subr.bf16.mxu0 %v17279_v0  ;;  %v153_v46 = vld [vmem:[%s17262_s0 + $0x14] sm:$0x1] }
  0x18   :  { %86 = vst [vmem:[#allocation2 + $0xb8] sm:$0xf] %v17279_v0  ;;  %87 = vst [vmem:[#allocation2 + $0xbc] sm:$0x1] %v17279_v0  ;;  %v286_v47 = vrot.slane %v284_v41, 4  ;;  %v289_v48 = vrot.slane %v287_v42, 5 }
  0x19   :  { %88 = vst [vmem:[#allocation2 + $0xc0] sm:$0xf] %v17279_v0  ;;  %89 = vst [vmem:[#allocation2 + $0xc4] sm:$0xf] %v17279_v0  ;;  %v295_v49 = vrot.slane %v293_v43, 5  ;;  %v299_v50 = vrot.slane %v297_v44, 4 }
  0x1a   :  { %90 = vst [vmem:[#allocation2 + $0xc8] sm:$0x1] %v17279_v0  ;;  %91 = vst [vmem:[#allocation2 + $0xcc] sm:$0xf] %v17279_v0  ;;  %2507 = vmatpush1.bf16.msra.mxu0 %v11553_v26  ;;  %v12143_v51 = vld [vmem:[%s17262_s0 + $0x18] sm:$0xf]  ;;  %v290_v54 = vor.u32 %v289_v48, %v286_v47 }
  0x1b   :  { %92 = vst [vmem:[#allocation2 + $0xd0] sm:$0xf] %v17279_v0  ;;  %93 = vst [vmem:[#allocation2 + $0xd4] sm:$0x1] %v17279_v0  ;;  %2508 = vmatprep.subr.bf16.mxu0 %v17279_v0  ;;  %v12148_v52 = vld [vmem:[%s17262_s0 + $0x1c] sm:$0xf]  ;;  %v300_v57 = vor.u32 %v299_v50, %v295_v49  ;;  %v12226_v50 = vcombine.low %v12118_v38, %v12123_v39 }
  0x1c   :  { %94 = vst [vmem:[#allocation2 + $0xd8] sm:$0xf] %v17279_v0  ;;  %95 = vst [vmem:[#allocation2 + $0xdc] sm:$0xf] %v17279_v0  ;;  %v11560_v53 = vld [vmem:[%s17261_s1 + $0x68] sm:$0xff]   ;;  %v303_v55 = vshll.u32 %v153_v46, 16 }
  0x1d   :  { %96 = vst [vmem:[#allocation2 + $0xe0] sm:$0x1] %v17279_v0  ;;  %97 = vst [vmem:[#allocation2 + $0xe4] sm:$0xf] %v17279_v0  ;;  %v308_v56 = vshrl.u32 %v12143_v51, 16  ;;  %v311_v58 = vshll.u32 %v12143_v51, 16 }
  0x1e   :  { %98 = vst [vmem:[#allocation2 + $0xe8] sm:$0xf] %v17279_v0  ;;  %99 = vst [vmem:[#allocation2 + $0xec] sm:$0x1] %v17279_v0  ;;  %2509 = vmatpush1.bf16.msra.mxu0 %v11554_v33  ;;  %v317_v59 = vshll.u32 %v12148_v52, 16  ;;  %v321_v60 = vshrl.u32 %v12148_v52, 16 }
  0x1f   :  { %100 = vst [vmem:[#allocation2 + $0xf0] sm:$0xf] %v17279_v0  ;;  %101 = vst [vmem:[#allocation2 + $0xf4] sm:$0xf] %v17279_v0  ;;  %2510 = vmatprep.subr.bf16.mxu0 %v17279_v0  ;;  %v156_v61 = vld [vmem:[%s17262_s0 + $0x20] sm:$0x1] }
  0x20   :  { %102 = vst [vmem:[#allocation2 + $0xf8] sm:$0x1] %v17279_v0  ;;  %103 = vst [vmem:[#allocation2 + $0xfc] sm:$0xf] %v17279_v0  ;;  %v11561_v62 = vld [vmem:[%s17261_s1 + $0x70] sm:$0xff]   ;;  %v291_v63 = vrot.slane %v290_v54, 4 }
  0x21   :  { %104 = vst [vmem:[#allocation2 + $0x100] sm:$0xf] %v17279_v0  ;;  %105 = vst [vmem:[#allocation2 + $0x104] sm:$0x1] %v17279_v0  ;;  %v305_v1 = vrot.slane %v303_v55, 5  ;;  %v310_v2 = vrot.slane %v308_v56, 4 }
  0x22   :  { %106 = vst [vmem:[#allocation2 + $0x108] sm:$0xf] %v17279_v0  ;;  %107 = vst [vmem:[#allocation2 + $0x10c] sm:$0xf] %v17279_v0  ;;  %2511 = vmatpush1.bf16.msra.mxu0 %v11555_v35  ;;  %v12167_v3 = vld [vmem:[%s17262_s0 + $0x24] sm:$0xf] }
  0x23   :  { %108 = vst [vmem:[#allocation2 + $0x110] sm:$0x1] %v17279_v0  ;;  %109 = vst [vmem:[#allocation2 + $0x114] sm:$0xf] %v17279_v0  ;;  %2512 = vmatprep.subr.bf16.mxu0 %v17279_v0  ;;  %v301_v4 = vrot.slane %v300_v57, 4  ;;  %v313_v5 = vrot.slane %v311_v58, 5 }
  0x24   :  { %110 = vst [vmem:[#allocation2 + $0x118] sm:$0xf] %v17279_v0  ;;  %111 = vst [vmem:[#allocation2 + $0x11c] sm:$0x1] %v17279_v0  ;;  %v319_v8 = vrot.slane %v317_v59, 5  ;;  %v323_v9 = vrot.slane %v321_v60, 4 }
  0x25   :  { %112 = vst [vmem:[#allocation2 + $0x120] sm:$0xf] %v17279_v0  ;;  %113 = vst [vmem:[#allocation2 + $0x124] sm:$0xf] %v17279_v0  ;;  %v12173_v10 = vld [vmem:[%s17262_s0 + $0x28] sm:$0xf]  ;;  %v314_v20 = vor.u32 %v313_v5, %v310_v2 }
  0x26   :  { %114 = vst [vmem:[#allocation2 + $0x128] sm:$0x1] %v17279_v0  ;;  %115 = vst [vmem:[#allocation2 + $0x12c] sm:$0xf] %v17279_v0  ;;  %2513 = vmatpush1.bf16.msra.mxu0 %v11556_v36  ;;  %v332_v11 = vshrl.u32 %v12167_v3, 16  ;;  %v335_v12 = vshll.u32 %v12167_v3, 16 }
  0x27   :  { %116 = vst [vmem:[#allocation2 + $0x130] sm:$0xf] %v17279_v0  ;;  %117 = vst [vmem:[#allocation2 + $0x134] sm:$0x1] %v17279_v0  ;;  %2514 = vmatprep.subr.bf16.mxu0 %v17279_v0  ;;  %v11562_v13 = vld [vmem:[%s17261_s1 + $0x78] sm:$0xff]   ;;  %v327_v14 = vshll.u32 %v156_v61, 16 }
  0x28   :  { %118 = vst [vmem:[#allocation2 + $0x138] sm:$0xf] %v17279_v0  ;;  %119 = vst [vmem:[#allocation2 + $0x13c] sm:$0xf] %v17279_v0  ;;  %v345_v17 = vshrl.u32 %v12173_v10, 16  ;;  %v337_v26 = vrot.slane %v335_v12, 5 }
  0x29   :  { %120 = vst [vmem:[#allocation2 + $0x140] sm:$0x1] %v17279_v0  ;;  %121 = vst [vmem:[#allocation2 + $0x144] sm:$0xf] %v17279_v0  ;;  %v159_v24 = vld [vmem:[%s17262_s0 + $0x2c] sm:$0x1] }
  0x2a   :  { %122 = vst [vmem:[#allocation2 + $0x148] sm:$0xf] %v17279_v0  ;;  %123 = vst [vmem:[#allocation2 + $0x14c] sm:$0x1] %v17279_v0  ;;  %2515 = vmatpush1.bf16.msra.mxu0 %v11557_v37  ;;  %v347_v33 = vrot.slane %v345_v17, 4  ;;  %v11567_v42 = vld [vmem:[%s17261_s1 + $0x88] sm:$0xff]  }
  0x2b   :  { %124 = vst [vmem:[#allocation2 + $0x150] sm:$0xf] %v17279_v0  ;;  %125 = vst [vmem:[#allocation2 + $0x154] sm:$0xf] %v17279_v0  ;;  %2516 = vmatprep.subr.bf16.mxu0 %v17279_v0  ;;  %v12200_v6 = vld [vmem:[%s17262_s0 + $0x30] sm:$0xf] }
  0x2c   :  { %126 = vst [vmem:[#allocation2 + $0x158] sm:$0x1] %v17279_v0  ;;  %127 = vst [vmem:[#allocation2 + $0x15c] sm:$0xf] %v17279_v0  ;;  %v12206_v36 = vld [vmem:[%s17262_s0 + $0x34] sm:$0xf] }
  0x2d   :  { %128 = vst [vmem:[#allocation2 + $0x160] sm:$0xf] %v17279_v0  ;;  %129 = vst [vmem:[#allocation2 + $0x164] sm:$0x1] %v17279_v0  ;;  %v356_v41 = vshrl.u32 %v12200_v6, 16  ;;  %v359_v44 = vshll.u32 %v12200_v6, 16 }
  0x2e   :  { %130 = vst [vmem:[#allocation2 + $0x168] sm:$0xf] %v17279_v0  ;;  %131 = vst [vmem:[#allocation2 + $0x16c] sm:$0xf] %v17279_v0  ;;  %2517 = vmatpush1.bf16.msra.mxu0 %v11558_v40  ;;  %v351_v40 = vshll.u32 %v159_v24, 16  ;;  %v365_v47 = vshll.u32 %v12206_v36, 16 }
  0x2f   :  { %132 = vst [vmem:[#allocation2 + $0x170] sm:$0x1] %v17279_v0  ;;  %133 = vst [vmem:[#allocation2 + $0x174] sm:$0xf] %v17279_v0  ;;  %2518 = vmatprep.subr.bf16.mxu0 %v17279_v0  ;;  %v369_v48 = vshrl.u32 %v12206_v36, 16  ;;  %v358_v55 = vrot.slane %v356_v41, 4 }
  0x30   :  { %134 = vst [vmem:[#allocation2 + $0x178] sm:$0xf] %v17279_v0  ;;  %135 = vst [vmem:[#allocation2 + $0x17c] sm:$0x1] %v17279_v0  ;;  %v353_v54 = vrot.slane %v351_v40, 5  ;;  %v11570_v56 = vld [vmem:[%s17261_s1 + $0x90] sm:$0xff]  }
  0x31   :  { %136 = vst [vmem:[#allocation2 + $0x180] sm:$0xf] %v17279_v0  ;;  %137 = vst [vmem:[#allocation2 + $0x184] sm:$0xf] %v17279_v0  ;;  %v12234_v57 = vld [vmem:[%s17262_s0 + $0x3c] sm:$0xf] }
  0x32   :  { %138 = vst [vmem:[#allocation2 + $0x188] sm:$0x1] %v17279_v0  ;;  %139 = vst [vmem:[#allocation2 + $0x18c] sm:$0xf] %v17279_v0  ;;  %2519 = vmatpush1.bf16.msra.mxu0 %v11559_v45  ;;  %v361_v60 = vrot.slane %v359_v44, 5  ;;  %v367_v61 = vrot.slane %v365_v47, 5 }
  0x33   :  { %140 = vst [vmem:[#allocation2 + $0x190] sm:$0xf] %v17279_v0  ;;  %141 = vst [vmem:[#allocation2 + $0x194] sm:$0x1] %v17279_v0  ;;  %2520 = vmatprep.subr.bf16.mxu0 %v17279_v0  ;;  %v371_v38 = vrot.slane %v369_v48, 4  ;;  %v383_v5 = vshll.u32 %v12234_v57, 16 }
  0x34   :  { %142 = vst [vmem:[#allocation2 + $0x198] sm:$0xf] %v17279_v0  ;;  %143 = vst [vmem:[#allocation2 + $0x19c] sm:$0xf] %v17279_v0  ;;  %v12242_v39 = vld [vmem:[%s17262_s0 + $0x40] sm:$0xf]  ;;  %v362_v2 = vor.u32 %v361_v60, %v358_v55 }
  0x35   :  { %144 = vst [vmem:[#allocation2 + $0x1a0] sm:$0x1] %v17279_v0  ;;  %145 = vst [vmem:[#allocation2 + $0x1a4] sm:$0xf] %v17279_v0  ;;  %v393_v12 = vshrl.u32 %v12242_v39, 16  ;;  %vm5476_vm8 = vcmask 1043456  }
  0x36   :  { %146 = vst [vmem:[#allocation2 + $0x1a8] sm:$0xf] %v17279_v0  ;;  %147 = vst [vmem:[#allocation2 + $0x1ac] sm:$0x1] %v17279_v0  ;;  %2521 = vmatpush1.bf16.msra.mxu0 %v11560_v53  ;;  %v165_v17 = vld [vmem:[%s17262_s0 + $0x44] sm:$0x1] }
  0x37   :  { %vm12075_vm4 = vmor %vm1123_vm2, %vm1124_vm3  ;;  %2522 = vmatprep.subr.bf16.mxu0 %v17279_v0  ;;  %v12316_v55 = vld [vmem:[%s17262_s0 + $0x58] sm:$0xf]  ;;  %vm5477_vm6 = vsmask.f32 7938  ;;  %vm4832_vm7 = vsmask.f32 256 }
  0x38   :  { %v17557_v21 = vsel %vm12075_vm4, 4294967295, %v17556_v21  ;;  %vm12086_vm5 = vmor %vm256_vm0, %vm257_vm1  ;;  %v12092_v28 = vsel %vm12075_vm4, %v1130_v22, %v1131_v16  ;;  %v341_v16 = vshll.u32 %v12173_v10, 16  ;;  %v324_v22 = vor.u32 %v323_v9, %v319_v8 }
  0x39   :  { %17558 = vst [vmem:[#allocation3_spill] sm:$0xff] %v17557_v21  ;;  %v272_v31 = vsel %vm12086_vm5, %v267_v29, %v271_v19  ;;  %v282_v32 = vsel %vm12086_vm5, %v277_v30, %v281_v25  ;;  %v296_v18 = vsel %vm12086_vm5, %v291_v63, %v295_v49  ;;  %v306_v19 = vsel %vm12086_vm5, %v301_v4, %v305_v1  ;;  %v11564_v29 = vld [vmem:[%s17261_s1 + $0x80] sm:$0xff]   ;;  %v162_v49 = vld [vmem:[%s17262_s0 + $0x38] sm:$0x1]  ;;  %vm14308_vm11 = vmand %vm5476_vm8, %vm5477_vm6 }
  0x3a   :  { %v9896_v34 = vcombine.low %v272_v31, %v282_v32  ;;  %2523 = vmatpush1.bf16.msra.mxu0 %v11561_v62  ;;  %v334_v25 = vrot.slane %v332_v11, 4  ;;  %v12195_v30 = vcombine.low %v296_v18, %v306_v19  ;;  %v329_v31 = vrot.slane %v327_v14, 5  ;;  %v11573_v63 = vld [vmem:[%s17261_s1 + $0x98] sm:$0xff]   ;;  %v12273_v18 = vld [vmem:[%s17262_s0 + $0x4c] sm:$0xf]  ;;  %v11576_v19 = vld [vmem:[%s17261_s1 + $0xa0] sm:$0xff]  }
  0x3b   :  { %2524 = vmatprep.subr.bf16.mxu0 %v17279_v0  ;;  %v343_v32 = vrot.slane %v341_v16, 5  ;;  %v325_v35 = vrot.slane %v324_v22, 4  ;;  %v375_v62 = vshll.u32 %v162_v49, 16  ;;  %v380_v4 = vshrl.u32 %v12234_v57, 16 }
  0x3c   :  { %2526 = vmatprep.mubr.bf16.mxu0 %v9896_v34  ;;  %17561 = vst [vmem:[#allocation4_spill] sm:$0xff] %v12195_v30  ;;  %v315_v34 = vrot.slane %v314_v20, 4  ;;  %v338_v37 = vor.u32 %v337_v26, %v334_v25  ;;  %v372_v9 = vor.u32 %v371_v38, %v367_v61  ;;  %v389_v11 = vshll.u32 %v12242_v39, 16 }
  0x3d   :  { %v348_v43 = vor.u32 %v347_v33, %v343_v32  ;;  %v330_v46 = vsel %vm12086_vm5, %v325_v35, %v329_v31  ;;  %v12265_v14 = vcombine.low %v12143_v51, %v12148_v52  ;;  %v377_v16 = vrot.slane %v375_v62, 5  ;;  %v11585_v62 = vld [vmem:[%s17261_s1 + $0xb8] sm:$0xff]  }
  0x3e   :  { %2525 = vmatpush1.bf16.msra.mxu0 %v11562_v13  ;;  %v320_v45 = vsel %vm12086_vm5, %v315_v34, %v319_v8  ;;  %v339_v53 = vrot.slane %v338_v37, 4  ;;  %v12261_v13 = vld [vmem:[%s17262_s0 + $0x48] sm:$0xf]  ;;  %v382_v22 = vrot.slane %v380_v4, 4  ;;  %v363_v51 = vrot.slane %v362_v2, 4 }
  0x3f   :  { %2783 = vmatprep.subr.bf16.mxu0 %v17279_v0  ;;  %v12236_v58 = vcombine.low %v320_v45, %v330_v46  ;;  %v349_v59 = vrot.slane %v348_v43, 4  ;;  %v373_v52 = vrot.slane %v372_v9, 4  ;;  %v391_v24 = vrot.slane %v389_v11, 5  ;;  %v11579_v34 = vld [vmem:[%s17261_s1 + $0xa8] sm:$0xff]   ;;  %v168_v43 = vld [vmem:[%s17262_s0 + $0x50] sm:$0x1] }
  0x40   :  { %v344_v1 = vsel %vm12086_vm5, %v339_v53, %v343_v32  ;;  %v395_v25 = vrot.slane %v393_v12, 4  ;;  %v404_v26 = vshrl.u32 %v12261_v13, 16  ;;  %v399_v32 = vshll.u32 %v165_v17, 16  ;;  %v12305_v46 = vld [vmem:[%s17262_s0 + $0x54] sm:$0xf] }
  0x41   :  { %2527 = vmatmul.mubr.bf16.vlgmr.msra.gmra.mrb[0].mxu0 %v9864_v23  ;;  %17562 = vst [vmem:[#allocation5_spill] sm:$0xff] %v12236_v58  ;;  %v354_v8 = vsel %vm12086_vm5, %v349_v59, %v353_v54  ;;  %v385_v23 = vrot.slane %v383_v5, 5  ;;  %v413_v33 = vshll.u32 %v12273_v18, 16  ;;  %v368_v35 = vsel %vm12086_vm5, %v363_v51, %v367_v61  ;;  %v171_v9 = vld [vmem:[%s17262_s0 + $0x5c] sm:$0x1] }
  0x42   :  { %2784 = vmatpush1.bf16.msra.mxu0 %v11564_v29  ;;  %2534 = vmatprep.mubr.bf16.mxu0 %v12195_v30  ;;  %v12278_v20 = vcombine.low %v344_v1, %v354_v8  ;;  %v407_v29 = vshll.u32 %v12261_v13, 16  ;;  %v378_v37 = vsel %vm12086_vm5, %v373_v52, %v377_v16  ;;  %v396_v40 = vor.u32 %v395_v25, %v391_v24  ;;  %v12342_v12 = vld [vmem:[%s17262_s0 + $0x60] sm:$0xf]  ;;  %v12353_v51 = vld [vmem:[%s17262_s0 + $0x64] sm:$0xf] }
  0x43   :  { %2785 = vmatprep.subr.bf16.mxu0 %v17279_v0  ;;  %v386_v31 = vor.u32 %v385_v23, %v382_v22  ;;  %v417_v41 = vshrl.u32 %v12273_v18, 16  ;;  %v406_v44 = vrot.slane %v404_v26, 4  ;;  %v12307_v47 = vcombine.low %v368_v35, %v378_v37 }
  0x44   :  { %17563 = vst [vmem:[#allocation6_spill] sm:$0xff] %v12278_v20  ;;  %v409_v45 = vrot.slane %v407_v29, 5  ;;  %v401_v49 = vrot.slane %v399_v32, 5  ;;  %v415_v53 = vrot.slane %v413_v33, 5  ;;  %v428_v59 = vshrl.u32 %v12305_v46, 16 }
  0x45   :  { %17564 = vst [vmem:[#allocation7_spill] sm:$0xff] %v12307_v47  ;;  %v387_v48 = vrot.slane %v386_v31, 4  ;;  %v419_v54 = vrot.slane %v417_v41, 4  ;;  %v423_v61 = vshll.u32 %v168_v43, 16  ;;  %v431_v38 = vshll.u32 %v12305_v46, 16  ;;  %v11591_v31 = vld [vmem:[%s17261_s1 + $0xc8] sm:$0xff]  }
  0x46   :  { %2786 = vmatpush1.bf16.msra.mxu0 %v11567_v42  ;;  %v12297_v42 = vcombine.low %v12167_v3, %v12173_v10  ;;  %v11582_v3 = vld [vmem:[%s17261_s1 + $0xb0] sm:$0xff]   ;;  %v397_v10 = vrot.slane %v396_v40, 4  ;;  %v437_v2 = vshll.u32 %v12316_v55, 16  ;;  %v441_v4 = vshrl.u32 %v12316_v55, 16  ;;  %v174_v40 = vld [vmem:[%s17262_s0 + $0x68] sm:$0x1] }
  0x47   :  { %2787 = vmatprep.subr.bf16.mxu0 %v17279_v0  ;;  %v392_v60 = vsel %vm12086_vm5, %v387_v48, %v391_v24  ;;  %v420_v1 = vor.u32 %v419_v54, %v415_v53  ;;  %v12334_v5 = vcombine.low %v12200_v6, %v12206_v36  ;;  %v430_v11 = vrot.slane %v428_v59, 4  ;;  %v11588_v6 = vld [vmem:[%s17261_s1 + $0xc0] sm:$0xff]   ;;  %v12379_v41 = vld [vmem:[%s17262_s0 + $0x6c] sm:$0xf] }
  0x48   :  { %v433_v17 = vrot.slane %v431_v38, 5  ;;  %v439_v22 = vrot.slane %v437_v2, 5  ;;  %v443_v23 = vrot.slane %v441_v4, 4  ;;  %v447_v25 = vshll.u32 %v171_v9, 16  ;;  %v177_v2 = vld [vmem:[%s17262_s0 + $0x74] sm:$0x1] }
  0x49   :  { %2535 = vmatmul.mubr.bf16.gmra.mrb[4].mxu0 %v12226_v50  ;;  %17565 = vst [vmem:[#allocation8_spill] sm:$0xff] %v12334_v5  ;;  %v421_v36 = vrot.slane %v420_v1, 4  ;;  %v452_v26 = vshrl.u32 %v12342_v12, 16  ;;  %v455_v29 = vshll.u32 %v12342_v12, 16  ;;  %v465_v35 = vshrl.u32 %v12353_v51, 16 }
  0x4a   :  { %2542 = vmatprep.mubr.bf16.mxu0 %v12236_v58  ;;  %2788 = vmatpush1.bf16.msra.mxu0 %v11570_v56  ;;  %v410_v56 = vor.u32 %v409_v45, %v406_v44  ;;  %v434_v24 = vor.u32 %v433_v17, %v430_v11  ;;  %v444_v33 = vor.u32 %v443_v23, %v439_v22  ;;  %v471_v54 = vshll.u32 %v174_v40, 16  ;;  %v12413_v9 = vld [vmem:[%s17262_s0 + $0x78] sm:$0xf]  ;;  %v12418_v11 = vld [vmem:[%s17262_s0 + $0x7c] sm:$0xf] }
  0x4b   :  { %2789 = vmatprep.subr.bf16.mxu0 %v17279_v0  ;;  %v12371_v37 = vcombine.low %v12234_v57, %v12242_v39  ;;  %v454_v45 = vrot.slane %v452_v26, 4  ;;  %v457_v48 = vrot.slane %v455_v29, 5  ;;  %v11594_v57 = vld [vmem:[%s17261_s1 + $0xd0] sm:$0xff]   ;;  %v12408_v4 = vcombine.low %v12261_v13, %v12273_v18 }
  0x4c   :  { %v411_v8 = vrot.slane %v410_v56, 4  ;;  %v435_v44 = vrot.slane %v434_v24, 4  ;;  %v445_v39 = vrot.slane %v444_v33, 4  ;;  %v495_v18 = vshll.u32 %v177_v2, 16  ;;  %v11597_v24 = vld [vmem:[%s17261_s1 + $0xd8] sm:$0xff]  }
  0x4d   :  { %17567 = vst [vmem:[#allocation10_spill] sm:$0xff] %v12371_v37  ;;  %v458_v59 = vor.u32 %v457_v48, %v454_v45  ;;  %17569 = vst [vmem:[#allocation12_spill] sm:$0xff] %v12408_v4  ;;  %v503_v26 = vshll.u32 %v12413_v9, 16  ;;  %v509_v29 = vshll.u32 %v12418_v11, 16  ;;  %v12443_v40 = vcombine.low %v12305_v46, %v12316_v55  ;;  %v180_v45 = vld [vmem:[%s17262_s0 + $0x80] sm:$0x1] }
  0x4e   :  { %2790 = vmatpush1.bf16.msra.mxu0 %v11573_v63  ;;  %v402_v63 = vsel %vm12086_vm5, %v397_v10, %v401_v49  ;;  %v416_v52 = vsel %vm12086_vm5, %v411_v8, %v415_v53  ;;  %v449_v49 = vrot.slane %v447_v25, 5  ;;  %v12390_v10 = vld [vmem:[%s17262_s0 + $0x70] sm:$0xf]  ;;  %v440_v56 = vsel %vm12086_vm5, %v435_v44, %v439_v22 }
  0x4f   :  { %2791 = vmatprep.subr.bf16.mxu0 %v17279_v0  ;;  %v12344_v16 = vcombine.low %v392_v60, %v402_v63  ;;  %v476_v60 = vshrl.u32 %v12379_v41, 16  ;;  %v485_v63 = vshll.u32 %v12390_v10, 16  ;;  %v489_v1 = vshrl.u32 %v12390_v10, 16  ;;  %17571 = vst [vmem:[#allocation14_spill] sm:$0xff] %v12443_v40  ;;  %v12468_v2 = vld [vmem:[%s17262_s0 + $0x90] sm:$0xf] }
  0x50   :  { %v450_v38 = vsel %vm12086_vm5, %v445_v39, %v449_v49  ;;  %v473_v8 = vrot.slane %v471_v54, 5  ;;  %v497_v44 = vrot.slane %v495_v18, 5  ;;  %v519_v55 = vshll.u32 %v180_v45, 16 }
  0x51   :  { %2543 = vmatmul.mubr.bf16.gmra.mrb[8].mxu0 %v12265_v14  ;;  %17566 = vst [vmem:[#allocation9_spill] sm:$0xff] %v12344_v16  ;;  %v12420_v17 = vcombine.low %v440_v56, %v450_v38  ;;  %v487_v23 = vrot.slane %v485_v63, 5  ;;  %v491_v13 = vrot.slane %v489_v1, 4  ;;  %vm4833_vm9 = vsmask.f32 4368 }
  0x52   :  { %2550 = vmatprep.mubr.bf16.mxu0 %v12278_v20  ;;  %2792 = vmatpush1.bf16.msra.mxu0 %v11576_v19  ;;  %v425_v19 = vrot.slane %v423_v61, 5  ;;  %v479_v61 = vshll.u32 %v12379_v41, 16  ;;  %vm5483_vm10 = vcmask 1040384   ;;  %vm14318_vm12 = vmor %vm4832_vm7, %vm4833_vm9 }
  0x53   :  { %2793 = vmatprep.subr.bf16.mxu0 %v17279_v0  ;;  %17570 = vst [vmem:[#allocation13_spill] sm:$0xff] %v12420_v17  ;;  %v492_v33 = vor.u32 %v491_v13, %v487_v23  ;;  %vm14324_vm13 = vmand %vm5483_vm10, %vm4832_vm7 }
  0x54   :  { %v426_v32 = vsel %vm12086_vm5, %v421_v36, %v425_v19  ;;  %v481_v36 = vrot.slane %v479_v61, 5  ;;  %v459_v19 = vrot.slane %v458_v59, 4 }
  0x55   :  { %v12381_v43 = vcombine.low %v416_v52, %v426_v32  ;;  %v500_v52 = vshrl.u32 %v12413_v9, 16  ;;  %v493_v54 = vrot.slane %v492_v33, 4 }
  0x56   :  { %2794 = vmatpush1.bf16.msra.mxu0 %v11579_v34  ;;  %v461_v34 = vshll.u32 %v12353_v51, 16 }
  0x57   :  { %2795 = vmatprep.subr.bf16.mxu0 %v17279_v0  ;;  %17568 = vst [vmem:[#allocation11_spill] sm:$0xff] %v12381_v43  ;;  %v502_v48 = vrot.slane %v500_v52, 4 }
  0x58   :  { %v463_v53 = vrot.slane %v461_v34, 5  ;;  %v513_v34 = vshrl.u32 %v12418_v11, 16 }
  0x59   :  { %2551 = vmatmul.mubr.bf16.gmra.mrb[12].mxu0 %v12297_v42 }
  0x5a   :  { %2558 = vmatprep.mubr.bf16.mxu0 %v12307_v47  ;;  %2796 = vmatpush1.bf16.msra.mxu0 %v11582_v3  ;;  %v467_v3 = vrot.slane %v465_v35, 4  ;;  %v12438_v35 = vld [vmem:[%s17262_s0 + $0x84] sm:$0xf]  ;;  %v515_v56 = vrot.slane %v513_v34, 4 }
  0x5b   :  { %2797 = vmatprep.subr.bf16.mxu0 %v17279_v0  ;;  %v524_v46 = vshrl.u32 %v12438_v35, 16  ;;  %v527_v59 = vshll.u32 %v12438_v35, 16 }
  0x5e   :  { %2798 = vmatpush1.bf16.msra.mxu0 %v11585_v62  ;;  %v468_v62 = vor.u32 %v467_v3, %v463_v53  ;;  %v511_v3 = vrot.slane %v509_v29, 5 }
  0x5f   :  { %2799 = vmatprep.subr.bf16.mxu0 %v17279_v0 }
  0x60   :  { %v469_v22 = vrot.slane %v468_v62, 4  ;;  %v498_v62 = vsel %vm12086_vm5, %v493_v54, %v497_v44  ;;  %v516_v1 = vor.u32 %v515_v56, %v511_v3  ;;  %v12508_v54 = vld [vmem:[%s17262_s0 + $0x9c] sm:$0xf] }
  0x61   :  { %2559 = vmatmul.mubr.bf16.gmra.mrb[16].mxu0 %v12334_v5 }
  0x62   :  { %2566 = vmatprep.mubr.bf16.mxu0 %v12344_v16  ;;  %2800 = vmatpush1.bf16.msra.mxu0 %v11588_v6  ;;  %v478_v6 = vrot.slane %v476_v60, 4  ;;  %v474_v32 = vsel %vm12086_vm5, %v469_v22, %v473_v8  ;;  %v12472_v8 = vcombine.low %v12342_v12, %v12353_v51  ;;  %v529_v22 = vrot.slane %v527_v59, 5 }
  0x63   :  { %2801 = vmatprep.subr.bf16.mxu0 %v17279_v0  ;;  %v517_v52 = vrot.slane %v516_v1, 4  ;;  %v548_v12 = vshrl.u32 %v12468_v2, 16  ;;  %v551_v51 = vshll.u32 %v12468_v2, 16 }
  0x64   :  { %v482_v25 = vor.u32 %v481_v36, %v478_v6  ;;  %17573 = vst [vmem:[#allocation16_spill] sm:$0xff] %v12472_v8  ;;  %v183_v6 = vld [vmem:[%s17262_s0 + $0x8c] sm:$0x1]  ;;  %v526_v36 = vrot.slane %v524_v46, 4 }
  0x66   :  { %2802 = vmatpush1.bf16.msra.mxu0 %v11591_v31  ;;  %v464_v31 = vsel %vm12086_vm5, %v459_v19, %v463_v53  ;;  %v483_v49 = vrot.slane %v482_v25, 4  ;;  %v505_v53 = vrot.slane %v503_v26, 5  ;;  %v12482_v25 = vld [vmem:[%s17262_s0 + $0x94] sm:$0xf]  ;;  %v11600_v26 = vld [vmem:[%s17261_s1 + $0xe0] sm:$0xff]   ;;  %v530_v29 = vor.u32 %v529_v22, %v526_v36 }
  0x67   :  { %2803 = vmatprep.subr.bf16.mxu0 %v17279_v0  ;;  %v12453_v39 = vcombine.low %v464_v31, %v474_v32  ;;  %v543_v32 = vshll.u32 %v183_v6, 16  ;;  %v557_v44 = vshll.u32 %v12482_v25, 16  ;;  %v561_v45 = vshrl.u32 %v12482_v25, 16 }
  0x68   :  { %v488_v38 = vsel %vm12086_vm5, %v483_v49, %v487_v23  ;;  %v506_v63 = vor.u32 %v505_v53, %v502_v48  ;;  %v186_v48 = vld [vmem:[%s17262_s0 + $0x98] sm:$0x1]  ;;  %v12503_v49 = vcombine.low %v12379_v41, %v12390_v10  ;;  %v550_v53 = vrot.slane %v548_v12, 4  ;;  %v12515_v41 = vld [vmem:[%s17262_s0 + $0xa0] sm:$0xf] }
  0x69   :  { %2567 = vmatmul.mubr.bf16.gmra.mrb[20].mxu0 %v12371_v37  ;;  %17572 = vst [vmem:[#allocation15_spill] sm:$0xff] %v12453_v39  ;;  %v12477_v19 = vcombine.low %v488_v38, %v498_v62  ;;  %v531_v46 = vrot.slane %v530_v29, 4  ;;  %v545_v59 = vrot.slane %v543_v32, 5  ;;  %v567_v38 = vshll.u32 %v186_v48, 16 }
  0x6a   :  { %2574 = vmatprep.mubr.bf16.mxu0 %v12381_v43  ;;  %2804 = vmatpush1.bf16.msra.mxu0 %v11594_v57  ;;  %v12451_v57 = vld [vmem:[%s17262_s0 + $0x88] sm:$0xf]  ;;  %v507_v18 = vrot.slane %v506_v63, 4  ;;  %17575 = vst [vmem:[#allocation18_spill] sm:$0xff] %v12503_v49  ;;  %v572_v62 = vshrl.u32 %v12508_v54, 16  ;;  %v575_v63 = vshll.u32 %v12508_v54, 16 }
  0x6b   :  { %2805 = vmatprep.subr.bf16.mxu0 %v17279_v0  ;;  %v533_v60 = vshll.u32 %v12451_v57, 16  ;;  %v537_v61 = vshrl.u32 %v12451_v57, 16  ;;  %17574 = vst [vmem:[#allocation17_spill] sm:$0xff] %v12477_v19  ;;  %v581_v22 = vshll.u32 %v12515_v41, 16 }
  0x6c   :  { %v512_v33 = vsel %vm12086_vm5, %v507_v18, %v511_v3  ;;  %v553_v3 = vrot.slane %v551_v51, 5  ;;  %v189_v18 = vld [vmem:[%s17262_s0 + $0xa4] sm:$0x1]  ;;  %v574_v12 = vrot.slane %v572_v62, 4  ;;  %v577_v51 = vrot.slane %v575_v63, 5 }
  0x6d   :  { %v535_v23 = vrot.slane %v533_v60, 5  ;;  %v539_v13 = vrot.slane %v537_v61, 4  ;;  %v559_v60 = vrot.slane %v557_v44, 5  ;;  %v563_v61 = vrot.slane %v561_v45, 4  ;;  %v12544_v44 = vld [vmem:[%s17262_s0 + $0xac] sm:$0xf] }
  0x6e   :  { %2806 = vmatpush1.bf16.msra.mxu0 %v11597_v24  ;;  %v521_v24 = vrot.slane %v519_v55, 5  ;;  %v554_v10 = vor.u32 %v553_v3, %v550_v53  ;;  %v583_v32 = vrot.slane %v581_v22, 5  ;;  %v578_v53 = vor.u32 %v577_v51, %v574_v12  ;;  %v12569_v63 = vld [vmem:[%s17262_s0 + $0xb0] sm:$0x1] }
  0x6f   :  { %2807 = vmatprep.subr.bf16.mxu0 %v17279_v0  ;;  %v540_v31 = vor.u32 %v539_v13, %v535_v23  ;;  %v536_v1 = vsel %vm12086_vm5, %v531_v46, %v535_v23  ;;  %v564_v36 = vor.u32 %v563_v61, %v559_v60  ;;  %v585_v13 = vshrl.u32 %v12515_v41, 16 }
  0x70   :  { %v522_v34 = vsel %vm12086_vm5, %v517_v52, %v521_v24  ;;  %v12533_v52 = vld [vmem:[%s17262_s0 + $0xa8] sm:$0xf]  ;;  %v12537_v23 = vcombine.low %v12413_v9, %v12418_v11  ;;  %v555_v24 = vrot.slane %v554_v10, 4  ;;  %v12562_v61 = vcombine.low %v12438_v35, %v12451_v57  ;;  %v12579_v35 = vld [vmem:[%s17262_s0 + $0xb8] sm:$0xf] }
  0x71   :  { %2575 = vmatmul.mubr.bf16.gmra.mrb[24].mxu0 %v12408_v4  ;;  %v12510_v56 = vcombine.low %v512_v33, %v522_v34  ;;  %v541_v55 = vrot.slane %v540_v31, 4  ;;  %v565_v29 = vrot.slane %v564_v36, 4  ;;  %v569_v31 = vrot.slane %v567_v38, 5  ;;  %v11603_v11 = vld [vmem:[%s17261_s1 + $0xe8] sm:$0xff]  }
  0x72   :  { %2582 = vmatprep.mubr.bf16.mxu0 %v12420_v17  ;;  %2808 = vmatpush1.bf16.msra.mxu0 %v11600_v26  ;;  %17577 = vst [vmem:[#allocation20_spill] sm:$0xff] %v12537_v23  ;;  %v587_v33 = vrot.slane %v585_v13, 4  ;;  %v591_v34 = vshll.u32 %v189_v18, 16  ;;  %v596_v45 = vshrl.u32 %v12533_v52, 16  ;;  %v599_v9 = vshll.u32 %v12533_v52, 16  ;;  %17579 = vst [vmem:[#allocation22_spill] sm:$0xff] %v12562_v61 }
  0x73   :  { %2809 = vmatprep.subr.bf16.mxu0 %v17279_v0  ;;  %17576 = vst [vmem:[#allocation19_spill] sm:$0xff] %v12510_v56  ;;  %v546_v6 = vsel %vm12086_vm5, %v541_v55, %v545_v59  ;;  %v560_v48 = vsel %vm12086_vm5, %v555_v24, %v559_v60  ;;  %v570_v3 = vsel %vm12086_vm5, %v565_v29, %v569_v31  ;;  %v605_v55 = vshll.u32 %v12544_v44, 16  ;;  %v12574_v13 = vld [vmem:[%s17262_s0 + $0xb4] sm:$0xf]  ;;  %v12885_v17 = vld [vmem:[%s17262_s0 + $0x140] sm:$0x1] }
  0x74   :  { %v12539_v26 = vcombine.low %v536_v1, %v546_v6  ;;  %v588_v46 = vor.u32 %v587_v33, %v583_v32  ;;  %v609_v59 = vshrl.u32 %v12544_v44, 16  ;;  %v598_v38 = vrot.slane %v596_v45, 4  ;;  %17606 = vst [vmem:[#allocation48_spill] sm:$0xff] %v12885_v17 }
  0x75   :  { %v601_v10 = vrot.slane %v599_v9, 5  ;;  %v12564_v62 = vcombine.low %v560_v48, %v570_v3  ;;  %v579_v60 = vrot.slane %v578_v53, 4  ;;  %v593_v6 = vrot.slane %v591_v34, 5 }
  0x76   :  { %17578 = vst [vmem:[#allocation21_spill] sm:$0xff] %v12539_v26  ;;  %2810 = vmatpush1.bf16.msra.mxu0 %v11603_v11  ;;  %v589_v1 = vrot.slane %v588_v46, 4  ;;  %v607_v36 = vrot.slane %v605_v55, 5  ;;  %v611_v22 = vrot.slane %v609_v59, 4  ;;  %v615_v24 = vshll.u32 %v12569_v63, 16 }
  0x77   :  { %2811 = vmatprep.subr.bf16.mxu0 %v17279_v0  ;;  %17580 = vst [vmem:[#allocation23_spill] sm:$0xff] %v12564_v62  ;;  %v602_v57 = vor.u32 %v601_v10, %v598_v38  ;;  %v584_v18 = vsel %vm12086_vm5, %v579_v60, %v583_v32  ;;  %v620_v12 = vshrl.u32 %v12574_v13, 16  ;;  %v623_v51 = vshll.u32 %v12574_v13, 16  ;;  %v195_v11 = vld [vmem:[%s17262_s0 + $0xbc] sm:$0x1]  ;;  %v11606_v10 = vld [vmem:[%s17261_s1 + $0xf0] sm:$0xff]  }
  0x78   :  { %v594_v29 = vsel %vm12086_vm5, %v589_v1, %v593_v6  ;;  %v612_v31 = vor.u32 %v611_v22, %v607_v36  ;;  %v629_v33 = vshll.u32 %v12579_v35, 16  ;;  %v633_v34 = vshrl.u32 %v12579_v35, 16  ;;  %v12604_v38 = vld [vmem:[%s17262_s0 + $0xd8] sm:$0xf] }
  0x79   :  { %2583 = vmatmul.mubr.bf16.gmra.mrb[28].mxu0 %v12443_v40  ;;  %v12594_v45 = vcombine.low %v12468_v2, %v12482_v25  ;;  %v603_v9 = vrot.slane %v602_v57, 4  ;;  %v12596_v32 = vcombine.low %v584_v18, %v594_v29  ;;  %v622_v48 = vrot.slane %v620_v12, 4  ;;  %v12609_v2 = vld [vmem:[%s17262_s0 + $0xdc] sm:$0xf] }
  0x7a   :  { %2590 = vmatprep.mubr.bf16.mxu0 %v12453_v39  ;;  %v625_v53 = vrot.slane %v623_v51, 5  ;;  %v613_v3 = vrot.slane %v612_v31, 4  ;;  %v617_v46 = vrot.slane %v615_v24, 5  ;;  %v631_v55 = vrot.slane %v629_v33, 5  ;;  %2812 = vmatpush1.bf16.msra.mxu0 %v11606_v10 }
  0x7b   :  { %17581 = vst [vmem:[#allocation24_spill] sm:$0xff] %v12594_v45  ;;  %17582 = vst [vmem:[#allocation25_spill] sm:$0xff] %v12596_v32  ;;  %v635_v59 = vrot.slane %v633_v34, 4  ;;  %v608_v25 = vsel %vm12086_vm5, %v603_v9, %v607_v36  ;;  %v639_v1 = vshll.u32 %v195_v11, 16  ;;  %v644_v6 = vshrl.u32 %v12604_v38, 16  ;;  %2813 = vmatprep.subr.bf16.mxu0 %v17279_v0 }
  0x7c   :  { %v626_v60 = vor.u32 %v625_v53, %v622_v48  ;;  %v647_v22 = vshll.u32 %v12604_v38, 16  ;;  %v618_v57 = vsel %vm12086_vm5, %v613_v3, %v617_v46  ;;  %v653_v24 = vshll.u32 %v12609_v2, 16  ;;  %v12634_v34 = vld [vmem:[%s17262_s0 + $0xe4] sm:$0xf]  ;;  %v204_v48 = vld [vmem:[%s17262_s0 + $0xe0] sm:$0x1] }
  0x7d   :  { %v636_v18 = vor.u32 %v635_v59, %v631_v55  ;;  %v657_v36 = vshrl.u32 %v12609_v2, 16  ;;  %v12627_v12 = vcombine.low %v12508_v54, %v12515_v41  ;;  %v12629_v51 = vcombine.low %v608_v25, %v618_v57  ;;  %v12642_v54 = vld [vmem:[%s17262_s0 + $0xe8] sm:$0xf] }
  0x7e   :  { %v627_v29 = vrot.slane %v626_v60, 4  ;;  %v646_v31 = vrot.slane %v644_v6, 4  ;;  %v649_v33 = vrot.slane %v647_v22, 5  ;;  %v641_v11 = vrot.slane %v639_v1, 5 }
  0x7f   :  { %17583 = vst [vmem:[#allocation26_spill] sm:$0xff] %v12627_v12  ;;  %17584 = vst [vmem:[#allocation27_spill] sm:$0xff] %v12629_v51  ;;  %v637_v9 = vrot.slane %v636_v18, 4  ;;  %v655_v53 = vrot.slane %v653_v24, 5  ;;  %v659_v3 = vrot.slane %v657_v36, 4  ;;  %v668_v41 = vshrl.u32 %v12634_v34, 16 }
  0x80   :  { %v671_v46 = vshll.u32 %v12634_v34, 16  ;;  %v632_v59 = vsel %vm12086_vm5, %v627_v29, %v631_v55  ;;  %v650_v25 = vor.u32 %v649_v33, %v646_v31  ;;  %v663_v10 = vshll.u32 %v204_v48, 16  ;;  %v12663_v55 = vld [vmem:[%s17262_s0 + $0xf0] sm:$0xf]  ;;  %v207_v48 = vld [vmem:[%s17262_s0 + $0xec] sm:$0x1] }
  0x81   :  { %2591 = vmatmul.mubr.bf16.gmra.mrb[32].mxu0 %v12472_v8  ;;  %v642_v60 = vsel %vm12086_vm5, %v637_v9, %v641_v11  ;;  %v660_v1 = vor.u32 %v659_v3, %v655_v53  ;;  %v677_v6 = vshll.u32 %v12642_v54, 16  ;;  %v681_v22 = vshrl.u32 %v12642_v54, 16  ;;  %v12668_v11 = vld [vmem:[%s17262_s0 + $0xf4] sm:$0xf] }
  0x82   :  { %2598 = vmatprep.mubr.bf16.mxu0 %v12477_v19  ;;  %v12656_v57 = vcombine.low %v12533_v52, %v12544_v44  ;;  %v670_v18 = vrot.slane %v668_v41, 4  ;;  %v673_v24 = vrot.slane %v671_v46, 5  ;;  %v12658_v36 = vcombine.low %v632_v59, %v642_v60  ;;  %v11609_v59 = vld [vmem:[%s17261_s1 + $0xf8] sm:$0xff]  }
  0x83   :  { %v665_v15 = vrot.slane %v663_v10, 5  ;;  %v651_v29 = vrot.slane %v650_v25, 4  ;;  %v661_v31 = vrot.slane %v660_v1, 4  ;;  %v679_v33 = vrot.slane %v677_v6, 5  ;;  %2814 = vmatpush1.bf16.msra.mxu0 %v11609_v59 }
  0x84   :  { %17585 = vst [vmem:[#allocation28_spill] sm:$0xff] %v12656_v57  ;;  %17586 = vst [vmem:[#allocation29_spill] sm:$0xff] %v12658_v36  ;;  %v683_v9 = vrot.slane %v681_v22, 4  ;;  %v674_v3 = vor.u32 %v673_v24, %v670_v18  ;;  %v692_v41 = vshrl.u32 %v12663_v55, 16  ;;  %v695_v46 = vshll.u32 %v12663_v55, 16  ;;  %3072 = vmatprep.subr.bf16.mxu0 %v17279_v0 }
  0x85   :  { %v701_v25 = vshll.u32 %v12668_v11, 16  ;;  %v705_v10 = vshrl.u32 %v12668_v11, 16  ;;  %v656_v60 = vsel %vm12086_vm5, %v651_v29, %v655_v53  ;;  %v666_v1 = vsel %vm12086_vm5, %v661_v31, %v665_v15  ;;  %v210_v15 = vld [vmem:[%s17262_s0 + $0xf8] sm:$0x1]  ;;  %v12736_v0 = vld [vmem:[%s17262_s0 + $0x10c] sm:$0xf] }
  0x86   :  { %v684_v6 = vor.u32 %v683_v9, %v679_v33  ;;  %v687_v22 = vshll.u32 %v207_v48, 16  ;;  %v12689_v18 = vcombine.low %v12574_v13, %v12579_v35  ;;  %v675_v24 = vrot.slane %v674_v3, 4  ;;  %v12700_v13 = vld [vmem:[%s17262_s0 + $0xfc] sm:$0xf]  ;;  %v12705_v35 = vld [vmem:[%s17262_s0 + $0x100] sm:$0xf] }
  0x87   :  { %v9912_v29 = vcombine.low %v656_v60, %v666_v1  ;;  %v703_v31 = vrot.slane %v701_v25, 5  ;;  %v707_v9 = vrot.slane %v705_v10, 4  ;;  %v716_v25 = vshrl.u32 %v12700_v13, 16 }
  0x88   :  { %17587 = vst [vmem:[#allocation30_spill] sm:$0xff] %v12689_v18  ;;  %v685_v48 = vrot.slane %v684_v6, 4  ;;  %v689_v59 = vrot.slane %v687_v22, 5  ;;  %v719_v10 = vshll.u32 %v12700_v13, 16  ;;  %v17588_v60 = vrot.slane %v12059_v7, 5 }
  0x89   :  { %2599 = vmatmul.mubr.bf16.gmra.mrb[36].mxu0 %v12503_v49  ;;  %v725_v22 = vshll.u32 %v12705_v35, 16 }
  0x8a   :  { %2606 = vmatprep.mubr.bf16.mxu0 %v12510_v56  ;;  %v690_v6 = vsel %vm12086_vm5, %v685_v48, %v689_v59  ;;  %v721_v48 = vrot.slane %v719_v10, 5  ;;  %v12828_v56 = vld [vmem:[%s17262_s0 + $0x12c] sm:$0xf] }
  0x8b   :  { %v727_v59 = vrot.slane %v725_v22, 5  ;;  %17598 = vst [vmem:[#allocation40_spill] sm:$0xff] %v12828_v56 }
  0x91   :  { %2607 = vmatmul.mubr.bf16.gmra.mrb[40].mxu0 %v12537_v23 }
  0x92   :  { %2614 = vmatprep.mubr.bf16.mxu0 %v12539_v26 }
  0x99   :  { %2615 = vmatmul.mubr.bf16.gmra.mrb[44].mxu0 %v12562_v61 }
  0x9a   :  { %2622 = vmatprep.mubr.bf16.mxu0 %v12564_v62 }
  0xa1   :  { %2623 = vmatmul.mubr.bf16.gmra.mrb[48].mxu0 %v12594_v45 }
  0xa2   :  { %2630 = vmatprep.mubr.bf16.mxu0 %v12596_v32  ;;  %v11771_v32 = vld [vmem:[%s17262_s0] sm:$0xf] }
  0xa3   :  { %v9828_v53 = vrot.slane %v11771_v32, 9  ;;  %v680_v32 = vsel %vm12086_vm5, %v675_v24, %v679_v33  ;;  %v9880_v33 = vcombine.low %v12604_v38, %v12609_v2  ;;  %v213_v38 = vld [vmem:[%s17262_s0 + $0x104] sm:$0x1] }
  0xa4   :  { %v12726_v24 = vcombine.low %v680_v32, %v690_v6  ;;  %v735_v22 = vshll.u32 %v213_v38, 16 }
  0xa5   :  { %v12716_v1 = vsel %vm12075_vm4, %v9828_v53, %v17588_v60  ;;  %v12731_v53 = vld [vmem:[%s17262_s0 + $0x108] sm:$0xf] }
  0xa6   :  { %17589 = vst [vmem:[#allocation31_spill] sm:$0xff] %v12726_v24  ;;  %v740_v2 = vshrl.u32 %v12731_v53, 16  ;;  %v743_v32 = vshll.u32 %v12731_v53, 16 }
  0xa9   :  { %2631 = vmatmul.mubr.bf16.gmra.mrb[52].mxu0 %v12627_v12 }
  0xaa   :  { %2638 = vmatprep.mubr.bf16.mxu0 %v12629_v51  ;;  %v697_v51 = vrot.slane %v695_v46, 5  ;;  %v708_v46 = vor.u32 %v707_v9, %v703_v31 }
  0xac   :  { %v709_v9 = vrot.slane %v708_v46, 4  ;;  %v753_v46 = vshrl.u32 %v12736_v0, 16 }
  0xb1   :  { %2639 = vmatmul.mubr.bf16.gmra.mrb[56].mxu0 %v12656_v57 }
  0xb2   :  { %2646 = vmatprep.mubr.bf16.mxu0 %v12658_v36  ;;  %v694_v36 = vrot.slane %v692_v41, 4  ;;  %v711_v41 = vshll.u32 %v210_v15, 16  ;;  %v718_v15 = vrot.slane %v716_v25, 4 }
  0xb4   :  { %v698_v3 = vor.u32 %v697_v51, %v694_v36  ;;  %v729_v51 = vshrl.u32 %v12705_v35, 16  ;;  %v722_v10 = vor.u32 %v721_v48, %v718_v15  ;;  %v745_v36 = vrot.slane %v743_v32, 5 }
  0xb5   :  { %v737_v15 = vrot.slane %v735_v22, 5 }
  0xb6   :  { %v699_v7 = vrot.slane %v698_v3, 4  ;;  %v731_v60 = vrot.slane %v729_v51, 4  ;;  %v12752_v51 = vcombine.low %v12634_v34, %v12642_v54  ;;  %v723_v26 = vrot.slane %v722_v10, 4  ;;  %v12769_v34 = vld [vmem:[%s17262_s0 + $0x118] sm:$0xf] }
  0xb8   :  { %v704_v3 = vsel %vm12086_vm5, %v699_v7, %v703_v31  ;;  %v732_v6 = vor.u32 %v731_v60, %v727_v59  ;;  %v755_v31 = vrot.slane %v753_v46, 4  ;;  %v12759_v7 = vld [vmem:[%s17262_s0 + $0x114] sm:$0xf]  ;;  %v728_v32 = vsel %vm12086_vm5, %v723_v26, %v727_v59  ;;  %v12791_v26 = vld [vmem:[%s17262_s0 + $0x120] sm:$0xf] }
  0xb9   :  { %2647 = vmatmul.mubr.bf16.gmra.mrb[60].mxu0 %v12689_v18  ;;  %v764_v48 = vshrl.u32 %v12759_v7, 16  ;;  %v767_v60 = vshll.u32 %v12759_v7, 16  ;;  %v777_v46 = vshrl.u32 %v12769_v34, 16  ;;  %17593 = vst [vmem:[#allocation35_spill] sm:$0xff] %v12791_v26  ;;  %v12880_v39 = vcombine.low %v12759_v7, %v12769_v34 }
  0xba   :  { %2654 = vmatprep.mubr.bf16.mxu0 %v9912_v29  ;;  %v713_v29 = vrot.slane %v711_v41, 5  ;;  %v749_v41 = vshll.u32 %v12736_v0, 16 }
  0xbb   :  { %v766_v10 = vrot.slane %v764_v48, 4  ;;  %v788_v48 = vshrl.u32 %v12791_v26, 16  ;;  %17605 = vst [vmem:[#allocation47_spill] sm:$0xff] %v12880_v39 }
  0xbc   :  { %v714_v25 = vsel %vm12086_vm5, %v709_v9, %v713_v29  ;;  %v751_v62 = vrot.slane %v749_v41, 5  ;;  %v733_v29 = vrot.slane %v732_v6, 4  ;;  %v12764_v9 = vld [vmem:[%s17262_s0 + $0x110] sm:$0x1]  ;;  %v773_v41 = vshll.u32 %v12769_v34, 16 }
  0xbd   :  { %v769_v6 = vrot.slane %v767_v60, 5 }
  0xbe   :  { %v756_v38 = vor.u32 %v755_v31, %v751_v62  ;;  %v775_v59 = vrot.slane %v773_v41, 5 }
  0xc1   :  { %2655 = vmatmul.mubr.bf16.gmra.mrb[64].mxu0 %v9880_v33  ;;  %v742_v33 = vrot.slane %v740_v2, 4  ;;  %v759_v2 = vshll.u32 %v12764_v9, 16 }
  0xc2   :  { %2662 = vmatprep.mubr.bf16.mxu0 %v12726_v24  ;;  %v12754_v24 = vcombine.low %v704_v3, %v714_v25  ;;  %v738_v3 = vsel %vm12086_vm5, %v733_v29, %v737_v15  ;;  %v779_v29 = vrot.slane %v777_v46, 4  ;;  %v12796_v15 = vld [vmem:[%s17262_s0 + $0x124] sm:$0xf] }
  0xc3   :  { %v746_v54 = vor.u32 %v745_v36, %v742_v33  ;;  %v12784_v36 = vcombine.low %v12663_v55, %v12668_v11  ;;  %v12786_v22 = vcombine.low %v728_v32, %v738_v3  ;;  %v757_v33 = vrot.slane %v756_v38, 4  ;;  %17594 = vst [vmem:[#allocation36_spill] sm:$0xff] %v12796_v15  ;;  %v12801_v55 = vld [vmem:[%s17262_s0 + $0x11c] sm:$0x1] }
  0xc4   :  { %17590 = vst [vmem:[#allocation32_spill] sm:$0xff] %v12754_v24  ;;  %v761_v31 = vrot.slane %v759_v2, 5  ;;  %v791_v38 = vshll.u32 %v12791_v26, 16  ;;  %v797_v2 = vshll.u32 %v12796_v15, 16  ;;  %v801_v32 = vshrl.u32 %v12796_v15, 16 }
  0xc5   :  { %17591 = vst [vmem:[#allocation33_spill] sm:$0xff] %v12784_v36  ;;  %v747_v25 = vrot.slane %v746_v54, 4  ;;  %17592 = vst [vmem:[#allocation34_spill] sm:$0xff] %v12786_v22  ;;  %v770_v54 = vor.u32 %v769_v6, %v766_v10  ;;  %v780_v3 = vor.u32 %v779_v29, %v775_v59  ;;  %v783_v41 = vshll.u32 %v12801_v55, 16  ;;  %v12823_v6 = vld [vmem:[%s17262_s0 + $0x128] sm:$0x1] }
  0xc6   :  { %v762_v60 = vsel %vm12086_vm5, %v757_v33, %v761_v31  ;;  %17597 = vst [vmem:[#allocation39_spill] sm:$0xff] %v12823_v6  ;;  %v793_v33 = vrot.slane %v791_v38, 5  ;;  %v799_v31 = vrot.slane %v797_v2, 5  ;;  %v815_v2 = vshll.u32 %v12828_v56, 16 }
  0xc7   :  { %v752_v11 = vsel %vm12086_vm5, %v747_v25, %v751_v62  ;;  %v12816_v62 = vcombine.low %v12700_v13, %v12705_v35  ;;  %v790_v25 = vrot.slane %v788_v48, 4  ;;  %v771_v10 = vrot.slane %v770_v54, 4  ;;  %v12833_v13 = vld [vmem:[%s17262_s0 + $0x130] sm:$0xf] }
  0xc8   :  { %v12818_v46 = vcombine.low %v752_v11, %v762_v60  ;;  %v785_v29 = vrot.slane %v783_v41, 5  ;;  %17599 = vst [vmem:[#allocation41_spill] sm:$0xff] %v12833_v13  ;;  %v807_v35 = vshll.u32 %v12823_v6, 16  ;;  %v812_v60 = vshrl.u32 %v12828_v56, 16 }
  0xc9   :  { %2663 = vmatmul.mubr.bf16.gmra.mrb[68].mxu0 %v12752_v51  ;;  %17595 = vst [vmem:[#allocation37_spill] sm:$0xff] %v12816_v62  ;;  %v776_v11 = vsel %vm12086_vm5, %v771_v10, %v775_v59  ;;  %v794_v54 = vor.u32 %v793_v33, %v790_v25  ;;  %v12848_v41 = vcombine.low %v12731_v53, %v12736_v0  ;;  %v12853_v59 = vld [vmem:[%s17262_s0 + $0x138] sm:$0xf]  ;;  %v12860_v33 = vld [vmem:[%s17262_s0 + $0x13c] sm:$0xf] }
  0xca   :  { %2670 = vmatprep.mubr.bf16.mxu0 %v12754_v24  ;;  %17596 = vst [vmem:[#allocation38_spill] sm:$0xff] %v12818_v46  ;;  %v781_v24 = vrot.slane %v780_v3, 4  ;;  %v825_v3 = vshrl.u32 %v12833_v13, 16  ;;  %17601 = vst [vmem:[#allocation43_spill] sm:$0xff] %v12853_v59  ;;  %v809_v10 = vrot.slane %v807_v35, 5  ;;  %v839_v35 = vshll.u32 %v12853_v59, 16 }
  0xcb   :  { %17600 = vst [vmem:[#allocation42_spill] sm:$0xff] %v12848_v41  ;;  %v795_v25 = vrot.slane %v794_v54, 4  ;;  %17603 = vst [vmem:[#allocation45_spill] sm:$0xff] %v12860_v33  ;;  %v12865_v53 = vld [vmem:[%s17262_s0 + $0x134] sm:$0x1]  ;;  %v845_v54 = vshll.u32 %v12860_v33, 16  ;;  %v12944_v30 = vcombine.low %v12828_v56, %v12833_v13 }
  0xcc   :  { %v786_v38 = vsel %vm12086_vm5, %v781_v24, %v785_v29  ;;  %v814_v24 = vrot.slane %v812_v60, 4  ;;  %v827_v0 = vrot.slane %v825_v3, 4  ;;  %17604 = vst [vmem:[#allocation46_spill] sm:$0xff] %v12865_v53  ;;  %v849_v60 = vshrl.u32 %v12860_v33, 16 }
  0xcd   :  { %v831_v3 = vshll.u32 %v12865_v53, 16  ;;  %v841_v43 = vrot.slane %v839_v35, 5  ;;  %v847_v16 = vrot.slane %v845_v54, 5  ;;  %17613 = vst [vmem:[#allocation55_spill] sm:$0xff] %v12944_v30 }
  0xcf   :  { %v833_v7 = vrot.slane %v831_v3, 5 }
  0xd1   :  { %2671 = vmatmul.mubr.bf16.gmra.mrb[72].mxu0 %v12784_v36 }
  0xd2   :  { %2678 = vmatprep.mubr.bf16.mxu0 %v12786_v22  ;;  %v803_v22 = vrot.slane %v801_v32, 4  ;;  %v821_v32 = vshll.u32 %v12833_v13, 16 }
  0xd4   :  { %v804_v48 = vor.u32 %v803_v22, %v799_v31  ;;  %v12855_v22 = vcombine.low %v776_v11, %v786_v38  ;;  %v823_v19 = vrot.slane %v821_v32, 5  ;;  %v836_v11 = vshrl.u32 %v12853_v59, 16 }
  0xd6   :  { %17602 = vst [vmem:[#allocation44_spill] sm:$0xff] %v12855_v22  ;;  %v805_v29 = vrot.slane %v804_v48, 4  ;;  %v800_v48 = vsel %vm12086_vm5, %v795_v25, %v799_v31  ;;  %v828_v32 = vor.u32 %v827_v0, %v823_v19  ;;  %v851_v31 = vrot.slane %v849_v60, 4 }
  0xd7   :  { %v855_v0 = vshll.u32 %v12885_v17, 16  ;;  %v12956_v17 = vld [vmem:[%s17262_s0 + $0x15c] sm:$0xf] }
  0xd8   :  { %v810_v38 = vsel %vm12086_vm5, %v805_v29, %v809_v10  ;;  %v12897_v29 = vld [vmem:[%s17262_s0 + $0x148] sm:$0xf]  ;;  %v852_v35 = vor.u32 %v851_v31, %v847_v16  ;;  %17616 = vst [vmem:[#allocation58_spill] sm:$0xff] %v12956_v17 }
  0xd9   :  { %2679 = vmatmul.mubr.bf16.gmra.mrb[76].mxu0 %v12816_v62  ;;  %v12887_v25 = vcombine.low %v800_v48, %v810_v38  ;;  %17609 = vst [vmem:[#allocation51_spill] sm:$0xff] %v12897_v29  ;;  %v869_v48 = vshll.u32 %v12897_v29, 16  ;;  %v873_v38 = vshrl.u32 %v12897_v29, 16 }
  0xda   :  { %2686 = vmatprep.mubr.bf16.mxu0 %v12818_v46  ;;  %v817_v46 = vrot.slane %v815_v2, 5  ;;  %v853_v31 = vrot.slane %v852_v35, 4 }
  0xdb   :  { %17607 = vst [vmem:[#allocation49_spill] sm:$0xff] %v12887_v25 }
  0xdc   :  { %v818_v2 = vor.u32 %v817_v46, %v814_v24  ;;  %v12892_v46 = vld [vmem:[%s17262_s0 + $0x144] sm:$0xf]  ;;  %v829_v24 = vrot.slane %v828_v32, 4 }
  0xdd   :  { %17608 = vst [vmem:[#allocation50_spill] sm:$0xff] %v12892_v46  ;;  %v860_v54 = vshrl.u32 %v12892_v46, 16  ;;  %v863_v60 = vshll.u32 %v12892_v46, 16 }
  0xde   :  { %v819_v10 = vrot.slane %v818_v2, 4  ;;  %v834_v32 = vsel %vm12086_vm5, %v829_v24, %v833_v7  ;;  %v12924_v24 = vld [vmem:[%s17262_s0 + $0x150] sm:$0xf]  ;;  %v12929_v7 = vld [vmem:[%s17262_s0 + $0x154] sm:$0xf] }
  0xdf   :  { %v862_v47 = vrot.slane %v860_v54, 4  ;;  %v865_v20 = vrot.slane %v863_v60, 5  ;;  %v884_v60 = vshrl.u32 %v12924_v24, 16 }
  0xe0   :  { %v824_v2 = vsel %vm12086_vm5, %v819_v10, %v823_v19  ;;  %v871_v19 = vrot.slane %v869_v48, 5  ;;  %v875_v10 = vrot.slane %v873_v38, 4  ;;  %v887_v38 = vshll.u32 %v12924_v24, 16 }
  0xe1   :  { %2687 = vmatmul.mubr.bf16.gmra.mrb[80].mxu0 %v12848_v41  ;;  %v12919_v58 = vcombine.low %v824_v2, %v834_v32  ;;  %v866_v54 = vor.u32 %v865_v20, %v862_v47  ;;  %v893_v2 = vshll.u32 %v12929_v7, 16  ;;  %v897_v32 = vshrl.u32 %v12929_v7, 16 }
  0xe2   :  { %2694 = vmatprep.mubr.bf16.mxu0 %v12855_v22  ;;  %v838_v22 = vrot.slane %v836_v11, 4  ;;  %v876_v48 = vor.u32 %v875_v10, %v871_v19  ;;  %v886_v20 = vrot.slane %v884_v60, 4  ;;  %v12951_v10 = vld [vmem:[%s17262_s0 + $0x158] sm:$0x1] }
  0xe3   :  { %17612 = vst [vmem:[#allocation54_spill] sm:$0xff] %v12919_v58  ;;  %17615 = vst [vmem:[#allocation57_spill] sm:$0xff] %v12951_v10 }
  0xe4   :  { %v842_v11 = vor.u32 %v841_v43, %v838_v22  ;;  %v12912_v43 = vcombine.low %v12791_v26, %v12796_v15  ;;  %v857_v22 = vrot.slane %v855_v0, 5  ;;  %v877_v47 = vrot.slane %v876_v48, 4 }
  0xe5   :  { %v903_v48 = vshll.u32 %v12951_v10, 16  ;;  %v13008_v15 = vcombine.low %v12892_v46, %v12897_v29 }
  0xe6   :  { %17610 = vst [vmem:[#allocation52_spill] sm:$0xff] %v12912_v43  ;;  %v843_v3 = vrot.slane %v842_v11, 4  ;;  %v858_v35 = vsel %vm12086_vm5, %v853_v31, %v857_v22  ;;  %v889_v31 = vrot.slane %v887_v38, 5  ;;  %v908_v38 = vshrl.u32 %v12956_v17, 16 }
  0xe7   :  { %17622 = vst [vmem:[#allocation64_spill] sm:$0xff] %v13008_v15 }
  0xe8   :  { %v848_v11 = vsel %vm12086_vm5, %v843_v3, %v847_v16  ;;  %v867_v3 = vrot.slane %v866_v54, 4  ;;  %v890_v54 = vor.u32 %v889_v31, %v886_v20  ;;  %v905_v31 = vrot.slane %v903_v48, 5 }
  0xe9   :  { %2695 = vmatmul.mubr.bf16.gmra.mrb[84].mxu0 %v12880_v39  ;;  %v12946_v16 = vcombine.low %v848_v11, %v858_v35  ;;  %v12961_v11 = vld [vmem:[%s17262_s0 + $0x160] sm:$0xf] }
  0xea   :  { %2702 = vmatprep.mubr.bf16.mxu0 %v12887_v25  ;;  %v12917_v25 = vld [vmem:[%s17262_s0 + $0x14c] sm:$0x1]  ;;  %17617 = vst [vmem:[#allocation59_spill] sm:$0xff] %v12961_v11  ;;  %v921_v53 = vshrl.u32 %v12961_v11, 16  ;;  %v891_v20 = vrot.slane %v890_v54, 4 }
  0xeb   :  { %17611 = vst [vmem:[#allocation53_spill] sm:$0xff] %v12917_v25  ;;  %v879_v0 = vshll.u32 %v12917_v25, 16  ;;  %17614 = vst [vmem:[#allocation56_spill] sm:$0xff] %v12946_v16  ;;  %v895_v25 = vrot.slane %v893_v2, 5  ;;  %v911_v2 = vshll.u32 %v12956_v17, 16 }
  0xed   :  { %v881_v22 = vrot.slane %v879_v0, 5  ;;  %v872_v0 = vsel %vm12086_vm5, %v867_v3, %v871_v19  ;;  %v12976_v19 = vcombine.low %v12853_v59, %v12860_v33  ;;  %v12981_v3 = vld [vmem:[%s17262_s0 + $0x168] sm:$0xf]  ;;  %v913_v10 = vrot.slane %v911_v2, 5  ;;  %v12993_v33 = vld [vmem:[%s17262_s0 + $0x164] sm:$0x1] }
  0xee   :  { %17619 = vst [vmem:[#allocation61_spill] sm:$0xff] %v12981_v3  ;;  %v923_v59 = vrot.slane %v921_v53, 4  ;;  %17621 = vst [vmem:[#allocation63_spill] sm:$0xff] %v12993_v33  ;;  %v932_v13 = vshrl.u32 %v12981_v3, 16  ;;  %v896_v53 = vsel %vm12086_vm5, %v891_v20, %v895_v25  ;;  %v927_v48 = vshll.u32 %v12993_v33, 16 }
  0xef   :  { %v882_v35 = vsel %vm12086_vm5, %v877_v47, %v881_v22  ;;  %17618 = vst [vmem:[#allocation60_spill] sm:$0xff] %v12976_v19 }
  0xf0   :  { %v12988_v22 = vcombine.low %v872_v0, %v882_v35 }
  0xf1   :  { %2703 = vmatmul.mubr.bf16.gmra.mrb[88].mxu0 %v12912_v43 }
  0xf2   :  { %2710 = vmatprep.mubr.bf16.mxu0 %v12919_v58  ;;  %v899_v58 = vrot.slane %v897_v32, 4  ;;  %v917_v32 = vshll.u32 %v12961_v11, 16  ;;  %17620 = vst [vmem:[#allocation62_spill] sm:$0xff] %v12988_v22 }
  0xf4   :  { %v900_v60 = vor.u32 %v899_v58, %v895_v25  ;;  %v12986_v58 = vld [vmem:[%s17262_s0 + $0x16c] sm:$0xf]  ;;  %v919_v56 = vrot.slane %v917_v32, 5 }
  0xf5   :  { %v941_v6 = vshll.u32 %v12986_v58, 16  ;;  %v945_v0 = vshrl.u32 %v12986_v58, 16 }
  0xf6   :  { %v901_v47 = vrot.slane %v900_v60, 4  ;;  %v924_v60 = vor.u32 %v923_v59, %v919_v56  ;;  %v13020_v59 = vld [vmem:[%s17262_s0 + $0x174] sm:$0xf] }
  0xf7   :  { %v943_v32 = vrot.slane %v941_v6, 5  ;;  %v947_v26 = vrot.slane %v945_v0, 4  ;;  %v959_v0 = vshll.u32 %v13020_v59, 16 }
  0xf8   :  { %v906_v35 = vsel %vm12086_vm5, %v901_v47, %v905_v31  ;;  %v956_v31 = vshrl.u32 %v13020_v59, 16 }
  0xf9   :  { %2711 = vmatmul.mubr.bf16.gmra.mrb[92].mxu0 %v12944_v30  ;;  %v935_v30 = vshll.u32 %v12981_v3, 16  ;;  %v13015_v25 = vcombine.low %v896_v53, %v906_v35  ;;  %v948_v20 = vor.u32 %v947_v26, %v943_v32  ;;  %v961_v33 = vrot.slane %v959_v0, 5 }
  0xfa   :  { %2718 = vmatprep.mubr.bf16.mxu0 %v12946_v16  ;;  %v910_v16 = vrot.slane %v908_v38, 4  ;;  %v934_v38 = vrot.slane %v932_v13, 4  ;;  %v925_v13 = vrot.slane %v924_v60, 4  ;;  %v13040_v60 = vcombine.low %v12924_v24, %v12929_v7 }
  0xfb   :  { %v937_v2 = vrot.slane %v935_v30, 5  ;;  %17624 = vst [vmem:[#allocation66_spill] sm:$0xff] %v13015_v25  ;;  %v13025_v30 = vld [vmem:[%s17262_s0 + $0x178] sm:$0xf] }
  0xfc   :  { %v914_v54 = vor.u32 %v913_v10, %v910_v16  ;;  %v929_v16 = vrot.slane %v927_v48, 5  ;;  %v965_v53 = vshll.u32 %v13025_v30, 16  ;;  %v969_v35 = vshrl.u32 %v13025_v30, 16  ;;  %17625 = vst [vmem:[#allocation67_spill] sm:$0xff] %v13040_v60 }
  0xfd   :  { %v938_v10 = vor.u32 %v937_v2, %v934_v38  ;;  %v949_v38 = vrot.slane %v948_v20, 4 }
  0xfe   :  { %v915_v6 = vrot.slane %v914_v54, 4  ;;  %v930_v26 = vsel %vm12086_vm5, %v925_v13, %v929_v16  ;;  %v967_v46 = vrot.slane %v965_v53, 5  ;;  %v971_v29 = vrot.slane %v969_v35, 4  ;;  %v13057_v13 = vld [vmem:[%s17262_s0 + $0x184] sm:$0xf] }
  0xff   :  { %v939_v48 = vrot.slane %v938_v10, 4  ;;  %v989_v35 = vshll.u32 %v13057_v13, 16 }
 0x100   :  { %v920_v54 = vsel %vm12086_vm5, %v915_v6, %v919_v56  ;;  %v13047_v56 = vld [vmem:[%s17262_s0 + $0x17c] sm:$0x1]  ;;  %v13052_v6 = vld [vmem:[%s17262_s0 + $0x180] sm:$0xf] }
 0x101   :  { %2719 = vmatmul.mubr.bf16.gmra.mrb[96].mxu0 %v12976_v19  ;;  %17627 = vst [vmem:[#allocation69_spill] sm:$0xff] %v13047_v56  ;;  %v944_v16 = vsel %vm12086_vm5, %v939_v48, %v943_v32  ;;  %v980_v0 = vshrl.u32 %v13052_v6, 16  ;;  %v983_v53 = vshll.u32 %v13052_v6, 16  ;;  %v13072_v32 = vcombine.low %v12956_v17, %v12961_v11  ;;  %v13111_v11 = vld [vmem:[%s17262_s0 + $0x194] sm:$0x1] }
 0x102   :  { %2726 = vmatprep.mubr.bf16.mxu0 %v12988_v22  ;;  %v13013_v22 = vld [vmem:[%s17262_s0 + $0x170] sm:$0x1] }
 0x103   :  { %17623 = vst [vmem:[#allocation65_spill] sm:$0xff] %v13013_v22  ;;  %v951_v47 = vshll.u32 %v13013_v22, 16  ;;  %v958_v22 = vrot.slane %v956_v31, 4  ;;  %v975_v31 = vshll.u32 %v13047_v56, 16  ;;  %17628 = vst [vmem:[#allocation70_spill] sm:$0xff] %v13072_v32  ;;  %v982_v48 = vrot.slane %v980_v0, 4 }
 0x104   :  { %v13084_v56 = vld [vmem:[%s17262_s0 + $0x18c] sm:$0xf] }
 0x105   :  { %v953_v2 = vrot.slane %v951_v47, 5  ;;  %v962_v20 = vor.u32 %v961_v33, %v958_v22  ;;  %v972_v47 = vor.u32 %v971_v29, %v967_v46  ;;  %v977_v22 = vrot.slane %v975_v31, 5 }
 0x107   :  { %v954_v10 = vsel %vm12086_vm5, %v949_v38, %v953_v2  ;;  %v963_v33 = vrot.slane %v962_v20, 4  ;;  %v973_v29 = vrot.slane %v972_v47, 4  ;;  %v985_v38 = vrot.slane %v983_v53, 5 }
 0x108   :  { %v991_v2 = vrot.slane %v989_v35, 5  ;;  %v1004_v53 = vshrl.u32 %v13084_v56, 16  ;;  %v1007_v35 = vshll.u32 %v13084_v56, 16 }
 0x109   :  { %2727 = vmatmul.mubr.bf16.gmra.mrb[100].mxu0 %v13008_v15  ;;  %v13042_v15 = vcombine.low %v920_v54, %v930_v26  ;;  %v993_v54 = vshrl.u32 %v13057_v13, 16  ;;  %v13074_v26 = vcombine.low %v944_v16, %v954_v10  ;;  %v13089_v16 = vld [vmem:[%s17262_s0 + $0x190] sm:$0xf]  ;;  %v968_v10 = vsel %vm12086_vm5, %v963_v33, %v967_v46 }
 0x10a   :  { %2734 = vmatprep.mubr.bf16.mxu0 %v13015_v25  ;;  %v13079_v25 = vld [vmem:[%s17262_s0 + $0x188] sm:$0x1]  ;;  %v978_v20 = vsel %vm12086_vm5, %v973_v29, %v977_v22  ;;  %v986_v47 = vor.u32 %v985_v38, %v982_v48  ;;  %v1017_v17 = vshrl.u32 %v13089_v16, 16  ;;  %v13104_v46 = vcombine.low %v12981_v3, %v12986_v58 }
 0x10b   :  { %17626 = vst [vmem:[#allocation68_spill] sm:$0xff] %v13042_v15  ;;  %17629 = vst [vmem:[#allocation71_spill] sm:$0xff] %v13074_v26  ;;  %v999_v0 = vshll.u32 %v13079_v25, 16  ;;  %v13106_v33 = vcombine.low %v968_v10, %v978_v20  ;;  %v1009_v48 = vrot.slane %v1007_v35, 5 }
 0x10c   :  { %17630 = vst [vmem:[#allocation72_spill] sm:$0xff] %v13079_v25  ;;  %17631 = vst [vmem:[#allocation73_spill] sm:$0xff] %v13104_v46  ;;  %v1019_v25 = vrot.slane %v1017_v17, 4  ;;  %v13122_v17 = vcombine.low %v13020_v59, %v13025_v30 }
 0x10d   :  { %17632 = vst [vmem:[#allocation74_spill] sm:$0xff] %v13106_v33  ;;  %v1001_v22 = vrot.slane %v999_v0, 5  ;;  %v1023_v0 = vshll.u32 %v13111_v11, 16 }
 0x10e   :  { %17633 = vst [vmem:[#allocation75_spill] sm:$0xff] %v13122_v17 }
 0x10f   :  { %v1025_v3 = vrot.slane %v1023_v0, 5 }
 0x111   :  { %2735 = vmatmul.mubr.bf16.gmra.mrb[104].mxu0 %v13040_v60 }
 0x112   :  { %2742 = vmatprep.mubr.bf16.mxu0 %v13042_v15  ;;  %v995_v15 = vrot.slane %v993_v54, 4  ;;  %v1013_v54 = vshll.u32 %v13089_v16, 16 }
 0x114   :  { %v996_v31 = vor.u32 %v995_v15, %v991_v2  ;;  %v1006_v15 = vrot.slane %v1004_v53, 4  ;;  %v1015_v38 = vrot.slane %v1013_v54, 5 }
 0x116   :  { %v997_v29 = vrot.slane %v996_v31, 4  ;;  %v1020_v31 = vor.u32 %v1019_v25, %v1015_v38  ;;  %v1229_v25 = vrot.slane %v12569_v63, 5  ;;  %v13152_v63 = vcombine.low %v13084_v56, %v13089_v16 }
 0x118   :  { %v1002_v20 = vsel %vm12086_vm5, %v997_v29, %v1001_v22  ;;  %v1021_v54 = vrot.slane %v1020_v31, 4  ;;  %17636 = vst [vmem:[#allocation78_spill] sm:$0xff] %v13152_v63  ;;  %v11773_v31 = vld [vmem:[%s17262_s0 + $0xc] sm:$0xf] }
 0x119   :  { %2743 = vmatmul.mubr.bf16.gmra.mrb[108].mxu0 %v13072_v32  ;;  %v9829_v0 = vrot.slane %v11773_v31, 9  ;;  %v11613_v31 = vld [vmem:[%s17261_s1 + $0x110] sm:$0xff]  }
 0x11a   :  { %2750 = vmatprep.mubr.bf16.mxu0 %v13074_v26  ;;  %v987_v26 = vrot.slane %v986_v47, 4  ;;  %v1010_v47 = vor.u32 %v1009_v48, %v1006_v15  ;;  %v1026_v22 = vsel %vm12086_vm5, %v1021_v54, %v1025_v3  ;;  %v11772_v3 = vld [vmem:[%s17262_s0 + $0x10] sm:$0xf]  ;;  %v11774_v54 = vld [vmem:[%s17262_s0 + $0x14] sm:$0x1] }
 0x11c   :  { %v992_v10 = vsel %vm12086_vm5, %v987_v26, %v991_v2  ;;  %v1011_v35 = vrot.slane %v1010_v47, 4  ;;  %v9842_v26 = vrot.slane %v12533_v52, 9  ;;  %v1226_v2 = vrot.slane %v12544_v44, 5  ;;  %v11611_v47 = vld [vmem:[%s17261_s1 + $0x100] sm:$0xff]  }
 0x11d   :  { %v13124_v53 = vcombine.low %v992_v10, %v1002_v20  ;;  %v13139_v10 = vcombine.low %v13052_v6, %v13057_v13 }
 0x11e   :  { %v1016_v29 = vsel %vm12086_vm5, %v1011_v35, %v1015_v38  ;;  %v1227_v15 = vsel %vm12075_vm4, %v9842_v26, %v1226_v2  ;;  %v1228_v48 = vrot.slane %v1226_v2, 4  ;;  %v1135_v38 = vrot.slane %v11772_v3, 5 }
 0x11f   :  { %17634 = vst [vmem:[#allocation76_spill] sm:$0xff] %v13124_v53  ;;  %17635 = vst [vmem:[#allocation77_spill] sm:$0xff] %v13139_v10  ;;  %v13141_v20 = vcombine.low %v1016_v29, %v1026_v22  ;;  %v17637_v26 = vcombine.low %v12716_v1, %v12092_v28  ;;  %v11775_v29 = vld [vmem:[%s17262_s0 + $0x1c] sm:$0xf]  ;;  %v17638_v28 = vmov 0  }
 0x120   :  { %v1230_v52 = vsel %vm12075_vm4, %v1228_v48, %v1229_v25  ;;  %v1137_v35 = vrot.slane %v1135_v38, 4  ;;  %v1136_v2 = vsel %vm12075_vm4, %v9829_v0, %v1135_v38  ;;  %v1142_v22 = vrot.slane %v11775_v29, 5  ;;  %v11776_v48 = vld [vmem:[%s17262_s0 + $0x18] sm:$0xf]  ;;  %v11777_v38 = vld [vmem:[%s17262_s0 + $0x20] sm:$0x1] }
 0x121   :  { %2751 = vmatmul.mubr.bf16.gmra.mrb[112].mxu0 %v13104_v46  ;;  %v13145_v44 = vcombine.low %v1227_v15, %v1230_v52  ;;  %v11612_v15 = vld [vmem:[%s17261_s1 + $0x108] sm:$0xff]   ;;  %v9830_v52 = vrot.slane %v11776_v48, 9 }
 0x122   :  { %2758 = vmatprep.mubr.bf16.mxu0 %v13106_v33  ;;  %v1144_v3 = vrot.slane %v1142_v22, 4 }
 0x123   :  { %10562 = vmatprep.mubr.bf16.mxu1 %v13145_v44  ;;  %v1143_v0 = vsel %vm12075_vm4, %v9830_v52, %v1142_v22  ;;  %v11615_v52 = vld [vmem:[%s17261_s1 + $0x120] sm:$0xff]  }
 0x129   :  { %2759 = vmatmul.mubr.bf16.gmra.mrb[116].mxu0 %v13122_v17 }
 0x12a   :  { %2766 = vmatprep.mubr.bf16.mxu0 %v13124_v53 }
 0x131   :  { %2767 = vmatmul.mubr.bf16.gmra.mrb[120].mxu0 %v13139_v10 }
 0x132   :  { %2774 = vmatprep.mubr.bf16.mxu0 %v13141_v20 }
 0x139   :  { %2775 = vmatmul.mubr.bf16.gmra.mrb[124].mxu0 %v13152_v63 }
 0x13a   :  { %2815 = vmatprep.mubr.bf16.mxu0 %v12226_v50  ;;  %v1138_v50 = vrot.slane %v11774_v54, 5  ;;  %v11778_v54 = vld [vmem:[%s17262_s0 + $0x28] sm:$0xf] }
 0x13c   :  { %v1139_v25 = vsel %vm12075_vm4, %v1137_v35, %v1138_v50  ;;  %v1149_v50 = vrot.slane %v11778_v54, 5  ;;  %v11782_v54 = vld [vmem:[%s17262_s0 + $0x30] sm:$0xf] }
 0x13d   :  { %v13183_v1 = vcombine.low %v1136_v2, %v1139_v25  ;;  %v11779_v25 = vld [vmem:[%s17262_s0 + $0x24] sm:$0xf] }
 0x13e   :  { %v9831_v29 = vrot.slane %v11779_v25, 9  ;;  %v1151_v22 = vrot.slane %v1149_v50, 4  ;;  %v11783_v25 = vld [vmem:[%s17262_s0 + $0x38] sm:$0x1] }
 0x141   :  { %2816 = vmatmul.mubr.bf16.vlgmr.msra.gmra.mrb[0].mxu0 %v17637_v26  ;;  %v11614_v26 = vld [vmem:[%s17261_s1 + $0x118] sm:$0xff]  }
 0x142   :  { %3073 = vmatpush1.bf16.msra.mxu0 %v11611_v47  ;;  %2823 = vmatprep.mubr.bf16.mxu0 %v12265_v14  ;;  %v1145_v47 = vrot.slane %v11777_v38, 5 }
 0x143   :  { %3074 = vmatprep.subr.bf16.mxu0 %v17638_v28 }
 0x144   :  { %v1146_v35 = vsel %vm12075_vm4, %v1144_v3, %v1145_v47  ;;  %v1150_v3 = vsel %vm12075_vm4, %v9831_v29, %v1149_v50  ;;  %v11781_v47 = vld [vmem:[%s17262_s0 + $0x34] sm:$0xf]  ;;  %v9832_v50 = vrot.slane %v11782_v54, 9  ;;  %v1159_v29 = vrot.slane %v11783_v25, 5  ;;  %v11620_v25 = vld [vmem:[%s17261_s1 + $0x140] sm:$0xff]  }
 0x145   :  { %v13208_v2 = vcombine.low %v1143_v0, %v1146_v35  ;;  %v11616_v0 = vld [vmem:[%s17261_s1 + $0x128] sm:$0xff]  }
 0x146   :  { %3075 = vmatpush1.bf16.msra.mxu0 %v11612_v15  ;;  %v11780_v15 = vld [vmem:[%s17262_s0 + $0x2c] sm:$0x1] }
 0x147   :  { %3076 = vmatprep.subr.bf16.mxu0 %v17638_v28  ;;  %17639 = vst [vmem:[#allocation79_spill] sm:$0xff] %v13208_v2  ;;  %v1152_v48 = vrot.slane %v11780_v15, 5 }
 0x149   :  { %2824 = vmatmul.mubr.bf16.gmra.mrb[4].mxu0 %v13183_v1  ;;  %v1153_v38 = vsel %vm12075_vm4, %v1151_v22, %v1152_v48  ;;  %v11617_v22 = vld [vmem:[%s17261_s1 + $0x130] sm:$0xff]  }
 0x14a   :  { %2831 = vmatprep.mubr.bf16.mxu0 %v12297_v42  ;;  %3077 = vmatpush1.bf16.msra.mxu0 %v11613_v31  ;;  %v1156_v31 = vrot.slane %v11781_v47, 5  ;;  %v13233_v35 = vcombine.low %v1150_v3, %v1153_v38  ;;  %v11618_v38 = vld [vmem:[%s17261_s1 + $0x138] sm:$0xff]  }
 0x14b   :  { %3078 = vmatprep.subr.bf16.mxu0 %v17638_v28 }
 0x14c   :  { %17640 = vst [vmem:[#allocation80_spill] sm:$0xff] %v13233_v35  ;;  %v1157_v15 = vsel %vm12075_vm4, %v9832_v50, %v1156_v31  ;;  %v11786_v50 = vld [vmem:[%s17262_s0 + $0x44] sm:$0x1] }
 0x14e   :  { %3079 = vmatpush1.bf16.msra.mxu0 %v11614_v26  ;;  %v1158_v26 = vrot.slane %v1156_v31, 4  ;;  %v11785_v31 = vld [vmem:[%s17262_s0 + $0x3c] sm:$0xf] }
 0x14f   :  { %3080 = vmatprep.subr.bf16.mxu0 %v17638_v28 }
 0x150   :  { %v1160_v48 = vsel %vm12075_vm4, %v1158_v26, %v1159_v29  ;;  %v1166_v26 = vrot.slane %v11786_v50, 5 }
 0x151   :  { %2832 = vmatmul.mubr.bf16.gmra.mrb[8].mxu0 %v13208_v2  ;;  %v13258_v47 = vcombine.low %v1157_v15, %v1160_v48  ;;  %v11787_v15 = vld [vmem:[%s17262_s0 + $0x4c] sm:$0xf] }
 0x152   :  { %2839 = vmatprep.mubr.bf16.mxu0 %v12334_v5  ;;  %3081 = vmatpush1.bf16.msra.mxu0 %v11615_v52  ;;  %v11784_v52 = vld [vmem:[%s17262_s0 + $0x40] sm:$0xf]  ;;  %v1170_v48 = vrot.slane %v11787_v15, 5 }
 0x153   :  { %3082 = vmatprep.subr.bf16.mxu0 %v17638_v28  ;;  %v1163_v3 = vrot.slane %v11784_v52, 5  ;;  %17641 = vst [vmem:[#allocation81_spill] sm:$0xff] %v13258_v47  ;;  %v11621_v52 = vld [vmem:[%s17261_s1 + $0x148] sm:$0xff]  }
 0x155   :  { %v1165_v54 = vrot.slane %v1163_v3, 4 }
 0x156   :  { %3083 = vmatpush1.bf16.msra.mxu0 %v11616_v0  ;;  %v9833_v0 = vrot.slane %v11785_v31, 9 }
 0x157   :  { %3084 = vmatprep.subr.bf16.mxu0 %v17638_v28 }
 0x158   :  { %v1164_v29 = vsel %vm12075_vm4, %v9833_v0, %v1163_v3  ;;  %v11788_v3 = vld [vmem:[%s17262_s0 + $0x48] sm:$0xf]  ;;  %v1172_v0 = vrot.slane %v1170_v48, 4 }
 0x159   :  { %2840 = vmatmul.mubr.bf16.gmra.mrb[12].mxu0 %v13233_v35  ;;  %v9834_v31 = vrot.slane %v11788_v3, 9  ;;  %v11791_v3 = vld [vmem:[%s17262_s0 + $0x54] sm:$0xf] }
 0x15a   :  { %2847 = vmatprep.mubr.bf16.mxu0 %v12371_v37  ;;  %3085 = vmatpush1.bf16.msra.mxu0 %v11617_v22  ;;  %v1167_v22 = vsel %vm12075_vm4, %v1165_v54, %v1166_v26  ;;  %v11789_v54 = vld [vmem:[%s17262_s0 + $0x50] sm:$0x1] }
 0x15b   :  { %3086 = vmatprep.subr.bf16.mxu0 %v17638_v28  ;;  %v1173_v50 = vrot.slane %v11789_v54, 5  ;;  %v11622_v26 = vld [vmem:[%s17261_s1 + $0x150] sm:$0xff]   ;;  %v9835_v54 = vrot.slane %v11791_v3, 9  ;;  %v11794_v3 = vld [vmem:[%s17262_s0 + $0x60] sm:$0xf] }
 0x15e   :  { %3087 = vmatpush1.bf16.msra.mxu0 %v11618_v38  ;;  %v13283_v38 = vcombine.low %v1164_v29, %v1167_v22  ;;  %v1174_v29 = vsel %vm12075_vm4, %v1172_v0, %v1173_v50  ;;  %v11790_v22 = vld [vmem:[%s17262_s0 + $0x58] sm:$0xf] }
 0x15f   :  { %3088 = vmatprep.subr.bf16.mxu0 %v17638_v28  ;;  %v1177_v15 = vrot.slane %v11790_v22, 5  ;;  %v11623_v0 = vld [vmem:[%s17261_s1 + $0x158] sm:$0xff]  }
 0x160   :  { %17642 = vst [vmem:[#allocation82_spill] sm:$0xff] %v13283_v38 }
 0x161   :  { %2848 = vmatmul.mubr.bf16.gmra.mrb[16].mxu0 %v13258_v47  ;;  %v1178_v50 = vsel %vm12075_vm4, %v9835_v54, %v1177_v15 }
 0x162   :  { %2855 = vmatprep.mubr.bf16.mxu0 %v12408_v4  ;;  %3089 = vmatpush1.bf16.msra.mxu0 %v11620_v25  ;;  %v1171_v25 = vsel %vm12075_vm4, %v9834_v31, %v1170_v48  ;;  %v11792_v48 = vld [vmem:[%s17262_s0 + $0x5c] sm:$0x1] }
 0x163   :  { %3090 = vmatprep.subr.bf16.mxu0 %v17638_v28  ;;  %v1180_v31 = vrot.slane %v11792_v48, 5  ;;  %v9836_v48 = vrot.slane %v11794_v3, 9 }
 0x166   :  { %3091 = vmatpush1.bf16.msra.mxu0 %v11621_v52  ;;  %v13305_v52 = vcombine.low %v1171_v25, %v1174_v29  ;;  %v11793_v25 = vld [vmem:[%s17262_s0 + $0x64] sm:$0xf] }
 0x167   :  { %3092 = vmatprep.subr.bf16.mxu0 %v17638_v28  ;;  %v1184_v29 = vrot.slane %v11793_v25, 5  ;;  %v11797_v25 = vld [vmem:[%s17262_s0 + $0x6c] sm:$0xf] }
 0x168   :  { %17643 = vst [vmem:[#allocation83_spill] sm:$0xff] %v13305_v52  ;;  %v9837_v3 = vrot.slane %v11797_v25, 9 }
 0x169   :  { %2856 = vmatmul.mubr.bf16.gmra.mrb[20].mxu0 %v13283_v38  ;;  %v1185_v54 = vsel %vm12075_vm4, %v9836_v48, %v1184_v29 }
 0x16a   :  { %2863 = vmatprep.mubr.bf16.mxu0 %v12443_v40  ;;  %3093 = vmatpush1.bf16.msra.mxu0 %v11622_v26  ;;  %v1179_v40 = vrot.slane %v1177_v15, 4 }
 0x16b   :  { %3094 = vmatprep.subr.bf16.mxu0 %v17638_v28 }
 0x16c   :  { %v1181_v26 = vsel %vm12075_vm4, %v1179_v40, %v1180_v31  ;;  %v11795_v40 = vld [vmem:[%s17262_s0 + $0x68] sm:$0x1] }
 0x16d   :  { %v13326_v22 = vcombine.low %v1178_v50, %v1181_v26  ;;  %v1187_v15 = vrot.slane %v11795_v40, 5 }
 0x16e   :  { %3095 = vmatpush1.bf16.msra.mxu0 %v11623_v0  ;;  %v11796_v0 = vld [vmem:[%s17262_s0 + $0x70] sm:$0xf] }
 0x16f   :  { %3096 = vmatprep.subr.bf16.mxu0 %v17638_v28  ;;  %17644 = vst [vmem:[#allocation84_spill] sm:$0xff] %v13326_v22  ;;  %v1191_v50 = vrot.slane %v11796_v0, 5 }
 0x171   :  { %2864 = vmatmul.mubr.bf16.gmra.mrb[24].mxu0 %v13305_v52  ;;  %v1193_v40 = vrot.slane %v1191_v50, 4 }
 0x172   :  { %2871 = vmatprep.mubr.bf16.mxu0 %v12472_v8  ;;  %v1186_v8 = vrot.slane %v1184_v29, 4  ;;  %v11798_v29 = vld [vmem:[%s17262_s0 + $0x74] sm:$0x1] }
 0x173   :  { %v1194_v48 = vrot.slane %v11798_v29, 5  ;;  %v11800_v29 = vld [vmem:[%s17262_s0 + $0x78] sm:$0xf] }
 0x174   :  { %v1188_v31 = vsel %vm12075_vm4, %v1186_v8, %v1187_v15  ;;  %v11624_v8 = vld [vmem:[%s17261_s1 + $0x160] sm:$0xff]   ;;  %v1192_v15 = vsel %vm12075_vm4, %v9837_v3, %v1191_v50 }
 0x175   :  { %v13343_v26 = vcombine.low %v1185_v54, %v1188_v31  ;;  %v1195_v54 = vsel %vm12075_vm4, %v1193_v40, %v1194_v48  ;;  %v11799_v31 = vld [vmem:[%s17262_s0 + $0x7c] sm:$0xf]  ;;  %3097 = vmatpush1.bf16.msra.mxu0 %v11624_v8  ;;  %v11801_v50 = vld [vmem:[%s17262_s0 + $0x80] sm:$0x1]  ;;  %v11802_v8 = vld [vmem:[%s17262_s0 + $0x88] sm:$0xf] }
 0x176   :  { %v1198_v0 = vrot.slane %v11799_v31, 5  ;;  %3098 = vmatprep.subr.bf16.mxu0 %v17638_v28  ;;  %v13364_v25 = vcombine.low %v1192_v15, %v1195_v54  ;;  %v1201_v3 = vrot.slane %v11801_v50, 5  ;;  %v1205_v15 = vrot.slane %v11802_v8, 5  ;;  %v11803_v31 = vld [vmem:[%s17262_s0 + $0x84] sm:$0xf] }
 0x177   :  { %17645 = vst [vmem:[#allocation85_spill] sm:$0xff] %v13343_v26 }
 0x178   :  { %17646 = vst [vmem:[#allocation86_spill] sm:$0xff] %v13364_v25  ;;  %v1207_v50 = vrot.slane %v1205_v15, 4 }
 0x179   :  { %2872 = vmatmul.mubr.bf16.gmra.mrb[28].mxu0 %v13326_v22 }
 0x17a   :  { %2879 = vmatprep.mubr.bf16.mxu0 %v12503_v49  ;;  %v1200_v49 = vrot.slane %v1198_v0, 4 }
 0x17c   :  { %v1202_v48 = vsel %vm12075_vm4, %v1200_v49, %v1201_v3  ;;  %v11625_v49 = vld [vmem:[%s17261_s1 + $0x168] sm:$0xff]  }
 0x17d   :  { %3099 = vmatpush1.bf16.msra.mxu0 %v11625_v49  ;;  %v11808_v49 = vld [vmem:[%s17262_s0 + $0xa0] sm:$0xf] }
 0x17e   :  { %3100 = vmatprep.subr.bf16.mxu0 %v17638_v28 }
 0x181   :  { %2880 = vmatmul.mubr.bf16.gmra.mrb[32].mxu0 %v13343_v26 }
 0x182   :  { %2887 = vmatprep.mubr.bf16.mxu0 %v12537_v23  ;;  %v9838_v23 = vrot.slane %v11800_v29, 9  ;;  %v9839_v29 = vrot.slane %v11803_v31, 9 }
 0x184   :  { %v1199_v40 = vsel %vm12075_vm4, %v9838_v23, %v1198_v0  ;;  %v11804_v23 = vld [vmem:[%s17262_s0 + $0x8c] sm:$0x1]  ;;  %v1206_v3 = vsel %vm12075_vm4, %v9839_v29, %v1205_v15  ;;  %v11807_v15 = vld [vmem:[%s17262_s0 + $0x98] sm:$0x1] }
 0x185   :  { %v13381_v54 = vcombine.low %v1199_v40, %v1202_v48  ;;  %v1208_v0 = vrot.slane %v11804_v23, 5  ;;  %v11805_v48 = vld [vmem:[%s17262_s0 + $0x94] sm:$0xf]  ;;  %v11806_v23 = vld [vmem:[%s17262_s0 + $0x90] sm:$0xf]  ;;  %v1215_v29 = vrot.slane %v11807_v15, 5 }
 0x186   :  { %v1212_v8 = vrot.slane %v11805_v48, 5  ;;  %v11809_v48 = vld [vmem:[%s17262_s0 + $0x9c] sm:$0xf] }
 0x187   :  { %17647 = vst [vmem:[#allocation87_spill] sm:$0xff] %v13381_v54  ;;  %v1209_v40 = vsel %vm12075_vm4, %v1207_v50, %v1208_v0 }
 0x188   :  { %v13402_v31 = vcombine.low %v1206_v3, %v1209_v40  ;;  %v1219_v3 = vrot.slane %v11808_v49, 5  ;;  %v11811_v49 = vld [vmem:[%s17262_s0 + $0xb8] sm:$0xf] }
 0x189   :  { %2888 = vmatmul.mubr.bf16.gmra.mrb[36].mxu0 %v13364_v25 }
 0x18a   :  { %2895 = vmatprep.mubr.bf16.mxu0 %v12562_v61  ;;  %17648 = vst [vmem:[#allocation88_spill] sm:$0xff] %v13402_v31  ;;  %v1214_v61 = vrot.slane %v1212_v8, 4  ;;  %v1221_v15 = vrot.slane %v1219_v3, 4 }
 0x18c   :  { %v1216_v0 = vsel %vm12075_vm4, %v1214_v61, %v1215_v29  ;;  %v11626_v61 = vld [vmem:[%s17261_s1 + $0x170] sm:$0xff]  }
 0x18d   :  { %3101 = vmatpush1.bf16.msra.mxu0 %v11626_v61 }
 0x18e   :  { %3102 = vmatprep.subr.bf16.mxu0 %v17638_v28 }
 0x191   :  { %2896 = vmatmul.mubr.bf16.gmra.mrb[40].mxu0 %v13381_v54 }
 0x192   :  { %2903 = vmatprep.mubr.bf16.mxu0 %v12594_v45  ;;  %v9840_v45 = vrot.slane %v11806_v23, 9  ;;  %v9841_v23 = vrot.slane %v11809_v48, 9  ;;  %v1233_v48 = vrot.slane %v11811_v49, 5  ;;  %v11627_v49 = vld [vmem:[%s17261_s1 + $0x178] sm:$0xff]  }
 0x193   :  { %3103 = vmatpush1.bf16.msra.mxu0 %v11627_v49  ;;  %v11818_v49 = vld [vmem:[%s17262_s0 + $0xe4] sm:$0xf] }
 0x194   :  { %v1213_v50 = vsel %vm12075_vm4, %v9840_v45, %v1212_v8  ;;  %v11810_v45 = vld [vmem:[%s17262_s0 + $0xa4] sm:$0x1]  ;;  %v1220_v29 = vsel %vm12075_vm4, %v9841_v23, %v1219_v3  ;;  %v13447_v3 = vld [vmem:[%s17262_s0 + $0xc0] sm:$0xf]  ;;  %v1235_v61 = vrot.slane %v1233_v48, 4  ;;  %3361 = vmatprep.subr.bf16.mxu0 %v17638_v28 }
 0x195   :  { %v13419_v40 = vcombine.low %v1213_v50, %v1216_v0  ;;  %v1222_v8 = vrot.slane %v11810_v45, 5  ;;  %v13452_v23 = vld [vmem:[%s17262_s0 + $0xc4] sm:$0xf]  ;;  %v11812_v45 = vld [vmem:[%s17262_s0 + $0xb4] sm:$0xf] }
 0x197   :  { %17649 = vst [vmem:[#allocation89_spill] sm:$0xff] %v13419_v40  ;;  %v1223_v50 = vsel %vm12075_vm4, %v1221_v15, %v1222_v8  ;;  %v13456_v15 = vcombine.low %v13447_v3, %v13452_v23  ;;  %v9843_v8 = vrot.slane %v11812_v45, 9 }
 0x198   :  { %v13437_v0 = vcombine.low %v1220_v29, %v1223_v50  ;;  %v11813_v29 = vld [vmem:[%s17262_s0 + $0xbc] sm:$0x1] }
 0x199   :  { %2904 = vmatmul.mubr.bf16.gmra.mrb[44].mxu0 %v13402_v31  ;;  %17651 = vst [vmem:[#allocation91_spill] sm:$0xff] %v13456_v15  ;;  %v1236_v50 = vrot.slane %v11813_v29, 5 }
 0x19a   :  { %2911 = vmatprep.mubr.bf16.mxu0 %v12627_v12  ;;  %17650 = vst [vmem:[#allocation90_spill] sm:$0xff] %v13437_v0 }
 0x19b   :  { %v1237_v45 = vsel %vm12075_vm4, %v1235_v61, %v1236_v50 }
 0x1a1   :  { %2912 = vmatmul.mubr.bf16.gmra.mrb[48].mxu0 %v13419_v40 }
 0x1a2   :  { %2919 = vmatprep.mubr.bf16.mxu0 %v12656_v57  ;;  %v11814_v57 = vld [vmem:[%s17262_s0 + $0xdc] sm:$0xf] }
 0x1a3   :  { %v1240_v12 = vrot.slane %v11814_v57, 5 }
 0x1a5   :  { %v1242_v37 = vrot.slane %v1240_v12, 4 }
 0x1a9   :  { %2920 = vmatmul.mubr.bf16.gmra.mrb[52].mxu0 %v13437_v0 }
 0x1aa   :  { %2927 = vmatprep.mubr.bf16.mxu0 %v12689_v18  ;;  %v1234_v18 = vsel %vm12075_vm4, %v9843_v8, %v1233_v48  ;;  %v11816_v48 = vld [vmem:[%s17262_s0 + $0xe0] sm:$0x1] }
 0x1ab   :  { %v13477_v29 = vcombine.low %v1234_v18, %v1237_v45  ;;  %v1243_v8 = vrot.slane %v11816_v48, 5  ;;  %v9845_v45 = vrot.slane %v11818_v49, 9 }
 0x1ad   :  { %v1244_v18 = vsel %vm12075_vm4, %v1242_v37, %v1243_v8  ;;  %v11820_v8 = vld [vmem:[%s17262_s0 + $0xf4] sm:$0xf] }
 0x1b1   :  { %2928 = vmatmul.mubr.bf16.gmra.mrb[56].mxu0 %v13145_v44 }
 0x1b2   :  { %2935 = vmatprep.mubr.bf16.mxu0 %v13456_v15  ;;  %v11815_v15 = vld [vmem:[%s17262_s0 + $0xd8] sm:$0xf] }
 0x1b3   :  { %v9844_v4 = vrot.slane %v11815_v15, 9  ;;  %v11817_v15 = vld [vmem:[%s17262_s0 + $0xe8] sm:$0xf] }
 0x1b4   :  { %v1247_v61 = vrot.slane %v11817_v15, 5  ;;  %v11821_v15 = vld [vmem:[%s17262_s0 + $0xf0] sm:$0xf] }
 0x1b5   :  { %v1241_v57 = vsel %vm12075_vm4, %v9844_v4, %v1240_v12 }
 0x1b6   :  { %v9944_v50 = vcombine.low %v1241_v57, %v1244_v18  ;;  %v1249_v48 = vrot.slane %v1247_v61, 4  ;;  %v1248_v37 = vsel %vm12075_vm4, %v9845_v45, %v1247_v61  ;;  %v1254_v57 = vrot.slane %v11820_v8, 5  ;;  %v11822_v61 = vld [vmem:[%s17262_s0 + $0xf8] sm:$0x1]  ;;  %v11824_v8 = vld [vmem:[%s17262_s0 + $0xfc] sm:$0xf] }
 0x1b7   :  { %v1257_v45 = vrot.slane %v11822_v61, 5 }
 0x1b8   :  { %v1256_v49 = vrot.slane %v1254_v57, 4 }
 0x1b9   :  { %2936 = vmatmul.mubr.bf16.gmra.mrb[60].mxu0 %v13477_v29 }
 0x1ba   :  { %2943 = vmatprep.mubr.bf16.mxu0 %v12752_v51  ;;  %v11819_v51 = vld [vmem:[%s17262_s0 + $0xec] sm:$0x1] }
 0x1bb   :  { %v1250_v4 = vrot.slane %v11819_v51, 5  ;;  %v1258_v51 = vsel %vm12075_vm4, %v1256_v49, %v1257_v45 }
 0x1bd   :  { %v1251_v12 = vsel %vm12075_vm4, %v1249_v48, %v1250_v4  ;;  %v11823_v4 = vld [vmem:[%s17262_s0 + $0x100] sm:$0xf] }
 0x1be   :  { %v13508_v18 = vcombine.low %v1248_v37, %v1251_v12  ;;  %v1261_v37 = vrot.slane %v11823_v4, 5 }
 0x1c0   :  { %v1263_v61 = vrot.slane %v1261_v37, 4 }
 0x1c1   :  { %2944 = vmatmul.mubr.bf16.gmra.mrb[64].mxu0 %v9944_v50  ;;  %v9846_v50 = vrot.slane %v11821_v15, 9  ;;  %v9847_v15 = vrot.slane %v11824_v8, 9  ;;  %v11827_v8 = vld [vmem:[%s17262_s0 + $0x108] sm:$0xf] }
 0x1c2   :  { %2951 = vmatprep.mubr.bf16.mxu0 %v12784_v36 }
 0x1c3   :  { %v1255_v48 = vsel %vm12075_vm4, %v9846_v50, %v1254_v57  ;;  %v11825_v57 = vld [vmem:[%s17262_s0 + $0x104] sm:$0x1]  ;;  %v1262_v49 = vsel %vm12075_vm4, %v9847_v15, %v1261_v37 }
 0x1c4   :  { %v13525_v12 = vcombine.low %v1255_v48, %v1258_v51  ;;  %v1264_v50 = vrot.slane %v11825_v57, 5  ;;  %v11826_v48 = vld [vmem:[%s17262_s0 + $0x10c] sm:$0xf]  ;;  %v9848_v57 = vrot.slane %v11827_v8, 9 }
 0x1c5   :  { %v1268_v51 = vrot.slane %v11826_v48, 5  ;;  %v1278_v48 = vrot.slane %v12801_v55, 5  ;;  %v17655_v55 = vld [vmem:[#allocation55_spill] sm:$0xff] }
 0x1c6   :  { %v1265_v45 = vsel %vm12075_vm4, %v1263_v61, %v1264_v50  ;;  %v1275_v61 = vrot.slane %v12769_v34, 5 }
 0x1c7   :  { %v13542_v4 = vcombine.low %v1262_v49, %v1265_v45  ;;  %v1269_v37 = vsel %vm12075_vm4, %v9848_v57, %v1268_v51  ;;  %v11828_v49 = vld [vmem:[%s17262_s0 + $0x114] sm:$0xf] }
 0x1c8   :  { %v9849_v45 = vrot.slane %v11828_v49, 9  ;;  %v17653_v57 = vld [vmem:[#allocation35_spill] sm:$0xff] }
 0x1c9   :  { %2952 = vmatmul.mubr.bf16.gmra.mrb[68].mxu0 %v13508_v18  ;;  %v17654_v49 = vld [vmem:[#allocation39_spill] sm:$0xff] }
 0x1ca   :  { %2959 = vmatprep.mubr.bf16.mxu0 %v12816_v62  ;;  %v1270_v62 = vrot.slane %v1268_v51, 4  ;;  %v1276_v51 = vsel %vm12075_vm4, %v9849_v45, %v1275_v61  ;;  %v17656_v45 = vld [vmem:[#allocation41_spill] sm:$0xff] }
 0x1d1   :  { %2960 = vmatmul.mubr.bf16.gmra.mrb[72].mxu0 %v13525_v12 }
 0x1d2   :  { %2967 = vmatprep.mubr.bf16.mxu0 %v12848_v41  ;;  %v1271_v41 = vrot.slane %v12764_v9, 5  ;;  %v1277_v9 = vrot.slane %v1275_v61, 4 }
 0x1d4   :  { %v1272_v15 = vsel %vm12075_vm4, %v1270_v62, %v1271_v41  ;;  %v1279_v34 = vsel %vm12075_vm4, %v1277_v9, %v1278_v48  ;;  %v17652_v62 = vld [vmem:[#allocation36_spill] sm:$0xff]  ;;  %v1289_v9 = vrot.slane %v17656_v45, 5 }
 0x1d5   :  { %v13555_v50 = vcombine.low %v1269_v37, %v1272_v15  ;;  %v1282_v41 = vrot.slane %v17652_v62, 5  ;;  %v13568_v8 = vcombine.low %v1276_v51, %v1279_v34  ;;  %v9850_v37 = vrot.slane %v17653_v57, 9  ;;  %v17657_v51 = vld [vmem:[#allocation40_spill] sm:$0xff]  ;;  %v17658_v57 = vld [vmem:[#allocation46_spill] sm:$0xff] }
 0x1d6   :  { %v9851_v34 = vrot.slane %v17657_v51, 9  ;;  %v1291_v62 = vrot.slane %v1289_v9, 4  ;;  %v1292_v36 = vrot.slane %v17658_v57, 5  ;;  %v17661_v51 = vld [vmem:[#allocation48_spill] sm:$0xff] }
 0x1d7   :  { %v1284_v15 = vrot.slane %v1282_v41, 4  ;;  %v17662_v57 = vld [vmem:[#allocation64_spill] sm:$0xff] }
 0x1d9   :  { %2968 = vmatmul.mubr.bf16.gmra.mrb[76].mxu0 %v13542_v4 }
 0x1da   :  { %2975 = vmatprep.mubr.bf16.mxu0 %v12880_v39  ;;  %v1285_v39 = vrot.slane %v17654_v49, 5  ;;  %v1290_v49 = vsel %vm12075_vm4, %v9851_v34, %v1289_v9 }
 0x1dc   :  { %v1286_v61 = vsel %vm12075_vm4, %v1284_v15, %v1285_v39  ;;  %v17659_v39 = vld [vmem:[#allocation45_spill] sm:$0xff] }
 0x1e1   :  { %2976 = vmatmul.mubr.bf16.gmra.mrb[80].mxu0 %v13555_v50 }
 0x1e2   :  { %2983 = vmatprep.mubr.bf16.mxu0 %v12912_v43  ;;  %v1283_v43 = vsel %vm12075_vm4, %v9850_v37, %v1282_v41  ;;  %v1293_v41 = vsel %vm12075_vm4, %v1291_v62, %v1292_v36  ;;  %v1296_v37 = vrot.slane %v17659_v39, 5  ;;  %v17663_v36 = vld [vmem:[#allocation51_spill] sm:$0xff] }
 0x1e3   :  { %v13579_v48 = vcombine.low %v1283_v43, %v1286_v61  ;;  %v13590_v15 = vcombine.low %v1290_v49, %v1293_v41  ;;  %v17660_v43 = vld [vmem:[#allocation43_spill] sm:$0xff]  ;;  %v1303_v34 = vrot.slane %v17663_v36, 5  ;;  %v17664_v49 = vld [vmem:[#allocation50_spill] sm:$0xff] }
 0x1e4   :  { %v9852_v61 = vrot.slane %v17660_v43, 9  ;;  %v1298_v45 = vrot.slane %v1296_v37, 4  ;;  %v9853_v41 = vrot.slane %v17664_v49, 9  ;;  %v17665_v43 = vld [vmem:[#allocation53_spill] sm:$0xff] }
 0x1e5   :  { %v1305_v39 = vrot.slane %v1303_v34, 4  ;;  %v1306_v5 = vrot.slane %v17665_v43, 5 }
 0x1e9   :  { %2984 = vmatmul.mubr.bf16.gmra.mrb[84].mxu0 %v13568_v8 }
 0x1ea   :  { %2991 = vmatprep.mubr.bf16.mxu0 %v17655_v55  ;;  %v1299_v55 = vrot.slane %v17661_v51, 5  ;;  %v1304_v51 = vsel %vm12075_vm4, %v9853_v41, %v1303_v34 }
 0x1ec   :  { %v1300_v9 = vsel %vm12075_vm4, %v1298_v45, %v1299_v55  ;;  %v1310_v55 = vrot.slane %v12929_v7, 5 }
 0x1ee   :  { %v1312_v45 = vrot.slane %v1310_v55, 4 }
 0x1f1   :  { %2992 = vmatmul.mubr.bf16.gmra.mrb[88].mxu0 %v13579_v48 }
 0x1f2   :  { %2999 = vmatprep.mubr.bf16.mxu0 %v12976_v19  ;;  %v1297_v19 = vsel %vm12075_vm4, %v9852_v61, %v1296_v37  ;;  %v1307_v37 = vsel %vm12075_vm4, %v1305_v39, %v1306_v5  ;;  %v17667_v5 = vld [vmem:[#allocation59_spill] sm:$0xff]  ;;  %v17668_v39 = vld [vmem:[#allocation58_spill] sm:$0xff] }
 0x1f3   :  { %v13601_v62 = vcombine.low %v1297_v19, %v1300_v9  ;;  %v13612_v61 = vcombine.low %v1304_v51, %v1307_v37  ;;  %v9854_v19 = vrot.slane %v12924_v24, 9  ;;  %v17666_v9 = vld [vmem:[#allocation57_spill] sm:$0xff]  ;;  %v1317_v41 = vrot.slane %v17667_v5, 5  ;;  %v17669_v51 = vld [vmem:[#allocation63_spill] sm:$0xff] }
 0x1f4   :  { %v1313_v36 = vrot.slane %v17666_v9, 5  ;;  %v9855_v43 = vrot.slane %v17668_v39, 9  ;;  %v1320_v37 = vrot.slane %v17669_v51, 5  ;;  %v17671_v5 = vld [vmem:[#allocation65_spill] sm:$0xff] }
 0x1f5   :  { %v1311_v49 = vsel %vm12075_vm4, %v9854_v19, %v1310_v55  ;;  %v1319_v24 = vrot.slane %v1317_v41, 4  ;;  %v1324_v19 = vrot.slane %v12986_v58, 5  ;;  %v1327_v39 = vrot.slane %v17671_v5, 5  ;;  %v17673_v5 = vld [vmem:[#allocation72_spill] sm:$0xff] }
 0x1f6   :  { %v1314_v34 = vsel %vm12075_vm4, %v1312_v45, %v1313_v36  ;;  %v1318_v9 = vsel %vm12075_vm4, %v9855_v43, %v1317_v41  ;;  %v17670_v36 = vld [vmem:[#allocation61_spill] sm:$0xff]  ;;  %v1331_v43 = vrot.slane %v13025_v30, 5 }
 0x1f7   :  { %v13623_v7 = vcombine.low %v1311_v49, %v1314_v34  ;;  %v1321_v55 = vsel %vm12075_vm4, %v1319_v24, %v1320_v37  ;;  %v9856_v49 = vrot.slane %v17670_v36, 9  ;;  %v1326_v34 = vrot.slane %v1324_v19, 4 }
 0x1f8   :  { %v13634_v45 = vcombine.low %v1318_v9, %v1321_v55  ;;  %v9857_v24 = vrot.slane %v13020_v59, 9  ;;  %v1333_v37 = vrot.slane %v1331_v43, 4  ;;  %v17672_v9 = vld [vmem:[#allocation69_spill] sm:$0xff] }
 0x1f9   :  { %3000 = vmatmul.mubr.bf16.gmra.mrb[92].mxu0 %v13590_v15  ;;  %v1325_v51 = vsel %vm12075_vm4, %v9856_v49, %v1324_v19  ;;  %v1328_v41 = vsel %vm12075_vm4, %v1326_v34, %v1327_v39  ;;  %v1334_v55 = vrot.slane %v17672_v9, 5  ;;  %v1338_v49 = vrot.slane %v13057_v13, 5  ;;  %v13670_v13 = vld [vmem:[%s17262_s0 + $0x198] sm:$0xf] }
 0x1fa   :  { %3007 = vmatprep.mubr.bf16.mxu0 %v17662_v57  ;;  %v13645_v58 = vcombine.low %v1325_v51, %v1328_v41  ;;  %v1332_v36 = vsel %vm12075_vm4, %v9857_v24, %v1331_v43  ;;  %v9858_v34 = vrot.slane %v13052_v6, 9  ;;  %v1341_v39 = vrot.slane %v17673_v5, 5  ;;  %v13675_v6 = vld [vmem:[%s17262_s0 + $0x19c] sm:$0xf] }
 0x1fb   :  { %v1335_v19 = vsel %vm12075_vm4, %v1333_v37, %v1334_v55  ;;  %v1340_v59 = vrot.slane %v1338_v49, 4  ;;  %v1345_v43 = vrot.slane %v13089_v16, 5  ;;  %v13681_v37 = vcombine.low %v13670_v13, %v13675_v6  ;;  %v11632_v5 = vld [vmem:[%s17261_s1 + $0x198] sm:$0xff]  }
 0x1fc   :  { %v13656_v30 = vcombine.low %v1332_v36, %v1335_v19  ;;  %v1339_v51 = vsel %vm12075_vm4, %v9858_v34, %v1338_v49  ;;  %v9859_v9 = vrot.slane %v13084_v56, 9  ;;  %v1348_v16 = vrot.slane %v13111_v11, 5  ;;  %v11629_v11 = vld [vmem:[%s17261_s1 + $0x180] sm:$0xff]   ;;  %v17675_v56 = vld [vmem:[#allocation4_spill] sm:$0xff]  ;;  %v11630_v34 = vld [vmem:[%s17261_s1 + $0x188] sm:$0xff]  }
 0x1fd   :  { %v1342_v41 = vsel %vm12075_vm4, %v1340_v59, %v1341_v39  ;;  %17674 = vst [vmem:[#allocation36_spill] sm:$0xff] %v13681_v37  ;;  %v1347_v55 = vrot.slane %v1345_v43, 4  ;;  %v17676_v59 = vld [vmem:[#allocation5_spill] sm:$0xff] }
 0x1fe   :  { %v13677_v24 = vcombine.low %v1339_v51, %v1342_v41  ;;  %v1346_v36 = vsel %vm12075_vm4, %v9859_v9, %v1345_v43  ;;  %v11633_v39 = vld [vmem:[%s17261_s1 + $0x1a0] sm:$0xff]   ;;  %v17677_v51 = vld [vmem:[#allocation6_spill] sm:$0xff]  ;;  %v11635_v43 = vld [vmem:[%s17261_s1 + $0x1b0] sm:$0xff]  }
 0x1ff   :  { %v1349_v19 = vsel %vm12075_vm4, %v1347_v55, %v1348_v16  ;;  %v11634_v41 = vld [vmem:[%s17261_s1 + $0x1a8] sm:$0xff]   ;;  %v17678_v9 = vld [vmem:[#allocation7_spill] sm:$0xff]  ;;  %v11636_v55 = vld [vmem:[%s17261_s1 + $0x1b8] sm:$0xff]  }
 0x200   :  { %v13691_v49 = vcombine.low %v1346_v36, %v1349_v19  ;;  %v11637_v16 = vld [vmem:[%s17261_s1 + $0x1c0] sm:$0xff]   ;;  %v11638_v19 = vld [vmem:[%s17261_s1 + $0x1c8] sm:$0xff]  }
 0x201   :  { %3008 = vmatmul.mubr.bf16.gmra.mrb[96].mxu0 %v13601_v62  ;;  %v17679_v36 = vld [vmem:[#allocation9_spill] sm:$0xff] }
 0x202   :  { %3015 = vmatprep.mubr.bf16.mxu0 %v13040_v60  ;;  %v1413_v60 = vrot.slane %v13675_v6, 5 }
 0x209   :  { %3016 = vmatmul.mubr.bf16.gmra.mrb[100].mxu0 %v13612_v61 }
 0x20a   :  { %3023 = vmatprep.mubr.bf16.mxu0 %v13072_v32  ;;  %v1378_v32 = vshll.u32 %v13670_v13, 16 }
 0x20c   :  { %v1380_v57 = vrot.slane %v1378_v32, 5 }
 0x211   :  { %3024 = vmatmul.mubr.bf16.gmra.mrb[104].mxu0 %v13623_v7 }
 0x212   :  { %3031 = vmatprep.mubr.bf16.mxu0 %v13104_v46  ;;  %v1375_v46 = vshrl.u32 %v13670_v13, 16 }
 0x219   :  { %3032 = vmatmul.mubr.bf16.gmra.mrb[108].mxu0 %v13634_v45 }
 0x21a   :  { %3039 = vmatprep.mubr.bf16.mxu0 %v13122_v17  ;;  %v13887_v17 = vld [vmem:[%s17261_s1 + $0x238] sm:$0xff]  }
 0x221   :  { %3040 = vmatmul.mubr.bf16.gmra.mrb[112].mxu0 %v13645_v58 }
 0x222   :  { %3047 = vmatprep.mubr.bf16.mxu0 %v13139_v10  ;;  %v11644_v10 = vld [vmem:[%s17261_s1 + $0x1f8] sm:$0xff]  }
 0x229   :  { %3048 = vmatmul.mubr.bf16.gmra.mrb[116].mxu0 %v13656_v30 }
 0x22a   :  { %3055 = vmatprep.mubr.bf16.mxu0 %v13152_v63 }
 0x231   :  { %3056 = vmatmul.mubr.bf16.gmra.mrb[120].mxu0 %v13677_v24 }
 0x232   :  { %3063 = vmatprep.mubr.bf16.mxu0 %v13681_v37 }
 0x239   :  { %3064 = vmatmul.mubr.bf16.gmra.mrb[124].mxu0 %v13691_v49 }
 0x23a   :  { %3104 = vmatprep.mubr.bf16.mxu0 %v13183_v1  ;;  %v11631_v1 = vld [vmem:[%s17261_s1 + $0x190] sm:$0xff]  }
 0x241   :  { %3105 = vmatmul.mubr.bf16.vlgmr.msra.gmra.mrb[0].mxu0 %v17675_v56 }
 0x242   :  { %3362 = vmatpush1.bf16.msra.mxu0 %v11629_v11  ;;  %3112 = vmatprep.mubr.bf16.mxu0 %v13208_v2  ;;  %v11639_v11 = vld [vmem:[%s17261_s1 + $0x1d0] sm:$0xff]  }
 0x243   :  { %3363 = vmatprep.subr.bf16.mxu0 %v17638_v28 }
 0x246   :  { %3364 = vmatpush1.bf16.msra.mxu0 %v11630_v34  ;;  %v17680_v34 = vld [vmem:[#allocation11_spill] sm:$0xff] }
 0x247   :  { %3365 = vmatprep.subr.bf16.mxu0 %v17638_v28 }
 0x249   :  { %3113 = vmatmul.mubr.bf16.gmra.mrb[4].mxu0 %v17676_v59 }
 0x24a   :  { %3120 = vmatprep.mubr.bf16.mxu0 %v13233_v35  ;;  %3366 = vmatpush1.bf16.msra.mxu0 %v11631_v1  ;;  %v17681_v1 = vld [vmem:[#allocation13_spill] sm:$0xff] }
 0x24b   :  { %3367 = vmatprep.subr.bf16.mxu0 %v17638_v28 }
 0x24e   :  { %3368 = vmatpush1.bf16.msra.mxu0 %v11632_v5  ;;  %v11640_v5 = vld [vmem:[%s17261_s1 + $0x1d8] sm:$0xff]  }
 0x24f   :  { %3369 = vmatprep.subr.bf16.mxu0 %v17638_v28 }
 0x251   :  { %3121 = vmatmul.mubr.bf16.gmra.mrb[8].mxu0 %v17677_v51 }
 0x252   :  { %3128 = vmatprep.mubr.bf16.mxu0 %v13258_v47  ;;  %3370 = vmatpush1.bf16.msra.mxu0 %v11633_v39  ;;  %v17682_v39 = vld [vmem:[#allocation15_spill] sm:$0xff]  ;;  %v9860_v47 = vrot.slane %v13447_v3, 9 }
 0x253   :  { %3371 = vmatprep.subr.bf16.mxu0 %v17638_v28 }
 0x256   :  { %3372 = vmatpush1.bf16.msra.mxu0 %v11634_v41  ;;  %v17683_v41 = vld [vmem:[#allocation17_spill] sm:$0xff] }
 0x257   :  { %3373 = vmatprep.subr.bf16.mxu0 %v17638_v28 }
 0x259   :  { %3129 = vmatmul.mubr.bf16.gmra.mrb[12].mxu0 %v17678_v9 }
 0x25a   :  { %3136 = vmatprep.mubr.bf16.mxu0 %v13283_v38  ;;  %3374 = vmatpush1.bf16.msra.mxu0 %v11635_v43  ;;  %v11641_v43 = vld [vmem:[%s17261_s1 + $0x1e0] sm:$0xff]  }
 0x25b   :  { %3375 = vmatprep.subr.bf16.mxu0 %v17638_v28 }
 0x25e   :  { %3376 = vmatpush1.bf16.msra.mxu0 %v11636_v55  ;;  %v17684_v55 = vld [vmem:[#allocation19_spill] sm:$0xff] }
 0x25f   :  { %3377 = vmatprep.subr.bf16.mxu0 %v17638_v28 }
 0x261   :  { %3137 = vmatmul.mubr.bf16.gmra.mrb[16].mxu0 %v17679_v36 }
 0x262   :  { %3144 = vmatprep.mubr.bf16.mxu0 %v13305_v52  ;;  %3378 = vmatpush1.bf16.msra.mxu0 %v11637_v16  ;;  %v17685_v16 = vld [vmem:[#allocation21_spill] sm:$0xff] }
 0x263   :  { %3379 = vmatprep.subr.bf16.mxu0 %v17638_v28 }
 0x266   :  { %3380 = vmatpush1.bf16.msra.mxu0 %v11638_v19  ;;  %v11642_v19 = vld [vmem:[%s17261_s1 + $0x1e8] sm:$0xff]  }
 0x267   :  { %3381 = vmatprep.subr.bf16.mxu0 %v17638_v28 }
 0x269   :  { %3145 = vmatmul.mubr.bf16.gmra.mrb[20].mxu0 %v17680_v34 }
 0x26a   :  { %3152 = vmatprep.mubr.bf16.mxu0 %v13326_v22  ;;  %3382 = vmatpush1.bf16.msra.mxu0 %v11639_v11  ;;  %v17686_v11 = vld [vmem:[#allocation23_spill] sm:$0xff] }
 0x26b   :  { %3383 = vmatprep.subr.bf16.mxu0 %v17638_v28 }
 0x26e   :  { %3384 = vmatpush1.bf16.msra.mxu0 %v11640_v5  ;;  %v17687_v5 = vld [vmem:[#allocation25_spill] sm:$0xff] }
 0x26f   :  { %3385 = vmatprep.subr.bf16.mxu0 %v17638_v28 }
 0x271   :  { %3153 = vmatmul.mubr.bf16.gmra.mrb[24].mxu0 %v17681_v1 }
 0x272   :  { %3160 = vmatprep.mubr.bf16.mxu0 %v13343_v26  ;;  %3386 = vmatpush1.bf16.msra.mxu0 %v11641_v43  ;;  %v11643_v43 = vld [vmem:[%s17261_s1 + $0x1f0] sm:$0xff]  }
 0x273   :  { %3387 = vmatprep.subr.bf16.mxu0 %v17638_v28 }
 0x276   :  { %3388 = vmatpush1.bf16.msra.mxu0 %v11642_v19  ;;  %v1360_v19 = vshll.u32 %v13452_v23, 16 }
 0x277   :  { %3389 = vmatprep.subr.bf16.mxu0 %v17638_v28 }
 0x278   :  { %v1362_v52 = vrot.slane %v1360_v19, 5 }
 0x279   :  { %3161 = vmatmul.mubr.bf16.gmra.mrb[28].mxu0 %v17682_v39 }
 0x27a   :  { %3168 = vmatprep.mubr.bf16.mxu0 %v13364_v25  ;;  %v1364_v25 = vshrl.u32 %v13452_v23, 16  ;;  %3390 = vmatpush1.bf16.msra.mxu0 %v11643_v43 }
 0x27b   :  { %3391 = vmatprep.subr.bf16.mxu0 %v17638_v28  ;;  %v17689_v28 = vld [vmem:[#allocation29_spill] sm:$0xff] }
 0x27c   :  { %v1366_v38 = vrot.slane %v1364_v25, 4 }
 0x27e   :  { %v1367_v43 = vor.u32 %v1366_v38, %v1362_v52  ;;  %3392 = vmatpush1.bf16.msra.mxu0 %v11644_v10  ;;  %v17692_v10 = vld [vmem:[#allocation32_spill] sm:$0xff] }
 0x280   :  { %v1368_v19 = vrot.slane %v1367_v43, 4  ;;  %v13846_v43 = vld [vmem:[%s17261_s1 + $0x210] sm:$0xff]  }
 0x281   :  { %3169 = vmatmul.mubr.bf16.gmra.mrb[32].mxu0 %v17683_v41 }
 0x282   :  { %3176 = vmatprep.mubr.bf16.mxu0 %v13381_v54  ;;  %v1354_v54 = vshll.u32 %v13447_v3, 16 }
 0x284   :  { %v1356_v22 = vrot.slane %v1354_v54, 5 }
 0x289   :  { %3177 = vmatmul.mubr.bf16.gmra.mrb[36].mxu0 %v17684_v55 }
 0x28a   :  { %3184 = vmatprep.mubr.bf16.mxu0 %v13402_v31  ;;  %v1351_v31 = vshrl.u32 %v13447_v3, 16 }
 0x28c   :  { %v1353_v26 = vrot.slane %v1351_v31, 4 }
 0x291   :  { %3185 = vmatmul.mubr.bf16.gmra.mrb[40].mxu0 %v17685_v16 }
 0x292   :  { %3192 = vmatprep.mubr.bf16.mxu0 %v13419_v40  ;;  %v1406_v40 = vrot.slane %v13452_v23, 5  ;;  %v1357_v23 = vor.u32 %v1356_v22, %v1353_v26  ;;  %v17694_v22 = vld [vmem:[#allocation38_spill] sm:$0xff]  ;;  %v17695_v26 = vld [vmem:[#allocation44_spill] sm:$0xff] }
 0x294   :  { %v1408_v35 = vrot.slane %v1406_v40, 4  ;;  %v1407_v63 = vsel %vm12075_vm4, %v9860_v47, %v1406_v40  ;;  %v1358_v25 = vrot.slane %v1357_v23, 4  ;;  %v13831_v40 = vld [vmem:[%s17261_s1 + $0x208] sm:$0xff]  }
 0x295   :  { %v17699_v23 = vld [vmem:[#allocation62_spill] sm:$0xff] }
 0x296   :  { %v1363_v38 = vsel %vm12086_vm5, %v1358_v25, %v1362_v52  ;;  %v17693_v52 = vld [vmem:[#allocation34_spill] sm:$0xff]  ;;  %v13855_v25 = vld [vmem:[%s17261_s1 + $0x218] sm:$0xff]  }
 0x299   :  { %3193 = vmatmul.mubr.bf16.gmra.mrb[44].mxu0 %v17686_v11 }
 0x29a   :  { %3200 = vmatprep.mubr.bf16.mxu0 %v13437_v0  ;;  %v198_v0 = vld [vmem:[%s17262_s0 + $0xc8] sm:$0x1] }
 0x29b   :  { %v1409_v2 = vrot.slane %v198_v0, 5  ;;  %v1370_v37 = vshll.u32 %v198_v0, 16  ;;  %v17696_v0 = vld [vmem:[#allocation49_spill] sm:$0xff] }
 0x29d   :  { %v1410_v31 = vsel %vm12075_vm4, %v1408_v35, %v1409_v2  ;;  %v1372_v3 = vrot.slane %v1370_v37, 5  ;;  %v17691_v2 = vld [vmem:[#allocation31_spill] sm:$0xff]  ;;  %v13815_v35 = vld [vmem:[%s17261_s1 + $0x200] sm:$0xff]   ;;  %v17698_v37 = vld [vmem:[#allocation56_spill] sm:$0xff] }
 0x29e   :  { %v13796_v54 = vcombine.low %v1407_v63, %v1410_v31  ;;  %10522 = vmatprep.subr.bf16.mxu0 %v13815_v35  ;;  %10762 = vmatprep.subr.bf16.mxu1 %v13815_v35  ;;  %v17700_v31 = vld [vmem:[#allocation66_spill] sm:$0xff] }
 0x29f   :  { %v1373_v47 = vsel %vm12086_vm5, %v1368_v19, %v1372_v3  ;;  %10770 = vmatpush3.bf16.msra.mxu1 %v13815_v35  ;;  %v13861_v19 = vld [vmem:[%s17261_s1 + $0x220] sm:$0xff]   ;;  %v17701_v3 = vld [vmem:[#allocation68_spill] sm:$0xff] }
 0x2a0   :  { %v13807_v63 = vcombine.low %v1363_v38, %v1373_v47  ;;  %10763 = vmatprep.subr.bf16.mxu1 %v13831_v40  ;;  %v13871_v38 = vld [vmem:[%s17261_s1 + $0x228] sm:$0xff]   ;;  %v13877_v47 = vld [vmem:[%s17261_s1 + $0x230] sm:$0xff]  }
 0x2a1   :  { %3201 = vmatmul.mubr.bf16.gmra.mrb[48].mxu0 %v17687_v5 }
 0x2a2   :  { %3208 = vmatprep.mubr.bf16.mxu0 %v13145_v44  ;;  %v17688_v44 = vld [vmem:[#allocation27_spill] sm:$0xff]  ;;  %17690 = vst [vmem:[#allocation35_spill] sm:$0xff] %v13807_v63 }
 0x2a3   :  { %10771 = vmatpush3.bf16.msra.mxu1 %v13831_v40 }
 0x2a4   :  { %10764 = vmatprep.subr.bf16.mxu1 %v13846_v43 }
 0x2a7   :  { %10772 = vmatpush3.bf16.msra.mxu1 %v13846_v43 }
 0x2a8   :  { %10765 = vmatprep.subr.bf16.mxu1 %v13855_v25 }
 0x2a9   :  { %3209 = vmatmul.mubr.bf16.gmra.mrb[52].mxu0 %v17688_v44 }
 0x2aa   :  { %3216 = vmatprep.mubr.bf16.mxu0 %v13477_v29 }
 0x2ab   :  { %10773 = vmatpush3.bf16.msra.mxu1 %v13855_v25 }
 0x2ac   :  { %10766 = vmatprep.subr.bf16.mxu1 %v13861_v19 }
 0x2af   :  { %10774 = vmatpush3.bf16.msra.mxu1 %v13861_v19 }
 0x2b0   :  { %10767 = vmatprep.subr.bf16.mxu1 %v13871_v38 }
 0x2b1   :  { %3217 = vmatmul.mubr.bf16.gmra.mrb[56].mxu0 %v17689_v28 }
 0x2b2   :  { %3224 = vmatprep.mubr.bf16.mxu0 %v13796_v54 }
 0x2b3   :  { %10775 = vmatpush3.bf16.msra.mxu1 %v13871_v38 }
 0x2b4   :  { %10768 = vmatprep.subr.bf16.mxu1 %v13877_v47 }
 0x2b7   :  { %10776 = vmatpush3.bf16.msra.mxu1 %v13877_v47 }
 0x2b8   :  { %10769 = vmatprep.subr.bf16.mxu1 %v13887_v17 }
 0x2b9   :  { %3225 = vmatmul.mubr.bf16.gmra.mrb[60].mxu0 %v13807_v63 }
 0x2ba   :  { %3232 = vmatprep.mubr.bf16.mxu0 %v13508_v18  ;;  %v17697_v18 = vld [vmem:[#allocation54_spill] sm:$0xff] }
 0x2bb   :  { %10777 = vmatpush3.bf16.msra.mxu1 %v13887_v17 }
 0x2be   :  { %10563 = vmatmul.mubr.bf16.vlgmr.msra.gmra.mrb[0].mxu1 %v13477_v29  ;;  %v252_v29 = vld [vmem:[%s17262_s0 + $0x1a0] sm:$0x1] }
 0x2bf   :  { %10566 = vmatprep.mubr.bf16.mxu1 %v13796_v54 }
 0x2c1   :  { %3233 = vmatmul.mubr.bf16.gmra.mrb[64].mxu0 %v17691_v2  ;;  %v17702_v2 = vld [vmem:[#allocation71_spill] sm:$0xff] }
 0x2c2   :  { %3240 = vmatprep.mubr.bf16.mxu0 %v13525_v12 }
 0x2c9   :  { %3241 = vmatmul.mubr.bf16.gmra.mrb[68].mxu0 %v17692_v10 }
 0x2ca   :  { %3248 = vmatprep.mubr.bf16.mxu0 %v13542_v4 }
 0x2d1   :  { %3249 = vmatmul.mubr.bf16.gmra.mrb[72].mxu0 %v17693_v52  ;;  %v1394_v52 = vshll.u32 %v252_v29, 16 }
 0x2d2   :  { %3256 = vmatprep.mubr.bf16.mxu0 %v13555_v50 }
 0x2d9   :  { %3257 = vmatmul.mubr.bf16.gmra.mrb[76].mxu0 %v17694_v22 }
 0x2da   :  { %3264 = vmatprep.mubr.bf16.mxu0 %v13568_v8 }
 0x2e1   :  { %3265 = vmatmul.mubr.bf16.gmra.mrb[80].mxu0 %v17695_v26  ;;  %v1416_v26 = vrot.slane %v252_v29, 5 }
 0x2e2   :  { %3272 = vmatprep.mubr.bf16.mxu0 %v13579_v48 }
 0x2e9   :  { %3273 = vmatmul.mubr.bf16.gmra.mrb[84].mxu0 %v17696_v0  ;;  %v1415_v0 = vrot.slane %v1413_v60, 4 }
 0x2ea   :  { %3280 = vmatprep.mubr.bf16.mxu0 %v13590_v15 }
 0x2f1   :  { %3281 = vmatmul.mubr.bf16.gmra.mrb[88].mxu0 %v17697_v18  ;;  %v9861_v18 = vrot.slane %v13670_v13, 9  ;;  %v1417_v13 = vsel %vm12075_vm4, %v1415_v0, %v1416_v26 }
 0x2f2   :  { %3288 = vmatprep.mubr.bf16.mxu0 %v13601_v62 }
 0x2f3   :  { %v1414_v32 = vsel %vm12075_vm4, %v9861_v18, %v1413_v60 }
 0x2f4   :  { %v13932_v63 = vcombine.low %v1414_v32, %v1417_v13 }
 0x2f9   :  { %3289 = vmatmul.mubr.bf16.gmra.mrb[92].mxu0 %v17698_v37 }
 0x2fa   :  { %3296 = vmatprep.mubr.bf16.mxu0 %v13612_v61 }
 0x301   :  { %3297 = vmatmul.mubr.bf16.gmra.mrb[96].mxu0 %v17699_v23 }
 0x302   :  { %3304 = vmatprep.mubr.bf16.mxu0 %v13623_v7 }
 0x309   :  { %3305 = vmatmul.mubr.bf16.gmra.mrb[100].mxu0 %v17700_v31  ;;  %v1377_v31 = vrot.slane %v1375_v46, 4  ;;  %v13918_v46 = vld [vmem:[%s17262_s0 + $0xcc] sm:$0xf] }
 0x30a   :  { %3312 = vmatprep.mubr.bf16.mxu0 %v13634_v45  ;;  %v1419_v10 = vshrl.u32 %v13918_v46, 16  ;;  %v1422_v56 = vshll.u32 %v13918_v46, 16 }
 0x30b   :  { %v1381_v22 = vor.u32 %v1380_v57, %v1377_v31  ;;  %v201_v57 = vld [vmem:[%s17262_s0 + $0xd4] sm:$0x1] }
 0x30c   :  { %v1477_v31 = vrot.slane %v201_v57, 5 }
 0x311   :  { %3313 = vmatmul.mubr.bf16.gmra.mrb[104].mxu0 %v17701_v3  ;;  %v1388_v3 = vshrl.u32 %v13675_v6, 16 }
 0x312   :  { %3320 = vmatprep.mubr.bf16.mxu0 %v13645_v58 }
 0x313   :  { %v1390_v37 = vrot.slane %v1388_v3, 4  ;;  %v1382_v3 = vrot.slane %v1381_v22, 4  ;;  %v1421_v22 = vrot.slane %v1419_v10, 4 }
 0x319   :  { %3321 = vmatmul.mubr.bf16.gmra.mrb[108].mxu0 %v17702_v2  ;;  %v1384_v2 = vshll.u32 %v13675_v6, 16 }
 0x31a   :  { %3328 = vmatprep.mubr.bf16.mxu0 %v13656_v30 }
 0x31b   :  { %v1386_v23 = vrot.slane %v1384_v2, 5  ;;  %v9862_v2 = vrot.slane %v13918_v46, 9 }
 0x31d   :  { %v1391_v54 = vor.u32 %v1390_v37, %v1386_v23  ;;  %v1387_v32 = vsel %vm12086_vm5, %v1382_v3, %v1386_v23 }
 0x31f   :  { %v1392_v29 = vrot.slane %v1391_v54, 4  ;;  %v1424_v54 = vrot.slane %v1422_v56, 5 }
 0x321   :  { %3329 = vmatmul.mubr.bf16.gmra.mrb[112].mxu0 %v13106_v33  ;;  %v13908_v33 = vld [vmem:[%s17262_s0 + $0xd0] sm:$0xf] }
 0x322   :  { %3336 = vmatprep.mubr.bf16.mxu0 %v13677_v24  ;;  %v1474_v6 = vrot.slane %v13908_v33, 5  ;;  %v1428_v0 = vshll.u32 %v13908_v33, 16  ;;  %v1432_v28 = vshrl.u32 %v13908_v33, 16  ;;  %v9966_v56 = vcombine.low %v13918_v46, %v13908_v33  ;;  %v17729_v33 = vld [vmem:[#allocation52_spill] sm:$0xff]  ;;  %v17730_v46 = vld [vmem:[#allocation54_spill] sm:$0xff] }
 0x324   :  { %v1476_v37 = vrot.slane %v1474_v6, 4  ;;  %v1475_v60 = vsel %vm12075_vm4, %v9862_v2, %v1474_v6  ;;  %v1434_v44 = vrot.slane %v1432_v28, 4  ;;  %v1425_v6 = vor.u32 %v1424_v54, %v1421_v22 }
 0x325   :  { %v1438_v2 = vshll.u32 %v201_v57, 16 }
 0x326   :  { %v1478_v18 = vsel %vm12075_vm4, %v1476_v37, %v1477_v31  ;;  %v1426_v10 = vrot.slane %v1425_v6, 4 }
 0x327   :  { %v9970_v26 = vcombine.low %v1475_v60, %v1478_v18  ;;  %v1440_v28 = vrot.slane %v1438_v2, 5 }
 0x329   :  { %3337 = vmatmul.mubr.bf16.gmra.mrb[116].mxu0 %v13124_v53  ;;  %v1396_v53 = vrot.slane %v1394_v52, 5  ;;  %10567 = vmatmul.mubr.bf16.gmra.mrb[4].mxu1 %v9970_v26  ;;  %v1430_v52 = vrot.slane %v1428_v0, 5 }
 0x32a   :  { %3344 = vmatprep.mubr.bf16.mxu0 %v13691_v49  ;;  %10570 = vmatprep.mubr.bf16.mxu1 %v13525_v12 }
 0x32b   :  { %v1397_v13 = vsel %vm12086_vm5, %v1392_v29, %v1396_v53  ;;  %v1435_v37 = vor.u32 %v1434_v44, %v1430_v52  ;;  %v1431_v12 = vsel %vm12086_vm5, %v1426_v10, %v1430_v52  ;;  %v17705_v53 = vld [vmem:[#allocation12_spill] sm:$0xff]  ;;  %v14021_v44 = vld [vmem:[%s17262_s0 + $0x1a4] sm:$0xf]  ;;  %v17718_v52 = vld [vmem:[#allocation91_spill] sm:$0xff] }
 0x32c   :  { %v13945_v60 = vcombine.low %v1387_v32, %v1397_v13  ;;  %v17719_v32 = vld [vmem:[#allocation4_spill] sm:$0xff] }
 0x32d   :  { %v1436_v31 = vrot.slane %v1435_v37, 4 }
 0x32f   :  { %v1441_v57 = vsel %vm12086_vm5, %v1436_v31, %v1440_v28 }
 0x330   :  { %v13951_v18 = vcombine.low %v1431_v12, %v1441_v57 }
 0x331   :  { %3345 = vmatmul.mubr.bf16.gmra.mrb[120].mxu0 %v13141_v20  ;;  %10571 = vmatmul.mubr.bf16.gmra.mrb[8].mxu1 %v13542_v4  ;;  %v17706_v4 = vld [vmem:[#allocation14_spill] sm:$0xff] }
 0x332   :  { %3352 = vmatprep.mubr.bf16.mxu0 %v13932_v63  ;;  %10574 = vmatprep.mubr.bf16.mxu1 %v13555_v50  ;;  %v17707_v50 = vld [vmem:[#allocation16_spill] sm:$0xff] }
 0x339   :  { %3353 = vmatmul.mubr.bf16.gmra.mrb[124].mxu0 %v13945_v60  ;;  %10575 = vmatmul.mubr.bf16.gmra.mrb[12].mxu1 %v13568_v8  ;;  %v17709_v8 = vld [vmem:[#allocation20_spill] sm:$0xff] }
 0x33a   :  { %3393 = vmatprep.mubr.bf16.mxu0 %v17676_v59  ;;  %10578 = vmatprep.mubr.bf16.mxu1 %v13579_v48  ;;  %v17710_v48 = vld [vmem:[#allocation22_spill] sm:$0xff] }
 0x341   :  { %3394 = vmatmul.mubr.bf16.vlgmr.msra.gmra.mrb[0].mxu0 %v12265_v14  ;;  %10579 = vmatmul.mubr.bf16.gmra.mrb[16].mxu1 %v13590_v15  ;;  %v17703_v14 = vld [vmem:[#allocation8_spill] sm:$0xff] }
 0x342   :  { %10523 = vmatpush3.bf16.msra.mxu0 %v13815_v35  ;;  %3401 = vmatprep.mubr.bf16.mxu0 %v17677_v51  ;;  %v17711_v15 = vld [vmem:[#allocation24_spill] sm:$0xff]  ;;  %v9863_v35 = vrot.slane %v14021_v44, 9 }
 0x343   :  { %10524 = vmatprep.subr.bf16.mxu0 %v13831_v40  ;;  %10582 = vmatprep.mubr.bf16.mxu1 %v13601_v62  ;;  %v17712_v62 = vld [vmem:[#allocation26_spill] sm:$0xff] }
 0x346   :  { %10525 = vmatpush3.bf16.msra.mxu0 %v13831_v40 }
 0x347   :  { %10526 = vmatprep.subr.bf16.mxu0 %v13846_v43 }
 0x349   :  { %3402 = vmatmul.mubr.bf16.gmra.mrb[4].mxu0 %v12297_v42  ;;  %10583 = vmatmul.mubr.bf16.gmra.mrb[20].mxu1 %v13612_v61  ;;  %v17704_v42 = vld [vmem:[#allocation10_spill] sm:$0xff]  ;;  %v17713_v61 = vld [vmem:[#allocation27_spill] sm:$0xff] }
 0x34a   :  { %3409 = vmatprep.mubr.bf16.mxu0 %v17678_v9  ;;  %10527 = vmatpush3.bf16.msra.mxu0 %v13846_v43 }
 0x34b   :  { %10528 = vmatprep.subr.bf16.mxu0 %v13855_v25  ;;  %10586 = vmatprep.mubr.bf16.mxu1 %v13623_v7  ;;  %v17714_v7 = vld [vmem:[#allocation28_spill] sm:$0xff] }
 0x34e   :  { %10529 = vmatpush3.bf16.msra.mxu0 %v13855_v25 }
 0x34f   :  { %10530 = vmatprep.subr.bf16.mxu0 %v13861_v19 }
 0x351   :  { %3410 = vmatmul.mubr.bf16.gmra.mrb[8].mxu0 %v17703_v14  ;;  %10587 = vmatmul.mubr.bf16.gmra.mrb[24].mxu1 %v13634_v45  ;;  %v17715_v45 = vld [vmem:[#allocation29_spill] sm:$0xff]  ;;  %v11662_v14 = vld [vmem:[%s17263_s7 + $0x38] sm:$0xff]  }
 0x352   :  { %3417 = vmatprep.mubr.bf16.mxu0 %v17679_v36  ;;  %10531 = vmatpush3.bf16.msra.mxu0 %v13861_v19  ;;  %v1443_v19 = vshrl.u32 %v14021_v44, 16 }
 0x353   :  { %10532 = vmatprep.subr.bf16.mxu0 %v13871_v38  ;;  %10590 = vmatprep.mubr.bf16.mxu1 %v13645_v58  ;;  %v14013_v58 = vld [vmem:[%s17262_s0 + $0x1a8] sm:$0xf] }
 0x354   :  { %v1452_v3 = vshll.u32 %v14013_v58, 16  ;;  %v1456_v29 = vshrl.u32 %v14013_v58, 16  ;;  %v1445_v26 = vrot.slane %v1443_v19, 4  ;;  %v17736_v19 = vld [vmem:[#allocation66_spill] sm:$0xff] }
 0x356   :  { %10533 = vmatpush3.bf16.msra.mxu0 %v13871_v38  ;;  %v1446_v38 = vshll.u32 %v14021_v44, 16  ;;  %v1454_v22 = vrot.slane %v1452_v3, 5  ;;  %v1458_v54 = vrot.slane %v1456_v29, 4 }
 0x357   :  { %10534 = vmatprep.subr.bf16.mxu0 %v13877_v47 }
 0x358   :  { %v1448_v0 = vrot.slane %v1446_v38, 5  ;;  %v1459_v13 = vor.u32 %v1458_v54, %v1454_v22  ;;  %v17737_v38 = vld [vmem:[#allocation67_spill] sm:$0xff]  ;;  %v17739_v54 = vld [vmem:[#allocation70_spill] sm:$0xff] }
 0x359   :  { %3418 = vmatmul.mubr.bf16.gmra.mrb[12].mxu0 %v17704_v42  ;;  %10591 = vmatmul.mubr.bf16.gmra.mrb[28].mxu1 %v13656_v30  ;;  %v17716_v30 = vld [vmem:[#allocation30_spill] sm:$0xff]  ;;  %v17721_v42 = vld [vmem:[#allocation33_spill] sm:$0xff] }
 0x35a   :  { %3425 = vmatprep.mubr.bf16.mxu0 %v17680_v34  ;;  %10535 = vmatpush3.bf16.msra.mxu0 %v13877_v47  ;;  %v1449_v6 = vor.u32 %v1448_v0, %v1445_v26  ;;  %v1460_v28 = vrot.slane %v1459_v13, 4 }
 0x35b   :  { %10536 = vmatprep.subr.bf16.mxu0 %v13887_v17  ;;  %10594 = vmatprep.mubr.bf16.mxu1 %v13677_v24  ;;  %v1481_v24 = vrot.slane %v14013_v58, 5 }
 0x35c   :  { %v1450_v37 = vrot.slane %v1449_v6, 4  ;;  %v17741_v6 = vld [vmem:[#allocation73_spill] sm:$0xff] }
 0x35d   :  { %v1483_v40 = vrot.slane %v1481_v24, 4  ;;  %v1482_v43 = vsel %vm12075_vm4, %v9863_v35, %v1481_v24  ;;  %v17733_v24 = vld [vmem:[#allocation60_spill] sm:$0xff] }
 0x35e   :  { %10537 = vmatpush3.bf16.msra.mxu0 %v13887_v17  ;;  %v17708_v17 = vld [vmem:[#allocation18_spill] sm:$0xff]  ;;  %v1455_v31 = vsel %vm12086_vm5, %v1450_v37, %v1454_v22  ;;  %v11657_v22 = vld [vmem:[%s17263_s7 + $0x10] sm:$0xff]  }
 0x361   :  { %3426 = vmatmul.mubr.bf16.gmra.mrb[16].mxu0 %v17705_v53  ;;  %10595 = vmatmul.mubr.bf16.gmra.mrb[32].mxu1 %v13691_v49  ;;  %v17717_v49 = vld [vmem:[#allocation35_spill] sm:$0xff]  ;;  %v17722_v53 = vld [vmem:[#allocation34_spill] sm:$0xff] }
 0x362   :  { %3433 = vmatprep.mubr.bf16.mxu0 %v17681_v1  ;;  %10598 = vmatprep.mubr.bf16.mxu1 %v13932_v63  ;;  %v255_v63 = vld [vmem:[%s17262_s0 + $0x1ac] sm:$0x1] }
 0x363   :  { %v1484_v23 = vrot.slane %v255_v63, 5  ;;  %v1462_v2 = vshll.u32 %v255_v63, 16  ;;  %v17734_v63 = vld [vmem:[#allocation62_spill] sm:$0xff] }
 0x365   :  { %v1485_v25 = vsel %vm12075_vm4, %v1483_v40, %v1484_v23  ;;  %v1464_v10 = vrot.slane %v1462_v2, 5  ;;  %v11658_v2 = vld [vmem:[%s17263_s7 + $0x18] sm:$0xff]  }
 0x366   :  { %v9971_v47 = vcombine.low %v1482_v43, %v1485_v25  ;;  %v17735_v25 = vld [vmem:[#allocation64_spill] sm:$0xff] }
 0x367   :  { %v1465_v12 = vsel %vm12086_vm5, %v1460_v28, %v1464_v10 }
 0x368   :  { %v14042_v57 = vcombine.low %v1455_v31, %v1465_v12 }
 0x369   :  { %3434 = vmatmul.mubr.bf16.gmra.mrb[20].mxu0 %v17706_v4  ;;  %10599 = vmatmul.mubr.bf16.gmra.mrb[36].mxu1 %v9971_v47  ;;  %v17723_v4 = vld [vmem:[#allocation37_spill] sm:$0xff]  ;;  %v17738_v47 = vld [vmem:[#allocation68_spill] sm:$0xff] }
 0x36a   :  { %3441 = vmatprep.mubr.bf16.mxu0 %v17682_v39  ;;  %10618 = vmatprep.mubr.bf16.mxu1 %v17719_v32  ;;  %v17742_v32 = vld [vmem:[#allocation74_spill] sm:$0xff] }
 0x371   :  { %3442 = vmatmul.mubr.bf16.gmra.mrb[24].mxu0 %v17707_v50  ;;  %v17724_v50 = vld [vmem:[#allocation38_spill] sm:$0xff] }
 0x372   :  { %3449 = vmatprep.mubr.bf16.mxu0 %v17683_v41 }
 0x379   :  { %3450 = vmatmul.mubr.bf16.gmra.mrb[28].mxu0 %v17708_v17  ;;  %v17725_v17 = vld [vmem:[#allocation42_spill] sm:$0xff] }
 0x37a   :  { %3457 = vmatprep.mubr.bf16.mxu0 %v17684_v55 }
 0x381   :  { %3458 = vmatmul.mubr.bf16.gmra.mrb[32].mxu0 %v17709_v8  ;;  %v17726_v8 = vld [vmem:[#allocation44_spill] sm:$0xff] }
 0x382   :  { %3465 = vmatprep.mubr.bf16.mxu0 %v17685_v16 }
 0x389   :  { %3466 = vmatmul.mubr.bf16.gmra.mrb[36].mxu0 %v17710_v48  ;;  %v17727_v48 = vld [vmem:[#allocation47_spill] sm:$0xff] }
 0x38a   :  { %3473 = vmatprep.mubr.bf16.mxu0 %v17686_v11 }
 0x391   :  { %3474 = vmatmul.mubr.bf16.gmra.mrb[40].mxu0 %v17711_v15  ;;  %v17728_v15 = vld [vmem:[#allocation49_spill] sm:$0xff]  ;;  %v14070_v35 = vpop.f32.mrb[0].mxu1 }
 0x392   :  { %3481 = vmatprep.mubr.bf16.mxu0 %v17687_v5  ;;  %v14072_v40 = vpop.f32.mrb[1].mxu1 }
 0x393   :  { %v14074_v23 = vpop.f32.mrb[2].mxu1 }
 0x394   :  { %v14076_v43 = vpop.f32.mrb[3].mxu1 }
 0x399   :  { %3482 = vmatmul.mubr.bf16.gmra.mrb[44].mxu0 %v17712_v62  ;;  %v17731_v62 = vld [vmem:[#allocation55_spill] sm:$0xff] }
 0x39a   :  { %3489 = vmatprep.mubr.bf16.mxu0 %v17713_v61 }
 0x3a1   :  { %3490 = vmatmul.mubr.bf16.gmra.mrb[48].mxu0 %v17714_v7  ;;  %v17732_v7 = vld [vmem:[#allocation56_spill] sm:$0xff] }
 0x3a2   :  { %3497 = vmatprep.mubr.bf16.mxu0 %v17715_v45 }
 0x3a9   :  { %3498 = vmatmul.mubr.bf16.gmra.mrb[52].mxu0 %v17716_v30  ;;  %v11656_v30 = vld [vmem:[%s17263_s7 + $0x8] sm:$0xff]  }
 0x3aa   :  { %3505 = vmatprep.mubr.bf16.mxu0 %v17717_v49 }
 0x3b1   :  { %3506 = vmatmul.mubr.bf16.gmra.mrb[56].mxu0 %v17718_v52  ;;  %v17740_v52 = vld [vmem:[#allocation71_spill] sm:$0xff] }
 0x3b2   :  { %3513 = vmatprep.mubr.bf16.mxu0 %v13951_v18  ;;  %v17720_v18 = vld [vmem:[#allocation32_spill] sm:$0xff] }
 0x3b9   :  { %3514 = vmatmul.mubr.bf16.gmra.mrb[60].mxu0 %v9966_v56  ;;  %v11655_v56 = vld [vmem:[%s17263_s7] sm:$0xff]  }
 0x3ba   :  { %3521 = vmatprep.mubr.bf16.mxu0 %v17720_v18  ;;  %10602 = vmatprep.subr.bf16.mxu1 %v11655_v56 }
 0x3bb   :  { %10603 = vmatpush3.bf16.msra.mxu1 %v11655_v56 }
 0x3bc   :  { %10604 = vmatprep.subr.bf16.mxu1 %v11656_v30 }
 0x3bf   :  { %10605 = vmatpush3.bf16.msra.mxu1 %v11656_v30  ;;  %v11659_v30 = vld [vmem:[%s17263_s7 + $0x20] sm:$0xff]  }
 0x3c0   :  { %10606 = vmatprep.subr.bf16.mxu1 %v11657_v22 }
 0x3c1   :  { %3522 = vmatmul.mubr.bf16.gmra.mrb[64].mxu0 %v17721_v42 }
 0x3c2   :  { %3529 = vmatprep.mubr.bf16.mxu0 %v17722_v53 }
 0x3c3   :  { %10607 = vmatpush3.bf16.msra.mxu1 %v11657_v22 }
 0x3c4   :  { %10608 = vmatprep.subr.bf16.mxu1 %v11658_v2 }
 0x3c7   :  { %10609 = vmatpush3.bf16.msra.mxu1 %v11658_v2  ;;  %v11660_v2 = vld [vmem:[%s17263_s7 + $0x28] sm:$0xff]  }
 0x3c8   :  { %10610 = vmatprep.subr.bf16.mxu1 %v11659_v30 }
 0x3c9   :  { %3530 = vmatmul.mubr.bf16.gmra.mrb[68].mxu0 %v17723_v4 }
 0x3ca   :  { %3537 = vmatprep.mubr.bf16.mxu0 %v17724_v50 }
 0x3cb   :  { %10611 = vmatpush3.bf16.msra.mxu1 %v11659_v30  ;;  %v17752_v30 = vld [vmem:[#allocation78_spill] sm:$0xff] }
 0x3cc   :  { %10612 = vmatprep.subr.bf16.mxu1 %v11660_v2 }
 0x3cf   :  { %10613 = vmatpush3.bf16.msra.mxu1 %v11660_v2  ;;  %v17755_v2 = vld [vmem:[#allocation36_spill] sm:$0xff] }
 0x3d1   :  { %3538 = vmatmul.mubr.bf16.gmra.mrb[72].mxu0 %v17725_v17  ;;  %v17745_v17 = vld [vmem:[#allocation75_spill] sm:$0xff] }
 0x3d2   :  { %3545 = vmatprep.mubr.bf16.mxu0 %v17726_v8 }
 0x3d9   :  { %3546 = vmatmul.mubr.bf16.gmra.mrb[76].mxu0 %v17727_v48  ;;  %v17746_v48 = vld [vmem:[#allocation76_spill] sm:$0xff] }
 0x3da   :  { %3553 = vmatprep.mubr.bf16.mxu0 %v17728_v15 }
 0x3e1   :  { %3554 = vmatmul.mubr.bf16.gmra.mrb[80].mxu0 %v17729_v33 }
 0x3e2   :  { %3561 = vmatprep.mubr.bf16.mxu0 %v17730_v46 }
 0x3e9   :  { %3562 = vmatmul.mubr.bf16.gmra.mrb[84].mxu0 %v17731_v62 }
 0x3ea   :  { %3569 = vmatprep.mubr.bf16.mxu0 %v17732_v7 }
 0x3f1   :  { %3570 = vmatmul.mubr.bf16.gmra.mrb[88].mxu0 %v17733_v24 }
 0x3f2   :  { %3577 = vmatprep.mubr.bf16.mxu0 %v17734_v63 }
 0x3f9   :  { %3578 = vmatmul.mubr.bf16.gmra.mrb[92].mxu0 %v17735_v25  ;;  %v17749_v25 = vld [vmem:[#allocation77_spill] sm:$0xff] }
 0x3fa   :  { %3585 = vmatprep.mubr.bf16.mxu0 %v17736_v19 }
 0x3fc   :  { %v14082_v3 = vpop.f32.mrb[4].mxu1 }
 0x3fd   :  { %v14084_v29 = vpop.f32.mrb[5].mxu1 }
 0x3fe   :  { %v14086_v26 = vpop.f32.mrb[6].mxu1 }
 0x3ff   :  { %v14088_v0 = vpop.f32.mrb[7].mxu1 }
 0x401   :  { %3586 = vmatmul.mubr.bf16.gmra.mrb[96].mxu0 %v17737_v38 }
 0x402   :  { %3593 = vmatprep.mubr.bf16.mxu0 %v17738_v47 }
 0x404   :  { %v14102_v10 = vpop.f32.mrb[8].mxu1 }
 0x405   :  { %v14106_v31 = vpop.f32.mrb[9].mxu1 }
 0x406   :  { %v14108_v42 = vpop.f32.mrb[10].mxu1 }
 0x407   :  { %v14110_v4 = vpop.f32.mrb[11].mxu1 }
 0x409   :  { %3594 = vmatmul.mubr.bf16.gmra.mrb[100].mxu0 %v17739_v54 }
 0x40a   :  { %3601 = vmatprep.mubr.bf16.mxu0 %v17740_v52 }
 0x40c   :  { %v14125_v54 = vpop.f32.mrb[12].mxu1 }
 0x411   :  { %3602 = vmatmul.mubr.bf16.gmra.mrb[104].mxu0 %v17741_v6 }
 0x412   :  { %3609 = vmatprep.mubr.bf16.mxu0 %v17742_v32 }
 0x414   :  { %v14100_v13 = vpop.f32.mrb[0].mxu0 }
 0x415   :  { %17743 = vst [vmem:[#allocation39_spill] sm:$0xff] %v14100_v13  ;;  %v3397_v37 = vpop.f32.mrb[1].mxu0 }
 0x416   :  { %v14104_v28 = vpop.f32.mrb[2].mxu0  ;;  %v14132_v37 = vpop.f32.mrb[13].mxu1 }
 0x417   :  { %17744 = vst [vmem:[#allocation41_spill] sm:$0xff] %v14104_v28  ;;  %v3400_v12 = vpop.f32.mrb[3].mxu0  ;;  %v17764_v28 = vld [vmem:[#allocation81_spill] sm:$0xff] }
 0x419   :  { %3610 = vmatmul.mubr.bf16.gmra.mrb[108].mxu0 %v17745_v17  ;;  %v14134_v17 = vpop.f32.mrb[14].mxu1 }
 0x41a   :  { %3617 = vmatprep.mubr.bf16.mxu0 %v17746_v48 }
 0x41c   :  { %v14114_v33 = vpop.f32.mrb[4].mxu0 }
 0x41d   :  { %17747 = vst [vmem:[#allocation40_spill] sm:$0xff] %v14114_v33  ;;  %v3405_v56 = vpop.f32.mrb[5].mxu0 }
 0x41e   :  { %v14116_v62 = vpop.f32.mrb[6].mxu0  ;;  %v14136_v56 = vpop.f32.mrb[15].mxu1 }
 0x41f   :  { %17748 = vst [vmem:[#allocation46_spill] sm:$0xff] %v14116_v62  ;;  %v3408_v24 = vpop.f32.mrb[7].mxu0 }
 0x420   :  { %v11661_v24 = vld [vmem:[%s17263_s7 + $0x30] sm:$0xff]  }
 0x421   :  { %3618 = vmatmul.mubr.bf16.gmra.mrb[112].mxu0 %v17749_v25  ;;  %10614 = vmatprep.subr.bf16.mxu1 %v11661_v24 }
 0x422   :  { %3625 = vmatprep.mubr.bf16.mxu0 %v13141_v20  ;;  %10615 = vmatpush3.bf16.msra.mxu1 %v11661_v24 }
 0x423   :  { %10616 = vmatprep.subr.bf16.mxu1 %v11662_v14 }
 0x424   :  { %v14123_v38 = vpop.f32.mrb[8].mxu0 }
 0x425   :  { %17750 = vst [vmem:[#allocation45_spill] sm:$0xff] %v14123_v38  ;;  %v3413_v22 = vpop.f32.mrb[9].mxu0 }
 0x426   :  { %v14127_v6 = vpop.f32.mrb[10].mxu0  ;;  %10617 = vmatpush3.bf16.msra.mxu1 %v11662_v14 }
 0x427   :  { %17751 = vst [vmem:[#allocation43_spill] sm:$0xff] %v14127_v6  ;;  %v3416_v12 = vpop.f32.mrb[11].mxu0 }
 0x429   :  { %3626 = vmatmul.mubr.bf16.gmra.mrb[116].mxu0 %v17752_v30  ;;  %v17756_v30 = vmov 0   ;;  %10619 = vmatmul.mubr.bf16.vlgmr.msra.gmra.mrb[40].mxu1 %v17676_v59 }
 0x42a   :  { %3633 = vmatprep.mubr.bf16.mxu0 %v13945_v60  ;;  %8045 = vmatprep.subr.bf16.mxu1 %v17756_v30 }
 0x42b   :  { %10622 = vmatprep.mubr.bf16.mxu1 %v17677_v51 }
 0x42c   :  { %v14143_v25 = vpop.f32.mrb[12].mxu0 }
 0x42d   :  { %17753 = vst [vmem:[#allocation48_spill] sm:$0xff] %v14143_v25  ;;  %v3421_v22 = vpop.f32.mrb[13].mxu0 }
 0x42e   :  { %v14145_v12 = vpop.f32.mrb[14].mxu0  ;;  %v14156_v22 = vpop.f32.mrb[16].mxu1 }
 0x42f   :  { %17754 = vst [vmem:[#allocation51_spill] sm:$0xff] %v14145_v12  ;;  %v3424_v6 = vpop.f32.mrb[15].mxu0 }
 0x430   :  { %v14161_v6 = vpop.f32.mrb[17].mxu1 }
 0x431   :  { %3634 = vmatmul.mubr.bf16.gmra.mrb[120].mxu0 %v17755_v2  ;;  %v14163_v2 = vpop.f32.mrb[18].mxu1  ;;  %10623 = vmatmul.mubr.bf16.gmra.mrb[44].mxu1 %v17678_v9 }
 0x432   :  { %3641 = vmatprep.mubr.bf16.mxu0 %v14042_v57  ;;  %v14165_v14 = vpop.f32.mrb[19].mxu1  ;;  %v17759_v57 = vcombine.low %v14021_v44, %v14013_v58  ;;  %10626 = vmatprep.mubr.bf16.mxu1 %v17679_v36 }
 0x433   :  { %v14182_v44 = vpop.f32.mrb[20].mxu1 }
 0x434   :  { %v14153_v38 = vpop.f32.mrb[16].mxu0 }
 0x435   :  { %17757 = vst [vmem:[#allocation50_spill] sm:$0xff] %v14153_v38  ;;  %v3429_v24 = vpop.f32.mrb[17].mxu0  ;;  %v17760_v38 = vld [vmem:[#allocation79_spill] sm:$0xff] }
 0x436   :  { %v14159_v12 = vpop.f32.mrb[18].mxu0 }
 0x437   :  { %17758 = vst [vmem:[#allocation53_spill] sm:$0xff] %v14159_v12  ;;  %v3432_v25 = vpop.f32.mrb[19].mxu0  ;;  %v17763_v12 = vld [vmem:[#allocation80_spill] sm:$0xff] }
 0x439   :  { %3642 = vmatmul.mubr.bf16.gmra.mrb[124].mxu0 %v17759_v57  ;;  %10627 = vmatmul.mubr.bf16.gmra.mrb[48].mxu1 %v17680_v34  ;;  %v11663_v34 = vld [vmem:[%s17264_s4] sm:$0xff]  }
 0x43a   :  { %10538 = vmatprep.mubr.bf16.mxu0 %v17760_v38  ;;  %10630 = vmatprep.mubr.bf16.mxu1 %v17681_v1  ;;  %v14187_v38 = vpop.f32.mrb[21].mxu1 }
 0x43b   :  { %v14189_v57 = vpop.f32.mrb[22].mxu1  ;;  %8046 = vmatpush1.bf16.msra.mxu1 %v11663_v34 }
 0x43c   :  { %v14171_v59 = vpop.f32.mrb[20].mxu0  ;;  %8047 = vmatprep.subr.bf16.mxu1 %v17756_v30 }
 0x43d   :  { %17761 = vst [vmem:[#allocation57_spill] sm:$0xff] %v14171_v59  ;;  %v3437_v51 = vpop.f32.mrb[21].mxu0 }
 0x43e   :  { %v14175_v24 = vpop.f32.mrb[22].mxu0  ;;  %v14191_v51 = vpop.f32.mrb[23].mxu1 }
 0x43f   :  { %17762 = vst [vmem:[#allocation59_spill] sm:$0xff] %v14175_v24  ;;  %v3440_v25 = vpop.f32.mrb[23].mxu0 }
 0x441   :  { %10539 = vmatmul.mubr.bf16.vlgmr.msra.gmra.mrb[128].mxu0 %v17763_v12  ;;  %v17767_v12 = vld [vmem:[#allocation82_spill] sm:$0xff]  ;;  %10631 = vmatmul.mubr.bf16.gmra.mrb[52].mxu1 %v17682_v39 }
 0x442   :  { %10542 = vmatprep.mubr.bf16.mxu0 %v17764_v28  ;;  %v17768_v28 = vld [vmem:[#allocation83_spill] sm:$0xff]  ;;  %10634 = vmatprep.mubr.bf16.mxu1 %v17683_v41  ;;  %v14214_v41 = vpop.f32.mrb[24].mxu1 }
 0x444   :  { %v14179_v62 = vpop.f32.mrb[24].mxu0 }
 0x445   :  { %17765 = vst [vmem:[#allocation58_spill] sm:$0xff] %v14179_v62  ;;  %v3445_v58 = vpop.f32.mrb[25].mxu0 }
 0x446   :  { %v14185_v9 = vpop.f32.mrb[26].mxu0 }
 0x447   :  { %17766 = vst [vmem:[#allocation63_spill] sm:$0xff] %v14185_v9  ;;  %v3448_v36 = vpop.f32.mrb[27].mxu0  ;;  %v17772_v9 = vld [vmem:[#allocation85_spill] sm:$0xff] }
 0x449   :  { %10543 = vmatmul.mubr.bf16.gmra.mrb[132].mxu0 %v17767_v12  ;;  %v17771_v12 = vld [vmem:[#allocation84_spill] sm:$0xff]  ;;  %10635 = vmatmul.mubr.bf16.gmra.mrb[56].mxu1 %v17684_v55  ;;  %v11665_v55 = vld [vmem:[%s17264_s4 + $0x10] sm:$0xff]  }
 0x44a   :  { %10546 = vmatprep.mubr.bf16.mxu0 %v17768_v28  ;;  %v11664_v28 = vld [vmem:[%s17264_s4 + $0x8] sm:$0xff]   ;;  %10638 = vmatprep.mubr.bf16.mxu1 %v17685_v16 }
 0x44b   :  { %8048 = vmatpush1.bf16.msra.mxu1 %v11664_v28  ;;  %v17775_v28 = vld [vmem:[#allocation86_spill] sm:$0xff] }
 0x44c   :  { %v14198_v25 = vpop.f32.mrb[28].mxu0  ;;  %8049 = vmatprep.subr.bf16.mxu1 %v17756_v30 }
 0x44d   :  { %17769 = vst [vmem:[#allocation61_spill] sm:$0xff] %v14198_v25  ;;  %v3453_v1 = vpop.f32.mrb[29].mxu0 }
 0x44e   :  { %v14202_v58 = vpop.f32.mrb[30].mxu0  ;;  %v14219_v1 = vpop.f32.mrb[25].mxu1 }
 0x44f   :  { %17770 = vst [vmem:[#allocation65_spill] sm:$0xff] %v14202_v58  ;;  %v3456_v36 = vpop.f32.mrb[31].mxu0  ;;  %8050 = vmatpush1.bf16.msra.mxu1 %v11665_v55  ;;  %v17780_v58 = vld [vmem:[#allocation89_spill] sm:$0xff] }
 0x450   :  { %8051 = vmatprep.subr.bf16.mxu1 %v17756_v30 }
 0x451   :  { %10547 = vmatmul.mubr.bf16.gmra.mrb[136].mxu0 %v17771_v12  ;;  %v14221_v12 = vpop.f32.mrb[26].mxu1  ;;  %10639 = vmatmul.mubr.bf16.gmra.mrb[60].mxu1 %v17686_v11 }
 0x452   :  { %10550 = vmatprep.mubr.bf16.mxu0 %v17772_v9  ;;  %v14223_v9 = vpop.f32.mrb[27].mxu1  ;;  %10642 = vmatprep.mubr.bf16.mxu1 %v17687_v5 }
 0x453   :  { %v14245_v11 = vpop.f32.mrb[28].mxu1 }
 0x454   :  { %v14210_v62 = vpop.f32.mrb[32].mxu0 }
 0x455   :  { %17773 = vst [vmem:[#allocation69_spill] sm:$0xff] %v14210_v62  ;;  %v3461_v39 = vpop.f32.mrb[33].mxu0  ;;  %v17776_v62 = vld [vmem:[#allocation87_spill] sm:$0xff] }
 0x456   :  { %v14217_v34 = vpop.f32.mrb[34].mxu0 }
 0x457   :  { %17774 = vst [vmem:[#allocation72_spill] sm:$0xff] %v14217_v34  ;;  %v3464_v36 = vpop.f32.mrb[35].mxu0 }
 0x459   :  { %10551 = vmatmul.mubr.bf16.gmra.mrb[140].mxu0 %v17775_v28  ;;  %v17779_v28 = vld [vmem:[#allocation88_spill] sm:$0xff]  ;;  %10643 = vmatmul.mubr.bf16.gmra.mrb[64].mxu1 %v17713_v61 }
 0x45a   :  { %10554 = vmatprep.mubr.bf16.mxu0 %v17776_v62  ;;  %v11666_v62 = vld [vmem:[%s17264_s4 + $0x18] sm:$0xff]   ;;  %10646 = vmatprep.mubr.bf16.mxu1 %v17715_v45 }
 0x45b   :  { %8052 = vmatpush1.bf16.msra.mxu1 %v11666_v62  ;;  %v17784_v62 = vld [vmem:[#allocation90_spill] sm:$0xff] }
 0x45c   :  { %v14230_v39 = vpop.f32.mrb[36].mxu0  ;;  %8053 = vmatprep.subr.bf16.mxu1 %v17756_v30 }
 0x45d   :  { %17777 = vst [vmem:[#allocation5_spill] sm:$0xff] %v14230_v39  ;;  %v3469_v16 = vpop.f32.mrb[37].mxu0  ;;  %v14274_v39 = vld [vmem:[%s17265_s2] ss:$0 sm:$0xff] }
 0x45e   :  { %v14234_v36 = vpop.f32.mrb[38].mxu0 }
 0x45f   :  { %17778 = vst [vmem:[#allocation6_spill] sm:$0xff] %v14234_v36  ;;  %v3472_v34 = vpop.f32.mrb[39].mxu0 }
 0x460   :  { %v14250_v34 = vpop.f32.mrb[29].mxu1 }
 0x461   :  { %10555 = vmatmul.mubr.bf16.gmra.mrb[144].mxu0 %v17779_v28  ;;  %v14253_v36 = vpop.f32.mrb[30].mxu1  ;;  %10647 = vmatmul.mubr.bf16.gmra.mrb[68].mxu1 %v17717_v49  ;;  %v14279_v49 = vld [vmem:[%s17266_s3] ss:$0 sm:$0xff] }
 0x462   :  { %10558 = vmatprep.mubr.bf16.mxu0 %v17780_v58  ;;  %17783 = vst [vmem:[#allocation11_spill] sm:$0xff] %v14253_v36  ;;  %v14255_v58 = vpop.f32.mrb[31].mxu1 }
 0x464   :  { %v14242_v55 = vpop.f32.mrb[40].mxu0 }
 0x465   :  { %17781 = vst [vmem:[#allocation7_spill] sm:$0xff] %v14242_v55  ;;  %v3477_v16 = vpop.f32.mrb[41].mxu0 }
 0x466   :  { %v14248_v5 = vpop.f32.mrb[42].mxu0  ;;  %v11667_v16 = vld [vmem:[%s17264_s4 + $0x20] sm:$0xff]  }
 0x467   :  { %17782 = vst [vmem:[#allocation9_spill] sm:$0xff] %v14248_v5  ;;  %v3480_v28 = vpop.f32.mrb[43].mxu0  ;;  %8054 = vmatpush1.bf16.msra.mxu1 %v11667_v16 }
 0x468   :  { %8055 = vmatprep.subr.bf16.mxu1 %v17756_v30  ;;  %v17787_v28 = vld [vmem:[#allocation31_spill] sm:$0xff] }
 0x469   :  { %10559 = vmatmul.mubr.bf16.gmra.mrb[148].mxu0 %v17784_v62  ;;  %10650 = vmatprep.mubr.bf16.mxu1 %v17787_v28  ;;  %v11668_v62 = vld [vmem:[%s17264_s4 + $0x28] sm:$0xff]   ;;  %v14283_v28 = vpop.f32.mrb[32].mxu1 }
 0x46a   :  { %17788 = vst [vmem:[#allocation17_spill] sm:$0xff] %v14283_v28  ;;  %10651 = vmatmul.mubr.bf16.gmra.mrb[72].mxu1 %v17720_v18  ;;  %v11669_v18 = vld [vmem:[%s17264_s4 + $0x30] sm:$0xff]  }
 0x46b   :  { %8056 = vmatpush1.bf16.msra.mxu1 %v11668_v62  ;;  %10654 = vmatprep.mubr.bf16.mxu1 %v17722_v53 }
 0x46c   :  { %v14261_v55 = vpop.f32.mrb[44].mxu0  ;;  %8057 = vmatprep.subr.bf16.mxu1 %v17756_v30 }
 0x46d   :  { %17785 = vst [vmem:[#allocation13_spill] sm:$0xff] %v14261_v55  ;;  %v3485_v61 = vpop.f32.mrb[45].mxu0  ;;  %v14286_v55 = vpop.f32.mrb[33].mxu1 }
 0x46e   :  { %v14265_v45 = vpop.f32.mrb[46].mxu0  ;;  %17789 = vst [vmem:[#allocation19_spill] sm:$0xff] %v14286_v55  ;;  %v14291_v59 = vpop.f32.mrb[34].mxu1 }
 0x46f   :  { %17786 = vst [vmem:[#allocation15_spill] sm:$0xff] %v14265_v45  ;;  %v3488_v5 = vpop.f32.mrb[47].mxu0  ;;  %17790 = vst [vmem:[#allocation21_spill] sm:$0xff] %v14291_v59  ;;  %v14293_v13 = vpop.f32.mrb[35].mxu1  ;;  %8058 = vmatpush1.bf16.msra.mxu1 %v11669_v18  ;;  %v5565_v18 = vld [vmem:[#allocation2 + $0x9c] sm:$0xf] }
 0x470   :  { %17791 = vst [vmem:[#allocation23_spill] sm:$0xff] %v14293_v13  ;;  %8059 = vmatprep.subr.bf16.mxu1 %v17756_v30  ;;  %v5569_v59 = vld [vmem:[#allocation2 + $0xa4] sm:$0x1] }
 0x472   :  { %10655 = vmatmul.mubr.bf16.gmra.mrb[76].mxu1 %v17724_v50 }
 0x473   :  { %10658 = vmatprep.mubr.bf16.mxu1 %v17726_v8 }
 0x474   :  { %v3491_v16 = vpop.f32.mrb[48].mxu0 }
 0x475   :  { %v3781_v5 = vadd.f32 %v14072_v40, %v3491_v16  ;;  %v3493_v61 = vpop.f32.mrb[49].mxu0 }
 0x476   :  { %v3494_v45 = vpop.f32.mrb[50].mxu0 }
 0x477   :  { %v3970_v62 = vmul.f32 %v14274_v39, %v3781_v5  ;;  %v3784_v25 = vadd.f32 %v14076_v43, %v3494_v45  ;;  %v3496_v24 = vpop.f32.mrb[51].mxu0 }
 0x479   :  { %v4041_v40 = vadd.f32 %v14279_v49, %v3970_v62  ;;  %v3971_v16 = vmul.f32 %v14274_v39, %v3784_v25 }
 0x47a   :  { %10659 = vmatmul.mubr.bf16.gmra.mrb[80].mxu1 %v17728_v15 }
 0x47b   :  { %v4105_v61 = vmax.f32 %v4041_v40, 0.0  ;;  %v4042_v53 = vadd.f32 %v14279_v49, %v3971_v16  ;;  %10662 = vmatprep.mubr.bf16.mxu1 %v17730_v46 }
 0x47c   :  { %v3499_v5 = vpop.f32.mrb[52].mxu0 }
 0x47d   :  { %v10362_v43 = vpack.c.bf16 %v4105_v61, %v4105_v61  ;;  %v4106_v24 = vmax.f32 %v4042_v53, 0.0  ;;  %v3789_v45 = vadd.f32 %v14070_v35, %v3499_v5  ;;  %v3501_v33 = vpop.f32.mrb[53].mxu0  ;;  %v11670_v5 = vld [vmem:[%s17264_s4 + $0x38] sm:$0xff]  }
 0x47e   :  { %v3502_v25 = vpop.f32.mrb[54].mxu0  ;;  %8060 = vmatpush1.bf16.msra.mxu1 %v11670_v5 }
 0x47f   :  { %v5040_v62 = vshrl.u32 %v10362_v43, 16  ;;  %v10363_v40 = vpack.c.bf16 %v4106_v24, %v4106_v24  ;;  %v3972_v16 = vmul.f32 %v14274_v39, %v3789_v45  ;;  %v3504_v21 = vpop.f32.mrb[55].mxu0  ;;  %v3792_v61 = vadd.f32 %v14074_v23, %v3502_v25  ;;  %8061 = vmatprep.subr.bf16.mxu1 %v17756_v30 }
 0x480   :  { %v5043_v33 = vshll.u32 %v10362_v43, 16 }
 0x481   :  { %v5042_v35 = vrot.slane %v5040_v62, 7  ;;  %v5048_v50 = vshrl.u32 %v10363_v40, 16  ;;  %v4043_v8 = vadd.f32 %v14279_v49, %v3972_v16  ;;  %v3973_v21 = vmul.f32 %v14274_v39, %v3792_v61 }
 0x482   :  { %v5051_v45 = vshll.u32 %v10363_v40, 16  ;;  %10663 = vmatmul.mubr.bf16.gmra.mrb[84].mxu1 %v17732_v7 }
 0x483   :  { %v5045_v24 = vor.u32 %v5043_v33, %v5042_v35  ;;  %v5050_v43 = vrot.slane %v5048_v50, 7  ;;  %v4107_v25 = vmax.f32 %v4043_v8, 0.0  ;;  %v5046_v62 = vrot.slane %v5042_v35, 4  ;;  %v14332_v35 = vpop.f32.mrb[36].mxu1  ;;  %10666 = vmatprep.mubr.bf16.mxu1 %v17734_v63  ;;  %v11672_v63 = vld [vmem:[%s17264_s4 + $0x48] sm:$0xff]  }
 0x484   :  { %v4044_v61 = vadd.f32 %v14279_v49, %v3973_v21  ;;  %v3507_v33 = vpop.f32.mrb[56].mxu0  ;;  %v14336_v21 = vpop.f32.mrb[37].mxu1 }
 0x485   :  { %v5566_v28 = vsel %vm14308_vm11, %v5045_v24, %v5565_v18  ;;  %v5053_v50 = vor.u32 %v5051_v45, %v5050_v43  ;;  %v5055_v40 = vrot.slane %v5050_v43, 4  ;;  %v10364_v8 = vpack.c.bf16 %v4107_v25, %v4107_v25  ;;  %v3509_v5 = vpop.f32.mrb[57].mxu0  ;;  %v14343_v25 = vpop.f32.mrb[38].mxu1 }
 0x486   :  { %5567 = vst [vmem:[#allocation2 + $0x9c] sm:$0xf] %v5566_v28  ;;  %v4108_v13 = vmax.f32 %v4044_v61, 0.0  ;;  %v3797_v55 = vadd.f32 %v14084_v29, %v3507_v33  ;;  %v3510_v36 = vpop.f32.mrb[58].mxu0  ;;  %v14347_v61 = vpop.f32.mrb[39].mxu1 }
 0x487   :  { %v5054_v18 = vsel %vm14318_vm12, %v5046_v62, %v5053_v50  ;;  %v5570_v24 = vsel %vm14324_vm13, %v5055_v40, %v5569_v59  ;;  %v5057_v43 = vshrl.u32 %v10364_v8, 16  ;;  %v3512_v45 = vpop.f32.mrb[59].mxu0  ;;  %v3800_v28 = vadd.f32 %v14088_v0, %v3510_v36  ;;  %v5572_v5 = vld [vmem:[#allocation2 + $0xa8] sm:$0xf]  ;;  %v11671_v40 = vld [vmem:[%s17264_s4 + $0x40] sm:$0xff]  }
 0x488   :  { %5568 = vst [vmem:[#allocation2 + $0xa0] sm:$0xf] %v5054_v18  ;;  %5571 = vst [vmem:[#allocation2 + $0xa4] sm:$0x1] %v5570_v24  ;;  %v10365_v15 = vpack.c.bf16 %v4108_v13, %v4108_v13  ;;  %v3974_v29 = vmul.f32 %v14274_v39, %v3797_v55  ;;  %v5060_v33 = vshll.u32 %v10364_v8, 16  ;;  %8062 = vmatpush1.bf16.msra.mxu1 %v11671_v40 }
 0x489   :  { %v5059_v46 = vrot.slane %v5057_v43, 7  ;;  %v3975_v59 = vmul.f32 %v14274_v39, %v3800_v28  ;;  %v5576_v45 = vld [vmem:[#allocation2 + $0xb0] sm:$0x1]  ;;  %8063 = vmatprep.subr.bf16.mxu1 %v17756_v30 }
 0x48a   :  { %v5065_v62 = vshrl.u32 %v10365_v15, 16  ;;  %v4045_v50 = vadd.f32 %v14279_v49, %v3974_v29  ;;  %v5068_v24 = vshll.u32 %v10365_v15, 16  ;;  %10667 = vmatmul.mubr.bf16.gmra.mrb[88].mxu1 %v17736_v19 }
 0x48b   :  { %v5062_v18 = vor.u32 %v5060_v33, %v5059_v46  ;;  %v4046_v0 = vadd.f32 %v14279_v49, %v3975_v59  ;;  %v5063_v43 = vrot.slane %v5059_v46, 4  ;;  %10670 = vmatprep.mubr.bf16.mxu1 %v17738_v47  ;;  %v5586_v47 = vld [vmem:[#allocation2 + $0xc0] sm:$0xf] }
 0x48c   :  { %v5067_v13 = vrot.slane %v5065_v62, 7  ;;  %v4109_v55 = vmax.f32 %v4045_v50, 0.0  ;;  %v3515_v36 = vpop.f32.mrb[60].mxu0  ;;  %8064 = vmatpush1.bf16.msra.mxu1 %v11672_v63 }
 0x48d   :  { %v5573_v8 = vsel %vm14308_vm11, %v5062_v18, %v5572_v5  ;;  %v3805_v29 = vadd.f32 %v14082_v3, %v3515_v36  ;;  %v3517_v28 = vpop.f32.mrb[61].mxu0  ;;  %v4110_v50 = vmax.f32 %v4046_v0, 0.0  ;;  %v5579_v36 = vld [vmem:[#allocation2 + $0xb4] sm:$0xf]  ;;  %8065 = vmatprep.subr.bf16.mxu1 %v17756_v30 }
 0x48e   :  { %5574 = vst [vmem:[#allocation2 + $0xa8] sm:$0xf] %v5573_v8  ;;  %v5070_v33 = vor.u32 %v5068_v24, %v5067_v13  ;;  %v5072_v15 = vrot.slane %v5067_v13, 4  ;;  %v10366_v62 = vpack.c.bf16 %v4109_v55, %v4109_v55  ;;  %v3518_v59 = vpop.f32.mrb[62].mxu0 }
 0x48f   :  { %v3976_v46 = vmul.f32 %v14274_v39, %v3805_v29  ;;  %v3808_v5 = vadd.f32 %v14086_v26, %v3518_v59  ;;  %v3520_v40 = vpop.f32.mrb[63].mxu0  ;;  %v10367_v13 = vpack.c.bf16 %v4110_v50, %v4110_v50 }
 0x490   :  { %v5071_v3 = vsel %vm14318_vm12, %v5063_v43, %v5070_v33  ;;  %v5577_v18 = vsel %vm14324_vm13, %v5072_v15, %v5576_v45  ;;  %v5074_v7 = vshrl.u32 %v10366_v62, 16  ;;  %v5077_v0 = vshll.u32 %v10366_v62, 16  ;;  %v5583_v40 = vld [vmem:[#allocation2 + $0xbc] sm:$0x1] }
 0x491   :  { %5575 = vst [vmem:[#allocation2 + $0xac] sm:$0xf] %v5071_v3  ;;  %5578 = vst [vmem:[#allocation2 + $0xb0] sm:$0x1] %v5577_v18  ;;  %v4047_v24 = vadd.f32 %v14279_v49, %v3976_v46  ;;  %v3977_v55 = vmul.f32 %v14274_v39, %v3808_v5  ;;  %v5082_v8 = vshrl.u32 %v10367_v13, 16  ;;  %v5085_v28 = vshll.u32 %v10367_v13, 16 }
 0x492   :  { %v5076_v26 = vrot.slane %v5074_v7, 7  ;;  %10671 = vmatmul.mubr.bf16.gmra.mrb[92].mxu1 %v17740_v52 }
 0x493   :  { %v4111_v43 = vmax.f32 %v4047_v24, 0.0  ;;  %v4048_v29 = vadd.f32 %v14279_v49, %v3977_v55  ;;  %v5084_v15 = vrot.slane %v5082_v8, 7  ;;  %10674 = vmatprep.mubr.bf16.mxu1 %v17742_v32  ;;  %v11674_v32 = vld [vmem:[%s17264_s4 + $0x58] sm:$0xff]  }
 0x494   :  { %v5079_v45 = vor.u32 %v5077_v0, %v5076_v26  ;;  %v3523_v33 = vpop.f32.mrb[64].mxu0  ;;  %v5080_v18 = vrot.slane %v5076_v26, 4 }
 0x495   :  { %v10368_v50 = vpack.c.bf16 %v4111_v43, %v4111_v43  ;;  %v4112_v59 = vmax.f32 %v4048_v29, 0.0  ;;  %v3813_v46 = vadd.f32 %v14106_v31, %v3523_v33  ;;  %v3525_v5 = vpop.f32.mrb[65].mxu0  ;;  %v5087_v7 = vor.u32 %v5085_v28, %v5084_v15 }
 0x496   :  { %v5580_v62 = vsel %vm14308_vm11, %v5079_v45, %v5579_v36  ;;  %v3526_v3 = vpop.f32.mrb[66].mxu0  ;;  %v5089_v13 = vrot.slane %v5084_v15, 4 }
 0x497   :  { %5581 = vst [vmem:[#allocation2 + $0xb4] sm:$0xf] %v5580_v62  ;;  %v5091_v24 = vshrl.u32 %v10368_v50, 16  ;;  %v3528_v55 = vpop.f32.mrb[67].mxu0  ;;  %v10369_v63 = vpack.c.bf16 %v4112_v59, %v4112_v59  ;;  %v3978_v0 = vmul.f32 %v14274_v39, %v3813_v46  ;;  %v3816_v31 = vadd.f32 %v14110_v4, %v3526_v3  ;;  %v11673_v4 = vld [vmem:[%s17264_s4 + $0x50] sm:$0xff]  }
 0x498   :  { %v5088_v19 = vsel %vm14318_vm12, %v5080_v18, %v5087_v7  ;;  %v5584_v36 = vsel %vm14324_vm13, %v5089_v13, %v5583_v40  ;;  %v5094_v43 = vshll.u32 %v10368_v50, 16  ;;  %8066 = vmatpush1.bf16.msra.mxu1 %v11673_v4  ;;  %v5590_v40 = vld [vmem:[#allocation2 + $0xc8] sm:$0x1] }
 0x499   :  { %v5093_v8 = vrot.slane %v5091_v24, 7  ;;  %5582 = vst [vmem:[#allocation2 + $0xb8] sm:$0xf] %v5088_v19  ;;  %5585 = vst [vmem:[#allocation2 + $0xbc] sm:$0x1] %v5584_v36  ;;  %v5099_v26 = vshrl.u32 %v10369_v63, 16  ;;  %v4049_v29 = vadd.f32 %v14279_v49, %v3978_v0  ;;  %v3979_v45 = vmul.f32 %v14274_v39, %v3816_v31  ;;  %8067 = vmatprep.subr.bf16.mxu1 %v17756_v30 }
 0x49a   :  { %v5102_v15 = vshll.u32 %v10369_v63, 16  ;;  %10675 = vmatmul.mubr.bf16.gmra.mrb[96].mxu1 %v17746_v48 }
 0x49b   :  { %v5096_v28 = vor.u32 %v5094_v43, %v5093_v8  ;;  %v5101_v33 = vrot.slane %v5099_v26, 7  ;;  %v4113_v59 = vmax.f32 %v4049_v29, 0.0  ;;  %v4050_v46 = vadd.f32 %v14279_v49, %v3979_v45  ;;  %v5593_v29 = vld [vmem:[#allocation2 + $0xe4] sm:$0xf]  ;;  %10678 = vmatprep.mubr.bf16.mxu1 %v13141_v20 }
 0x49c   :  { %v3531_v5 = vpop.f32.mrb[68].mxu0  ;;  %v5097_v50 = vrot.slane %v5093_v8, 4  ;;  %8068 = vmatpush1.bf16.msra.mxu1 %v11674_v32 }
 0x49d   :  { %v5587_v62 = vsel %vm14308_vm11, %v5096_v28, %v5586_v47  ;;  %v3821_v3 = vadd.f32 %v14102_v10, %v3531_v5  ;;  %v3533_v18 = vpop.f32.mrb[69].mxu0  ;;  %v5104_v7 = vor.u32 %v5102_v15, %v5101_v33  ;;  %v5106_v13 = vrot.slane %v5101_v33, 4  ;;  %8069 = vmatprep.subr.bf16.mxu1 %v17756_v30 }
 0x49e   :  { %5588 = vst [vmem:[#allocation2 + $0xc0] sm:$0xf] %v5587_v62  ;;  %v10370_v24 = vpack.c.bf16 %v4113_v59, %v4113_v59  ;;  %v4114_v55 = vmax.f32 %v4050_v46, 0.0  ;;  %v3534_v63 = vpop.f32.mrb[70].mxu0  ;;  %v5597_v18 = vld [vmem:[#allocation2 + $0xec] sm:$0x1] }
 0x49f   :  { %v3980_v0 = vmul.f32 %v14274_v39, %v3821_v3  ;;  %v3824_v31 = vadd.f32 %v14108_v42, %v3534_v63  ;;  %v3536_v19 = vpop.f32.mrb[71].mxu0  ;;  %v5105_v10 = vsel %vm14318_vm12, %v5097_v50, %v5104_v7  ;;  %v5591_v36 = vsel %vm14324_vm13, %v5106_v13, %v5590_v40  ;;  %v11675_v13 = vld [vmem:[%s17264_s4 + $0x60] sm:$0xff]  }
 0x4a0   :  { %v5108_v52 = vshrl.u32 %v10370_v24, 16  ;;  %5589 = vst [vmem:[#allocation2 + $0xc4] sm:$0xf] %v5105_v10  ;;  %5592 = vst [vmem:[#allocation2 + $0xc8] sm:$0x1] %v5591_v36  ;;  %v10371_v8 = vpack.c.bf16 %v4114_v55, %v4114_v55  ;;  %v5111_v26 = vshll.u32 %v10370_v24, 16  ;;  %8070 = vmatpush1.bf16.msra.mxu1 %v11675_v13 }
 0x4a1   :  { %v4051_v43 = vadd.f32 %v14279_v49, %v3980_v0  ;;  %v3981_v47 = vmul.f32 %v14274_v39, %v3824_v31  ;;  %8071 = vmatprep.subr.bf16.mxu1 %v17756_v30  ;;  %v11676_v13 = vld [vmem:[%s17264_s4 + $0x68] sm:$0xff]  }
 0x4a2   :  { %v5110_v42 = vrot.slane %v5108_v52, 7  ;;  %v5116_v45 = vshrl.u32 %v10371_v8, 16  ;;  %v5119_v15 = vshll.u32 %v10371_v8, 16  ;;  %v11677_v8 = vld [vmem:[%s17264_s4 + $0x200] sm:$0xff]   ;;  %10679 = vmatmul.mubr.bf16.gmra.mrb[100].mxu1 %v13945_v60 }
 0x4a3   :  { %v4115_v4 = vmax.f32 %v4051_v43, 0.0  ;;  %v4052_v28 = vadd.f32 %v14279_v49, %v3981_v47  ;;  %v5600_v43 = vld [vmem:[#allocation2 + $0xf0] sm:$0xf]  ;;  %10682 = vmatprep.subr.bf16.mxu0 %v11677_v8 }
 0x4a4   :  { %v5113_v33 = vor.u32 %v5111_v26, %v5110_v42  ;;  %v3539_v59 = vpop.f32.mrb[72].mxu0  ;;  %v5118_v46 = vrot.slane %v5116_v45, 7  ;;  %v5114_v24 = vrot.slane %v5110_v42, 4  ;;  %10683 = vmatpush3.bf16.msra.mxu0 %v11677_v8  ;;  %8072 = vmatpush1.bf16.msra.mxu1 %v11676_v13  ;;  %v14465_v13 = vld [vmem:[#allocation2] sm:$0xf] }
 0x4a5   :  { %v10372_v5 = vpack.c.bf16 %v4115_v4, %v4115_v4  ;;  %v4116_v50 = vmax.f32 %v4052_v28, 0.0  ;;  %v3829_v62 = vadd.f32 %v14132_v37, %v3539_v59  ;;  %v3541_v40 = vpop.f32.mrb[73].mxu0  ;;  %v5604_v59 = vld [vmem:[#allocation2 + $0xf8] sm:$0x1]  ;;  %8073 = vmatprep.subr.bf16.mxu1 %v17756_v30 }
 0x4a6   :  { %v5594_v3 = vsel %vm14308_vm11, %v5113_v33, %v5593_v29  ;;  %v3542_v7 = vpop.f32.mrb[74].mxu0  ;;  %v5121_v55 = vor.u32 %v5119_v15, %v5118_v46  ;;  %v5123_v63 = vrot.slane %v5118_v46, 4 }
 0x4a7   :  { %5595 = vst [vmem:[#allocation2 + $0xe4] sm:$0xf] %v5594_v3  ;;  %v5125_v0 = vshrl.u32 %v10372_v5, 16  ;;  %v3544_v37 = vpop.f32.mrb[75].mxu0  ;;  %v10373_v31 = vpack.c.bf16 %v4116_v50, %v4116_v50  ;;  %v3982_v48 = vmul.f32 %v14274_v39, %v3829_v62  ;;  %v3832_v19 = vadd.f32 %v14136_v56, %v3542_v7  ;;  %v11678_v50 = vld [vmem:[%s17264_s4 + $0x208] sm:$0xff]  }
 0x4a8   :  { %v5122_v10 = vsel %vm14318_vm12, %v5114_v24, %v5121_v55  ;;  %v5598_v36 = vsel %vm14324_vm13, %v5123_v63, %v5597_v18  ;;  %v5128_v20 = vshll.u32 %v10372_v5, 16  ;;  %10684 = vmatprep.subr.bf16.mxu0 %v11678_v50 }
 0x4a9   :  { %v5127_v52 = vrot.slane %v5125_v0, 7  ;;  %5596 = vst [vmem:[#allocation2 + $0xe8] sm:$0xf] %v5122_v10  ;;  %5599 = vst [vmem:[#allocation2 + $0xec] sm:$0x1] %v5598_v36  ;;  %v5133_v47 = vshrl.u32 %v10373_v31, 16  ;;  %v4053_v56 = vadd.f32 %v14279_v49, %v3982_v48  ;;  %v3983_v32 = vmul.f32 %v14274_v39, %v3832_v19  ;;  %10685 = vmatpush3.bf16.msra.mxu0 %v11678_v50 }
 0x4aa   :  { %v5136_v29 = vshll.u32 %v10373_v31, 16  ;;  %v5607_v36 = vld [vmem:[#allocation2 + $0xfc] sm:$0xf] }
 0x4ab   :  { %v5130_v42 = vor.u32 %v5128_v20, %v5127_v52  ;;  %v5135_v26 = vrot.slane %v5133_v47, 7  ;;  %v4117_v45 = vmax.f32 %v4053_v56, 0.0  ;;  %v4054_v4 = vadd.f32 %v14279_v49, %v3983_v32 }
 0x4ac   :  { %v3547_v28 = vpop.f32.mrb[76].mxu0  ;;  %v5131_v33 = vrot.slane %v5127_v52, 4 }
 0x4ad   :  { %v5601_v15 = vsel %vm14308_vm11, %v5130_v42, %v5600_v43  ;;  %v3837_v46 = vadd.f32 %v14125_v54, %v3547_v28  ;;  %v3549_v5 = vpop.f32.mrb[77].mxu0  ;;  %v5138_v62 = vor.u32 %v5136_v29, %v5135_v26  ;;  %v5140_v40 = vrot.slane %v5135_v26, 4 }
 0x4ae   :  { %5602 = vst [vmem:[#allocation2 + $0xf0] sm:$0xf] %v5601_v15  ;;  %v10374_v3 = vpack.c.bf16 %v4117_v45, %v4117_v45  ;;  %v4118_v18 = vmax.f32 %v4054_v4, 0.0  ;;  %v3550_v7 = vpop.f32.mrb[78].mxu0  ;;  %v11681_v4 = vld [vmem:[%s17264_s4 + $0x218] sm:$0xff]  }
 0x4af   :  { %v3984_v24 = vmul.f32 %v14274_v39, %v3837_v46  ;;  %v3840_v54 = vadd.f32 %v14134_v17, %v3550_v7  ;;  %v3552_v55 = vpop.f32.mrb[79].mxu0  ;;  %v5139_v63 = vsel %vm14318_vm12, %v5131_v33, %v5138_v62  ;;  %v5605_v60 = vsel %vm14324_vm13, %v5140_v40, %v5604_v59  ;;  %v11680_v17 = vld [vmem:[%s17264_s4 + $0x210] sm:$0xff]   ;;  %v5611_v33 = vld [vmem:[#allocation2 + $0x104] sm:$0x1] }
 0x4b0   :  { %v5142_v0 = vshrl.u32 %v10374_v3, 16  ;;  %5603 = vst [vmem:[#allocation2 + $0xf4] sm:$0xf] %v5139_v63  ;;  %5606 = vst [vmem:[#allocation2 + $0xf8] sm:$0x1] %v5605_v60  ;;  %v10375_v37 = vpack.c.bf16 %v4118_v18, %v4118_v18  ;;  %v5145_v10 = vshll.u32 %v10374_v3, 16  ;;  %10686 = vmatprep.subr.bf16.mxu0 %v11680_v17 }
 0x4b1   :  { %v4055_v31 = vadd.f32 %v14279_v49, %v3984_v24  ;;  %v3985_v48 = vmul.f32 %v14274_v39, %v3840_v54  ;;  %10687 = vmatpush3.bf16.msra.mxu0 %v11680_v17  ;;  %v14471_v63 = vld [vmem:[#allocation2 + $0x4] sm:$0xf]  ;;  %v5814_v60 = vshrl.u32 %v14465_v13, 16 }
 0x4b2   :  { %v5144_v19 = vrot.slane %v5142_v0, 7  ;;  %v5150_v52 = vshrl.u32 %v10375_v37, 16  ;;  %v5153_v47 = vshll.u32 %v10375_v37, 16  ;;  %10688 = vmatprep.subr.bf16.mxu0 %v11681_v4  ;;  %v5614_v0 = vld [vmem:[#allocation2 + $0x108] sm:$0xf] }
 0x4b3   :  { %v4119_v20 = vmax.f32 %v4055_v31, 0.0  ;;  %v4056_v8 = vadd.f32 %v14279_v49, %v3985_v48 }
 0x4b4   :  { %v5147_v43 = vor.u32 %v5145_v10, %v5144_v19  ;;  %v3555_v56 = vpop.f32.mrb[80].mxu0  ;;  %v5152_v32 = vrot.slane %v5150_v52, 7  ;;  %v5148_v59 = vrot.slane %v5144_v19, 4  ;;  %v5816_v10 = vrot.slane %v5814_v60, 4 }
 0x4b5   :  { %v10376_v42 = vpack.c.bf16 %v4119_v20, %v4119_v20  ;;  %v4120_v26 = vmax.f32 %v4056_v8, 0.0  ;;  %v3845_v29 = vadd.f32 %v14161_v6, %v3555_v56  ;;  %v3557_v45 = vpop.f32.mrb[81].mxu0  ;;  %v11679_v6 = vld [vmem:[%s17264_s4 + $0x70] sm:$0xff]   ;;  %10689 = vmatpush3.bf16.msra.mxu0 %v11681_v4  ;;  %v5827_v4 = vshrl.u32 %v14471_v63, 16 }
 0x4b6   :  { %v5608_v28 = vsel %vm14308_vm11, %v5147_v43, %v5607_v36  ;;  %v3558_v15 = vpop.f32.mrb[82].mxu0  ;;  %v5155_v46 = vor.u32 %v5153_v47, %v5152_v32  ;;  %v5157_v5 = vrot.slane %v5152_v32, 4  ;;  %8074 = vmatpush1.bf16.msra.mxu1 %v11679_v6  ;;  %v5817_v36 = vshll.u32 %v14465_v13, 16  ;;  %v5618_v32 = vld [vmem:[#allocation2 + $0x110] sm:$0x1] }
 0x4b7   :  { %5609 = vst [vmem:[#allocation2 + $0xfc] sm:$0xf] %v5608_v28  ;;  %v5159_v50 = vshrl.u32 %v10376_v42, 16  ;;  %v3560_v62 = vpop.f32.mrb[83].mxu0  ;;  %v5162_v40 = vshll.u32 %v10376_v42, 16  ;;  %v10377_v3 = vpack.c.bf16 %v4120_v26, %v4120_v26  ;;  %v3986_v18 = vmul.f32 %v14274_v39, %v3845_v29  ;;  %8075 = vmatprep.subr.bf16.mxu1 %v17756_v30  ;;  %v11683_v29 = vld [vmem:[%s17264_s4 + $0x220] sm:$0xff]  }
 0x4b8   :  { %v3848_v7 = vadd.f32 %v14165_v14, %v3558_v15  ;;  %v5156_v24 = vsel %vm14318_vm12, %v5148_v59, %v5155_v46  ;;  %v5612_v54 = vsel %vm14324_vm13, %v5157_v5, %v5611_v33  ;;  %v5823_v47 = vshll.u32 %v14471_v63, 16  ;;  %10690 = vmatprep.subr.bf16.mxu0 %v11683_v29  ;;  %v5707_v6 = vld [vmem:[#allocation2 + $0x8] sm:$0x1] }
 0x4b9   :  { %v5161_v55 = vrot.slane %v5159_v50, 7  ;;  %5610 = vst [vmem:[#allocation2 + $0x100] sm:$0xf] %v5156_v24  ;;  %5613 = vst [vmem:[#allocation2 + $0x104] sm:$0x1] %v5612_v54  ;;  %v5167_v37 = vshrl.u32 %v10377_v3, 16  ;;  %v4057_v31 = vadd.f32 %v14279_v49, %v3986_v18  ;;  %10691 = vmatpush3.bf16.msra.mxu0 %v11683_v29 }
 0x4ba   :  { %v5170_v14 = vshll.u32 %v10377_v3, 16  ;;  %v3987_v48 = vmul.f32 %v14274_v39, %v3848_v7  ;;  %v5819_v45 = vrot.slane %v5817_v36, 5  ;;  %v5825_v24 = vrot.slane %v5823_v47, 5 }
 0x4bb   :  { %v5164_v17 = vor.u32 %v5162_v40, %v5161_v55  ;;  %v5165_v19 = vrot.slane %v5161_v55, 4  ;;  %v5169_v52 = vrot.slane %v5167_v37, 7  ;;  %v4121_v20 = vmax.f32 %v4057_v31, 0.0 }
 0x4bc   :  { %v4058_v8 = vadd.f32 %v14279_v49, %v3987_v48  ;;  %v3563_v43 = vpop.f32.mrb[84].mxu0  ;;  %v5820_v40 = vor.u32 %v5819_v45, %v5816_v10  ;;  %v5829_v31 = vrot.slane %v5827_v4, 4  ;;  %v5833_v48 = vshll.u32 %v5707_v6, 16 }
 0x4bd   :  { %v5615_v56 = vsel %vm14308_vm11, %v5164_v17, %v5614_v0  ;;  %v3853_v42 = vadd.f32 %v14156_v22, %v3563_v43  ;;  %v3565_v26 = vpop.f32.mrb[85].mxu0  ;;  %v5172_v28 = vor.u32 %v5170_v14, %v5169_v52  ;;  %v5174_v33 = vrot.slane %v5169_v52, 4  ;;  %v11682_v22 = vld [vmem:[%s17264_s4 + $0x78] sm:$0xff]   ;;  %v11684_v0 = vld [vmem:[%s17264_s4 + $0x228] sm:$0xff]   ;;  %v5621_v17 = vld [vmem:[#allocation2 + $0x114] sm:$0xf] }
 0x4be   :  { %5616 = vst [vmem:[#allocation2 + $0x108] sm:$0xf] %v5615_v56  ;;  %v10378_v15 = vpack.c.bf16 %v4121_v20, %v4121_v20  ;;  %v4122_v59 = vmax.f32 %v4058_v8, 0.0  ;;  %v3566_v46 = vpop.f32.mrb[86].mxu0  ;;  %8076 = vmatpush1.bf16.msra.mxu1 %v11682_v22  ;;  %v5821_v14 = vrot.slane %v5820_v40, 4  ;;  %10692 = vmatprep.subr.bf16.mxu0 %v11684_v0  ;;  %v10156_v52 = vcombine.low %v14465_v13, %v14471_v63 }
 0x4bf   :  { %v3988_v5 = vmul.f32 %v14274_v39, %v3853_v42  ;;  %v3856_v50 = vadd.f32 %v14163_v2, %v3566_v46  ;;  %v3568_v62 = vpop.f32.mrb[87].mxu0  ;;  %v5173_v3 = vsel %vm14318_vm12, %v5165_v19, %v5172_v28  ;;  %v5619_v18 = vsel %vm14324_vm13, %v5174_v33, %v5618_v32  ;;  %8334 = vmatprep.subr.bf16.mxu1 %v17756_v30  ;;  %v5625_v28 = vld [vmem:[#allocation2 + $0x11c] sm:$0x1] }
 0x4c0   :  { %v5176_v7 = vshrl.u32 %v10378_v15, 16  ;;  %5617 = vst [vmem:[#allocation2 + $0x10c] sm:$0xf] %v5173_v3  ;;  %5620 = vst [vmem:[#allocation2 + $0x110] sm:$0x1] %v5619_v18  ;;  %v5179_v2 = vshll.u32 %v10378_v15, 16  ;;  %v10379_v54 = vpack.c.bf16 %v4122_v59, %v4122_v59  ;;  %v5830_v56 = vor.u32 %v5829_v31, %v5825_v24  ;;  %10693 = vmatpush3.bf16.msra.mxu0 %v11684_v0 }
 0x4c1   :  { %v4059_v55 = vadd.f32 %v14279_v49, %v3988_v5  ;;  %v3989_v60 = vmul.f32 %v14274_v39, %v3856_v50  ;;  %v5826_v13 = vsel %vm12086_vm5, %v5821_v14, %v5825_v24  ;;  %v5835_v15 = vrot.slane %v5833_v48, 5 }
 0x4c2   :  { %v5178_v37 = vrot.slane %v5176_v7, 7  ;;  %v5184_v19 = vshrl.u32 %v10379_v54, 16  ;;  %v5187_v43 = vshll.u32 %v10379_v54, 16  ;;  %v5831_v63 = vrot.slane %v5830_v56, 4 }
 0x4c3   :  { %v4123_v10 = vmax.f32 %v4059_v55, 0.0  ;;  %v4060_v36 = vadd.f32 %v14279_v49, %v3989_v60 }
 0x4c4   :  { %v5181_v20 = vor.u32 %v5179_v2, %v5178_v37  ;;  %v5182_v8 = vrot.slane %v5178_v37, 4  ;;  %v3571_v47 = vpop.f32.mrb[88].mxu0  ;;  %v5186_v32 = vrot.slane %v5184_v19, 7  ;;  %v5836_v40 = vsel %vm12086_vm5, %v5831_v63, %v5835_v15  ;;  %v5628_v2 = vld [vmem:[#allocation2 + $0x120] sm:$0xf] }
 0x4c5   :  { %v10380_v42 = vpack.c.bf16 %v4123_v10, %v4123_v10  ;;  %v4124_v26 = vmax.f32 %v4060_v36, 0.0  ;;  %v3861_v29 = vadd.f32 %v14187_v38, %v3571_v47  ;;  %v3573_v45 = vpop.f32.mrb[89].mxu0  ;;  %v10188_v24 = vcombine.low %v5826_v13, %v5836_v40  ;;  %v5632_v10 = vld [vmem:[#allocation2 + $0x128] sm:$0x1]  ;;  %v5635_v63 = vld [vmem:[#allocation2 + $0x12c] sm:$0xf] }
 0x4c6   :  { %v5622_v4 = vsel %vm14308_vm11, %v5181_v20, %v5621_v17  ;;  %v3574_v33 = vpop.f32.mrb[90].mxu0  ;;  %v5189_v59 = vor.u32 %v5187_v43, %v5186_v32  ;;  %v5191_v46 = vrot.slane %v5186_v32, 4 }
 0x4c7   :  { %5623 = vst [vmem:[#allocation2 + $0x114] sm:$0xf] %v5622_v4  ;;  %v5193_v5 = vshrl.u32 %v10380_v42, 16  ;;  %v5196_v50 = vshll.u32 %v10380_v42, 16  ;;  %v3576_v62 = vpop.f32.mrb[91].mxu0  ;;  %v10381_v22 = vpack.c.bf16 %v4124_v26, %v4124_v26  ;;  %v3990_v38 = vmul.f32 %v14274_v39, %v3861_v29  ;;  %8077 = vmatprep.mubr.bf16.mxu1 %v10188_v24 }
 0x4c8   :  { %v3864_v6 = vadd.f32 %v14191_v51, %v3574_v33  ;;  %v5190_v3 = vsel %vm14318_vm12, %v5182_v8, %v5189_v59  ;;  %v5626_v18 = vsel %vm14324_vm13, %v5191_v46, %v5625_v28  ;;  %8078 = vmatmul.mubr.bf16.vlgmr.msra.gmra.mrb[104].mxu1 %v10156_v52  ;;  %v14534_v33 = vld [vmem:[%s17265_s2] ss:$0 sm:$0xff] }
 0x4c9   :  { %v5195_v7 = vrot.slane %v5193_v5, 7  ;;  %5624 = vst [vmem:[#allocation2 + $0x118] sm:$0xf] %v5190_v3  ;;  %5627 = vst [vmem:[#allocation2 + $0x11c] sm:$0x1] %v5626_v18  ;;  %v5201_v54 = vshrl.u32 %v10381_v22, 16  ;;  %v4061_v55 = vadd.f32 %v14279_v49, %v3990_v38 }
 0x4ca   :  { %v3991_v60 = vmul.f32 %v14274_v39, %v3864_v6  ;;  %v5204_v37 = vshll.u32 %v10381_v22, 16 }
 0x4cb   :  { %v5198_v51 = vor.u32 %v5196_v50, %v5195_v7  ;;  %v5203_v0 = vrot.slane %v5201_v54, 7  ;;  %v4125_v14 = vmax.f32 %v4061_v55, 0.0  ;;  %v5199_v17 = vrot.slane %v5195_v7, 4  ;;  %v5639_v7 = vld [vmem:[#allocation2 + $0x134] sm:$0x1] }
 0x4cc   :  { %v4062_v31 = vadd.f32 %v14279_v49, %v3991_v60  ;;  %v3579_v48 = vpop.f32.mrb[92].mxu0 }
 0x4cd   :  { %v5629_v19 = vsel %vm14308_vm11, %v5198_v51, %v5628_v2  ;;  %v3869_v36 = vadd.f32 %v14182_v44, %v3579_v48  ;;  %v3581_v20 = vpop.f32.mrb[93].mxu0  ;;  %v5206_v8 = vor.u32 %v5204_v37, %v5203_v0  ;;  %v5208_v43 = vrot.slane %v5203_v0, 4  ;;  %v11686_v2 = vld [vmem:[%s17264_s4 + $0x80] sm:$0xff]  }
 0x4ce   :  { %5630 = vst [vmem:[#allocation2 + $0x120] sm:$0xf] %v5629_v19  ;;  %v10382_v47 = vpack.c.bf16 %v4125_v14, %v4125_v14  ;;  %v4126_v56 = vmax.f32 %v4062_v31, 0.0  ;;  %v3582_v32 = vpop.f32.mrb[94].mxu0  ;;  %8335 = vmatpush1.bf16.msra.mxu1 %v11686_v2  ;;  %v11687_v14 = vld [vmem:[%s17264_s4 + $0x230] sm:$0xff]  }
 0x4cf   :  { %v3992_v42 = vmul.f32 %v14274_v39, %v3869_v36  ;;  %v3872_v26 = vadd.f32 %v14189_v57, %v3582_v32  ;;  %v3584_v29 = vpop.f32.mrb[95].mxu0  ;;  %v5207_v52 = vsel %vm14318_vm12, %v5199_v17, %v5206_v8  ;;  %v5633_v45 = vsel %vm14324_vm13, %v5208_v43, %v5632_v10  ;;  %8336 = vmatprep.subr.bf16.mxu1 %v17756_v30  ;;  %v5642_v10 = vld [vmem:[#allocation2 + $0x138] sm:$0xf] }
 0x4d0   :  { %v5210_v4 = vshrl.u32 %v10382_v47, 16  ;;  %5631 = vst [vmem:[#allocation2 + $0x124] sm:$0xf] %v5207_v52  ;;  %5634 = vst [vmem:[#allocation2 + $0x128] sm:$0x1] %v5633_v45  ;;  %v10383_v44 = vpack.c.bf16 %v4126_v56, %v4126_v56  ;;  %v5213_v13 = vshll.u32 %v10382_v47, 16  ;;  %10694 = vmatprep.subr.bf16.mxu0 %v11687_v14 }
 0x4d1   :  { %v4063_v28 = vadd.f32 %v14279_v49, %v3992_v42  ;;  %v3993_v57 = vmul.f32 %v14534_v33, %v3872_v26  ;;  %10695 = vmatpush3.bf16.msra.mxu0 %v11687_v14  ;;  %v5646_v45 = vld [vmem:[#allocation2 + $0x140] sm:$0x1]  ;;  %v5653_v14 = vld [vmem:[#allocation2 + $0x14c] sm:$0x1] }
 0x4d2   :  { %v5212_v39 = vrot.slane %v5210_v4, 7  ;;  %v5218_v15 = vshrl.u32 %v10383_v44, 16  ;;  %v5221_v50 = vshll.u32 %v10383_v44, 16 }
 0x4d3   :  { %v4127_v59 = vmax.f32 %v4063_v28, 0.0  ;;  %v4064_v46 = vadd.f32 %v14279_v49, %v3993_v57 }
 0x4d4   :  { %v5215_v5 = vor.u32 %v5213_v13, %v5212_v39  ;;  %v3587_v62 = vpop.f32.mrb[96].mxu0  ;;  %v5220_v22 = vrot.slane %v5218_v15, 7  ;;  %v5216_v54 = vrot.slane %v5212_v39, 4 }
 0x4d5   :  { %v10384_v38 = vpack.c.bf16 %v4127_v59, %v4127_v59  ;;  %v4128_v6 = vmax.f32 %v4064_v46, 0.0  ;;  %v3877_v40 = vadd.f32 %v14219_v1, %v3587_v62  ;;  %v3589_v3 = vpop.f32.mrb[97].mxu0 }
 0x4d6   :  { %v5636_v18 = vsel %vm14308_vm11, %v5215_v5, %v5635_v63  ;;  %v3590_v24 = vpop.f32.mrb[98].mxu0  ;;  %v5223_v49 = vor.u32 %v5221_v50, %v5220_v22  ;;  %v5225_v55 = vrot.slane %v5220_v22, 4  ;;  %v5649_v3 = vld [vmem:[#allocation2 + $0x144] sm:$0xf] }
 0x4d7   :  { %5637 = vst [vmem:[#allocation2 + $0x12c] sm:$0xf] %v5636_v18  ;;  %v5227_v60 = vshrl.u32 %v10384_v38, 16  ;;  %v3592_v51 = vpop.f32.mrb[99].mxu0  ;;  %v10385_v0 = vpack.c.bf16 %v4128_v6, %v4128_v6  ;;  %v3994_v37 = vmul.f32 %v14534_v33, %v3877_v40  ;;  %v3880_v1 = vadd.f32 %v14223_v9, %v3590_v24  ;;  %v14557_v9 = vld [vmem:[%s17266_s3] ss:$0 sm:$0xff] }
 0x4d8   :  { %v5224_v31 = vsel %vm14318_vm12, %v5216_v54, %v5223_v49  ;;  %v5640_v48 = vsel %vm14324_vm13, %v5225_v55, %v5639_v7  ;;  %v5230_v19 = vshll.u32 %v10384_v38, 16  ;;  %v11688_v6 = vld [vmem:[%s17264_s4 + $0x238] sm:$0xff]  }
 0x4d9   :  { %v5229_v17 = vrot.slane %v5227_v60, 7  ;;  %5638 = vst [vmem:[#allocation2 + $0x130] sm:$0xf] %v5224_v31  ;;  %5641 = vst [vmem:[#allocation2 + $0x134] sm:$0x1] %v5640_v48  ;;  %v5235_v36 = vshrl.u32 %v10385_v0, 16  ;;  %v4065_v20 = vadd.f32 %v14557_v9, %v3994_v37  ;;  %v3995_v8 = vmul.f32 %v14534_v33, %v3880_v1  ;;  %10696 = vmatprep.subr.bf16.mxu0 %v11688_v6 }
 0x4da   :  { %v5238_v56 = vshll.u32 %v10385_v0, 16  ;;  %10697 = vmatpush3.bf16.msra.mxu0 %v11688_v6 }
 0x4db   :  { %v5232_v43 = vor.u32 %v5230_v19, %v5229_v17  ;;  %v5237_v47 = vrot.slane %v5235_v36, 7  ;;  %v4129_v32 = vmax.f32 %v4065_v20, 0.0  ;;  %v4066_v42 = vadd.f32 %v14557_v9, %v3995_v8 }
 0x4dc   :  { %v3595_v26 = vpop.f32.mrb[100].mxu0  ;;  %v5233_v29 = vrot.slane %v5229_v17, 4 }
 0x4dd   :  { %v5643_v52 = vsel %vm14308_vm11, %v5232_v43, %v5642_v10  ;;  %v3885_v4 = vadd.f32 %v14214_v41, %v3595_v26  ;;  %v3597_v44 = vpop.f32.mrb[101].mxu0  ;;  %v5240_v28 = vor.u32 %v5238_v56, %v5237_v47  ;;  %v5242_v57 = vrot.slane %v5237_v47, 4 }
 0x4de   :  { %5644 = vst [vmem:[#allocation2 + $0x138] sm:$0xf] %v5643_v52  ;;  %v10386_v39 = vpack.c.bf16 %v4129_v32, %v4129_v32  ;;  %v4130_v13 = vmax.f32 %v4066_v42, 0.0  ;;  %v3598_v63 = vpop.f32.mrb[102].mxu0  ;;  %v5656_v42 = vld [vmem:[#allocation2 + $0x150] sm:$0xf] }
 0x4df   :  { %v3996_v15 = vmul.f32 %v14534_v33, %v3885_v4  ;;  %v3888_v59 = vadd.f32 %v14221_v12, %v3598_v63  ;;  %v3600_v46 = vpop.f32.mrb[103].mxu0  ;;  %v5241_v5 = vsel %vm14318_vm12, %v5233_v29, %v5240_v28  ;;  %v5647_v50 = vsel %vm14324_vm13, %v5242_v57, %v5646_v45  ;;  %v5660_v63 = vld [vmem:[#allocation2 + $0x158] sm:$0x1] }
 0x4e0   :  { %v5244_v62 = vshrl.u32 %v10386_v39, 16  ;;  %5645 = vst [vmem:[#allocation2 + $0x13c] sm:$0xf] %v5241_v5  ;;  %5648 = vst [vmem:[#allocation2 + $0x140] sm:$0x1] %v5647_v50  ;;  %v10387_v41 = vpack.c.bf16 %v4130_v13, %v4130_v13  ;;  %v5247_v40 = vshll.u32 %v10386_v39, 16 }
 0x4e1   :  { %v4067_v22 = vadd.f32 %v14557_v9, %v3996_v15  ;;  %v3997_v38 = vmul.f32 %v14534_v33, %v3888_v59 }
 0x4e2   :  { %v5246_v12 = vrot.slane %v5244_v62, 7  ;;  %v5252_v18 = vshrl.u32 %v10387_v41, 16  ;;  %v5255_v54 = vshll.u32 %v10387_v41, 16 }
 0x4e3   :  { %v4131_v7 = vmax.f32 %v4067_v22, 0.0  ;;  %v4068_v24 = vadd.f32 %v14557_v9, %v3997_v38  ;;  %v17798_v38 = vld [vmem:[#allocation11_spill] sm:$0xff] }
 0x4e4   :  { %v5249_v2 = vor.u32 %v5247_v40, %v5246_v12  ;;  %v3603_v49 = vpop.f32.mrb[104].mxu0  ;;  %v5254_v55 = vrot.slane %v5252_v18, 7  ;;  %v5250_v48 = vrot.slane %v5246_v12, 4 }
 0x4e5   :  { %v10388_v60 = vpack.c.bf16 %v4131_v7, %v4131_v7  ;;  %v4132_v51 = vmax.f32 %v4068_v24, 0.0  ;;  %v3893_v0 = vadd.f32 %v14250_v34, %v3603_v49  ;;  %v3605_v37 = vpop.f32.mrb[105].mxu0  ;;  %v5663_v49 = vld [vmem:[#allocation2 + $0x15c] sm:$0xf] }
 0x4e6   :  { %v5650_v1 = vsel %vm14308_vm11, %v5249_v2, %v5649_v3  ;;  %v3606_v31 = vpop.f32.mrb[106].mxu0  ;;  %v5257_v17 = vor.u32 %v5255_v54, %v5254_v55  ;;  %v5259_v19 = vrot.slane %v5254_v55, 4 }
 0x4e7   :  { %5651 = vst [vmem:[#allocation2 + $0x144] sm:$0xf] %v5650_v1  ;;  %v5261_v10 = vshrl.u32 %v10388_v60, 16  ;;  %v3608_v36 = vpop.f32.mrb[107].mxu0  ;;  %v10389_v20 = vpack.c.bf16 %v4132_v51, %v4132_v51  ;;  %v3998_v8 = vmul.f32 %v14534_v33, %v3893_v0  ;;  %v3896_v43 = vadd.f32 %v14255_v58, %v3606_v31 }
 0x4e8   :  { %v5258_v34 = vsel %vm14318_vm12, %v5250_v48, %v5257_v17  ;;  %v5654_v47 = vsel %vm14324_vm13, %v5259_v19, %v5653_v14  ;;  %v5264_v32 = vshll.u32 %v10388_v60, 16  ;;  %v17799_v17 = vld [vmem:[#allocation19_spill] sm:$0xff]  ;;  %v14602_v36 = vld [vmem:[#allocation2 + $0xa0] sm:$0xf] }
 0x4e9   :  { %v5263_v56 = vrot.slane %v5261_v10, 7  ;;  %5652 = vst [vmem:[#allocation2 + $0x148] sm:$0xf] %v5258_v34  ;;  %5655 = vst [vmem:[#allocation2 + $0x14c] sm:$0x1] %v5654_v47  ;;  %v5269_v26 = vshrl.u32 %v10389_v20, 16  ;;  %v4069_v29 = vadd.f32 %v14557_v9, %v3998_v8  ;;  %v3999_v52 = vmul.f32 %v14534_v33, %v3896_v43 }
 0x4ea   :  { %v5272_v44 = vshll.u32 %v10389_v20, 16  ;;  %v5667_v8 = vld [vmem:[#allocation2 + $0x164] sm:$0x1] }
 0x4eb   :  { %v5266_v45 = vor.u32 %v5264_v32, %v5263_v56  ;;  %v5271_v4 = vrot.slane %v5269_v26, 7  ;;  %v4133_v58 = vmax.f32 %v4069_v29, 0.0  ;;  %v4070_v28 = vadd.f32 %v14557_v9, %v3999_v52  ;;  %v17800_v52 = vld [vmem:[#allocation23_spill] sm:$0xff] }
 0x4ec   :  { %v3611_v57 = vpop.f32.mrb[108].mxu0  ;;  %v5267_v39 = vrot.slane %v5263_v56, 4 }
 0x4ed   :  { %v5657_v13 = vsel %vm14308_vm11, %v5266_v45, %v5656_v42  ;;  %v3901_v15 = vadd.f32 %v14245_v11, %v3611_v57  ;;  %v3613_v59 = vpop.f32.mrb[109].mxu0  ;;  %v5274_v46 = vor.u32 %v5272_v44, %v5271_v4  ;;  %v5276_v5 = vrot.slane %v5271_v4, 4  ;;  %v14608_v4 = vld [vmem:[#allocation2 + $0x9c] sm:$0xf] }
 0x4ee   :  { %5658 = vst [vmem:[#allocation2 + $0x150] sm:$0xf] %v5657_v13  ;;  %v10390_v50 = vpack.c.bf16 %v4133_v58, %v4133_v58  ;;  %v4134_v62 = vmax.f32 %v4070_v28, 0.0  ;;  %v3614_v41 = vpop.f32.mrb[110].mxu0  ;;  %v6770_v44 = vrot.slane %v14602_v36, 5  ;;  %v11691_v13 = vld [vmem:[%s17264_s4 + $0x88] sm:$0xff]  }
 0x4ef   :  { %v4000_v22 = vmul.f32 %v14534_v33, %v3901_v15  ;;  %v3904_v6 = vadd.f32 %v17798_v38, %v3614_v41  ;;  %v3616_v12 = vpop.f32.mrb[111].mxu0  ;;  %v5275_v40 = vsel %vm14318_vm12, %v5267_v39, %v5274_v46  ;;  %v5661_v3 = vsel %vm14324_vm13, %v5276_v5, %v5660_v63  ;;  %v5670_v63 = vld [vmem:[#allocation2 + $0x168] sm:$0xf]  ;;  %8337 = vmatpush1.bf16.msra.mxu1 %v11691_v13  ;;  %v14641_v13 = vld [vmem:[#allocation2 + $0xb8] sm:$0xf] }
 0x4f0   :  { %v5278_v18 = vshrl.u32 %v10390_v50, 16  ;;  %5659 = vst [vmem:[#allocation2 + $0x154] sm:$0xf] %v5275_v40  ;;  %5662 = vst [vmem:[#allocation2 + $0x158] sm:$0x1] %v5661_v3  ;;  %v10391_v11 = vpack.c.bf16 %v4134_v62, %v4134_v62  ;;  %v5281_v54 = vshll.u32 %v10390_v50, 16  ;;  %8338 = vmatprep.subr.bf16.mxu1 %v17756_v30 }
 0x4f1   :  { %v4071_v7 = vadd.f32 %v14557_v9, %v4000_v22  ;;  %v4001_v24 = vmul.f32 %v14534_v33, %v3904_v6  ;;  %v10133_v50 = vrot.slane %v14608_v4, 9  ;;  %v5746_v12 = vld [vmem:[#allocation2 + $0xa4] sm:$0x1] }
 0x4f2   :  { %v5280_v2 = vrot.slane %v5278_v18, 7  ;;  %v5286_v55 = vshrl.u32 %v10391_v11, 16  ;;  %v5289_v37 = vshll.u32 %v10391_v11, 16  ;;  %v5674_v18 = vld [vmem:[#allocation2 + $0x170] sm:$0x1]  ;;  %v17801_v11 = vld [vmem:[#allocation17_spill] sm:$0xff] }
 0x4f3   :  { %v4135_v60 = vmax.f32 %v4071_v7, 0.0  ;;  %v4072_v51 = vadd.f32 %v14557_v9, %v4001_v24 }
 0x4f4   :  { %v5283_v0 = vor.u32 %v5281_v54, %v5280_v2  ;;  %v3619_v1 = vpop.f32.mrb[112].mxu0  ;;  %v5288_v14 = vrot.slane %v5286_v55, 7  ;;  %v5284_v34 = vrot.slane %v5280_v2, 4  ;;  %v6772_v2 = vrot.slane %v6770_v44, 4 }
 0x4f5   :  { %v10392_v31 = vpack.c.bf16 %v4135_v60, %v4135_v60  ;;  %v4136_v48 = vmax.f32 %v4072_v51, 0.0  ;;  %v3909_v19 = vadd.f32 %v17799_v17, %v3619_v1  ;;  %v3621_v10 = vpop.f32.mrb[113].mxu0  ;;  %v6126_v17 = vshrl.u32 %v14608_v4, 16 }
 0x4f6   :  { %v5664_v20 = vsel %vm14308_vm11, %v5283_v0, %v5663_v49  ;;  %v3622_v43 = vpop.f32.mrb[114].mxu0  ;;  %v5291_v47 = vor.u32 %v5289_v37, %v5288_v14  ;;  %v5293_v56 = vrot.slane %v5288_v14, 4  ;;  %v17802_v37 = vld [vmem:[#allocation21_spill] sm:$0xff] }
 0x4f7   :  { %5665 = vst [vmem:[#allocation2 + $0x15c] sm:$0xf] %v5664_v20  ;;  %v5295_v32 = vshrl.u32 %v10392_v31, 16  ;;  %v3624_v42 = vpop.f32.mrb[115].mxu0  ;;  %v10393_v26 = vpack.c.bf16 %v4136_v48, %v4136_v48  ;;  %v4002_v29 = vmul.f32 %v14534_v33, %v3909_v19  ;;  %v3912_v45 = vadd.f32 %v17800_v52, %v3622_v43  ;;  %v5748_v48 = vld [vmem:[#allocation2 + $0xac] sm:$0xf] }
 0x4f8   :  { %v5292_v58 = vsel %vm14318_vm12, %v5284_v34, %v5291_v47  ;;  %v5668_v28 = vsel %vm14324_vm13, %v5293_v56, %v5667_v8  ;;  %v5298_v39 = vshll.u32 %v10392_v31, 16  ;;  %v6773_v31 = vrot.slane %v5746_v12, 5  ;;  %v5747_v8 = vld [vmem:[#allocation2 + $0xa8] sm:$0xf]  ;;  %v5677_v52 = vld [vmem:[#allocation2 + $0x174] sm:$0xf] }
 0x4f9   :  { %v5297_v57 = vrot.slane %v5295_v32, 7  ;;  %5666 = vst [vmem:[#allocation2 + $0x160] sm:$0xf] %v5292_v58  ;;  %5669 = vst [vmem:[#allocation2 + $0x164] sm:$0x1] %v5668_v28  ;;  %v5303_v15 = vshrl.u32 %v10393_v26, 16  ;;  %v4073_v59 = vadd.f32 %v14557_v9, %v4002_v29  ;;  %v4003_v46 = vmul.f32 %v14534_v33, %v3912_v45 }
 0x4fa   :  { %v5306_v41 = vshll.u32 %v10393_v26, 16  ;;  %v6129_v43 = vshll.u32 %v14608_v4, 16  ;;  %v6774_v42 = vsel %vm12075_vm4, %v6772_v2, %v6773_v31  ;;  %v6771_v45 = vsel %vm12075_vm4, %v10133_v50, %v6770_v44  ;;  %v5681_v12 = vld [vmem:[#allocation2 + $0x17c] sm:$0x1]  ;;  %v5684_v31 = vld [vmem:[#allocation2 + $0x180] sm:$0xf] }
 0x4fb   :  { %v5300_v5 = vor.u32 %v5298_v39, %v5297_v57  ;;  %v5305_v62 = vrot.slane %v5303_v15, 7  ;;  %v4137_v22 = vmax.f32 %v4073_v59, 0.0  ;;  %v4074_v38 = vadd.f32 %v14557_v9, %v4003_v46 }
 0x4fc   :  { %v3627_v6 = vpop.f32.mrb[116].mxu0  ;;  %v5301_v40 = vrot.slane %v5297_v57, 4  ;;  %v6777_v58 = vrot.slane %v5748_v48, 5  ;;  %v10134_v39 = vrot.slane %v5747_v8, 9  ;;  %v14643_v46 = vcombine.low %v6771_v45, %v6774_v42  ;;  %v5688_v8 = vld [vmem:[#allocation2 + $0x188] sm:$0x1] }
 0x4fd   :  { %v5671_v3 = vsel %vm14308_vm11, %v5300_v5, %v5670_v63  ;;  %v3917_v7 = vadd.f32 %v17801_v11, %v3627_v6  ;;  %v3629_v24 = vpop.f32.mrb[117].mxu0  ;;  %v5308_v54 = vor.u32 %v5306_v41, %v5305_v62  ;;  %v5310_v49 = vrot.slane %v5305_v62, 4 }
 0x4fe   :  { %5672 = vst [vmem:[#allocation2 + $0x168] sm:$0xf] %v5671_v3  ;;  %v10394_v55 = vpack.c.bf16 %v4137_v22, %v4137_v22  ;;  %v4138_v60 = vmax.f32 %v4074_v38, 0.0  ;;  %v3630_v51 = vpop.f32.mrb[118].mxu0  ;;  %17804 = vst [vmem:[#allocation25_spill] sm:$0xff] %v14643_v46  ;;  %v14645_v5 = vrot.slane %v6126_v17, 4  ;;  %v14652_v3 = vsel %vm12075_vm4, %v10134_v39, %v6777_v58 }
 0x4ff   :  { %v4004_v0 = vmul.f32 %v14534_v33, %v3917_v7  ;;  %v3920_v1 = vadd.f32 %v17802_v37, %v3630_v51  ;;  %v3632_v14 = vpop.f32.mrb[119].mxu0  ;;  %v5309_v19 = vsel %vm14318_vm12, %v5301_v40, %v5308_v54  ;;  %v5675_v10 = vsel %vm14324_vm13, %v5310_v49, %v5674_v18  ;;  %v5749_v38 = vld [vmem:[#allocation2 + $0xb0] sm:$0x1] }
 0x500   :  { %v5312_v20 = vshrl.u32 %v10394_v55, 16  ;;  %5673 = vst [vmem:[#allocation2 + $0x16c] sm:$0xf] %v5309_v19  ;;  %5676 = vst [vmem:[#allocation2 + $0x170] sm:$0x1] %v5675_v10  ;;  %v10395_v34 = vpack.c.bf16 %v4138_v60, %v4138_v60  ;;  %v5315_v29 = vshll.u32 %v10394_v55, 16 }
 0x501   :  { %v4075_v47 = vadd.f32 %v14557_v9, %v4004_v0  ;;  %v4005_v56 = vmul.f32 %v14534_v33, %v3920_v1  ;;  %v6779_v18 = vrot.slane %v6777_v58, 4  ;;  %v6784_v11 = vrot.slane %v14641_v13, 5  ;;  %v5752_v10 = vld [vmem:[#allocation2 + $0xbc] sm:$0x1]  ;;  %v5750_v58 = vld [vmem:[#allocation2 + $0xb4] sm:$0xf] }
 0x502   :  { %v5314_v26 = vrot.slane %v5312_v20, 7  ;;  %v5320_v28 = vshrl.u32 %v10395_v34, 16  ;;  %v5323_v15 = vshll.u32 %v10395_v34, 16  ;;  %v6780_v51 = vrot.slane %v5749_v38, 5  ;;  %v11694_v34 = vld [vmem:[%s17264_s4 + $0x90] sm:$0xff]  }
 0x503   :  { %v4139_v57 = vmax.f32 %v4075_v47, 0.0  ;;  %v4076_v4 = vadd.f32 %v14557_v9, %v4005_v56  ;;  %v14663_v20 = vrot.slane %v6129_v43, 5  ;;  %v6786_v56 = vrot.slane %v6784_v11, 4  ;;  %8339 = vmatpush1.bf16.msra.mxu1 %v11694_v34 }
 0x504   :  { %v5317_v63 = vor.u32 %v5315_v29, %v5314_v26  ;;  %v3635_v59 = vpop.f32.mrb[120].mxu0  ;;  %v5322_v62 = vrot.slane %v5320_v28, 7  ;;  %v5318_v7 = vrot.slane %v5314_v26, 4  ;;  %v6781_v47 = vsel %vm12075_vm4, %v6779_v18, %v6780_v51  ;;  %8340 = vmatprep.subr.bf16.mxu1 %v17756_v30 }
 0x505   :  { %v10396_v41 = vpack.c.bf16 %v4139_v57, %v4139_v57  ;;  %v4140_v22 = vmax.f32 %v4076_v4, 0.0  ;;  %v3925_v44 = vadd.f32 %v14336_v21, %v3635_v59  ;;  %v3637_v50 = vpop.f32.mrb[121].mxu0  ;;  %v6135_v42 = vshll.u32 %v14602_v36, 16  ;;  %v5702_v36 = vld [vmem:[#allocation2 + $0x1a0] sm:$0x1] }
 0x506   :  { %v5678_v6 = vsel %vm14308_vm11, %v5317_v63, %v5677_v52  ;;  %v3638_v40 = vpop.f32.mrb[122].mxu0  ;;  %v5325_v24 = vor.u32 %v5323_v15, %v5322_v62  ;;  %v5327_v2 = vrot.slane %v5322_v62, 4  ;;  %v6787_v63 = vrot.slane %v5752_v10, 5  ;;  %v5754_v15 = vld [vmem:[#allocation2 + $0xc4] sm:$0xf] }
 0x507   :  { %5679 = vst [vmem:[#allocation2 + $0x174] sm:$0xf] %v5678_v6  ;;  %v5329_v54 = vshrl.u32 %v10396_v41, 16  ;;  %v3640_v21 = vpop.f32.mrb[123].mxu0  ;;  %v10397_v49 = vpack.c.bf16 %v4140_v22, %v4140_v22  ;;  %v4006_v55 = vmul.f32 %v14534_v33, %v3925_v44  ;;  %v3928_v60 = vadd.f32 %v14347_v61, %v3638_v40  ;;  %v5753_v40 = vld [vmem:[#allocation2 + $0xc0] sm:$0xf] }
 0x508   :  { %v5326_v0 = vsel %vm14318_vm12, %v5318_v7, %v5325_v24  ;;  %v5682_v37 = vsel %vm14324_vm13, %v5327_v2, %v5681_v12  ;;  %v5332_v14 = vshll.u32 %v10396_v41, 16  ;;  %v10135_v12 = vrot.slane %v5750_v58, 9 }
 0x509   :  { %v5331_v1 = vrot.slane %v5329_v54, 7  ;;  %5680 = vst [vmem:[#allocation2 + $0x178] sm:$0xf] %v5326_v0  ;;  %5683 = vst [vmem:[#allocation2 + $0x17c] sm:$0x1] %v5682_v37  ;;  %v5337_v48 = vshrl.u32 %v10397_v49, 16  ;;  %v4077_v17 = vadd.f32 %v14557_v9, %v4006_v55  ;;  %v4007_v19 = vmul.f32 %v14534_v33, %v3928_v60 }
 0x50a   :  { %v5340_v29 = vshll.u32 %v10397_v49, 16  ;;  %v6957_v2 = vrot.slane %v5754_v15, 5  ;;  %v14689_v49 = vcombine.low %v14652_v3, %v6781_v47  ;;  %v6785_v51 = vsel %vm12075_vm4, %v10135_v12, %v6784_v11  ;;  %v5691_v37 = vld [vmem:[#allocation2 + $0x18c] sm:$0xf]  ;;  %v17807_v47 = vld [vmem:[#allocation40_spill] sm:$0xff] }
 0x50b   :  { %v5334_v61 = vor.u32 %v5332_v14, %v5331_v1  ;;  %v5339_v26 = vrot.slane %v5337_v48, 7  ;;  %v4141_v52 = vmax.f32 %v4077_v17, 0.0  ;;  %v4078_v43 = vadd.f32 %v14557_v9, %v4007_v19  ;;  %v14698_v17 = vld [vmem:[#allocation2 + $0xc8] sm:$0x1] }
 0x50c   :  { %v3643_v45 = vpop.f32.mrb[124].mxu0  ;;  %v5335_v28 = vrot.slane %v5331_v1, 4  ;;  %17805 = vst [vmem:[#allocation8_spill] sm:$0xff] %v14689_v49  ;;  %v10152_v0 = vrot.slane %v5753_v40, 9  ;;  %v14704_v13 = vrot.slane %v6957_v2, 4 }
 0x50d   :  { %v5685_v57 = vsel %vm14308_vm11, %v5334_v61, %v5684_v31  ;;  %v3933_v4 = vadd.f32 %v14332_v35, %v3643_v45  ;;  %v3645_v39 = vpop.f32.mrb[125].mxu0  ;;  %v5342_v59 = vor.u32 %v5340_v29, %v5339_v26  ;;  %v5344_v62 = vrot.slane %v5339_v26, 4  ;;  %v17808_v45 = vld [vmem:[#allocation39_spill] sm:$0xff] }
 0x50e   :  { %5686 = vst [vmem:[#allocation2 + $0x180] sm:$0xf] %v5685_v57  ;;  %v10398_v41 = vpack.c.bf16 %v4141_v52, %v4141_v52  ;;  %v4142_v22 = vmax.f32 %v4078_v43, 0.0  ;;  %v3646_v44 = vpop.f32.mrb[126].mxu0  ;;  %v6788_v35 = vsel %vm12075_vm4, %v6786_v56, %v6787_v63  ;;  %v14702_v61 = vsel %vm12075_vm4, %v10152_v0, %v6957_v2  ;;  %v5695_v43 = vld [vmem:[#allocation2 + $0x194] sm:$0x1] }
 0x50f   :  { %v4008_v50 = vmul.f32 %v14534_v33, %v3933_v4  ;;  %v3936_v38 = vadd.f32 %v14343_v25, %v3646_v44  ;;  %v3648_v6 = vpop.f32.mrb[127].mxu0  ;;  %v5343_v18 = vsel %vm14318_vm12, %v5335_v28, %v5342_v59  ;;  %v5689_v7 = vsel %vm14324_vm13, %v5344_v62, %v5688_v8  ;;  %v17809_v44 = vld [vmem:[#allocation46_spill] sm:$0xff] }
 0x510   :  { %v5346_v24 = vshrl.u32 %v10398_v41, 16  ;;  %5687 = vst [vmem:[#allocation2 + $0x184] sm:$0xf] %v5343_v18  ;;  %5690 = vst [vmem:[#allocation2 + $0x188] sm:$0x1] %v5689_v7  ;;  %v10399_v54 = vpack.c.bf16 %v4142_v22, %v4142_v22  ;;  %v5349_v60 = vshll.u32 %v10398_v41, 16  ;;  %v14696_v48 = vcombine.low %v6785_v51, %v6788_v35 }
 0x511   :  { %v4079_v21 = vadd.f32 %v14557_v9, %v4008_v50  ;;  %v4009_v25 = vmul.f32 %v14534_v33, %v3936_v38  ;;  %v17810_v35 = vld [vmem:[#allocation41_spill] sm:$0xff]  ;;  %v11697_v18 = vld [vmem:[%s17264_s4 + $0x98] sm:$0xff]  }
 0x512   :  { %v5348_v55 = vrot.slane %v5346_v24, 7  ;;  %v5354_v1 = vshrl.u32 %v10399_v54, 16  ;;  %17806 = vst [vmem:[#allocation10_spill] sm:$0xff] %v14696_v48  ;;  %v5357_v3 = vshll.u32 %v10399_v54, 16  ;;  %v5698_v7 = vld [vmem:[#allocation2 + $0x198] sm:$0xf]  ;;  %8341 = vmatpush1.bf16.msra.mxu1 %v11697_v18 }
 0x513   :  { %v4143_v14 = vmax.f32 %v4079_v21, 0.0  ;;  %v4080_v31 = vadd.f32 %v14557_v9, %v4009_v25  ;;  %v14726_v21 = vrot.slane %v6135_v42, 5  ;;  %8342 = vmatprep.subr.bf16.mxu1 %v17756_v30 }
 0x514   :  { %v5351_v19 = vor.u32 %v5349_v60, %v5348_v55  ;;  %v10540_v10 = vpop.f32.mrb[128].mxu0  ;;  %v5356_v11 = vrot.slane %v5354_v1, 7  ;;  %v5352_v29 = vrot.slane %v5348_v55, 4 }
 0x515   :  { %v10400_v8 = vpack.c.bf16 %v4143_v14, %v4143_v14  ;;  %v4144_v34 = vmax.f32 %v4080_v31, 0.0  ;;  %v3693_v56 = vadd.f32 %v10540_v10, %v17807_v47  ;;  %v3684_v26 = vpop.f32.mrb[129].mxu0  ;;  %v17811_v10 = vld [vmem:[#allocation48_spill] sm:$0xff] }
 0x516   :  { %v5692_v52 = vsel %vm14308_vm11, %v5351_v19, %v5691_v37  ;;  %v3685_v58 = vadd.f32 %v3684_v26, %v17808_v45  ;;  %v10541_v28 = vpop.f32.mrb[130].mxu0  ;;  %v5359_v4 = vor.u32 %v5357_v3, %v5356_v11  ;;  %v5361_v39 = vrot.slane %v5356_v11, 4 }
 0x517   :  { %5693 = vst [vmem:[#allocation2 + $0x18c] sm:$0xf] %v5692_v52  ;;  %v5363_v63 = vshrl.u32 %v10400_v8, 16  ;;  %v5366_v15 = vshll.u32 %v10400_v8, 16  ;;  %v3687_v59 = vpop.f32.mrb[131].mxu0  ;;  %v10401_v62 = vpack.c.bf16 %v4144_v34, %v4144_v34  ;;  %v3948_v41 = vmul.f32 %v14534_v33, %v3693_v56 }
 0x518   :  { %v3946_v22 = vmul.f32 %v14534_v33, %v3685_v58  ;;  %v3696_v50 = vadd.f32 %v10541_v28, %v17809_v44  ;;  %v5360_v38 = vsel %vm14318_vm12, %v5352_v29, %v5359_v4  ;;  %v5696_v6 = vsel %vm14324_vm13, %v5361_v39, %v5695_v43  ;;  %v17812_v58 = vld [vmem:[#allocation45_spill] sm:$0xff] }
 0x519   :  { %v5365_v12 = vrot.slane %v5363_v63, 7  ;;  %v3688_v40 = vadd.f32 %v3687_v59, %v17810_v35  ;;  %5694 = vst [vmem:[#allocation2 + $0x190] sm:$0xf] %v5360_v38  ;;  %5697 = vst [vmem:[#allocation2 + $0x194] sm:$0x1] %v5696_v6  ;;  %v5371_v24 = vshrl.u32 %v10401_v62, 16  ;;  %v4019_v2 = vadd.f32 %v14557_v9, %v3948_v41 }
 0x51a   :  { %v4017_v54 = vadd.f32 %v14557_v9, %v3946_v22  ;;  %v5374_v55 = vshll.u32 %v10401_v62, 16  ;;  %v3949_v60 = vmul.f32 %v14534_v33, %v3696_v50 }
 0x51b   :  { %v5368_v25 = vor.u32 %v5366_v15, %v5365_v12  ;;  %v3947_v51 = vmul.f32 %v14534_v33, %v3688_v40  ;;  %v5369_v0 = vrot.slane %v5365_v12, 4  ;;  %v5373_v37 = vrot.slane %v5371_v24, 7  ;;  %v17813_v12 = vld [vmem:[#allocation51_spill] sm:$0xff]  ;;  %v5488_v40 = vld [vmem:[#allocation2 + $0x18] sm:$0xf] }
 0x51c   :  { %v4083_v1 = vmax.f32 %v4019_v2, 0.0  ;;  %v4081_v14 = vmax.f32 %v4017_v54, 0.0  ;;  %v10544_v31 = vpop.f32.mrb[132].mxu0  ;;  %v4020_v42 = vadd.f32 %v14557_v9, %v3949_v60 }
 0x51d   :  { %v5699_v19 = vsel %vm14308_vm11, %v5368_v25, %v5698_v7  ;;  %v4018_v3 = vadd.f32 %v14557_v9, %v3947_v51  ;;  %v3709_v11 = vadd.f32 %v10544_v31, %v17811_v10  ;;  %v3700_v8 = vpop.f32.mrb[133].mxu0  ;;  %v5376_v34 = vor.u32 %v5374_v55, %v5373_v37  ;;  %v5479_v55 = vld [vmem:[#allocation2 + $0xc] sm:$0xf] }
 0x51e   :  { %5700 = vst [vmem:[#allocation2 + $0x198] sm:$0xf] %v5699_v19  ;;  %v5378_v47 = vrot.slane %v5373_v37, 4  ;;  %v10340_v56 = vpack.c.bf16 %v4083_v1, %v4083_v1  ;;  %v10338_v26 = vpack.c.bf16 %v4081_v14, %v4081_v14  ;;  %v10545_v29 = vpop.f32.mrb[134].mxu0  ;;  %v4084_v52 = vmax.f32 %v4020_v42, 0.0 }
 0x51f   :  { %v4082_v43 = vmax.f32 %v4018_v3, 0.0  ;;  %v3952_v45 = vmul.f32 %v14534_v33, %v3709_v11  ;;  %v3701_v28 = vadd.f32 %v3700_v8, %v17812_v58  ;;  %v3703_v4 = vpop.f32.mrb[135].mxu0  ;;  %v5377_v39 = vsel %vm14318_vm12, %v5369_v0, %v5376_v34  ;;  %v5492_v3 = vld [vmem:[#allocation2 + $0x20] sm:$0x1] }
 0x520   :  { %v5703_v63 = vsel %vm14324_vm13, %v5378_v47, %v5702_v36  ;;  %v4853_v15 = vshrl.u32 %v10340_v56, 16  ;;  %v4856_v59 = vshll.u32 %v10340_v56, 16  ;;  %5701 = vst [vmem:[#allocation2 + $0x19c] sm:$0xf] %v5377_v39  ;;  %v4836_v62 = vshrl.u32 %v10338_v26, 16  ;;  %v11700_v36 = vld [vmem:[%s17264_s4 + $0xa0] sm:$0xff]  }
 0x521   :  { %5704 = vst [vmem:[#allocation2 + $0x1a0] sm:$0x1] %v5703_v63  ;;  %v4839_v41 = vshll.u32 %v10338_v26, 16  ;;  %v10341_v22 = vpack.c.bf16 %v4084_v52, %v4084_v52  ;;  %v10339_v44 = vpack.c.bf16 %v4082_v43, %v4082_v43  ;;  %v4023_v38 = vadd.f32 %v14557_v9, %v3952_v45  ;;  %v5485_v52 = vld [vmem:[#allocation2 + $0x14] sm:$0x1]  ;;  %8343 = vmatpush1.bf16.msra.mxu1 %v11700_v36 }
 0x522   :  { %v4855_v50 = vrot.slane %v4853_v15, 7  ;;  %v3950_v6 = vmul.f32 %v14534_v33, %v3701_v28  ;;  %v3712_v35 = vadd.f32 %v10545_v29, %v17813_v12  ;;  %v4838_v18 = vrot.slane %v4836_v62, 7  ;;  %8344 = vmatprep.subr.bf16.mxu1 %v17756_v30 }
 0x523   :  { %v4861_v7 = vshrl.u32 %v10341_v22, 16  ;;  %v4864_v24 = vshll.u32 %v10341_v22, 16  ;;  %v4844_v2 = vshrl.u32 %v10339_v44, 16  ;;  %v4847_v60 = vshll.u32 %v10339_v44, 16 }
 0x524   :  { %v4858_v54 = vor.u32 %v4856_v59, %v4855_v50  ;;  %v4859_v25 = vrot.slane %v4855_v50, 4  ;;  %v4087_v51 = vmax.f32 %v4023_v38, 0.0  ;;  %v10548_v0 = vpop.f32.mrb[136].mxu0  ;;  %v4841_v37 = vor.u32 %v4839_v41, %v4838_v18  ;;  %v17814_v50 = vld [vmem:[#allocation43_spill] sm:$0xff] }
 0x525   :  { %v4842_v1 = vrot.slane %v4838_v18, 4  ;;  %v4863_v14 = vrot.slane %v4861_v7, 7  ;;  %v4846_v31 = vrot.slane %v4844_v2, 7  ;;  %v3716_v19 = vpop.f32.mrb[137].mxu0  ;;  %v4021_v11 = vadd.f32 %v14557_v9, %v3950_v6  ;;  %v5502_v6 = vld [vmem:[#allocation2 + $0x30] sm:$0xf] }
 0x526   :  { %v5489_v42 = vsel %vm14308_vm11, %v4858_v54, %v5488_v40  ;;  %v10344_v10 = vpack.c.bf16 %v4087_v51, %v4087_v51  ;;  %v3953_v8 = vmul.f32 %v14534_v33, %v3712_v35  ;;  %v10549_v34 = vpop.f32.mrb[138].mxu0  ;;  %v5480_v47 = vsel %vm14308_vm11, %v4841_v37, %v5479_v55  ;;  %v17815_v35 = vld [vmem:[#allocation57_spill] sm:$0xff]  ;;  %v17816_v18 = vld [vmem:[#allocation50_spill] sm:$0xff] }
 0x527   :  { %5490 = vst [vmem:[#allocation2 + $0x18] sm:$0xf] %v5489_v42  ;;  %v4866_v56 = vor.u32 %v4864_v24, %v4863_v14  ;;  %v4868_v26 = vrot.slane %v4863_v14, 4  ;;  %v4849_v29 = vor.u32 %v4847_v60, %v4846_v31  ;;  %v3719_v43 = vpop.f32.mrb[139].mxu0  ;;  %5481 = vst [vmem:[#allocation2 + $0xc] sm:$0xf] %v5480_v47  ;;  %v3704_v38 = vadd.f32 %v3703_v4, %v17814_v50 }
 0x528   :  { %v4851_v45 = vrot.slane %v4846_v31, 4  ;;  %v4887_v58 = vshrl.u32 %v10344_v10, 16  ;;  %v4890_v28 = vshll.u32 %v10344_v10, 16  ;;  %v4085_v39 = vmax.f32 %v4021_v11, 0.0  ;;  %v17817_v24 = vld [vmem:[#allocation59_spill] sm:$0xff]  ;;  %v17818_v42 = vld [vmem:[#allocation53_spill] sm:$0xff] }
 0x529   :  { %v4867_v63 = vsel %vm14318_vm12, %v4859_v25, %v4866_v56  ;;  %v5493_v15 = vsel %vm14324_vm13, %v4868_v26, %v5492_v3  ;;  %v4850_v59 = vsel %vm14318_vm12, %v4842_v1, %v4849_v29  ;;  %v4024_v62 = vadd.f32 %v14557_v9, %v3953_v8  ;;  %v5495_v11 = vld [vmem:[#allocation2 + $0x24] sm:$0xf] }
 0x52a   :  { %5491 = vst [vmem:[#allocation2 + $0x1c] sm:$0xf] %v4867_v63  ;;  %5494 = vst [vmem:[#allocation2 + $0x20] sm:$0x1] %v5493_v15  ;;  %v5486_v41 = vsel %vm14324_vm13, %v4851_v45, %v5485_v52  ;;  %v4889_v22 = vrot.slane %v4887_v58, 7  ;;  %v10342_v44 = vpack.c.bf16 %v4085_v39, %v4085_v39  ;;  %v3725_v40 = vadd.f32 %v10548_v0, %v17815_v35 }
 0x52b   :  { %5482 = vst [vmem:[#allocation2 + $0x10] sm:$0xf] %v4850_v59  ;;  %5487 = vst [vmem:[#allocation2 + $0x14] sm:$0x1] %v5486_v41  ;;  %v4088_v12 = vmax.f32 %v4024_v62, 0.0  ;;  %v3717_v7 = vadd.f32 %v3716_v19, %v17816_v18  ;;  %v3728_v2 = vadd.f32 %v10549_v34, %v17817_v24  ;;  %v3951_v1 = vmul.f32 %v14534_v33, %v3704_v38 }
 0x52c   :  { %v4892_v54 = vor.u32 %v4890_v28, %v4889_v22  ;;  %v4893_v25 = vrot.slane %v4889_v22, 4  ;;  %v4870_v55 = vshrl.u32 %v10342_v44, 16  ;;  %v4873_v60 = vshll.u32 %v10342_v44, 16  ;;  %v10552_v51 = vpop.f32.mrb[140].mxu0  ;;  %v5506_v59 = vld [vmem:[#allocation2 + $0x38] sm:$0x1] }
 0x52d   :  { %v10345_v37 = vpack.c.bf16 %v4088_v12, %v4088_v12  ;;  %v3956_v14 = vmul.f32 %v14534_v33, %v3725_v40  ;;  %v3954_v4 = vmul.f32 %v14534_v33, %v3717_v7  ;;  %v14771_v31 = vpop.f32.mrb[141].mxu0  ;;  %v3957_v36 = vmul.f32 %v14534_v33, %v3728_v2  ;;  %v17819_v22 = vld [vmem:[#allocation61_spill] sm:$0xff]  ;;  %v14797_v2 = vpop.f32.mrb[40].mxu1 }
 0x52e   :  { %v5503_v0 = vsel %vm14308_vm11, %v4892_v54, %v5502_v6  ;;  %v14775_v19 = vrot.slane %v4870_v55, 7  ;;  %v3720_v3 = vadd.f32 %v3719_v43, %v17818_v42  ;;  %v14779_v10 = vpop.f32.mrb[142].mxu0  ;;  %v4022_v47 = vadd.f32 %v14557_v9, %v3951_v1  ;;  %17820 = vst [vmem:[#allocation12_spill] sm:$0xff] %v14797_v2  ;;  %v11703_v1 = vld [vmem:[%s17264_s4 + $0xa8] sm:$0xff]   ;;  %v14808_v42 = vpop.f32.mrb[41].mxu1 }
 0x52f   :  { %5504 = vst [vmem:[#allocation2 + $0x30] sm:$0xf] %v5503_v0  ;;  %v4895_v8 = vshrl.u32 %v10345_v37, 16  ;;  %v4898_v34 = vshll.u32 %v10345_v37, 16  ;;  %v4027_v56 = vadd.f32 %v14557_v9, %v3956_v14  ;;  %v14783_v26 = vpop.f32.mrb[143].mxu0  ;;  %v4025_v45 = vadd.f32 %v14557_v9, %v3954_v4  ;;  %17821 = vst [vmem:[#allocation14_spill] sm:$0xff] %v14808_v42  ;;  %8345 = vmatpush1.bf16.msra.mxu1 %v11703_v1 }
 0x530   :  { %v4875_v29 = vor.u32 %v4873_v60, %v14775_v19  ;;  %v4876_v52 = vrot.slane %v14775_v19, 4  ;;  %v4028_v43 = vadd.f32 %v14557_v9, %v3957_v36  ;;  %v4086_v28 = vmax.f32 %v4022_v47, 0.0  ;;  %v14812_v47 = vpop.f32.mrb[42].mxu1  ;;  %8346 = vmatprep.subr.bf16.mxu1 %v17756_v30 }
 0x531   :  { %v4897_v58 = vrot.slane %v4895_v8, 7  ;;  %v4091_v39 = vmax.f32 %v4027_v56, 0.0  ;;  %v3955_v63 = vmul.f32 %v14534_v33, %v3720_v3  ;;  %v4089_v62 = vmax.f32 %v4025_v45, 0.0  ;;  %17822 = vst [vmem:[#allocation16_spill] sm:$0xff] %v14812_v47  ;;  %v5499_v56 = vld [vmem:[#allocation2 + $0x2c] sm:$0x1] }
 0x532   :  { %v5496_v15 = vsel %vm14308_vm11, %v4875_v29, %v5495_v11  ;;  %v4092_v41 = vmax.f32 %v4028_v43, 0.0  ;;  %v3741_v44 = vadd.f32 %v10552_v51, %v17819_v22  ;;  %v10343_v6 = vpack.c.bf16 %v4086_v28, %v4086_v28  ;;  %v5516_v45 = vld [vmem:[#allocation2 + $0x48] sm:$0xf]  ;;  %v14818_v22 = vpop.f32.mrb[43].mxu1 }
 0x533   :  { %5497 = vst [vmem:[#allocation2 + $0x24] sm:$0xf] %v5496_v15  ;;  %v4900_v50 = vor.u32 %v4898_v34, %v4897_v58  ;;  %v4902_v38 = vrot.slane %v4897_v58, 4  ;;  %v10348_v12 = vpack.c.bf16 %v4091_v39, %v4091_v39  ;;  %v10346_v35 = vpack.c.bf16 %v4089_v62, %v4089_v62  ;;  %v17823_v28 = vld [vmem:[#allocation58_spill] sm:$0xff]  ;;  %17824 = vst [vmem:[#allocation18_spill] sm:$0xff] %v14818_v22  ;;  %v14832_v19 = vpop.f32.mrb[44].mxu1 }
 0x534   :  { %v10349_v40 = vpack.c.bf16 %v4092_v41, %v4092_v41  ;;  %v4026_v18 = vadd.f32 %v14557_v9, %v3955_v63  ;;  %v3960_v7 = vmul.f32 %v14534_v33, %v3741_v44  ;;  %v14795_v24 = vpop.f32.mrb[144].mxu0  ;;  %v4878_v60 = vshrl.u32 %v10343_v6, 16  ;;  %17825 = vst [vmem:[#allocation20_spill] sm:$0xff] %v14832_v19 }
 0x535   :  { %v4901_v54 = vsel %vm14318_vm12, %v4893_v25, %v4900_v50  ;;  %v5507_v55 = vsel %vm14324_vm13, %v4902_v38, %v5506_v59  ;;  %v4881_v51 = vshll.u32 %v10343_v6, 16  ;;  %v14803_v37 = vpop.f32.mrb[145].mxu0  ;;  %v4921_v33 = vshrl.u32 %v10348_v12, 16  ;;  %v5509_v59 = vld [vmem:[#allocation2 + $0x3c] sm:$0xf] }
 0x536   :  { %5505 = vst [vmem:[#allocation2 + $0x34] sm:$0xf] %v4901_v54  ;;  %5508 = vst [vmem:[#allocation2 + $0x38] sm:$0x1] %v5507_v55  ;;  %v4924_v14 = vshll.u32 %v10348_v12, 16  ;;  %v4904_v4 = vshrl.u32 %v10346_v35, 16  ;;  %v4031_v58 = vadd.f32 %v14557_v9, %v3960_v7  ;;  %v3733_v39 = vadd.f32 %v14771_v31, %v17823_v28 }
 0x537   :  { %v4907_v0 = vshll.u32 %v10346_v35, 16  ;;  %v10557_v36 = vpop.f32.mrb[146].mxu0  ;;  %v4880_v25 = vrot.slane %v4878_v60, 7  ;;  %v4929_v3 = vshrl.u32 %v10349_v40, 16  ;;  %v4932_v11 = vshll.u32 %v10349_v40, 16 }
 0x538   :  { %v4090_v8 = vmax.f32 %v4026_v18, 0.0  ;;  %v14810_v34 = vpop.f32.mrb[147].mxu0  ;;  %v4923_v29 = vrot.slane %v4921_v33, 7  ;;  %v4906_v43 = vrot.slane %v4904_v4, 7  ;;  %v5520_v12 = vld [vmem:[#allocation2 + $0x50] sm:$0x1] }
 0x539   :  { %v4883_v63 = vor.u32 %v4881_v51, %v4880_v25  ;;  %v4885_v15 = vrot.slane %v4880_v25, 4  ;;  %v4931_v62 = vrot.slane %v4929_v3, 7  ;;  %v4095_v1 = vmax.f32 %v4031_v58, 0.0  ;;  %v14841_v33 = vld [vmem:[%s17265_s2] ss:$0 sm:$0xff] }
 0x53a   :  { %v10347_v41 = vpack.c.bf16 %v4090_v8, %v4090_v8  ;;  %v4926_v44 = vor.u32 %v4924_v14, %v4923_v29  ;;  %v4927_v50 = vrot.slane %v4923_v29, 4  ;;  %v4909_v38 = vor.u32 %v4907_v0, %v4906_v43  ;;  %v17826_v25 = vld [vmem:[#allocation65_spill] sm:$0xff] }
 0x53b   :  { %v4910_v6 = vrot.slane %v4906_v43, 4  ;;  %v4884_v9 = vsel %vm14318_vm12, %v4876_v52, %v4883_v63  ;;  %v5500_v31 = vsel %vm14324_vm13, %v4885_v15, %v5499_v56  ;;  %v4934_v35 = vor.u32 %v4932_v11, %v4931_v62  ;;  %v17827_v11 = vld [vmem:[#allocation63_spill] sm:$0xff]  ;;  %v17828_v56 = vld [vmem:[#allocation5_spill] sm:$0xff]  ;;  %v14854_v43 = vpop.f32.mrb[45].mxu1 }
 0x53c   :  { %v4936_v40 = vrot.slane %v4931_v62, 4  ;;  %5498 = vst [vmem:[#allocation2 + $0x28] sm:$0xf] %v4884_v9  ;;  %5501 = vst [vmem:[#allocation2 + $0x2c] sm:$0x1] %v5500_v31  ;;  %v5517_v18 = vsel %vm14308_vm11, %v4926_v44, %v5516_v45  ;;  %v5510_v7 = vsel %vm14308_vm11, %v4909_v38, %v5509_v59  ;;  %v4912_v54 = vshrl.u32 %v10347_v41, 16 }
 0x53d   :  { %v4915_v55 = vshll.u32 %v10347_v41, 16  ;;  %v14830_v60 = vpop.f32.mrb[148].mxu0  ;;  %5518 = vst [vmem:[#allocation2 + $0x48] sm:$0xf] %v5517_v18  ;;  %5511 = vst [vmem:[#allocation2 + $0x3c] sm:$0xf] %v5510_v7  ;;  %v4935_v52 = vsel %vm14318_vm12, %v4927_v50, %v4934_v35  ;;  %v3958_v14 = vmul.f32 %v14841_v33, %v3733_v39  ;;  %v3744_v3 = vadd.f32 %v14779_v10, %v17826_v25 }
 0x53e   :  { %v5521_v51 = vsel %vm14324_vm13, %v4936_v40, %v5520_v12  ;;  %v14844_v4 = vpop.f32.mrb[149].mxu0  ;;  %5519 = vst [vmem:[#allocation2 + $0x4c] sm:$0xf] %v4935_v52  ;;  %v4914_v0 = vrot.slane %v4912_v54, 7  ;;  %v3736_v8 = vadd.f32 %v14783_v26, %v17827_v11  ;;  %v3757_v29 = vadd.f32 %v14795_v24, %v17828_v56  ;;  %17829 = vst [vmem:[#allocation22_spill] sm:$0xff] %v14854_v43  ;;  %v17830_v10 = vld [vmem:[#allocation69_spill] sm:$0xff] }
 0x53f   :  { %5522 = vst [vmem:[#allocation2 + $0x50] sm:$0x1] %v5521_v51  ;;  %v14852_v45 = vpop.f32.mrb[150].mxu0  ;;  %v5513_v58 = vld [vmem:[#allocation2 + $0x44] sm:$0x1]  ;;  %v10352_v28 = vpack.c.bf16 %v4095_v1, %v4095_v1  ;;  %v3749_v15 = vadd.f32 %v14803_v37, %v17830_v10  ;;  %v17831_v26 = vld [vmem:[#allocation6_spill] sm:$0xff]  ;;  %v3961_v50 = vmul.f32 %v14841_v33, %v3744_v3 }
 0x540   :  { %v14859_v39 = vld [vmem:[%s17266_s3] ss:$0 sm:$0xff]  ;;  %v3760_v59 = vadd.f32 %v10557_v36, %v17831_v26  ;;  %v14865_v62 = vpop.f32.mrb[151].mxu0  ;;  %v14867_v24 = vpop.f32.mrb[46].mxu1  ;;  %v4917_v41 = vor.u32 %v4915_v55, %v4914_v0  ;;  %v4919_v44 = vrot.slane %v4914_v0, 4  ;;  %v3959_v38 = vmul.f32 %v14841_v33, %v3736_v8  ;;  %v17834_v25 = vld [vmem:[#allocation72_spill] sm:$0xff] }
 0x541   :  { %v4029_v63 = vadd.f32 %v14859_v39, %v3958_v14  ;;  %17832 = vst [vmem:[#allocation24_spill] sm:$0xff] %v14867_v24  ;;  %v14871_v12 = vpop.f32.mrb[47].mxu1  ;;  %v4955_v9 = vshrl.u32 %v10352_v28, 16  ;;  %v4958_v31 = vshll.u32 %v10352_v28, 16  ;;  %v3964_v40 = vmul.f32 %v14841_v33, %v3757_v29  ;;  %v5530_v1 = vld [vmem:[#allocation2 + $0x60] sm:$0xf] }
 0x542   :  { %17833 = vst [vmem:[#allocation26_spill] sm:$0xff] %v14871_v12  ;;  %v4918_v37 = vsel %vm14318_vm12, %v4910_v6, %v4917_v41  ;;  %v5514_v36 = vsel %vm14324_vm13, %v4919_v44, %v5513_v58  ;;  %v4032_v18 = vadd.f32 %v14859_v39, %v3961_v50  ;;  %v4030_v7 = vadd.f32 %v14859_v39, %v3959_v38  ;;  %v14889_v58 = vpop.f32.mrb[48].mxu1  ;;  %v11706_v26 = vld [vmem:[%s17264_s4 + $0xb0] sm:$0xff]  }
 0x543   :  { %v4093_v35 = vmax.f32 %v4029_v63, 0.0  ;;  %5512 = vst [vmem:[#allocation2 + $0x40] sm:$0xf] %v4918_v37  ;;  %5515 = vst [vmem:[#allocation2 + $0x44] sm:$0x1] %v5514_v36  ;;  %v14880_v54 = vrot.slane %v4955_v9, 7  ;;  %v4035_v52 = vadd.f32 %v14859_v39, %v3964_v40  ;;  %v3962_v51 = vmul.f32 %v14841_v33, %v3749_v15  ;;  %8347 = vmatpush1.bf16.msra.mxu1 %v11706_v26 }
 0x544   :  { %v4096_v14 = vmax.f32 %v4032_v18, 0.0  ;;  %v4094_v0 = vmax.f32 %v4030_v7, 0.0  ;;  %v3965_v6 = vmul.f32 %v14841_v33, %v3760_v59  ;;  %v3752_v3 = vadd.f32 %v14810_v34, %v17834_v25  ;;  %17835 = vst [vmem:[#allocation27_spill] sm:$0xff] %v14889_v58  ;;  %v14895_v59 = vpop.f32.mrb[49].mxu1  ;;  %v5523_v44 = vld [vmem:[#allocation2 + $0x54] sm:$0xf]  ;;  %8348 = vmatprep.subr.bf16.mxu1 %v17756_v30 }
 0x545   :  { %v10350_v55 = vpack.c.bf16 %v4093_v35, %v4093_v35  ;;  %v4960_v11 = vor.u32 %v4958_v31, %v14880_v54  ;;  %v4961_v8 = vrot.slane %v14880_v54, 4  ;;  %v4099_v10 = vmax.f32 %v4035_v52, 0.0  ;;  %17836 = vst [vmem:[#allocation28_spill] sm:$0xff] %v14895_v59  ;;  %v14901_v9 = vpop.f32.mrb[50].mxu1  ;;  %v5527_v25 = vld [vmem:[#allocation2 + $0x5c] sm:$0x1] }
 0x546   :  { %v10353_v28 = vpack.c.bf16 %v4096_v14, %v4096_v14  ;;  %v10351_v63 = vpack.c.bf16 %v4094_v0, %v4094_v0  ;;  %v4033_v15 = vadd.f32 %v14859_v39, %v3962_v51  ;;  %v4036_v50 = vadd.f32 %v14859_v39, %v3965_v6  ;;  %17837 = vst [vmem:[#allocation29_spill] sm:$0xff] %v14901_v9  ;;  %v14903_v36 = vpop.f32.mrb[51].mxu1  ;;  %v5534_v6 = vld [vmem:[#allocation2 + $0x68] sm:$0x1] }
 0x547   :  { %v4938_v56 = vshrl.u32 %v10350_v55, 16  ;;  %v4941_v29 = vshll.u32 %v10350_v55, 16  ;;  %v5531_v34 = vsel %vm14308_vm11, %v4960_v11, %v5530_v1  ;;  %v3963_v38 = vmul.f32 %v14841_v33, %v3752_v3  ;;  %17838 = vst [vmem:[#allocation30_spill] sm:$0xff] %v14903_v36  ;;  %v14911_v26 = vpop.f32.mrb[52].mxu1 }
 0x548   :  { %5532 = vst [vmem:[#allocation2 + $0x60] sm:$0xf] %v5531_v34  ;;  %v4963_v31 = vshrl.u32 %v10353_v28, 16  ;;  %v4966_v35 = vshll.u32 %v10353_v28, 16  ;;  %v4946_v40 = vshrl.u32 %v10351_v63, 16  ;;  %v4949_v37 = vshll.u32 %v10351_v63, 16 }
 0x549   :  { %v4940_v41 = vrot.slane %v4938_v56, 7  ;;  %v10356_v54 = vpack.c.bf16 %v4099_v10, %v4099_v10  ;;  %v4097_v55 = vmax.f32 %v4033_v15, 0.0  ;;  %v4100_v1 = vmax.f32 %v4036_v50, 0.0  ;;  %v14909_v15 = vld [vmem:[#allocation2 + $0x18] sm:$0xf]  ;;  %17839 = vst [vmem:[#allocation35_spill] sm:$0xff] %v14911_v26 }
 0x54a   :  { %v4965_v52 = vrot.slane %v4963_v31, 7  ;;  %v4948_v51 = vrot.slane %v4946_v40, 7  ;;  %v4034_v14 = vadd.f32 %v14859_v39, %v3963_v38  ;;  %v14913_v31 = vld [vmem:[#allocation2 + $0x1c] sm:$0xf] }
 0x54b   :  { %v4943_v18 = vor.u32 %v4941_v29, %v4940_v41  ;;  %v4944_v7 = vrot.slane %v4940_v41, 4  ;;  %v4989_v3 = vshrl.u32 %v10356_v54, 16  ;;  %v4992_v11 = vshll.u32 %v10356_v54, 16  ;;  %v5544_v54 = vld [vmem:[#allocation2 + $0x78] sm:$0xf] }
 0x54c   :  { %v10354_v56 = vpack.c.bf16 %v4097_v55, %v4097_v55  ;;  %v4968_v29 = vor.u32 %v4966_v35, %v4965_v52  ;;  %v4970_v28 = vrot.slane %v4965_v52, 4  ;;  %v4951_v63 = vor.u32 %v4949_v37, %v4948_v51  ;;  %v5537_v55 = vld [vmem:[#allocation2 + $0x6c] sm:$0xf] }
 0x54d   :  { %v5524_v0 = vsel %vm14308_vm11, %v4943_v18, %v5523_v44  ;;  %v4953_v10 = vrot.slane %v4948_v51, 4  ;;  %v4991_v34 = vrot.slane %v4989_v3, 7  ;;  %v10357_v38 = vpack.c.bf16 %v4100_v1, %v4100_v1  ;;  %v14915_v44 = vpop.f32.mrb[53].mxu1 }
 0x54e   :  { %5525 = vst [vmem:[#allocation2 + $0x54] sm:$0xf] %v5524_v0  ;;  %v4972_v41 = vshrl.u32 %v10354_v56, 16  ;;  %v4975_v50 = vshll.u32 %v10354_v56, 16  ;;  %17840 = vst [vmem:[#allocation91_spill] sm:$0xff] %v14915_v44  ;;  %v4969_v40 = vsel %vm14318_vm12, %v4961_v8, %v4968_v29  ;;  %v5535_v35 = vsel %vm14324_vm13, %v4970_v28, %v5534_v6  ;;  %v14925_v52 = vpop.f32.mrb[54].mxu1 }
 0x54f   :  { %v4952_v37 = vsel %vm14318_vm12, %v4944_v7, %v4951_v63  ;;  %v5528_v18 = vsel %vm14324_vm13, %v4953_v10, %v5527_v25  ;;  %17841 = vst [vmem:[#allocation4_spill] sm:$0xff] %v14925_v52  ;;  %5533 = vst [vmem:[#allocation2 + $0x64] sm:$0xf] %v4969_v40  ;;  %v4994_v51 = vor.u32 %v4992_v11, %v4991_v34  ;;  %v4995_v1 = vrot.slane %v4991_v34, 4  ;;  %v14929_v6 = vld [vmem:[#allocation2 + $0x20] sm:$0x1] }
 0x550   :  { %5536 = vst [vmem:[#allocation2 + $0x68] sm:$0x1] %v5535_v35  ;;  %5526 = vst [vmem:[#allocation2 + $0x58] sm:$0xf] %v4952_v37  ;;  %v14927_v8 = vrot.slane %v4972_v41, 7  ;;  %v4997_v0 = vshrl.u32 %v10357_v38, 16 }
 0x551   :  { %5529 = vst [vmem:[#allocation2 + $0x5c] sm:$0x1] %v5528_v18  ;;  %v5000_v3 = vshll.u32 %v10357_v38, 16  ;;  %v4098_v7 = vmax.f32 %v4034_v14, 0.0  ;;  %v10122_v56 = vrot.slane %v14909_v15, 9  ;;  %v6693_v25 = vrot.slane %v14913_v31, 5 }
 0x552   :  { %v14933_v29 = vpop.f32.mrb[55].mxu1  ;;  %v5545_v28 = vsel %vm14308_vm11, %v4994_v51, %v5544_v54  ;;  %v4977_v63 = vor.u32 %v4975_v50, %v14927_v8  ;;  %v4978_v11 = vrot.slane %v14927_v8, 4  ;;  %v4999_v10 = vrot.slane %v4997_v0, 7  ;;  %v14939_v34 = vld [vmem:[#allocation2 + $0xc] sm:$0xf]  ;;  %v17843_v50 = vld [vmem:[#allocation13_spill] sm:$0xff] }
 0x553   :  { %17842 = vst [vmem:[#allocation32_spill] sm:$0xff] %v14933_v29  ;;  %5546 = vst [vmem:[#allocation2 + $0x78] sm:$0xf] %v5545_v28  ;;  %v5548_v41 = vld [vmem:[#allocation2 + $0x80] sm:$0x1]  ;;  %v10355_v38 = vpack.c.bf16 %v4098_v7, %v4098_v7  ;;  %v6694_v14 = vsel %vm12075_vm4, %v10122_v56, %v6693_v25  ;;  %v6695_v40 = vrot.slane %v6693_v25, 4  ;;  %v3773_v51 = vadd.f32 %v14830_v60, %v17843_v50 }
 0x554   :  { %v6696_v35 = vrot.slane %v14929_v6, 5  ;;  %v5538_v37 = vsel %vm14308_vm11, %v4977_v63, %v5537_v55  ;;  %v5002_v18 = vor.u32 %v5000_v3, %v4999_v10  ;;  %v5004_v54 = vrot.slane %v4999_v10, 4  ;;  %v14948_v8 = vld [vmem:[#allocation2 + $0x10] sm:$0xf]  ;;  %v5710_v56 = vld [vmem:[#allocation2 + $0x14] sm:$0x1] }
 0x555   :  { %5539 = vst [vmem:[#allocation2 + $0x6c] sm:$0xf] %v5538_v37  ;;  %v4980_v0 = vshrl.u32 %v10355_v38, 16  ;;  %v4983_v28 = vshll.u32 %v10355_v38, 16  ;;  %v5838_v25 = vshrl.u32 %v14939_v34, 16  ;;  %v14953_v57 = vpop.f32.mrb[56].mxu1  ;;  %v3968_v63 = vmul.f32 %v14841_v33, %v3773_v51 }
 0x556   :  { %v6697_v7 = vsel %vm12075_vm4, %v6695_v40, %v6696_v35  ;;  %17844 = vst [vmem:[#allocation33_spill] sm:$0xff] %v14953_v57  ;;  %v5003_v55 = vsel %vm14318_vm12, %v4995_v1, %v5002_v18  ;;  %v5549_v3 = vsel %vm14324_vm13, %v5004_v54, %v5548_v41  ;;  %v11709_v10 = vld [vmem:[%s17264_s4 + $0xb8] sm:$0xff]   ;;  %v14965_v38 = vpop.f32.mrb[57].mxu1  ;;  %v5841_v37 = vshll.u32 %v14939_v34, 16  ;;  %v5541_v18 = vld [vmem:[#allocation2 + $0x74] sm:$0x1] }
 0x557   :  { %v14959_v60 = vcombine.low %v6694_v14, %v6697_v7  ;;  %17846 = vst [vmem:[#allocation37_spill] sm:$0xff] %v14965_v38  ;;  %5547 = vst [vmem:[#allocation2 + $0x7c] sm:$0xf] %v5003_v55  ;;  %v4982_v40 = vrot.slane %v4980_v0, 7  ;;  %v5840_v35 = vrot.slane %v5838_v25, 4  ;;  %v5847_v1 = vshll.u32 %v14948_v8, 16  ;;  %8349 = vmatpush1.bf16.msra.mxu1 %v11709_v10 }
 0x558   :  { %5550 = vst [vmem:[#allocation2 + $0x80] sm:$0x1] %v5549_v3  ;;  %v4039_v41 = vadd.f32 %v14859_v39, %v3968_v63  ;;  %v5851_v14 = vshrl.u32 %v14948_v8, 16  ;;  %v5857_v54 = vshll.u32 %v5710_v56, 16  ;;  %v17847_v50 = vld [vmem:[#allocation7_spill] sm:$0xff]  ;;  %v5843_v0 = vrot.slane %v5841_v37, 5  ;;  %8350 = vmatprep.subr.bf16.mxu1 %v17756_v30 }
 0x559   :  { %17845 = vst [vmem:[#allocation34_spill] sm:$0xff] %v14959_v60  ;;  %10698 = vmatprep.mubr.bf16.mxu0 %v14959_v60  ;;  %v3765_v51 = vadd.f32 %v14844_v4, %v17847_v50  ;;  %v4985_v7 = vor.u32 %v4983_v28, %v4982_v40  ;;  %v4987_v55 = vrot.slane %v4982_v40, 4  ;;  %v5849_v25 = vrot.slane %v5847_v1, 5  ;;  %v14974_v3 = vpop.f32.mrb[58].mxu1  ;;  %v14978_v63 = vld [vmem:[#allocation2 + $0xa0] sm:$0xf] }
 0x55a   :  { %17848 = vst [vmem:[#allocation38_spill] sm:$0xff] %v14974_v3  ;;  %v4103_v57 = vmax.f32 %v4039_v41, 0.0  ;;  %v5853_v38 = vrot.slane %v5851_v14, 4  ;;  %v14981_v26 = vpop.f32.mrb[59].mxu1  ;;  %v5844_v10 = vor.u32 %v5843_v0, %v5840_v35  ;;  %v5859_v40 = vrot.slane %v5857_v54, 5  ;;  %v17850_v14 = vld [vmem:[#allocation15_spill] sm:$0xff] }
 0x55b   :  { %v3966_v52 = vmul.f32 %v14841_v33, %v3765_v51  ;;  %17849 = vst [vmem:[#allocation42_spill] sm:$0xff] %v14981_v26  ;;  %v4986_v4 = vsel %vm14318_vm12, %v4978_v11, %v4985_v7  ;;  %v5542_v28 = vsel %vm14324_vm13, %v4987_v55, %v5541_v18  ;;  %v3776_v50 = vadd.f32 %v14852_v45, %v17850_v14  ;;  %v14993_v7 = vpop.f32.mrb[60].mxu1  ;;  %v15108_v26 = vld [vmem:[#allocation2 + $0x48] sm:$0xf]  ;;  %v15114_v29 = vld [vmem:[#allocation2 + $0x4c] sm:$0xf] }
 0x55c   :  { %5540 = vst [vmem:[#allocation2 + $0x70] sm:$0xf] %v4986_v4  ;;  %5543 = vst [vmem:[#allocation2 + $0x74] sm:$0x1] %v5542_v28  ;;  %v10360_v37 = vpack.c.bf16 %v4103_v57, %v4103_v57  ;;  %v5854_v1 = vor.u32 %v5853_v38, %v5849_v25  ;;  %v5845_v51 = vrot.slane %v5844_v10, 4  ;;  %v5862_v56 = vshrl.u32 %v14909_v15, 16 }
 0x55d   :  { %v4037_v41 = vadd.f32 %v14859_v39, %v3966_v52  ;;  %v5865_v3 = vshll.u32 %v14909_v15, 16  ;;  %v5871_v11 = vshll.u32 %v14913_v31, 16  ;;  %17851 = vst [vmem:[#allocation44_spill] sm:$0xff] %v14993_v7  ;;  %v3969_v52 = vmul.f32 %v14841_v33, %v3776_v50  ;;  %v14998_v0 = vpop.f32.mrb[61].mxu1  ;;  %v15142_v16 = vld [vmem:[#allocation2 + $0x58] sm:$0xf] }
 0x55e   :  { %v5023_v35 = vshrl.u32 %v10360_v37, 16  ;;  %v5026_v18 = vshll.u32 %v10360_v37, 16  ;;  %v5855_v54 = vrot.slane %v5854_v1, 4  ;;  %v5850_v57 = vsel %vm12086_vm5, %v5845_v51, %v5849_v25  ;;  %17852 = vst [vmem:[#allocation47_spill] sm:$0xff] %v14998_v0  ;;  %v15004_v7 = vpop.f32.mrb[62].mxu1 }
 0x55f   :  { %v4101_v55 = vmax.f32 %v4037_v41, 0.0  ;;  %v5864_v38 = vrot.slane %v5862_v56, 4  ;;  %v5867_v45 = vrot.slane %v5865_v3, 5  ;;  %v5873_v14 = vrot.slane %v5871_v11, 5  ;;  %17853 = vst [vmem:[#allocation49_spill] sm:$0xff] %v15004_v7  ;;  %v15010_v3 = vpop.f32.mrb[63].mxu1 }
 0x560   :  { %v15000_v4 = vrot.slane %v5023_v35, 7  ;;  %v5860_v28 = vsel %vm12086_vm5, %v5855_v54, %v5859_v40  ;;  %v5558_v37 = vld [vmem:[#allocation2 + $0x90] sm:$0xf]  ;;  %v4040_v25 = vadd.f32 %v14859_v39, %v3969_v52  ;;  %v5875_v56 = vshrl.u32 %v14913_v31, 16  ;;  %17855 = vst [vmem:[#allocation54_spill] sm:$0xff] %v15010_v3 }
 0x561   :  { %v10358_v10 = vpack.c.bf16 %v4101_v55, %v4101_v55  ;;  %v15006_v1 = vcombine.low %v5850_v57, %v5860_v28  ;;  %v5868_v41 = vor.u32 %v5867_v45, %v5864_v38  ;;  %v15016_v40 = vcombine.low %v14939_v34, %v14948_v8  ;;  %v15018_v11 = vld [vmem:[#allocation2 + $0x24] sm:$0xf]  ;;  %v15022_v38 = vld [vmem:[#allocation2 + $0x28] sm:$0xf]  ;;  %v15055_v0 = vld [vmem:[#allocation2 + $0x38] sm:$0x1] }
 0x562   :  { %v5028_v50 = vor.u32 %v5026_v18, %v15000_v4  ;;  %v4104_v54 = vmax.f32 %v4040_v25, 0.0  ;;  %v5877_v57 = vrot.slane %v5875_v56, 4  ;;  %v5881_v52 = vshll.u32 %v14929_v6, 16  ;;  %v17857_v34 = vld [vmem:[#allocation9_spill] sm:$0xff]  ;;  %v15033_v56 = vld [vmem:[#allocation2 + $0x2c] sm:$0x1] }
 0x563   :  { %17854 = vst [vmem:[#allocation52_spill] sm:$0xff] %v15006_v1  ;;  %v5006_v35 = vshrl.u32 %v10358_v10, 16  ;;  %17856 = vst [vmem:[#allocation55_spill] sm:$0xff] %v15016_v40  ;;  %8085 = vmatprep.mubr.bf16.mxu1 %v15006_v1  ;;  %v5869_v55 = vrot.slane %v5868_v41, 4  ;;  %v5009_v28 = vshll.u32 %v10358_v10, 16  ;;  %v3768_v8 = vadd.f32 %v14865_v62, %v17857_v34 }
 0x564   :  { %v5559_v18 = vsel %vm14308_vm11, %v5028_v50, %v5558_v37  ;;  %8086 = vmatmul.mubr.bf16.gmra.mrb[108].mxu1 %v15016_v40  ;;  %v5551_v51 = vld [vmem:[#allocation2 + $0x84] sm:$0xf]  ;;  %v10361_v25 = vpack.c.bf16 %v4104_v54, %v4104_v54  ;;  %v5878_v6 = vor.u32 %v5877_v57, %v5873_v14  ;;  %v10123_v7 = vrot.slane %v15018_v11, 9  ;;  %v15036_v37 = vpop.f32.mrb[64].mxu1  ;;  %v15043_v54 = vld [vmem:[#allocation2 + $0x34] sm:$0xf] }
 0x565   :  { %v15026_v45 = vrot.slane %v5006_v35, 7  ;;  %5560 = vst [vmem:[#allocation2 + $0x90] sm:$0xf] %v5559_v18  ;;  %v5874_v41 = vsel %vm12086_vm5, %v5869_v55, %v5873_v14  ;;  %17858 = vst [vmem:[#allocation56_spill] sm:$0xff] %v15036_v37  ;;  %v5883_v50 = vrot.slane %v5881_v52, 5  ;;  %v3967_v35 = vmul.f32 %v14841_v33, %v3768_v8  ;;  %v11712_v37 = vld [vmem:[%s17264_s4 + $0xc0] sm:$0xff]  }
 0x566   :  { %v6700_v62 = vrot.slane %v15022_v38, 5  ;;  %v15041_v18 = vld [vmem:[#allocation2 + $0x30] sm:$0xf]  ;;  %v5031_v14 = vshrl.u32 %v10361_v25, 16  ;;  %v5034_v57 = vshll.u32 %v10361_v25, 16  ;;  %v5879_v34 = vrot.slane %v5878_v6, 4  ;;  %8351 = vmatpush1.bf16.msra.mxu1 %v11712_v37 }
 0x567   :  { %v5011_v10 = vor.u32 %v5009_v28, %v15026_v45  ;;  %v15049_v3 = vpop.f32.mrb[65].mxu1  ;;  %v4038_v52 = vadd.f32 %v14859_v39, %v3967_v35  ;;  %v6703_v8 = vrot.slane %v15033_v56, 5  ;;  %v6707_v53 = vrot.slane %v15043_v54, 5  ;;  %v5562_v39 = vld [vmem:[#allocation2 + $0x98] sm:$0x1]  ;;  %8352 = vmatprep.subr.bf16.mxu1 %v17756_v30 }
 0x568   :  { %17859 = vst [vmem:[#allocation60_spill] sm:$0xff] %v15049_v3  ;;  %v6702_v28 = vrot.slane %v6700_v62, 4  ;;  %v15057_v55 = vpop.f32.mrb[66].mxu1  ;;  %v5033_v25 = vrot.slane %v5031_v14, 7  ;;  %v5884_v6 = vsel %vm12086_vm5, %v5879_v34, %v5883_v50  ;;  %v6701_v3 = vsel %vm12075_vm4, %v10123_v7, %v6700_v62  ;;  %v15208_v19 = vld [vmem:[#allocation2 + $0x70] sm:$0xf] }
 0x569   :  { %v5552_v33 = vsel %vm14308_vm11, %v5011_v10, %v5551_v51  ;;  %17860 = vst [vmem:[#allocation62_spill] sm:$0xff] %v15057_v55  ;;  %v15064_v51 = vpop.f32.mrb[67].mxu1  ;;  %v15066_v10 = vcombine.low %v5874_v41, %v5884_v6  ;;  %v4102_v35 = vmax.f32 %v4038_v52, 0.0  ;;  %v10124_v14 = vrot.slane %v15041_v18, 9 }
 0x56a   :  { %5553 = vst [vmem:[#allocation2 + $0x84] sm:$0xf] %v5552_v33  ;;  %17861 = vst [vmem:[#allocation64_spill] sm:$0xff] %v15064_v51  ;;  %v6704_v55 = vsel %vm12075_vm4, %v6702_v28, %v6703_v8  ;;  %v5036_v50 = vor.u32 %v5034_v57, %v5033_v25  ;;  %v5038_v34 = vrot.slane %v5033_v25, 4  ;;  %v6710_v7 = vrot.slane %v15055_v0, 5 }
 0x56b   :  { %17862 = vst [vmem:[#allocation66_spill] sm:$0xff] %v15066_v10  ;;  %v15072_v33 = vcombine.low %v6701_v3, %v6704_v55  ;;  %8093 = vmatprep.mubr.bf16.mxu1 %v15066_v10  ;;  %v10359_v37 = vpack.c.bf16 %v4102_v35, %v4102_v35  ;;  %v6709_v62 = vrot.slane %v6707_v53, 4  ;;  %v15078_v41 = vcombine.low %v14909_v15, %v14913_v31  ;;  %v15081_v28 = vld [vmem:[#allocation2 + $0x3c] sm:$0xf]  ;;  %v15092_v15 = vld [vmem:[#allocation2 + $0x40] sm:$0xf] }
 0x56c   :  { %v5886_v52 = vshrl.u32 %v15018_v11, 16  ;;  %v17865_v8 = vrot.slane %v15000_v4, 4  ;;  %v5563_v55 = vsel %vm14324_vm13, %v5038_v34, %v5562_v39  ;;  %v5889_v57 = vshll.u32 %v15018_v11, 16  ;;  %v15094_v31 = vpop.f32.mrb[68].mxu1 }
 0x56d   :  { %17863 = vst [vmem:[#allocation67_spill] sm:$0xff] %v15072_v33  ;;  %17864 = vst [vmem:[#allocation68_spill] sm:$0xff] %v15078_v41  ;;  %10699 = vmatmul.mubr.bf16.vlgmr.msra.gmra.mrb[152].mxu0 %v15072_v33  ;;  %v5895_v25 = vshll.u32 %v15022_v38, 16  ;;  %v5014_v6 = vshrl.u32 %v10359_v37, 16  ;;  %v6708_v4 = vsel %vm12075_vm4, %v10124_v14, %v6707_v53  ;;  %v6711_v35 = vsel %vm12075_vm4, %v6709_v62, %v6710_v7  ;;  %v15103_v34 = vpop.f32.mrb[69].mxu1 }
 0x56e   :  { %v5037_v3 = vsel %vm14318_vm12, %v17865_v8, %v5036_v50  ;;  %17866 = vst [vmem:[#allocation70_spill] sm:$0xff] %v15094_v31  ;;  %5564 = vst [vmem:[#allocation2 + $0x98] sm:$0x1] %v5563_v55  ;;  %8094 = vmatmul.mubr.bf16.gmra.mrb[112].mxu1 %v15078_v41  ;;  %v5888_v39 = vrot.slane %v5886_v52, 4  ;;  %v15101_v50 = vld [vmem:[#allocation2 + $0x44] sm:$0x1]  ;;  %v15105_v51 = vcombine.low %v6708_v4, %v6711_v35 }
 0x56f   :  { %5561 = vst [vmem:[#allocation2 + $0x94] sm:$0xf] %v5037_v3  ;;  %17867 = vst [vmem:[#allocation71_spill] sm:$0xff] %v15103_v34  ;;  %v5555_v8 = vld [vmem:[#allocation2 + $0x8c] sm:$0x1]  ;;  %v5891_v31 = vrot.slane %v5889_v57, 5 }
 0x570   :  { %17868 = vst [vmem:[#allocation73_spill] sm:$0xff] %v15105_v51  ;;  %v5897_v3 = vrot.slane %v5895_v25, 5  ;;  %v5899_v55 = vshrl.u32 %v15022_v38, 16  ;;  %v15110_v53 = vpop.f32.mrb[70].mxu1  ;;  %v5016_v14 = vrot.slane %v5014_v6, 7  ;;  %v5017_v7 = vshll.u32 %v10359_v37, 16  ;;  %10702 = vmatprep.mubr.bf16.mxu0 %v15105_v51 }
 0x571   :  { %17869 = vst [vmem:[#allocation74_spill] sm:$0xff] %v15110_v53  ;;  %v5905_v62 = vshll.u32 %v15033_v56, 16  ;;  %v6714_v52 = vrot.slane %v15092_v15, 5  ;;  %v5892_v4 = vor.u32 %v5891_v31, %v5888_v39  ;;  %v10125_v57 = vrot.slane %v15081_v28, 9  ;;  %v15119_v34 = vld [vmem:[#allocation2 + $0x50] sm:$0x1] }
 0x572   :  { %v5901_v35 = vrot.slane %v5899_v55, 4  ;;  %v6717_v25 = vrot.slane %v15101_v50, 5  ;;  %v15121_v44 = vpop.f32.mrb[71].mxu1  ;;  %v5019_v6 = vor.u32 %v5017_v7, %v5016_v14  ;;  %v5021_v37 = vrot.slane %v5016_v14, 4  ;;  %v15709_v41 = vld [vmem:[#allocation2 + $0x15c] sm:$0xf] }
 0x573   :  { %17870 = vst [vmem:[#allocation75_spill] sm:$0xff] %v15121_v44  ;;  %v5907_v53 = vrot.slane %v5905_v62, 5  ;;  %v10126_v56 = vrot.slane %v15108_v26, 9  ;;  %v5893_v9 = vrot.slane %v5892_v4, 4  ;;  %v6716_v36 = vrot.slane %v6714_v52, 4  ;;  %17954 = vst [vmem:[#allocation122_spill] sm:$0xff] %v15709_v41 }
 0x574   :  { %v5902_v58 = vor.u32 %v5901_v35, %v5897_v3  ;;  %v6721_v59 = vrot.slane %v15114_v29, 5  ;;  %v17871_v31 = vrot.slane %v15026_v45, 4  ;;  %v5556_v55 = vsel %vm14324_vm13, %v5021_v37, %v5555_v8  ;;  %v15140_v35 = vld [vmem:[#allocation2 + $0x54] sm:$0xf]  ;;  %v15144_v8 = vpop.f32.mrb[72].mxu1 }
 0x575   :  { %v6715_v7 = vsel %vm12075_vm4, %v10125_v57, %v6714_v52  ;;  %v6724_v14 = vrot.slane %v15119_v34, 5  ;;  %5557 = vst [vmem:[#allocation2 + $0x8c] sm:$0x1] %v5556_v55  ;;  %v5898_v62 = vsel %vm12086_vm5, %v5893_v9, %v5897_v3  ;;  %v6718_v45 = vsel %vm12075_vm4, %v6716_v36, %v6717_v25  ;;  %17872 = vst [vmem:[#allocation76_spill] sm:$0xff] %v15144_v8  ;;  %v11715_v36 = vld [vmem:[%s17264_s4 + $0xc8] sm:$0xff]   ;;  %v15155_v3 = vpop.f32.mrb[73].mxu1 }
 0x576   :  { %v5020_v39 = vsel %vm14318_vm12, %v17871_v31, %v5019_v6  ;;  %v5903_v4 = vrot.slane %v5902_v58, 4  ;;  %v6722_v23 = vsel %vm12075_vm4, %v10126_v56, %v6721_v59  ;;  %v15146_v52 = vcombine.low %v6715_v7, %v6718_v45  ;;  %v15150_v58 = vld [vmem:[#allocation2 + $0x60] sm:$0xf]  ;;  %17874 = vst [vmem:[#allocation78_spill] sm:$0xff] %v15155_v3  ;;  %v15162_v31 = vld [vmem:[#allocation2 + $0x5c] sm:$0x1]  ;;  %8353 = vmatpush1.bf16.msra.mxu1 %v11715_v36 }
 0x577   :  { %5554 = vst [vmem:[#allocation2 + $0x88] sm:$0xf] %v5020_v39  ;;  %v6723_v57 = vrot.slane %v6721_v59, 4  ;;  %v5910_v6 = vshrl.u32 %v15041_v18, 16  ;;  %v5913_v9 = vshll.u32 %v15041_v18, 16  ;;  %v5919_v37 = vshll.u32 %v15043_v54, 16  ;;  %8354 = vmatprep.subr.bf16.mxu1 %v17756_v30 }
 0x578   :  { %17873 = vst [vmem:[#allocation77_spill] sm:$0xff] %v15146_v52  ;;  %v5908_v25 = vsel %vm12086_vm5, %v5903_v4, %v5907_v53  ;;  %v5923_v56 = vshrl.u32 %v15043_v54, 16  ;;  %v5929_v59 = vshll.u32 %v15055_v0, 16  ;;  %v15164_v39 = vpop.f32.mrb[74].mxu1  ;;  %10703 = vmatmul.mubr.bf16.gmra.mrb[156].mxu0 %v15146_v52  ;;  %v15171_v53 = vld [vmem:[#allocation2 + $0x64] sm:$0xf]  ;;  %v15179_v0 = vcombine.low %v15018_v11, %v15022_v38 }
 0x579   :  { %17875 = vst [vmem:[#allocation36_spill] sm:$0xff] %v15164_v39  ;;  %v15166_v55 = vcombine.low %v5898_v62, %v5908_v25  ;;  %v6725_v7 = vsel %vm12075_vm4, %v6723_v57, %v6724_v14  ;;  %v5912_v45 = vrot.slane %v5910_v6, 4  ;;  %v5915_v8 = vrot.slane %v5913_v9, 5  ;;  %v15173_v4 = vpop.f32.mrb[75].mxu1  ;;  %v15181_v39 = vld [vmem:[#allocation2 + $0x68] sm:$0x1] }
 0x57a   :  { %17877 = vst [vmem:[#allocation80_spill] sm:$0xff] %v15173_v4  ;;  %v15175_v3 = vcombine.low %v6722_v23, %v6725_v7  ;;  %17879 = vst [vmem:[#allocation82_spill] sm:$0xff] %v15179_v0  ;;  %v5921_v62 = vrot.slane %v5919_v37, 5  ;;  %v5925_v25 = vrot.slane %v5923_v56, 4  ;;  %v5931_v57 = vrot.slane %v5929_v59, 5  ;;  %v15200_v24 = vpop.f32.mrb[76].mxu1 }
 0x57b   :  { %17876 = vst [vmem:[#allocation79_spill] sm:$0xff] %v15166_v55  ;;  %8101 = vmatprep.mubr.bf16.mxu1 %v15166_v55  ;;  %v5916_v14 = vor.u32 %v5915_v8, %v5912_v45  ;;  %v10127_v6 = vrot.slane %v15140_v35, 9  ;;  %v6728_v9 = vrot.slane %v15142_v16, 5  ;;  %v6731_v38 = vrot.slane %v15162_v31, 5  ;;  %v15198_v44 = vld [vmem:[#allocation2 + $0x6c] sm:$0xf] }
 0x57c   :  { %17878 = vst [vmem:[#allocation81_spill] sm:$0xff] %v15175_v3  ;;  %10706 = vmatprep.mubr.bf16.mxu0 %v15175_v3  ;;  %8102 = vmatmul.mubr.bf16.gmra.mrb[116].mxu1 %v15179_v0  ;;  %v5926_v11 = vor.u32 %v5925_v25, %v5921_v62  ;;  %v10128_v23 = vrot.slane %v15150_v58, 9  ;;  %v6735_v36 = vrot.slane %v15171_v53, 5  ;;  %v6738_v59 = vrot.slane %v15181_v39, 5  ;;  %17880 = vst [vmem:[#allocation83_spill] sm:$0xff] %v15200_v24 }
 0x57d   :  { %v5917_v37 = vrot.slane %v5916_v14, 4  ;;  %v6729_v8 = vsel %vm12075_vm4, %v10127_v6, %v6728_v9  ;;  %v6730_v56 = vrot.slane %v6728_v9, 4  ;;  %v5934_v25 = vshrl.u32 %v15081_v28, 16 }
 0x57e   :  { %v5927_v7 = vrot.slane %v5926_v11, 4  ;;  %v6736_v45 = vsel %vm12075_vm4, %v10128_v23, %v6735_v36  ;;  %v6737_v4 = vrot.slane %v6735_v36, 4  ;;  %v5937_v9 = vshll.u32 %v15081_v28, 16  ;;  %v15210_v23 = vpop.f32.mrb[77].mxu1 }
 0x57f   :  { %v5922_v14 = vsel %vm12086_vm5, %v5917_v37, %v5921_v62  ;;  %v6732_v6 = vsel %vm12075_vm4, %v6730_v56, %v6731_v38  ;;  %v5943_v11 = vshll.u32 %v15092_v15, 16  ;;  %17881 = vst [vmem:[#allocation84_spill] sm:$0xff] %v15210_v23  ;;  %v5936_v62 = vrot.slane %v5934_v25, 4  ;;  %v15218_v37 = vld [vmem:[#allocation2 + $0x74] sm:$0x1]  ;;  %v15222_v56 = vpop.f32.mrb[78].mxu1 }
 0x580   :  { %v5932_v36 = vsel %vm12086_vm5, %v5927_v7, %v5931_v57  ;;  %v15214_v12 = vcombine.low %v6729_v8, %v6732_v6  ;;  %v6739_v24 = vsel %vm12075_vm4, %v6737_v4, %v6738_v59  ;;  %v15220_v38 = vld [vmem:[#allocation2 + $0x7c] sm:$0xf]  ;;  %17883 = vst [vmem:[#allocation86_spill] sm:$0xff] %v15222_v56  ;;  %v15230_v23 = vcombine.low %v15041_v18, %v15043_v54  ;;  %v15232_v8 = vld [vmem:[#allocation2 + $0x78] sm:$0xf]  ;;  %v15234_v7 = vpop.f32.mrb[79].mxu1 }
 0x581   :  { %v15224_v43 = vcombine.low %v5922_v14, %v5932_v36  ;;  %v15226_v47 = vcombine.low %v6736_v45, %v6739_v24  ;;  %v5939_v57 = vrot.slane %v5937_v9, 5  ;;  %17887 = vst [vmem:[#allocation90_spill] sm:$0xff] %v15234_v7  ;;  %v5945_v4 = vrot.slane %v5943_v11, 5  ;;  %v15240_v24 = vld [vmem:[#allocation2 + $0x80] sm:$0x1] }
 0x582   :  { %17882 = vst [vmem:[#allocation85_spill] sm:$0xff] %v15214_v12  ;;  %17886 = vst [vmem:[#allocation89_spill] sm:$0xff] %v15230_v23  ;;  %10707 = vmatmul.mubr.bf16.gmra.mrb[160].mxu0 %v15214_v12  ;;  %v5947_v59 = vshrl.u32 %v15092_v15, 16  ;;  %v5953_v25 = vshll.u32 %v15101_v50, 16  ;;  %v6742_v14 = vrot.slane %v15208_v19, 5  ;;  %v10129_v54 = vrot.slane %v15198_v44, 9 }
 0x583   :  { %17884 = vst [vmem:[#allocation87_spill] sm:$0xff] %v15224_v43  ;;  %17885 = vst [vmem:[#allocation88_spill] sm:$0xff] %v15226_v47  ;;  %8109 = vmatprep.mubr.bf16.mxu1 %v15224_v43  ;;  %10710 = vmatprep.mubr.bf16.mxu0 %v15226_v47  ;;  %v5940_v18 = vor.u32 %v5939_v57, %v5936_v62  ;;  %v6745_v45 = vrot.slane %v15218_v37, 5  ;;  %v6749_v6 = vrot.slane %v15220_v38, 5  ;;  %v10130_v36 = vrot.slane %v15232_v8, 9  ;;  %v15259_v43 = vpop.f32.mrb[80].mxu1 }
 0x584   :  { %8110 = vmatmul.mubr.bf16.gmra.mrb[120].mxu1 %v15230_v23  ;;  %v5949_v9 = vrot.slane %v5947_v59, 4  ;;  %v5955_v11 = vrot.slane %v5953_v25, 5  ;;  %v6744_v50 = vrot.slane %v6742_v14, 4  ;;  %v6743_v7 = vsel %vm12075_vm4, %v10129_v54, %v6742_v14  ;;  %v15257_v25 = vld [vmem:[#allocation2 + $0x84] sm:$0xf]  ;;  %17888 = vst [vmem:[#allocation31_spill] sm:$0xff] %v15259_v43 }
 0x585   :  { %v5941_v56 = vrot.slane %v5940_v18, 4  ;;  %v6751_v2 = vrot.slane %v6749_v6, 4  ;;  %v6752_v62 = vrot.slane %v15240_v24, 5  ;;  %v6750_v42 = vsel %vm12075_vm4, %v10130_v36, %v6749_v6  ;;  %v15272_v6 = vld [vmem:[#allocation2 + $0x90] sm:$0xf]  ;;  %v15277_v36 = vpop.f32.mrb[81].mxu1 }
 0x586   :  { %v5950_v57 = vor.u32 %v5949_v9, %v5945_v4  ;;  %v6746_v22 = vsel %vm12075_vm4, %v6744_v50, %v6745_v45  ;;  %v5958_v59 = vshrl.u32 %v15108_v26, 16  ;;  %v15267_v54 = vcombine.low %v15081_v28, %v15092_v15  ;;  %v15270_v9 = vld [vmem:[#allocation2 + $0x88] sm:$0xf]  ;;  %v11718_v50 = vld [vmem:[%s17264_s4 + $0xd0] sm:$0xff]   ;;  %17891 = vst [vmem:[#allocation23_spill] sm:$0xff] %v15277_v36 }
 0x587   :  { %v15261_v18 = vcombine.low %v6743_v7, %v6746_v22  ;;  %v6753_v14 = vsel %vm12075_vm4, %v6751_v2, %v6752_v62  ;;  %v5961_v45 = vshll.u32 %v15108_v26, 16  ;;  %v5946_v22 = vsel %vm12086_vm5, %v5941_v56, %v5945_v4  ;;  %v15282_v15 = vld [vmem:[#allocation2 + $0x8c] sm:$0x1]  ;;  %v15284_v62 = vpop.f32.mrb[82].mxu1  ;;  %v15290_v47 = vld [vmem:[#allocation2 + $0x94] sm:$0xf]  ;;  %8355 = vmatpush1.bf16.msra.mxu1 %v11718_v50 }
 0x588   :  { %17890 = vst [vmem:[#allocation19_spill] sm:$0xff] %v15267_v54  ;;  %v5951_v2 = vrot.slane %v5950_v57, 4  ;;  %v5960_v7 = vrot.slane %v5958_v59, 4  ;;  %v5967_v28 = vshll.u32 %v15114_v29, 16  ;;  %17892 = vst [vmem:[#allocation17_spill] sm:$0xff] %v15284_v62  ;;  %v15286_v43 = vcombine.low %v6750_v42, %v6753_v14  ;;  %v15292_v36 = vpop.f32.mrb[83].mxu1  ;;  %8356 = vmatprep.subr.bf16.mxu1 %v17756_v30 }
 0x589   :  { %17889 = vst [vmem:[#allocation11_spill] sm:$0xff] %v15261_v18  ;;  %v5963_v55 = vrot.slane %v5961_v45, 5  ;;  %v5971_v10 = vshrl.u32 %v15114_v29, 16  ;;  %v5977_v1 = vshll.u32 %v15119_v34, 16  ;;  %17894 = vst [vmem:[#allocation3_spill] sm:$0xff] %v15292_v36  ;;  %v10131_v57 = vrot.slane %v15257_v25, 9 }
 0x58a   :  { %17893 = vst [vmem:[#allocation21_spill] sm:$0xff] %v15286_v43  ;;  %v5956_v56 = vsel %vm12086_vm5, %v5951_v2, %v5955_v11  ;;  %10711 = vmatmul.mubr.bf16.gmra.mrb[164].mxu0 %v15261_v18  ;;  %v5969_v4 = vrot.slane %v5967_v28, 5  ;;  %v6756_v42 = vrot.slane %v15270_v9, 5  ;;  %v15299_v59 = vld [vmem:[#allocation2 + $0x98] sm:$0x1]  ;;  %v6759_v50 = vrot.slane %v15282_v15, 5 }
 0x58b   :  { %v15302_v34 = vcombine.low %v5946_v22, %v5956_v56  ;;  %10714 = vmatprep.mubr.bf16.mxu0 %v15286_v43  ;;  %v5964_v14 = vor.u32 %v5963_v55, %v5960_v7  ;;  %v5973_v45 = vrot.slane %v5971_v10, 4  ;;  %v5979_v11 = vrot.slane %v5977_v1, 5  ;;  %v15318_v43 = vpop.f32.mrb[84].mxu1 }
 0x58c   :  { %v6758_v2 = vrot.slane %v6756_v42, 4  ;;  %v10132_v28 = vrot.slane %v15272_v6, 9  ;;  %v6763_v62 = vrot.slane %v15290_v47, 5  ;;  %v6757_v22 = vsel %vm12075_vm4, %v10131_v57, %v6756_v42  ;;  %17896 = vst [vmem:[#allocation39_spill] sm:$0xff] %v15318_v43 }
 0x58d   :  { %17895 = vst [vmem:[#allocation40_spill] sm:$0xff] %v15302_v34  ;;  %8117 = vmatprep.mubr.bf16.mxu1 %v15302_v34  ;;  %v5965_v36 = vrot.slane %v5964_v14, 4  ;;  %v5974_v18 = vor.u32 %v5973_v45, %v5969_v4  ;;  %v6766_v56 = vrot.slane %v15299_v59, 5  ;;  %v5982_v7 = vshrl.u32 %v15140_v35, 16  ;;  %v15325_v34 = vpop.f32.mrb[85].mxu1 }
 0x58e   :  { %8118 = vmatmul.mubr.bf16.gmra.mrb[124].mxu1 %v15267_v54  ;;  %v6760_v10 = vsel %vm12075_vm4, %v6758_v2, %v6759_v50  ;;  %v6764_v1 = vsel %vm12075_vm4, %v10132_v28, %v6763_v62  ;;  %v6765_v55 = vrot.slane %v6763_v62, 4  ;;  %v5985_v42 = vshll.u32 %v15140_v35, 16  ;;  %17898 = vst [vmem:[#allocation41_spill] sm:$0xff] %v15325_v34  ;;  %v15331_v12 = vpop.f32.mrb[86].mxu1 }
 0x58f   :  { %v5970_v14 = vsel %vm12086_vm5, %v5965_v36, %v5969_v4  ;;  %v5975_v45 = vrot.slane %v5974_v18, 4  ;;  %v15322_v57 = vcombine.low %v6757_v22, %v6760_v10  ;;  %v5984_v2 = vrot.slane %v5982_v7, 4  ;;  %17899 = vst [vmem:[#allocation48_spill] sm:$0xff] %v15331_v12  ;;  %v15338_v10 = vpop.f32.mrb[87].mxu1 }
 0x590   :  { %v6767_v50 = vsel %vm12075_vm4, %v6765_v55, %v6766_v56  ;;  %v5991_v62 = vshll.u32 %v15142_v16, 16  ;;  %v5995_v28 = vshrl.u32 %v15142_v16, 16  ;;  %v5987_v4 = vrot.slane %v5985_v42, 5  ;;  %17901 = vst [vmem:[#allocation51_spill] sm:$0xff] %v15338_v10  ;;  %v15364_v10 = vpop.f32.mrb[88].mxu1 }
 0x591   :  { %17897 = vst [vmem:[#allocation46_spill] sm:$0xff] %v15322_v57  ;;  %v5980_v36 = vsel %vm12086_vm5, %v5975_v45, %v5979_v11  ;;  %v15335_v18 = vcombine.low %v6764_v1, %v6767_v50  ;;  %v6001_v22 = vshll.u32 %v15162_v31, 16  ;;  %v17903_v7 = vrot.slane %v14698_v17, 5  ;;  %17906 = vst [vmem:[#allocation50_spill] sm:$0xff] %v15364_v10 }
 0x592   :  { %v15340_v43 = vcombine.low %v5970_v14, %v5980_v36  ;;  %10715 = vmatmul.mubr.bf16.gmra.mrb[168].mxu0 %v15322_v57  ;;  %v5993_v56 = vrot.slane %v5991_v62, 5  ;;  %v5997_v55 = vrot.slane %v5995_v28, 4  ;;  %v5988_v11 = vor.u32 %v5987_v4, %v5984_v2  ;;  %v5756_v57 = vld [vmem:[#allocation2 + $0xcc] sm:$0xf] }
 0x593   :  { %17900 = vst [vmem:[#allocation45_spill] sm:$0xff] %v15335_v18  ;;  %v6961_v12 = vsel %vm12075_vm4, %v14704_v13, %v17903_v7  ;;  %10718 = vmatprep.mubr.bf16.mxu0 %v15335_v18  ;;  %v6006_v1 = vshrl.u32 %v15150_v58, 16  ;;  %v6009_v31 = vshll.u32 %v15150_v58, 16  ;;  %v17904_v14 = vshrl.u32 %v14978_v63, 16 }
 0x594   :  { %17902 = vst [vmem:[#allocation43_spill] sm:$0xff] %v15340_v43  ;;  %8125 = vmatprep.mubr.bf16.mxu1 %v15340_v43  ;;  %v15358_v17 = vcombine.low %v15108_v26, %v15114_v29  ;;  %v5998_v42 = vor.u32 %v5997_v55, %v5993_v56  ;;  %v6015_v13 = vshll.u32 %v15171_v53, 16  ;;  %v6019_v50 = vshrl.u32 %v15171_v53, 16  ;;  %v15385_v43 = vld [vmem:[#allocation2 + $0xf0] sm:$0xf] }
 0x595   :  { %v15353_v45 = vrot.slane %v17904_v14, 4  ;;  %v5989_v2 = vrot.slane %v5988_v11, 4  ;;  %v6003_v62 = vrot.slane %v6001_v22, 5  ;;  %v6008_v28 = vrot.slane %v6006_v1, 4  ;;  %v15370_v22 = vld [vmem:[#allocation2 + $0xf4] sm:$0xf] }
 0x596   :  { %17905 = vst [vmem:[#allocation57_spill] sm:$0xff] %v15358_v17  ;;  %v6011_v36 = vrot.slane %v6009_v31, 5  ;;  %8126 = vmatmul.mubr.bf16.gmra.mrb[128].mxu1 %v15358_v17  ;;  %v5999_v63 = vrot.slane %v5998_v42, 4  ;;  %v6017_v4 = vrot.slane %v6015_v13, 5  ;;  %v6021_v7 = vrot.slane %v6019_v50, 4  ;;  %v11721_v1 = vld [vmem:[%s17264_s4 + $0xd8] sm:$0xff]  }
 0x597   :  { %v6025_v14 = vshll.u32 %v15181_v39, 16  ;;  %v5994_v26 = vsel %vm12086_vm5, %v5989_v2, %v5993_v56  ;;  %v6030_v55 = vshrl.u32 %v15198_v44, 16  ;;  %v6033_v11 = vshll.u32 %v15198_v44, 16  ;;  %v15375_v31 = vpop.f32.mrb[89].mxu1  ;;  %v5757_v50 = vld [vmem:[#allocation2 + $0xd0] sm:$0xf]  ;;  %8357 = vmatpush1.bf16.msra.mxu1 %v11721_v1 }
 0x598   :  { %v6012_v29 = vor.u32 %v6011_v36, %v6008_v28  ;;  %17907 = vst [vmem:[#allocation59_spill] sm:$0xff] %v15375_v31  ;;  %v6004_v39 = vsel %vm12086_vm5, %v5999_v63, %v6003_v62  ;;  %v6022_v42 = vor.u32 %v6021_v7, %v6017_v4  ;;  %v6039_v13 = vshll.u32 %v15208_v19, 16  ;;  %v15381_v2 = vpop.f32.mrb[90].mxu1  ;;  %8358 = vmatprep.subr.bf16.mxu1 %v17756_v30 }
 0x599   :  { %v6043_v56 = vshrl.u32 %v15208_v19, 16  ;;  %17908 = vst [vmem:[#allocation53_spill] sm:$0xff] %v15381_v2  ;;  %v15383_v28 = vcombine.low %v5994_v26, %v6004_v39  ;;  %v6032_v10 = vrot.slane %v6030_v55, 4  ;;  %v6035_v34 = vrot.slane %v6033_v11, 5  ;;  %v15387_v31 = vpop.f32.mrb[91].mxu1 }
 0x59a   :  { %v6013_v36 = vrot.slane %v6012_v29, 4  ;;  %17910 = vst [vmem:[#allocation58_spill] sm:$0xff] %v15387_v31  ;;  %10719 = vmatmul.mubr.bf16.gmra.mrb[172].mxu0 %v14643_v46  ;;  %v6023_v62 = vrot.slane %v6022_v42, 4  ;;  %v6027_v63 = vrot.slane %v6025_v14, 5  ;;  %v6041_v7 = vrot.slane %v6039_v13, 5 }
 0x59b   :  { %17909 = vst [vmem:[#allocation61_spill] sm:$0xff] %v15383_v28  ;;  %v6045_v18 = vrot.slane %v6043_v56, 4  ;;  %8133 = vmatprep.mubr.bf16.mxu1 %v15383_v28  ;;  %10722 = vmatprep.mubr.bf16.mxu0 %v14689_v49  ;;  %v15395_v26 = vcombine.low %v15140_v35, %v15142_v16  ;;  %v6036_v29 = vor.u32 %v6035_v34, %v6032_v10  ;;  %v7025_v55 = vrot.slane %v5757_v50, 5  ;;  %v5758_v13 = vld [vmem:[#allocation2 + $0xd4] sm:$0x1] }
 0x59c   :  { %v17429_v11 = vrot.slane %v15370_v22, 5  ;;  %v6018_v14 = vsel %vm12086_vm5, %v6013_v36, %v6017_v4  ;;  %v6028_v1 = vsel %vm12086_vm5, %v6023_v62, %v6027_v63  ;;  %v6049_v42 = vshll.u32 %v15218_v37, 16  ;;  %v15408_v16 = vld [vmem:[#allocation2 + $0xf8] sm:$0x1]  ;;  %v15411_v10 = vld [vmem:[#allocation2 + $0x100] sm:$0xf] }
 0x59d   :  { %17911 = vst [vmem:[#allocation65_spill] sm:$0xff] %v15395_v26  ;;  %v6046_v39 = vor.u32 %v6045_v18, %v6041_v7  ;;  %v15403_v56 = vcombine.low %v6018_v14, %v6028_v1  ;;  %v15406_v2 = vcombine.low %v14702_v61, %v6961_v12  ;;  %v10154_v35 = vrot.slane %v5756_v57, 9  ;;  %v15416_v36 = vpop.f32.mrb[92].mxu1 }
 0x59e   :  { %v10138_v34 = vrot.slane %v15385_v43, 9  ;;  %8134 = vmatmul.mubr.bf16.gmra.mrb[132].mxu1 %v15395_v26  ;;  %v6037_v4 = vrot.slane %v6036_v29, 4  ;;  %v6054_v18 = vshrl.u32 %v15232_v8, 16  ;;  %v6057_v37 = vshll.u32 %v15232_v8, 16  ;;  %17914 = vst [vmem:[#allocation69_spill] sm:$0xff] %v15416_v36  ;;  %v15421_v63 = vpop.f32.mrb[93].mxu1 }
 0x59f   :  { %17912 = vst [vmem:[#allocation63_spill] sm:$0xff] %v15403_v56  ;;  %17913 = vst [vmem:[#allocation5_spill] sm:$0xff] %v15406_v2  ;;  %v6047_v50 = vrot.slane %v6046_v39, 4  ;;  %8141 = vmatprep.mubr.bf16.mxu1 %v15403_v56  ;;  %v7027_v61 = vrot.slane %v7025_v55, 4  ;;  %v7028_v12 = vrot.slane %v5758_v13, 5  ;;  %v6063_v57 = vshll.u32 %v15220_v38, 16 }
 0x5a0   :  { %v6067_v62 = vshrl.u32 %v15220_v38, 16  ;;  %17915 = vst [vmem:[#allocation6_spill] sm:$0xff] %v15421_v63  ;;  %v6051_v14 = vrot.slane %v6049_v42, 5  ;;  %v6807_v29 = vrot.slane %v17429_v11, 4  ;;  %v6056_v1 = vrot.slane %v6054_v18, 4  ;;  %v15425_v31 = vpop.f32.mrb[94].mxu1 }
 0x5a1   :  { %v6059_v39 = vrot.slane %v6057_v37, 5  ;;  %17916 = vst [vmem:[#allocation72_spill] sm:$0xff] %v15425_v31  ;;  %v6808_v36 = vrot.slane %v15408_v16, 5  ;;  %v15428_v28 = vrot.slane %v6063_v57, 5  ;;  %v15431_v49 = vpop.f32.mrb[95].mxu1  ;;  %v15436_v42 = vcombine.low %v15150_v58, %v15171_v53 }
 0x5a2   :  { %v6069_v56 = vrot.slane %v6067_v62, 4  ;;  %17917 = vst [vmem:[#allocation13_spill] sm:$0xff] %v15431_v49  ;;  %10723 = vmatmul.mubr.bf16.gmra.mrb[176].mxu0 %v14696_v48  ;;  %v6042_v18 = vsel %vm12086_vm5, %v6037_v4, %v6041_v7  ;;  %v6052_v37 = vsel %vm12086_vm5, %v6047_v50, %v6051_v14  ;;  %v7026_v57 = vsel %vm12075_vm4, %v10154_v35, %v7025_v55  ;;  %v15444_v62 = vld [vmem:[#allocation2 + $0x10c] sm:$0xf]  ;;  %v15452_v4 = vld [vmem:[#allocation2 + $0x104] sm:$0x1] }
 0x5a3   :  { %17918 = vst [vmem:[#allocation7_spill] sm:$0xff] %v15436_v42  ;;  %10726 = vmatprep.mubr.bf16.mxu0 %v15406_v2  ;;  %v7029_v11 = vsel %vm12075_vm4, %v7027_v61, %v7028_v12  ;;  %v6073_v58 = vshll.u32 %v15240_v24, 16  ;;  %v6087_v53 = vshll.u32 %v15270_v9, 16  ;;  %v6060_v7 = vor.u32 %v6059_v39, %v6056_v1  ;;  %v15461_v12 = vld [vmem:[#allocation2 + $0xfc] sm:$0xf] }
 0x5a4   :  { %v6070_v13 = vor.u32 %v6069_v56, %v15428_v28  ;;  %v6078_v50 = vshrl.u32 %v15257_v25, 16  ;;  %v6081_v55 = vshll.u32 %v15257_v25, 16  ;;  %v6091_v35 = vshrl.u32 %v15270_v9, 16  ;;  %v15467_v49 = vld [vmem:[#allocation2 + $0x110] sm:$0x1] }
 0x5a5   :  { %v15457_v14 = vcombine.low %v6042_v18, %v6052_v37  ;;  %v6809_v61 = vsel %vm12075_vm4, %v6807_v29, %v6808_v36  ;;  %v17920_v24 = vrot.slane %v15411_v10, 5  ;;  %v6819_v1 = vrot.slane %v15444_v62, 5  ;;  %v15471_v37 = vpop.f32.mrb[96].mxu1  ;;  %v15479_v2 = vld [vmem:[#allocation2 + $0x118] sm:$0xf] }
 0x5a6   :  { %8142 = vmatmul.mubr.bf16.gmra.mrb[136].mxu1 %v15436_v42  ;;  %v10262_v39 = vcombine.low %v7026_v57, %v7029_v11  ;;  %v6071_v31 = vrot.slane %v6070_v13, 4  ;;  %v15469_v63 = vrot.slane %v6087_v53, 5  ;;  %v6093_v18 = vrot.slane %v6091_v35, 4  ;;  %17921 = vst [vmem:[#allocation9_spill] sm:$0xff] %v15471_v37  ;;  %v15481_v11 = vld [vmem:[#allocation2 + $0xa4] sm:$0x1] }
 0x5a7   :  { %17919 = vst [vmem:[#allocation15_spill] sm:$0xff] %v15457_v14  ;;  %v6814_v56 = vrot.slane %v17920_v24, 4  ;;  %8149 = vmatprep.mubr.bf16.mxu1 %v15457_v14  ;;  %v17922_v36 = vrot.slane %v15370_v22, 5  ;;  %v6815_v24 = vrot.slane %v15452_v4, 5  ;;  %v6145_v13 = vshll.u32 %v15481_v11, 16  ;;  %v11724_v57 = vld [vmem:[%s17264_s4 + $0xe0] sm:$0xff]  }
 0x5a8   :  { %v15487_v53 = vpop.f32.mrb[97].mxu1  ;;  %v6061_v35 = vrot.slane %v6060_v7, 4  ;;  %v6075_v37 = vrot.slane %v6073_v58, 5  ;;  %v6080_v14 = vrot.slane %v6078_v50, 4  ;;  %v6083_v48 = vrot.slane %v6081_v55, 5  ;;  %8359 = vmatpush1.bf16.msra.mxu1 %v11724_v57 }
 0x5a9   :  { %v6806_v29 = vsel %vm12075_vm4, %v10138_v34, %v17922_v36  ;;  %17923 = vst [vmem:[#allocation92_spill] sm:$0xff] %v15487_v53  ;;  %v15489_v46 = vpop.f32.mrb[98].mxu1  ;;  %v10139_v36 = vrot.slane %v15461_v12, 9  ;;  %v6816_v42 = vsel %vm12075_vm4, %v6814_v56, %v6815_v24  ;;  %v6821_v11 = vrot.slane %v6819_v1, 4  ;;  %v15500_v58 = vld [vmem:[#allocation2 + $0x108] sm:$0xf]  ;;  %8360 = vmatprep.subr.bf16.mxu1 %v17756_v30 }
 0x5aa   :  { %17924 = vst [vmem:[#allocation93_spill] sm:$0xff] %v15489_v46  ;;  %v15491_v34 = vcombine.low %v6806_v29, %v6809_v61  ;;  %v15496_v3 = vpop.f32.mrb[99].mxu1  ;;  %10727 = vmatmul.mubr.bf16.gmra.mrb[180].mxu0 %v10262_v39  ;;  %v6076_v7 = vsel %vm12086_vm5, %v6071_v31, %v6075_v37  ;;  %v6822_v50 = vrot.slane %v15467_v49, 5  ;;  %v6094_v55 = vor.u32 %v6093_v18, %v15469_v63  ;;  %v15513_v37 = vld [vmem:[#allocation2 + $0x124] sm:$0xf] }
 0x5ab   :  { %17926 = vst [vmem:[#allocation95_spill] sm:$0xff] %v15496_v3  ;;  %v6111_v61 = vshll.u32 %v15290_v47, 16  ;;  %v15509_v56 = vcombine.low %v15198_v44, %v15208_v19  ;;  %v6097_v39 = vshll.u32 %v15282_v15, 16  ;;  %v6826_v31 = vrot.slane %v15479_v2, 5 }
 0x5ac   :  { %17925 = vst [vmem:[#allocation94_spill] sm:$0xff] %v15491_v34  ;;  %10730 = vmatprep.mubr.bf16.mxu0 %v15491_v34  ;;  %v6115_v29 = vshrl.u32 %v15290_v47, 16  ;;  %v6066_v18 = vsel %vm12086_vm5, %v6061_v35, %v15428_v28  ;;  %v6084_v24 = vor.u32 %v6083_v48, %v6080_v14  ;;  %v6102_v57 = vshrl.u32 %v15272_v6, 16  ;;  %v15530_v34 = vld [vmem:[#allocation2 + $0x11c] sm:$0x1] }
 0x5ad   :  { %17927 = vst [vmem:[#allocation96_spill] sm:$0xff] %v15509_v56  ;;  %v6105_v46 = vshll.u32 %v15272_v6, 16  ;;  %v15521_v3 = vcombine.low %v6066_v18, %v6076_v7  ;;  %v17929_v19 = vrot.slane %v15411_v10, 5  ;;  %v10140_v15 = vrot.slane %v15500_v58, 9  ;;  %v15536_v7 = vpop.f32.mrb[100].mxu1 }
 0x5ae   :  { %v6823_v53 = vsel %vm12075_vm4, %v6821_v11, %v6822_v50  ;;  %8150 = vmatmul.mubr.bf16.gmra.mrb[140].mxu1 %v15509_v56  ;;  %v6095_v48 = vrot.slane %v6094_v55, 4  ;;  %v6833_v28 = vrot.slane %v15513_v37, 5  ;;  %v15534_v14 = vrot.slane %v6111_v61, 5  ;;  %17930 = vst [vmem:[#allocation98_spill] sm:$0xff] %v15536_v7  ;;  %v15543_v11 = vld [vmem:[#allocation2 + $0x114] sm:$0xf] }
 0x5af   :  { %17928 = vst [vmem:[#allocation97_spill] sm:$0xff] %v15521_v3  ;;  %v6813_v44 = vsel %vm12075_vm4, %v10139_v36, %v17929_v19  ;;  %v6117_v35 = vrot.slane %v6115_v29, 4  ;;  %8157 = vmatprep.mubr.bf16.mxu1 %v15521_v3  ;;  %v6820_v18 = vsel %vm12075_vm4, %v10140_v15, %v6819_v1  ;;  %v6828_v50 = vrot.slane %v6826_v31, 4  ;;  %v15545_v19 = vld [vmem:[#allocation2 + $0x128] sm:$0x1]  ;;  %v15547_v55 = vpop.f32.mrb[101].mxu1 }
 0x5b0   :  { %v15539_v36 = vcombine.low %v6813_v44, %v6816_v42  ;;  %17932 = vst [vmem:[#allocation100_spill] sm:$0xff] %v15547_v55  ;;  %v6085_v56 = vrot.slane %v6084_v24, 4  ;;  %v6099_v61 = vrot.slane %v6097_v39, 5  ;;  %v6104_v26 = vrot.slane %v6102_v57, 4  ;;  %v15549_v52 = vpop.f32.mrb[102].mxu1 }
 0x5b1   :  { %v6107_v29 = vrot.slane %v6105_v46, 5  ;;  %17933 = vst [vmem:[#allocation101_spill] sm:$0xff] %v15549_v52  ;;  %v15551_v7 = vcombine.low %v6820_v18, %v6823_v53  ;;  %v6829_v42 = vrot.slane %v15530_v34, 5  ;;  %v6142_v1 = vor.u32 %v15353_v45, %v14726_v21  ;;  %v15556_v44 = vpop.f32.mrb[103].mxu1  ;;  %v15562_v46 = vld [vmem:[#allocation2 + $0x130] sm:$0xf] }
 0x5b2   :  { %17931 = vst [vmem:[#allocation99_spill] sm:$0xff] %v15539_v36  ;;  %17935 = vst [vmem:[#allocation103_spill] sm:$0xff] %v15556_v44  ;;  %10731 = vmatmul.mubr.bf16.gmra.mrb[184].mxu0 %v15539_v36  ;;  %v6100_v15 = vsel %vm12086_vm5, %v6095_v48, %v6099_v61  ;;  %v6835_v24 = vrot.slane %v6833_v28, 4  ;;  %v6118_v39 = vor.u32 %v6117_v35, %v15534_v14  ;;  %v15564_v57 = vrot.slane %v6145_v13, 5  ;;  %v15570_v18 = vld [vmem:[#allocation2 + $0x120] sm:$0xf] }
 0x5b3   :  { %17934 = vst [vmem:[#allocation102_spill] sm:$0xff] %v15551_v7  ;;  %10734 = vmatprep.mubr.bf16.mxu0 %v15551_v7  ;;  %v10141_v53 = vrot.slane %v15543_v11, 9  ;;  %v6830_v45 = vsel %vm12075_vm4, %v6828_v50, %v6829_v42  ;;  %v6836_v52 = vrot.slane %v15545_v19, 5  ;;  %v15573_v44 = vld [vmem:[#allocation2 + $0x13c] sm:$0xf]  ;;  %v6132_v48 = vor.u32 %v14663_v20, %v14645_v5 }
 0x5b4   :  { %v15579_v13 = vcombine.low %v15232_v8, %v15220_v38  ;;  %v6090_v35 = vsel %vm12086_vm5, %v6085_v56, %v15469_v63  ;;  %v6108_v61 = vor.u32 %v6107_v29, %v6104_v26  ;;  %v6121_v50 = vshll.u32 %v15299_v59, 16  ;;  %v15594_v8 = vld [vmem:[#allocation2 + $0x12c] sm:$0xf]  ;;  %v15600_v63 = vld [vmem:[#allocation2 + $0x134] sm:$0x1] }
 0x5b5   :  { %v15585_v42 = vcombine.low %v6090_v35, %v6100_v15  ;;  %v6827_v55 = vsel %vm12075_vm4, %v10141_v53, %v6826_v31  ;;  %v6840_v3 = vrot.slane %v15562_v46, 5  ;;  %v6143_v7 = vrot.slane %v6142_v1, 4  ;;  %v15602_v56 = vld [vmem:[#allocation2 + $0x140] sm:$0x1]  ;;  %v15604_v31 = vld [vmem:[#allocation2 + $0xa8] sm:$0xf] }
 0x5b6   :  { %17936 = vst [vmem:[#allocation104_spill] sm:$0xff] %v15579_v13  ;;  %8158 = vmatmul.mubr.bf16.gmra.mrb[144].mxu1 %v15579_v13  ;;  %v10142_v5 = vrot.slane %v15570_v18, 9  ;;  %v6837_v20 = vsel %vm12075_vm4, %v6835_v24, %v6836_v52  ;;  %v6119_v38 = vrot.slane %v6118_v39, 4  ;;  %v6847_v59 = vrot.slane %v15573_v44, 5  ;;  %v11727_v52 = vld [vmem:[%s17264_s4 + $0xe8] sm:$0xff]  }
 0x5b7   :  { %17937 = vst [vmem:[#allocation105_spill] sm:$0xff] %v15585_v42  ;;  %8165 = vmatprep.mubr.bf16.mxu1 %v15585_v42  ;;  %v15598_v26 = vcombine.low %v6827_v55, %v6830_v45  ;;  %v6150_v29 = vshrl.u32 %v15604_v31, 16  ;;  %v6109_v15 = vrot.slane %v6108_v61, 4  ;;  %v6123_v24 = vrot.slane %v6121_v50, 5  ;;  %v15612_v39 = vld [vmem:[#allocation2 + $0x148] sm:$0xf]  ;;  %8361 = vmatpush1.bf16.msra.mxu1 %v11727_v52 }
 0x5b8   :  { %v6834_v1 = vsel %vm12075_vm4, %v10142_v5, %v6833_v28  ;;  %v6153_v55 = vshll.u32 %v15604_v31, 16  ;;  %v6842_v45 = vrot.slane %v6840_v3, 4  ;;  %v15617_v35 = vld [vmem:[#allocation2 + $0x138] sm:$0xf]  ;;  %v6133_v42 = vrot.slane %v6132_v48, 4  ;;  %8362 = vmatprep.subr.bf16.mxu1 %v17756_v30 }
 0x5b9   :  { %17938 = vst [vmem:[#allocation106_spill] sm:$0xff] %v15598_v26  ;;  %v15615_v53 = vcombine.low %v6834_v1, %v6837_v20  ;;  %v6148_v36 = vsel %vm12086_vm5, %v6143_v7, %v15564_v57  ;;  %v6124_v28 = vsel %vm12086_vm5, %v6119_v38, %v6123_v24  ;;  %v6849_v61 = vrot.slane %v6847_v59, 4  ;;  %v15625_v50 = vld [vmem:[#allocation2 + $0x154] sm:$0xf]  ;;  %v15627_v5 = vld [vmem:[#allocation2 + $0xac] sm:$0xf] }
 0x5ba   :  { %10735 = vmatmul.mubr.bf16.gmra.mrb[188].mxu0 %v15598_v26  ;;  %17940 = vst [vmem:[#allocation108_spill] sm:$0xff] %v15625_v50  ;;  %v6159_v20 = vshll.u32 %v15627_v5, 16  ;;  %v6163_v1 = vshrl.u32 %v15627_v5, 16  ;;  %v10143_v7 = vrot.slane %v15594_v8, 9  ;;  %v6843_v57 = vrot.slane %v15600_v63, 5 }
 0x5bb   :  { %17939 = vst [vmem:[#allocation107_spill] sm:$0xff] %v15615_v53  ;;  %10738 = vmatprep.mubr.bf16.mxu0 %v15615_v53  ;;  %v6850_v48 = vrot.slane %v15602_v56, 5  ;;  %v6854_v38 = vrot.slane %v15612_v39, 5  ;;  %v15639_v52 = vcombine.low %v15257_v25, %v15270_v9  ;;  %v6114_v24 = vsel %vm12086_vm5, %v6109_v15, %v15534_v14 }
 0x5bc   :  { %v6152_v26 = vrot.slane %v6150_v29, 4  ;;  %v6155_v13 = vrot.slane %v6153_v55, 5  ;;  %v15644_v17 = vcombine.low %v6114_v24, %v6124_v28  ;;  %v6844_v53 = vsel %vm12075_vm4, %v6842_v45, %v6843_v57  ;;  %v15663_v55 = vld [vmem:[#allocation2 + $0x144] sm:$0xf]  ;;  %v15665_v45 = vld [vmem:[#allocation2 + $0x14c] sm:$0x1] }
 0x5bd   :  { %17941 = vst [vmem:[#allocation109_spill] sm:$0xff] %v15639_v52  ;;  %v10144_v51 = vrot.slane %v15617_v35, 9  ;;  %v6861_v54 = vrot.slane %v15625_v50, 5  ;;  %v6851_v25 = vsel %vm12075_vm4, %v6849_v61, %v6850_v48  ;;  %v15653_v9 = vrot.slane %v6159_v20, 5  ;;  %17943 = vst [vmem:[#allocation111_spill] sm:$0xff] %v15663_v55 }
 0x5be   :  { %17942 = vst [vmem:[#allocation110_spill] sm:$0xff] %v15644_v17  ;;  %8166 = vmatmul.mubr.bf16.gmra.mrb[148].mxu1 %v15639_v52  ;;  %v6165_v33 = vrot.slane %v6163_v1, 4  ;;  %v6841_v14 = vsel %vm12075_vm4, %v10143_v7, %v6840_v3  ;;  %v6138_v15 = vsel %vm12086_vm5, %v6133_v42, %v14726_v21  ;;  %17944 = vst [vmem:[#allocation112_spill] sm:$0xff] %v15665_v45  ;;  %v11837_v28 = vld [vmem:[#allocation2 + $0xa0] sm:$0xf]  ;;  %v6856_v3 = vrot.slane %v6854_v38, 4 }
 0x5bf   :  { %8173 = vmatprep.mubr.bf16.mxu1 %v15644_v17  ;;  %v6848_v29 = vsel %vm12075_vm4, %v10144_v51, %v6847_v59  ;;  %v11838_v61 = vld [vmem:[#allocation2 + $0x9c] sm:$0xf]  ;;  %v15669_v1 = vcombine.low %v6841_v14, %v6844_v53  ;;  %v15671_v57 = vcombine.low %v6138_v15, %v6148_v36  ;;  %v15673_v7 = vld [vmem:[#allocation2 + $0x158] sm:$0x1]  ;;  %v6156_v51 = vor.u32 %v6155_v13, %v6152_v26  ;;  %v15675_v59 = vld [vmem:[#allocation2 + $0x160] sm:$0xf] }
 0x5c0   :  { %v15667_v20 = vcombine.low %v11838_v61, %v11837_v28  ;;  %17948 = vst [vmem:[#allocation116_spill] sm:$0xff] %v15673_v7  ;;  %17949 = vst [vmem:[#allocation117_spill] sm:$0xff] %v15675_v59  ;;  %v15677_v48 = vcombine.low %v6848_v29, %v6851_v25  ;;  %v15679_v21 = vld [vmem:[#allocation2 + $0x150] sm:$0xf]  ;;  %v6863_v42 = vrot.slane %v6861_v54, 4  ;;  %v6857_v36 = vrot.slane %v15665_v45, 5 }
 0x5c1   :  { %17946 = vst [vmem:[#allocation114_spill] sm:$0xff] %v15669_v1  ;;  %17947 = vst [vmem:[#allocation115_spill] sm:$0xff] %v15671_v57  ;;  %v15681_v24 = vld [vmem:[#allocation2 + $0xb4] sm:$0xf]  ;;  %v6166_v14 = vor.u32 %v6165_v33, %v15653_v9  ;;  %v15688_v13 = vld [vmem:[#allocation2 + $0xb8] sm:$0xf]  ;;  %v15700_v33 = vcombine.low %v15272_v6, %v15290_v47 }
 0x5c2   :  { %17945 = vst [vmem:[#allocation113_spill] sm:$0xff] %v15667_v20  ;;  %17950 = vst [vmem:[#allocation118_spill] sm:$0xff] %v15677_v48  ;;  %v6174_v28 = vshrl.u32 %v15681_v24, 16  ;;  %v6177_v53 = vshll.u32 %v15681_v24, 16  ;;  %10739 = vmatmul.mubr.bf16.gmra.mrb[192].mxu0 %v15669_v1  ;;  %v6183_v26 = vshll.u32 %v15688_v13, 16  ;;  %v6187_v25 = vshrl.u32 %v15688_v13, 16 }
 0x5c3   :  { %17951 = vst [vmem:[#allocation119_spill] sm:$0xff] %v15679_v21  ;;  %10742 = vmatprep.mubr.bf16.mxu0 %v15677_v48  ;;  %v10145_v29 = vrot.slane %v15663_v55, 9  ;;  %v6864_v15 = vrot.slane %v15673_v7, 5  ;;  %v11841_v61 = vld [vmem:[#allocation2 + $0xb0] sm:$0x1]  ;;  %v6868_v1 = vrot.slane %v15675_v59, 5  ;;  %v6858_v23 = vsel %vm12075_vm4, %v6856_v3, %v6857_v36 }
 0x5c4   :  { %v6169_v17 = vshll.u32 %v11841_v61, 16  ;;  %v15696_v52 = vld [vmem:[#allocation2 + $0x16c] sm:$0xf]  ;;  %17953 = vst [vmem:[#allocation121_spill] sm:$0xff] %v15700_v33  ;;  %v10146_v60 = vrot.slane %v15679_v21, 9  ;;  %v6157_v48 = vrot.slane %v6156_v51, 4 }
 0x5c5   :  { %17952 = vst [vmem:[#allocation120_spill] sm:$0xff] %v15696_v52  ;;  %v6855_v0 = vsel %vm12075_vm4, %v10145_v29, %v6854_v38  ;;  %v6865_v61 = vsel %vm12075_vm4, %v6863_v42, %v6864_v15  ;;  %v6176_v40 = vrot.slane %v6174_v28, 4  ;;  %v6179_v7 = vrot.slane %v6177_v53, 5  ;;  %v15711_v59 = vld [vmem:[#allocation2 + $0xd8] sm:$0xf] }
 0x5c6   :  { %v15713_v47 = vld [vmem:[#allocation2 + $0xdc] sm:$0xf]  ;;  %8174 = vmatmul.mubr.bf16.gmra.mrb[152].mxu1 %v15700_v33  ;;  %v6167_v6 = vrot.slane %v6166_v14, 4  ;;  %v15716_v3 = vld [vmem:[#allocation2 + $0x164] sm:$0x1]  ;;  %v6875_v51 = vrot.slane %v15696_v52, 5  ;;  %v15722_v42 = vcombine.low %v6855_v0, %v6858_v23  ;;  %v6862_v28 = vsel %vm12075_vm4, %v10146_v60, %v6861_v54 }
 0x5c7   :  { %17955 = vst [vmem:[#allocation123_spill] sm:$0xff] %v15716_v3  ;;  %v15719_v36 = vrot.slane %v6183_v26, 5  ;;  %v6189_v38 = vrot.slane %v6187_v25, 4  ;;  %8181 = vmatprep.mubr.bf16.mxu1 %v15671_v57  ;;  %v6171_v53 = vrot.slane %v6169_v17, 5  ;;  %v6870_v29 = vrot.slane %v6868_v1, 4  ;;  %v11730_v14 = vld [vmem:[%s17264_s4 + $0xf0] sm:$0xff]  }
 0x5c8   :  { %17956 = vst [vmem:[#allocation124_spill] sm:$0xff] %v15722_v42  ;;  %v15726_v15 = vld [vmem:[#allocation2 + $0x170] sm:$0x1]  ;;  %v15731_v33 = vld [vmem:[#allocation2 + $0x178] sm:$0xf]  ;;  %v6198_v26 = vshrl.u32 %v15711_v59, 16  ;;  %v15737_v57 = vcombine.low %v6862_v28, %v6865_v61  ;;  %v6162_v60 = vsel %vm12086_vm5, %v6157_v48, %v15653_v9  ;;  %v6180_v17 = vor.u32 %v6179_v7, %v6176_v40  ;;  %8363 = vmatpush1.bf16.msra.mxu1 %v11730_v14 }
 0x5c9   :  { %17957 = vst [vmem:[#allocation125_spill] sm:$0xff] %v15726_v15  ;;  %v6201_v25 = vshll.u32 %v15711_v59, 16  ;;  %v6207_v0 = vshll.u32 %v15713_v47, 16  ;;  %v6211_v23 = vshrl.u32 %v15713_v47, 16  ;;  %v6871_v54 = vrot.slane %v15716_v3, 5  ;;  %8364 = vmatprep.subr.bf16.mxu1 %v17756_v30 }
 0x5ca   :  { %17958 = vst [vmem:[#allocation126_spill] sm:$0xff] %v15737_v57  ;;  %10743 = vmatmul.mubr.bf16.gmra.mrb[196].mxu0 %v15722_v42  ;;  %v6172_v52 = vsel %vm12086_vm5, %v6167_v6, %v6171_v53  ;;  %v10147_v21 = vrot.slane %v15709_v41, 9  ;;  %v15747_v45 = vld [vmem:[#allocation2 + $0x168] sm:$0xf]  ;;  %v6877_v50 = vrot.slane %v6875_v51, 4  ;;  %v6190_v61 = vor.u32 %v6189_v38, %v15719_v36 }
 0x5cb   :  { %10746 = vmatprep.mubr.bf16.mxu0 %v15737_v57  ;;  %v6872_v40 = vsel %vm12075_vm4, %v6870_v29, %v6871_v54  ;;  %v6878_v9 = vrot.slane %v15726_v15, 5  ;;  %v11842_v7 = vld [vmem:[#allocation2 + $0xbc] sm:$0x1]  ;;  %v6882_v6 = vrot.slane %v15731_v33, 5  ;;  %v15756_v28 = vld [vmem:[#allocation2 + $0x184] sm:$0xf]  ;;  %v15760_v3 = vcombine.low %v6162_v60, %v6172_v52 }
 0x5cc   :  { %v6193_v48 = vshll.u32 %v11842_v7, 16  ;;  %17959 = vst [vmem:[#allocation127_spill] sm:$0xff] %v15756_v28  ;;  %v6200_v53 = vrot.slane %v6198_v26, 4  ;;  %v6203_v14 = vrot.slane %v6201_v25, 5  ;;  %v15758_v42 = vrot.slane %v6207_v0, 5 }
 0x5cd   :  { %v6213_v38 = vrot.slane %v6211_v23, 4  ;;  %17960 = vst [vmem:[#allocation128_spill] sm:$0xff] %v15760_v3  ;;  %v10148_v57 = vrot.slane %v15747_v45, 9  ;;  %v6181_v41 = vrot.slane %v6180_v17, 4  ;;  %v5761_v55 = vld [vmem:[#allocation2 + $0xe0] sm:$0x1]  ;;  %v6869_v29 = vsel %vm12075_vm4, %v10147_v21, %v6868_v1 }
 0x5ce   :  { %8182 = vmatmul.mubr.bf16.gmra.mrb[156].mxu1 %v15667_v20  ;;  %v6879_v54 = vsel %vm12075_vm4, %v6877_v50, %v6878_v9  ;;  %v6191_v7 = vrot.slane %v6190_v61, 4  ;;  %v15768_v26 = vld [vmem:[#allocation2 + $0x174] sm:$0xf]  ;;  %v15770_v25 = vld [vmem:[#allocation2 + $0x17c] sm:$0x1]  ;;  %v6889_v52 = vrot.slane %v15756_v28, 5  ;;  %v15774_v0 = vcombine.low %v6869_v29, %v6872_v40 }
 0x5cf   :  { %17961 = vst [vmem:[#allocation129_spill] sm:$0xff] %v15768_v26  ;;  %17962 = vst [vmem:[#allocation130_spill] sm:$0xff] %v15770_v25  ;;  %8189 = vmatprep.mubr.bf16.mxu1 %v15760_v3  ;;  %v6876_v23 = vsel %vm12075_vm4, %v10148_v57, %v6875_v51  ;;  %v15780_v1 = vcombine.low %v15604_v31, %v15627_v5  ;;  %v6884_v21 = vrot.slane %v6882_v6, 4  ;;  %v15782_v50 = vld [vmem:[#allocation2 + $0xe8] sm:$0xf]  ;;  %v6195_v60 = vrot.slane %v6193_v48, 5 }
 0x5d0   :  { %17963 = vst [vmem:[#allocation131_spill] sm:$0xff] %v15774_v0  ;;  %v15784_v17 = vld [vmem:[#allocation2 + $0x188] sm:$0x1]  ;;  %v6204_v61 = vor.u32 %v6203_v14, %v6200_v53  ;;  %v6214_v9 = vor.u32 %v6213_v38, %v15758_v42  ;;  %v6217_v20 = vshll.u32 %v5761_v55, 16  ;;  %v15787_v3 = vld [vmem:[#allocation2 + $0xe4] sm:$0xf]  ;;  %v15789_v40 = vcombine.low %v6876_v23, %v6879_v54 }
 0x5d1   :  { %17964 = vst [vmem:[#allocation132_spill] sm:$0xff] %v15780_v1  ;;  %17965 = vst [vmem:[#allocation133_spill] sm:$0xff] %v15784_v17  ;;  %v6186_v57 = vsel %vm12086_vm5, %v6181_v41, %v15719_v36  ;;  %v10149_v31 = vrot.slane %v15768_v26, 9  ;;  %v6885_v5 = vrot.slane %v15770_v25, 5  ;;  %v15796_v51 = vld [vmem:[#allocation2 + $0x190] sm:$0xf]  ;;  %v6196_v48 = vsel %vm12086_vm5, %v6191_v7, %v6195_v60 }
 0x5d2   :  { %17966 = vst [vmem:[#allocation134_spill] sm:$0xff] %v15789_v40  ;;  %17967 = vst [vmem:[#allocation135_spill] sm:$0xff] %v15796_v51  ;;  %10747 = vmatmul.mubr.bf16.gmra.mrb[200].mxu0 %v15774_v0  ;;  %v15801_v55 = vld [vmem:[#allocation2 + $0x180] sm:$0xf]  ;;  %v6891_v53 = vrot.slane %v6889_v52, 4  ;;  %v6231_v14 = vshll.u32 %v15782_v50, 16  ;;  %v15812_v28 = vcombine.low %v6186_v57, %v6196_v48 }
 0x5d3   :  { %v6235_v38 = vshrl.u32 %v15782_v50, 16  ;;  %10750 = vmatprep.mubr.bf16.mxu0 %v15789_v40  ;;  %v6886_v41 = vsel %vm12075_vm4, %v6884_v21, %v6885_v5  ;;  %v6892_v36 = vrot.slane %v15784_v17, 5  ;;  %v5808_v29 = vld [vmem:[#allocation2 + $0x19c] sm:$0xf]  ;;  %v6222_v54 = vshrl.u32 %v15787_v3, 16 }
 0x5d4   :  { %v6225_v23 = vshll.u32 %v15787_v3, 16  ;;  %v6896_v7 = vrot.slane %v15796_v51, 5  ;;  %v6205_v60 = vrot.slane %v6204_v61, 4  ;;  %v6215_v0 = vrot.slane %v6214_v9, 4  ;;  %17968 = vst [vmem:[#allocation136_spill] sm:$0xff] %v15812_v28 }
 0x5d5   :  { %v6219_v25 = vrot.slane %v6217_v20, 5  ;;  %v6883_v40 = vsel %vm12075_vm4, %v10149_v31, %v6882_v6  ;;  %v10150_v26 = vrot.slane %v15801_v55, 9  ;;  %v6893_v21 = vsel %vm12075_vm4, %v6891_v53, %v6892_v36  ;;  %v15820_v5 = vld [vmem:[#allocation2 + $0x194] sm:$0x1]  ;;  %v11733_v6 = vld [vmem:[%s17264_s4 + $0xf8] sm:$0xff]  }
 0x5d6   :  { %8190 = vmatmul.mubr.bf16.gmra.mrb[160].mxu1 %v15780_v1  ;;  %v6964_v17 = vrot.slane %v5808_v29, 5  ;;  %v6233_v15 = vrot.slane %v6231_v14, 5  ;;  %v6237_v51 = vrot.slane %v6235_v38, 4  ;;  %v15823_v20 = vcombine.low %v6883_v40, %v6886_v41  ;;  %v15830_v31 = vld [vmem:[#allocation2 + $0x18c] sm:$0xf] }
 0x5d7   :  { %8197 = vmatprep.mubr.bf16.mxu1 %v15812_v28  ;;  %v6224_v61 = vrot.slane %v6222_v54, 4  ;;  %v6227_v9 = vrot.slane %v6225_v23, 5  ;;  %v6890_v57 = vsel %vm12075_vm4, %v10150_v26, %v6889_v52  ;;  %v6898_v48 = vrot.slane %v6896_v7, 4  ;;  %v5809_v53 = vld [vmem:[#allocation2 + $0x1a0] sm:$0x1]  ;;  %8365 = vmatpush1.bf16.msra.mxu1 %v11733_v6 }
 0x5d8   :  { %17969 = vst [vmem:[#allocation137_spill] sm:$0xff] %v15823_v20  ;;  %v6210_v14 = vsel %vm12086_vm5, %v6205_v60, %v15758_v42  ;;  %v6220_v40 = vsel %vm12086_vm5, %v6215_v0, %v6219_v25  ;;  %v15837_v38 = vcombine.low %v6890_v57, %v6893_v21  ;;  %v15841_v41 = vcombine.low %v15681_v24, %v15688_v13  ;;  %v15844_v26 = vld [vmem:[#allocation2 + $0xec] sm:$0x1]  ;;  %v15847_v52 = vld [vmem:[#allocation2 + $0x198] sm:$0xf] }
 0x5d9   :  { %v6899_v36 = vrot.slane %v15820_v5, 5  ;;  %17972 = vst [vmem:[#allocation140_spill] sm:$0xff] %v15847_v52  ;;  %v6966_v29 = vrot.slane %v6964_v17, 4  ;;  %v6238_v42 = vor.u32 %v6237_v51, %v6233_v15  ;;  %v6255_v54 = vshll.u32 %v15370_v22, 16  ;;  %8623 = vmatprep.subr.bf16.mxu1 %v17756_v30 }
 0x5da   :  { %17970 = vst [vmem:[#allocation138_spill] sm:$0xff] %v15837_v38  ;;  %17971 = vst [vmem:[#allocation139_spill] sm:$0xff] %v15841_v41  ;;  %10751 = vmatmul.mubr.bf16.gmra.mrb[204].mxu0 %v15823_v20  ;;  %v6259_v25 = vshrl.u32 %v15370_v22, 16  ;;  %v10151_v24 = vrot.slane %v15830_v31, 9  ;;  %v6967_v13 = vrot.slane %v5809_v53, 5  ;;  %v10204_v0 = vcombine.low %v6210_v14, %v6220_v40 }
 0x5db   :  { %10754 = vmatprep.mubr.bf16.mxu0 %v15837_v38  ;;  %v6228_v23 = vor.u32 %v6227_v9, %v6224_v61  ;;  %v6900_v60 = vsel %vm12075_vm4, %v6898_v48, %v6899_v36  ;;  %v6241_v21 = vshll.u32 %v15844_v26, 16  ;;  %v6246_v51 = vshrl.u32 %v15385_v43, 16 }
 0x5dc   :  { %v6249_v6 = vshll.u32 %v15385_v43, 16  ;;  %v6897_v57 = vsel %vm12075_vm4, %v10151_v24, %v6896_v7  ;;  %v10153_v28 = vrot.slane %v15847_v52, 9  ;;  %v6968_v53 = vsel %vm12075_vm4, %v6966_v29, %v6967_v13 }
 0x5dd   :  { %v6239_v61 = vrot.slane %v6238_v42, 4  ;;  %v6257_v9 = vrot.slane %v6255_v54, 5  ;;  %v6261_v14 = vrot.slane %v6259_v25, 4  ;;  %v15865_v48 = vcombine.low %v6897_v57, %v6900_v60 }
 0x5de   :  { %8198 = vmatmul.mubr.bf16.gmra.mrb[164].mxu1 %v15841_v41  ;;  %v6229_v40 = vrot.slane %v6228_v23, 4  ;;  %v6965_v36 = vsel %vm12075_vm4, %v10153_v28, %v6964_v17  ;;  %v6243_v38 = vrot.slane %v6241_v21, 5  ;;  %v6248_v20 = vrot.slane %v6246_v51, 4 }
 0x5df   :  { %8205 = vmatprep.mubr.bf16.mxu1 %v10204_v0  ;;  %v6251_v7 = vrot.slane %v6249_v6, 5  ;;  %v15869_v24 = vcombine.low %v6965_v36, %v6968_v53  ;;  %v10172_v52 = vcombine.low %v15711_v59, %v15713_v47  ;;  %v6262_v42 = vor.u32 %v6261_v14, %v6257_v9 }
 0x5e0   :  { %v6244_v29 = vsel %vm12086_vm5, %v6239_v61, %v6243_v38  ;;  %v6279_v54 = vshll.u32 %v15411_v10, 16  ;;  %v6283_v25 = vshrl.u32 %v15411_v10, 16  ;;  %v6234_v28 = vsel %vm12086_vm5, %v6229_v40, %v6233_v15 }
 0x5e1   :  { %17973 = vst [vmem:[#allocation141_spill] sm:$0xff] %v15869_v24  ;;  %v6252_v17 = vor.u32 %v6251_v7, %v6248_v20  ;;  %v6265_v13 = vshll.u32 %v15408_v16, 16  ;;  %v6270_v59 = vshrl.u32 %v15461_v12, 16  ;;  %v6273_v47 = vshll.u32 %v15461_v12, 16 }
 0x5e2   :  { %10755 = vmatmul.mubr.bf16.gmra.mrb[208].mxu0 %v15865_v48  ;;  %v15884_v0 = vcombine.low %v6234_v28, %v6244_v29  ;;  %v6263_v38 = vrot.slane %v6262_v42, 4  ;;  %v6281_v23 = vrot.slane %v6279_v54, 5  ;;  %v6285_v60 = vrot.slane %v6283_v25, 4 }
 0x5e3   :  { %10758 = vmatprep.mubr.bf16.mxu0 %v15869_v24  ;;  %v6253_v21 = vrot.slane %v6252_v17, 4  ;;  %v6267_v51 = vrot.slane %v6265_v13, 5  ;;  %v6272_v6 = vrot.slane %v6270_v59, 4  ;;  %v6275_v57 = vrot.slane %v6273_v47, 5 }
 0x5e4   :  { %v6286_v16 = vor.u32 %v6285_v60, %v6281_v23  ;;  %v6303_v20 = vshll.u32 %v15444_v62, 16  ;;  %v6307_v53 = vshrl.u32 %v15444_v62, 16  ;;  %v6294_v61 = vshrl.u32 %v15500_v58, 16 }
 0x5e5   :  { %v6268_v15 = vsel %vm12086_vm5, %v6263_v38, %v6267_v51  ;;  %v15895_v14 = vcombine.low %v15787_v3, %v15782_v50  ;;  %v6258_v40 = vsel %vm12086_vm5, %v6253_v21, %v6257_v9  ;;  %v6276_v36 = vor.u32 %v6275_v57, %v6272_v6 }
 0x5e6   :  { %8206 = vmatmul.mubr.bf16.gmra.mrb[168].mxu1 %v10172_v52  ;;  %v6297_v52 = vshll.u32 %v15500_v58, 16  ;;  %v6289_v7 = vshll.u32 %v15452_v4, 16  ;;  %v15900_v29 = vcombine.low %v6258_v40, %v6268_v15  ;;  %v6287_v42 = vrot.slane %v6286_v16, 4 }
 0x5e7   :  { %8213 = vmatprep.mubr.bf16.mxu1 %v15884_v0  ;;  %v6305_v54 = vrot.slane %v6303_v20, 5  ;;  %v6309_v25 = vrot.slane %v6307_v53, 4  ;;  %v6296_v28 = vrot.slane %v6294_v61, 4  ;;  %v6277_v13 = vrot.slane %v6276_v36, 4 }
 0x5e8   :  { %v6299_v17 = vrot.slane %v6297_v52, 5  ;;  %v6291_v3 = vrot.slane %v6289_v7, 5  ;;  %v6327_v59 = vshll.u32 %v15479_v2, 16  ;;  %v6331_v4 = vshrl.u32 %v15479_v2, 16 }
 0x5e9   :  { %v6310_v9 = vor.u32 %v6309_v25, %v6305_v54  ;;  %v15910_v47 = vcombine.low %v15385_v43, %v15370_v22  ;;  %v6282_v60 = vsel %vm12086_vm5, %v6277_v13, %v6281_v23  ;;  %v6313_v21 = vshll.u32 %v15467_v49, 16 }
 0x5ea   :  { %v6292_v50 = vsel %vm12086_vm5, %v6287_v42, %v6291_v3  ;;  %v6300_v38 = vor.u32 %v6299_v17, %v6296_v28  ;;  %v6318_v51 = vshrl.u32 %v15543_v11, 16  ;;  %v6321_v6 = vshll.u32 %v15543_v11, 16 }
 0x5eb   :  { %17974 = vst [vmem:[#allocation142_spill] sm:$0xff] %v15910_v47  ;;  %v15917_v57 = vcombine.low %v6282_v60, %v6292_v50  ;;  %v6311_v15 = vrot.slane %v6310_v9, 4  ;;  %v6329_v16 = vrot.slane %v6327_v59, 5  ;;  %v6333_v20 = vrot.slane %v6331_v4, 4 }
 0x5ec   :  { %v6301_v43 = vrot.slane %v6300_v38, 4  ;;  %v6315_v22 = vrot.slane %v6313_v21, 5  ;;  %v6320_v53 = vrot.slane %v6318_v51, 4  ;;  %v6323_v61 = vrot.slane %v6321_v6, 5 }
 0x5ed   :  { %v6334_v23 = vor.u32 %v6333_v20, %v6329_v16  ;;  %v6351_v52 = vshll.u32 %v15513_v37, 16  ;;  %v6355_v40 = vshrl.u32 %v15513_v37, 16  ;;  %v15927_v36 = vcombine.low %v15461_v12, %v15411_v10 }
 0x5ee   :  { %8214 = vmatmul.mubr.bf16.gmra.mrb[172].mxu1 %v15895_v14  ;;  %v6316_v49 = vsel %vm12086_vm5, %v6311_v15, %v6315_v22  ;;  %v6306_v7 = vsel %vm12086_vm5, %v6301_v43, %v6305_v54  ;;  %v6324_v42 = vor.u32 %v6323_v61, %v6320_v53  ;;  %v6337_v25 = vshll.u32 %v15530_v34, 16 }
 0x5ef   :  { %8221 = vmatprep.mubr.bf16.mxu1 %v15900_v29  ;;  %17975 = vst [vmem:[#allocation143_spill] sm:$0xff] %v15927_v36  ;;  %v6342_v28 = vshrl.u32 %v15570_v18, 16  ;;  %v6345_v17 = vshll.u32 %v15570_v18, 16  ;;  %v15934_v13 = vcombine.low %v6306_v7, %v6316_v49  ;;  %v6335_v3 = vrot.slane %v6334_v23, 4 }
 0x5f0   :  { %v6353_v50 = vrot.slane %v6351_v52, 5  ;;  %v6357_v9 = vrot.slane %v6355_v40, 4  ;;  %v6325_v10 = vrot.slane %v6324_v42, 4  ;;  %v6339_v12 = vrot.slane %v6337_v25, 5 }
 0x5f1   :  { %v6344_v59 = vrot.slane %v6342_v28, 4  ;;  %v6347_v54 = vrot.slane %v6345_v17, 5  ;;  %v6375_v38 = vshll.u32 %v15562_v46, 16  ;;  %v6379_v60 = vshrl.u32 %v15562_v46, 16 }
 0x5f2   :  { %v6340_v34 = vsel %vm12086_vm5, %v6335_v3, %v6339_v12  ;;  %v6358_v4 = vor.u32 %v6357_v9, %v6353_v50  ;;  %v15944_v21 = vcombine.low %v15500_v58, %v15444_v62  ;;  %v6361_v51 = vshll.u32 %v15545_v19, 16 }
 0x5f3   :  { %v6330_v6 = vsel %vm12086_vm5, %v6325_v10, %v6329_v16  ;;  %v6348_v15 = vor.u32 %v6347_v54, %v6344_v59  ;;  %v6366_v20 = vshrl.u32 %v15594_v8, 16  ;;  %v6369_v43 = vshll.u32 %v15594_v8, 16 }
 0x5f4   :  { %17976 = vst [vmem:[#allocation144_spill] sm:$0xff] %v15944_v21  ;;  %v15951_v22 = vcombine.low %v6330_v6, %v6340_v34  ;;  %v6359_v53 = vrot.slane %v6358_v4, 4  ;;  %v6377_v61 = vrot.slane %v6375_v38, 5  ;;  %v6381_v49 = vrot.slane %v6379_v60, 4 }
 0x5f5   :  { %v6349_v62 = vrot.slane %v6348_v15, 4  ;;  %v6363_v58 = vrot.slane %v6361_v51, 5  ;;  %v6368_v19 = vrot.slane %v6366_v20, 4  ;;  %v6371_v23 = vrot.slane %v6369_v43, 5  ;;  %v17979_v43 = vld [vmem:[#allocation111_spill] sm:$0xff] }
 0x5f6   :  { %8222 = vmatmul.mubr.bf16.gmra.mrb[176].mxu1 %v15910_v47  ;;  %v6382_v52 = vor.u32 %v6381_v49, %v6377_v61  ;;  %v6399_v40 = vshll.u32 %v15573_v44, 16  ;;  %v6403_v7 = vshrl.u32 %v15573_v44, 16  ;;  %v6390_v42 = vshrl.u32 %v15617_v35, 16 }
 0x5f7   :  { %8229 = vmatprep.mubr.bf16.mxu1 %v15917_v57  ;;  %v6364_v16 = vsel %vm12086_vm5, %v6359_v53, %v6363_v58  ;;  %v6393_v25 = vshll.u32 %v15617_v35, 16  ;;  %v15963_v28 = vcombine.low %v15543_v11, %v15479_v2  ;;  %v6354_v17 = vsel %vm12086_vm5, %v6349_v62, %v6353_v50 }
 0x5f8   :  { %v6372_v3 = vor.u32 %v6371_v23, %v6368_v19  ;;  %v6385_v9 = vshll.u32 %v15600_v63, 16  ;;  %v15968_v10 = vcombine.low %v6354_v17, %v6364_v16  ;;  %v6383_v12 = vrot.slane %v6382_v52, 4 }
 0x5f9   :  { %17977 = vst [vmem:[#allocation145_spill] sm:$0xff] %v15963_v28  ;;  %v6401_v59 = vrot.slane %v6399_v40, 5  ;;  %v6405_v54 = vrot.slane %v6403_v7, 4  ;;  %v6392_v34 = vrot.slane %v6390_v42, 4  ;;  %v6395_v4 = vrot.slane %v6393_v25, 5  ;;  %v17980_v40 = vld [vmem:[#allocation108_spill] sm:$0xff] }
 0x5fa   :  { %v6373_v38 = vrot.slane %v6372_v3, 4  ;;  %v6387_v2 = vrot.slane %v6385_v9, 5  ;;  %v6423_v60 = vshll.u32 %v15612_v39, 16  ;;  %v6427_v63 = vshrl.u32 %v15612_v39, 16  ;;  %v17982_v9 = vld [vmem:[#allocation112_spill] sm:$0xff] }
 0x5fb   :  { %v6406_v50 = vor.u32 %v6405_v54, %v6401_v59  ;;  %v15978_v51 = vcombine.low %v15570_v18, %v15513_v37  ;;  %v6396_v6 = vor.u32 %v6395_v4, %v6392_v34  ;;  %v6409_v20 = vshll.u32 %v15602_v56, 16  ;;  %v17983_v54 = vld [vmem:[#allocation119_spill] sm:$0xff] }
 0x5fc   :  { %v6388_v11 = vsel %vm12086_vm5, %v6383_v12, %v6387_v2  ;;  %v6378_v15 = vsel %vm12086_vm5, %v6373_v38, %v6377_v61  ;;  %v6414_v53 = vshrl.u32 %v17979_v43, 16  ;;  %v6417_v49 = vshll.u32 %v17979_v43, 16 }
 0x5fd   :  { %17978 = vst [vmem:[#allocation146_spill] sm:$0xff] %v15978_v51  ;;  %v15985_v62 = vcombine.low %v6378_v15, %v6388_v11  ;;  %v6407_v58 = vrot.slane %v6406_v50, 4  ;;  %v6425_v19 = vrot.slane %v6423_v60, 5  ;;  %v6429_v23 = vrot.slane %v6427_v63, 4  ;;  %v17984_v15 = vld [vmem:[#allocation117_spill] sm:$0xff] }
 0x5fe   :  { %8230 = vmatmul.mubr.bf16.gmra.mrb[180].mxu1 %v15927_v36  ;;  %v6397_v37 = vrot.slane %v6396_v6, 4  ;;  %v6411_v18 = vrot.slane %v6409_v20, 5  ;;  %v6416_v16 = vrot.slane %v6414_v53, 4  ;;  %v6419_v52 = vrot.slane %v6417_v49, 5 }
 0x5ff   :  { %8237 = vmatprep.mubr.bf16.mxu1 %v15934_v13  ;;  %v6430_v61 = vor.u32 %v6429_v23, %v6425_v19  ;;  %v6447_v7 = vshll.u32 %v17980_v40, 16  ;;  %v6451_v42 = vshrl.u32 %v17980_v40, 16  ;;  %v15995_v25 = vcombine.low %v15594_v8, %v15562_v46 }
 0x600   :  { %v6412_v56 = vsel %vm12086_vm5, %v6407_v58, %v6411_v18  ;;  %v6402_v17 = vsel %vm12086_vm5, %v6397_v37, %v6401_v59  ;;  %v6420_v3 = vor.u32 %v6419_v52, %v6416_v16  ;;  %v6433_v12 = vshll.u32 %v17982_v9, 16  ;;  %v17986_v58 = vld [vmem:[#allocation116_spill] sm:$0xff]  ;;  %v17987_v16 = vld [vmem:[#allocation122_spill] sm:$0xff] }
 0x601   :  { %17981 = vst [vmem:[#allocation111_spill] sm:$0xff] %v15995_v25  ;;  %v6438_v34 = vshrl.u32 %v17983_v54, 16  ;;  %v6441_v4 = vshll.u32 %v17983_v54, 16  ;;  %v16002_v38 = vcombine.low %v6402_v17, %v6412_v56  ;;  %v6431_v2 = vrot.slane %v6430_v61, 4 }
 0x602   :  { %v6449_v11 = vrot.slane %v6447_v7, 5  ;;  %v6453_v50 = vrot.slane %v6451_v42, 4  ;;  %v6421_v46 = vrot.slane %v6420_v3, 4  ;;  %v6435_v8 = vrot.slane %v6433_v12, 5 }
 0x603   :  { %v6440_v60 = vrot.slane %v6438_v34, 4  ;;  %v6443_v59 = vrot.slane %v6441_v4, 5  ;;  %v6471_v20 = vshll.u32 %v17984_v15, 16  ;;  %v6475_v53 = vshrl.u32 %v17984_v15, 16  ;;  %v17988_v34 = vld [vmem:[#allocation120_spill] sm:$0xff] }
 0x604   :  { %v6436_v63 = vsel %vm12086_vm5, %v6431_v2, %v6435_v8  ;;  %v6454_v6 = vor.u32 %v6453_v50, %v6449_v11  ;;  %v16012_v49 = vcombine.low %v15617_v35, %v15573_v44  ;;  %v6457_v23 = vshll.u32 %v17986_v58, 16 }
 0x605   :  { %v6426_v37 = vsel %vm12086_vm5, %v6421_v46, %v6425_v19  ;;  %v6444_v18 = vor.u32 %v6443_v59, %v6440_v60  ;;  %v6462_v52 = vshrl.u32 %v17987_v16, 16  ;;  %v6465_v56 = vshll.u32 %v17987_v16, 16  ;;  %v17990_v46 = vld [vmem:[#allocation123_spill] sm:$0xff] }
 0x606   :  { %8238 = vmatmul.mubr.bf16.gmra.mrb[184].mxu1 %v15944_v21  ;;  %17985 = vst [vmem:[#allocation108_spill] sm:$0xff] %v16012_v49  ;;  %v16019_v61 = vcombine.low %v6426_v37, %v6436_v63  ;;  %v6455_v7 = vrot.slane %v6454_v6, 4  ;;  %v6473_v42 = vrot.slane %v6471_v20, 5  ;;  %v6477_v17 = vrot.slane %v6475_v53, 4 }
 0x607   :  { %8245 = vmatprep.mubr.bf16.mxu1 %v15951_v22  ;;  %v6445_v44 = vrot.slane %v6444_v18, 4  ;;  %v6459_v35 = vrot.slane %v6457_v23, 5  ;;  %v6464_v3 = vrot.slane %v6462_v52, 4  ;;  %v6467_v9 = vrot.slane %v6465_v56, 5 }
 0x608   :  { %v6478_v12 = vor.u32 %v6477_v17, %v6473_v42  ;;  %v6495_v4 = vshll.u32 %v17988_v34, 16  ;;  %v6499_v2 = vshrl.u32 %v17988_v34, 16  ;;  %v16029_v50 = vcombine.low %v17979_v43, %v15612_v39 }
 0x609   :  { %v6460_v19 = vsel %vm12086_vm5, %v6455_v7, %v6459_v35  ;;  %v6481_v8 = vshll.u32 %v17990_v46, 16  ;;  %v6450_v60 = vsel %vm12086_vm5, %v6445_v44, %v6449_v11  ;;  %v6468_v59 = vor.u32 %v6467_v9, %v6464_v3  ;;  %v17992_v44 = vld [vmem:[#allocation125_spill] sm:$0xff] }
 0x60a   :  { %17989 = vst [vmem:[#allocation112_spill] sm:$0xff] %v16029_v50  ;;  %v6486_v63 = vshrl.u32 %v15747_v45, 16  ;;  %v6489_v6 = vshll.u32 %v15747_v45, 16  ;;  %v16036_v20 = vcombine.low %v6450_v60, %v6460_v19  ;;  %v6479_v53 = vrot.slane %v6478_v12, 4  ;;  %v17993_v19 = vld [vmem:[#allocation129_spill] sm:$0xff] }
 0x60b   :  { %v6497_v58 = vrot.slane %v6495_v4, 5  ;;  %v6501_v23 = vrot.slane %v6499_v2, 4  ;;  %v6469_v39 = vrot.slane %v6468_v59, 4  ;;  %v6483_v43 = vrot.slane %v6481_v8, 5 }
 0x60c   :  { %v6488_v37 = vrot.slane %v6486_v63, 4  ;;  %v6491_v18 = vrot.slane %v6489_v6, 5  ;;  %v6519_v56 = vshll.u32 %v15731_v33, 16  ;;  %v6523_v7 = vshrl.u32 %v15731_v33, 16 }
 0x60d   :  { %v6484_v11 = vsel %vm12086_vm5, %v6479_v53, %v6483_v43  ;;  %v6502_v52 = vor.u32 %v6501_v23, %v6497_v58  ;;  %v16046_v17 = vcombine.low %v17983_v54, %v17980_v40  ;;  %v6505_v35 = vshll.u32 %v17992_v44, 16  ;;  %v17994_v53 = vld [vmem:[#allocation127_spill] sm:$0xff]  ;;  %v18146_v27 = vld [vmem:[#allocation108_spill] sm:$0xff] }
 0x60e   :  { %8246 = vmatmul.mubr.bf16.gmra.mrb[188].mxu1 %v15963_v28  ;;  %v6474_v3 = vsel %vm12086_vm5, %v6469_v39, %v6473_v42  ;;  %v6492_v9 = vor.u32 %v6491_v18, %v6488_v37  ;;  %v6510_v12 = vshrl.u32 %v17993_v19, 16  ;;  %v6513_v4 = vshll.u32 %v17993_v19, 16  ;;  %v17996_v37 = vld [vmem:[#allocation130_spill] sm:$0xff] }
 0x60f   :  { %8253 = vmatprep.mubr.bf16.mxu1 %v15968_v10  ;;  %17991 = vst [vmem:[#allocation119_spill] sm:$0xff] %v16046_v17  ;;  %v16053_v2 = vcombine.low %v6474_v3, %v6484_v11  ;;  %v6503_v46 = vrot.slane %v6502_v52, 4  ;;  %v6521_v8 = vrot.slane %v6519_v56, 5  ;;  %v6525_v60 = vrot.slane %v6523_v7, 4 }
 0x610   :  { %v6493_v40 = vrot.slane %v6492_v9, 4  ;;  %v6507_v54 = vrot.slane %v6505_v35, 5  ;;  %v6512_v59 = vrot.slane %v6510_v12, 4  ;;  %v6515_v63 = vrot.slane %v6513_v4, 5 }
 0x611   :  { %v6526_v6 = vor.u32 %v6525_v60, %v6521_v8  ;;  %v6543_v23 = vshll.u32 %v17994_v53, 16  ;;  %v6547_v39 = vshrl.u32 %v17994_v53, 16  ;;  %v16063_v43 = vcombine.low %v17987_v16, %v17984_v15 }
 0x612   :  { %v6508_v42 = vsel %vm12086_vm5, %v6503_v46, %v6507_v54  ;;  %v6529_v18 = vshll.u32 %v17996_v37, 16  ;;  %v6498_v11 = vsel %vm12086_vm5, %v6493_v40, %v6497_v58  ;;  %v6516_v52 = vor.u32 %v6515_v63, %v6512_v59  ;;  %v17999_v54 = vld [vmem:[#allocation135_spill] sm:$0xff] }
 0x613   :  { %17995 = vst [vmem:[#allocation117_spill] sm:$0xff] %v16063_v43  ;;  %v6534_v56 = vshrl.u32 %v15801_v55, 16  ;;  %v6537_v7 = vshll.u32 %v15801_v55, 16  ;;  %v16070_v44 = vcombine.low %v6498_v11, %v6508_v42  ;;  %v6527_v35 = vrot.slane %v6526_v6, 4 }
 0x614   :  { %v6545_v3 = vrot.slane %v6543_v23, 5  ;;  %v6549_v9 = vrot.slane %v6547_v39, 4  ;;  %v6517_v15 = vrot.slane %v6516_v52, 4  ;;  %v6531_v16 = vrot.slane %v6529_v18, 5  ;;  %v18002_v23 = vld [vmem:[#allocation133_spill] sm:$0xff] }
 0x615   :  { %v6536_v12 = vrot.slane %v6534_v56, 4  ;;  %v6539_v4 = vrot.slane %v6537_v7, 5  ;;  %v6567_v59 = vshll.u32 %v17999_v54, 16  ;;  %v6571_v63 = vshrl.u32 %v17999_v54, 16 }
 0x616   :  { %8254 = vmatmul.mubr.bf16.gmra.mrb[192].mxu1 %v15978_v51  ;;  %v6532_v60 = vsel %vm12086_vm5, %v6527_v35, %v6531_v16  ;;  %v6550_v40 = vor.u32 %v6549_v9, %v6545_v3  ;;  %v16084_v42 = vcombine.low %v15747_v45, %v17988_v34  ;;  %v6553_v39 = vshll.u32 %v18002_v23, 16 }
 0x617   :  { %8261 = vmatprep.mubr.bf16.mxu1 %v15985_v62  ;;  %v6522_v37 = vsel %vm12086_vm5, %v6517_v15, %v6521_v8  ;;  %v6540_v11 = vor.u32 %v6539_v4, %v6536_v12  ;;  %v6558_v52 = vshrl.u32 %v15830_v31, 16  ;;  %v6561_v56 = vshll.u32 %v15830_v31, 16 }
 0x618   :  { %18000 = vst [vmem:[#allocation120_spill] sm:$0xff] %v16084_v42  ;;  %v16095_v7 = vcombine.low %v6522_v37, %v6532_v60  ;;  %v6551_v45 = vrot.slane %v6550_v40, 4  ;;  %v6569_v34 = vrot.slane %v6567_v59, 5  ;;  %v6573_v35 = vrot.slane %v6571_v63, 4 }
 0x619   :  { %v6541_v9 = vrot.slane %v6540_v11, 4  ;;  %v6555_v16 = vrot.slane %v6553_v39, 5  ;;  %v6560_v23 = vrot.slane %v6558_v52, 4  ;;  %v6563_v8 = vrot.slane %v6561_v56, 5 }
 0x61a   :  { %v6574_v12 = vor.u32 %v6573_v35, %v6569_v34  ;;  %v16105_v60 = vcombine.low %v17993_v19, %v15731_v33  ;;  %v6577_v63 = vshll.u32 %v15820_v5, 16  ;;  %v16124_v5 = vcombine.low %v15801_v55, %v17994_v53  ;;  %v11844_v55 = vld [vmem:[#allocation2 + $0x8] sm:$0x1] }
 0x61b   :  { %v6556_v15 = vsel %vm12086_vm5, %v6551_v45, %v6555_v16  ;;  %v6546_v40 = vsel %vm12086_vm5, %v6541_v9, %v6545_v3  ;;  %v6564_v59 = vor.u32 %v6563_v8, %v6560_v23  ;;  %v11843_v8 = vld [vmem:[#allocation2 + $0x4] sm:$0xf]  ;;  %v6682_v53 = vrot.slane %v11844_v55, 5 }
 0x61c   :  { %18005 = vst [vmem:[#allocation127_spill] sm:$0xff] %v16105_v60  ;;  %v16112_v39 = vcombine.low %v6546_v40, %v6556_v15  ;;  %v6575_v52 = vrot.slane %v6574_v12, 4  ;;  %v6579_v19 = vrot.slane %v6577_v63, 5  ;;  %18009 = vst [vmem:[#allocation147_spill] sm:$0xff] %v16124_v5  ;;  %v6679_v15 = vrot.slane %v11843_v8, 5 }
 0x61d   :  { %v6565_v33 = vrot.slane %v6564_v59, 4  ;;  %v11845_v40 = vld [vmem:[#allocation2] sm:$0xf]  ;;  %v16142_v63 = vcombine.low %v15830_v31, %v17999_v54  ;;  %v11846_v31 = vld [vmem:[#allocation2 + $0x10] sm:$0xf] }
 0x61e   :  { %8262 = vmatmul.mubr.bf16.gmra.mrb[196].mxu1 %v15995_v25  ;;  %v6580_v3 = vsel %vm12086_vm5, %v6575_v52, %v6579_v19  ;;  %v6681_v59 = vrot.slane %v6679_v15, 4  ;;  %v6686_v54 = vrot.slane %v11846_v31, 5 }
 0x61f   :  { %8269 = vmatprep.mubr.bf16.mxu1 %v16002_v38  ;;  %v6570_v45 = vsel %vm12086_vm5, %v6565_v33, %v6569_v34  ;;  %v10120_v34 = vrot.slane %v11845_v40, 9  ;;  %18015 = vst [vmem:[#allocation153_spill] sm:$0xff] %v16142_v63 }
 0x620   :  { %v16130_v9 = vcombine.low %v6570_v45, %v6580_v3  ;;  %v18019_v3 = vld [vmem:[#allocation55_spill] sm:$0xff]  ;;  %v6683_v8 = vsel %vm12075_vm4, %v6681_v59, %v6682_v53  ;;  %v11736_v59 = vld [vmem:[%s17264_s4 + $0x108] sm:$0xff]  }
 0x621   :  { %v6680_v45 = vsel %vm12075_vm4, %v10120_v34, %v6679_v15  ;;  %v18024_v15 = vld [vmem:[#allocation68_spill] sm:$0xff]  ;;  %v11847_v53 = vld [vmem:[#allocation2 + $0x14] sm:$0x1] }
 0x622   :  { %18011 = vst [vmem:[#allocation149_spill] sm:$0xff] %v16130_v9  ;;  %v10220_v40 = vcombine.low %v6680_v45, %v6683_v8  ;;  %v6689_v34 = vrot.slane %v11847_v53, 5  ;;  %v11848_v8 = vld [vmem:[#allocation2 + $0xc] sm:$0xf] }
 0x623   :  { %v10121_v31 = vrot.slane %v11848_v8, 9 }
 0x626   :  { %8270 = vmatmul.mubr.bf16.gmra.mrb[200].mxu1 %v16012_v49 }
 0x627   :  { %8277 = vmatprep.mubr.bf16.mxu1 %v16019_v61 }
 0x62e   :  { %8278 = vmatmul.mubr.bf16.gmra.mrb[204].mxu1 %v16029_v50 }
 0x62f   :  { %8285 = vmatprep.mubr.bf16.mxu1 %v16036_v20 }
 0x636   :  { %8286 = vmatmul.mubr.bf16.gmra.mrb[208].mxu1 %v16046_v17 }
 0x637   :  { %8293 = vmatprep.mubr.bf16.mxu1 %v16053_v2 }
 0x63e   :  { %8294 = vmatmul.mubr.bf16.gmra.mrb[212].mxu1 %v16063_v43 }
 0x63f   :  { %8301 = vmatprep.mubr.bf16.mxu1 %v16070_v44 }
 0x640   :  { %v16074_v46 = vpop.f32.mrb[152].mxu0 }
 0x641   :  { %17997 = vst [vmem:[#allocation116_spill] sm:$0xff] %v16074_v46  ;;  %v16076_v58 = vpop.f32.mrb[153].mxu0  ;;  %v18071_v46 = vld [vmem:[#allocation104_spill] sm:$0xff] }
 0x642   :  { %17998 = vst [vmem:[#allocation122_spill] sm:$0xff] %v16076_v58  ;;  %v16086_v6 = vpop.f32.mrb[154].mxu0 }
 0x643   :  { %18001 = vst [vmem:[#allocation123_spill] sm:$0xff] %v16086_v6  ;;  %v16091_v18 = vpop.f32.mrb[155].mxu0 }
 0x644   :  { %18003 = vst [vmem:[#allocation125_spill] sm:$0xff] %v16091_v18 }
 0x646   :  { %8302 = vmatmul.mubr.bf16.gmra.mrb[216].mxu1 %v16084_v42 }
 0x647   :  { %8309 = vmatprep.mubr.bf16.mxu1 %v16095_v7 }
 0x64b   :  { %v16101_v4 = vpop.f32.mrb[156].mxu0 }
 0x64c   :  { %18004 = vst [vmem:[#allocation129_spill] sm:$0xff] %v16101_v4  ;;  %v16110_v37 = vpop.f32.mrb[157].mxu0 }
 0x64d   :  { %18006 = vst [vmem:[#allocation130_spill] sm:$0xff] %v16110_v37  ;;  %v16115_v11 = vpop.f32.mrb[158].mxu0 }
 0x64e   :  { %8310 = vmatmul.mubr.bf16.gmra.mrb[220].mxu1 %v16105_v60  ;;  %18007 = vst [vmem:[#allocation135_spill] sm:$0xff] %v16115_v11  ;;  %v16118_v56 = vpop.f32.mrb[159].mxu0  ;;  %v18057_v11 = vld [vmem:[#allocation81_spill] sm:$0xff] }
 0x64f   :  { %8317 = vmatprep.mubr.bf16.mxu1 %v16112_v39  ;;  %18008 = vst [vmem:[#allocation133_spill] sm:$0xff] %v16118_v56 }
 0x655   :  { %v16128_v35 = vpop.f32.mrb[160].mxu0 }
 0x656   :  { %18010 = vst [vmem:[#allocation148_spill] sm:$0xff] %v16128_v35  ;;  %v16132_v16 = vpop.f32.mrb[161].mxu0  ;;  %8318 = vmatmul.mubr.bf16.gmra.mrb[224].mxu1 %v16124_v5 }
 0x657   :  { %18012 = vst [vmem:[#allocation150_spill] sm:$0xff] %v16132_v16  ;;  %v16135_v23 = vpop.f32.mrb[162].mxu0  ;;  %8325 = vmatprep.mubr.bf16.mxu1 %v16130_v9 }
 0x658   :  { %18013 = vst [vmem:[#allocation151_spill] sm:$0xff] %v16135_v23  ;;  %v16138_v12 = vpop.f32.mrb[163].mxu0 }
 0x659   :  { %18014 = vst [vmem:[#allocation152_spill] sm:$0xff] %v16138_v12  ;;  %v18053_v12 = vld [vmem:[#allocation65_spill] sm:$0xff] }
 0x65d   :  { %v16144_v52 = vpop.f32.mrb[164].mxu0 }
 0x65e   :  { %18016 = vst [vmem:[#allocation154_spill] sm:$0xff] %v16144_v52  ;;  %v16146_v33 = vpop.f32.mrb[165].mxu0  ;;  %8326 = vmatmul.mubr.bf16.gmra.mrb[228].mxu1 %v16142_v63  ;;  %v11735_v52 = vld [vmem:[%s17264_s4 + $0x100] sm:$0xff]  }
 0x65f   :  { %18017 = vst [vmem:[#allocation155_spill] sm:$0xff] %v16146_v33  ;;  %v16149_v19 = vpop.f32.mrb[166].mxu0  ;;  %8366 = vmatprep.mubr.bf16.mxu1 %v18019_v3 }
 0x660   :  { %18018 = vst [vmem:[#allocation156_spill] sm:$0xff] %v16149_v19  ;;  %v16156_v55 = vpop.f32.mrb[167].mxu0  ;;  %v6688_v19 = vrot.slane %v6686_v54, 4 }
 0x661   :  { %18020 = vst [vmem:[#allocation55_spill] sm:$0xff] %v16156_v55  ;;  %v18047_v55 = vld [vmem:[#allocation57_spill] sm:$0xff] }
 0x665   :  { %v16161_v33 = vpop.f32.mrb[168].mxu0 }
 0x666   :  { %18021 = vst [vmem:[#allocation157_spill] sm:$0xff] %v16161_v33  ;;  %v16163_v23 = vpop.f32.mrb[169].mxu0  ;;  %8367 = vmatmul.mubr.bf16.vlgmr.msra.gmra.mrb[104].mxu1 %v10220_v40  ;;  %v6690_v40 = vsel %vm12075_vm4, %v6688_v19, %v6689_v34  ;;  %v18029_v19 = vld [vmem:[#allocation82_spill] sm:$0xff] }
 0x667   :  { %18022 = vst [vmem:[#allocation158_spill] sm:$0xff] %v16163_v23  ;;  %v16165_v3 = vpop.f32.mrb[170].mxu0  ;;  %8374 = vmatprep.mubr.bf16.mxu1 %v18024_v15  ;;  %8624 = vmatpush1.bf16.msra.mxu1 %v11735_v52  ;;  %v11737_v52 = vld [vmem:[%s17264_s4 + $0x110] sm:$0xff]  }
 0x668   :  { %18023 = vst [vmem:[#allocation159_spill] sm:$0xff] %v16165_v3  ;;  %v16171_v45 = vpop.f32.mrb[171].mxu0  ;;  %8625 = vmatprep.subr.bf16.mxu1 %v17756_v30  ;;  %v6687_v3 = vsel %vm12075_vm4, %v10121_v31, %v6686_v54  ;;  %v11738_v54 = vld [vmem:[%s17264_s4 + $0x118] sm:$0xff]  }
 0x669   :  { %18025 = vst [vmem:[#allocation160_spill] sm:$0xff] %v16171_v45  ;;  %v16181_v53 = vcombine.low %v6687_v3, %v6690_v40  ;;  %v11739_v3 = vld [vmem:[%s17264_s4 + $0x120] sm:$0xff]   ;;  %v18033_v40 = vld [vmem:[#allocation34_spill] sm:$0xff] }
 0x66b   :  { %8626 = vmatpush1.bf16.msra.mxu1 %v11736_v59 }
 0x66c   :  { %8627 = vmatprep.subr.bf16.mxu1 %v17756_v30 }
 0x66d   :  { %v16184_v33 = vpop.f32.mrb[172].mxu0 }
 0x66e   :  { %18026 = vst [vmem:[#allocation161_spill] sm:$0xff] %v16184_v33  ;;  %v16186_v45 = vpop.f32.mrb[173].mxu0  ;;  %8375 = vmatmul.mubr.bf16.gmra.mrb[108].mxu1 %v16181_v53 }
 0x66f   :  { %18027 = vst [vmem:[#allocation162_spill] sm:$0xff] %v16186_v45  ;;  %v16189_v8 = vpop.f32.mrb[174].mxu0  ;;  %8382 = vmatprep.mubr.bf16.mxu1 %v18029_v19  ;;  %8628 = vmatpush1.bf16.msra.mxu1 %v11737_v52  ;;  %v11854_v19 = vld [vmem:[#allocation2 + $0xe8] sm:$0xf] }
 0x670   :  { %18028 = vst [vmem:[#allocation163_spill] sm:$0xff] %v16189_v8  ;;  %v16195_v34 = vpop.f32.mrb[175].mxu0  ;;  %8629 = vmatprep.subr.bf16.mxu1 %v17756_v30  ;;  %v18035_v8 = vld [vmem:[#allocation89_spill] sm:$0xff]  ;;  %v6798_v15 = vrot.slane %v11854_v19, 5  ;;  %v18098_v19 = vld [vmem:[#allocation118_spill] sm:$0xff] }
 0x671   :  { %18030 = vst [vmem:[#allocation164_spill] sm:$0xff] %v16195_v34  ;;  %v18040_v34 = vld [vmem:[#allocation19_spill] sm:$0xff] }
 0x672   :  { %v6800_v24 = vrot.slane %v6798_v15, 4 }
 0x673   :  { %8630 = vmatpush1.bf16.msra.mxu1 %v11738_v54  ;;  %v11740_v54 = vld [vmem:[%s17264_s4 + $0x128] sm:$0xff]  }
 0x674   :  { %8631 = vmatprep.subr.bf16.mxu1 %v17756_v30 }
 0x675   :  { %v16202_v59 = vpop.f32.mrb[176].mxu0 }
 0x676   :  { %18031 = vst [vmem:[#allocation165_spill] sm:$0xff] %v16202_v59  ;;  %v16204_v31 = vpop.f32.mrb[177].mxu0  ;;  %8383 = vmatmul.mubr.bf16.gmra.mrb[112].mxu1 %v18033_v40  ;;  %v11741_v59 = vld [vmem:[%s17264_s4 + $0x130] sm:$0xff]  }
 0x677   :  { %18032 = vst [vmem:[#allocation166_spill] sm:$0xff] %v16204_v31  ;;  %v16207_v52 = vpop.f32.mrb[178].mxu0  ;;  %8390 = vmatprep.mubr.bf16.mxu1 %v18035_v8  ;;  %8632 = vmatpush1.bf16.msra.mxu1 %v11739_v3  ;;  %v18091_v8 = vld [vmem:[#allocation10_spill] sm:$0xff] }
 0x678   :  { %18034 = vst [vmem:[#allocation34_spill] sm:$0xff] %v16207_v52  ;;  %v16213_v33 = vpop.f32.mrb[179].mxu0  ;;  %8633 = vmatprep.subr.bf16.mxu1 %v17756_v30  ;;  %v18038_v52 = vld [vmem:[#allocation67_spill] sm:$0xff] }
 0x679   :  { %18036 = vst [vmem:[#allocation167_spill] sm:$0xff] %v16213_v33 }
 0x67b   :  { %8634 = vmatpush1.bf16.msra.mxu1 %v11740_v54  ;;  %v11743_v54 = vld [vmem:[%s17264_s4 + $0x138] sm:$0xff]  }
 0x67c   :  { %8635 = vmatprep.subr.bf16.mxu1 %v17756_v30 }
 0x67d   :  { %v16220_v31 = vpop.f32.mrb[180].mxu0 }
 0x67e   :  { %18037 = vst [vmem:[#allocation168_spill] sm:$0xff] %v16220_v31  ;;  %8391 = vmatmul.mubr.bf16.gmra.mrb[116].mxu1 %v18038_v52  ;;  %v16223_v3 = vpop.f32.mrb[181].mxu0  ;;  %v11744_v31 = vld [vmem:[%s17264_s4 + $0x140] sm:$0xff]  }
 0x67f   :  { %18039 = vst [vmem:[#allocation67_spill] sm:$0xff] %v16223_v3  ;;  %8398 = vmatprep.mubr.bf16.mxu1 %v18040_v34  ;;  %v16226_v45 = vpop.f32.mrb[182].mxu0  ;;  %8636 = vmatpush1.bf16.msra.mxu1 %v11741_v59  ;;  %v18045_v59 = vld [vmem:[#allocation73_spill] sm:$0xff] }
 0x680   :  { %18041 = vst [vmem:[#allocation169_spill] sm:$0xff] %v16226_v45  ;;  %v16231_v33 = vpop.f32.mrb[183].mxu0  ;;  %8637 = vmatprep.subr.bf16.mxu1 %v17756_v30 }
 0x681   :  { %18042 = vst [vmem:[#allocation170_spill] sm:$0xff] %v16231_v33 }
 0x683   :  { %8638 = vmatpush1.bf16.msra.mxu1 %v11743_v54  ;;  %v11745_v54 = vld [vmem:[%s17264_s4 + $0x148] sm:$0xff]  }
 0x684   :  { %8639 = vmatprep.subr.bf16.mxu1 %v17756_v30 }
 0x685   :  { %v16238_v3 = vpop.f32.mrb[184].mxu0 }
 0x686   :  { %18043 = vst [vmem:[#allocation171_spill] sm:$0xff] %v16238_v3  ;;  %v16240_v23 = vpop.f32.mrb[185].mxu0  ;;  %8399 = vmatmul.mubr.bf16.gmra.mrb[120].mxu1 %v18045_v59  ;;  %v11746_v3 = vld [vmem:[%s17264_s4 + $0x150] sm:$0xff]  }
 0x687   :  { %18044 = vst [vmem:[#allocation172_spill] sm:$0xff] %v16240_v23  ;;  %v16243_v45 = vpop.f32.mrb[186].mxu0  ;;  %8406 = vmatprep.mubr.bf16.mxu1 %v18047_v55  ;;  %8640 = vmatpush1.bf16.msra.mxu1 %v11744_v31  ;;  %v18051_v31 = vld [vmem:[#allocation77_spill] sm:$0xff] }
 0x688   :  { %18046 = vst [vmem:[#allocation73_spill] sm:$0xff] %v16243_v45  ;;  %v16249_v33 = vpop.f32.mrb[187].mxu0  ;;  %8641 = vmatprep.subr.bf16.mxu1 %v17756_v30  ;;  %v11853_v55 = vld [vmem:[#allocation2 + $0xe0] sm:$0x1] }
 0x689   :  { %18048 = vst [vmem:[#allocation173_spill] sm:$0xff] %v16249_v33  ;;  %v6794_v34 = vrot.slane %v11853_v55, 5  ;;  %v11855_v55 = vld [vmem:[#allocation2 + $0xe4] sm:$0xf] }
 0x68a   :  { %v10137_v9 = vrot.slane %v11855_v55, 9  ;;  %v18103_v55 = vld [vmem:[#allocation137_spill] sm:$0xff] }
 0x68b   :  { %8642 = vmatpush1.bf16.msra.mxu1 %v11745_v54 }
 0x68c   :  { %8643 = vmatprep.subr.bf16.mxu1 %v17756_v30 }
 0x68d   :  { %v16256_v23 = vpop.f32.mrb[188].mxu0 }
 0x68e   :  { %18049 = vst [vmem:[#allocation174_spill] sm:$0xff] %v16256_v23  ;;  %v16258_v45 = vpop.f32.mrb[189].mxu0  ;;  %8407 = vmatmul.mubr.bf16.gmra.mrb[124].mxu1 %v18051_v31 }
 0x68f   :  { %18050 = vst [vmem:[#allocation175_spill] sm:$0xff] %v16258_v45  ;;  %v16261_v35 = vpop.f32.mrb[190].mxu0  ;;  %8414 = vmatprep.mubr.bf16.mxu1 %v18053_v12  ;;  %8644 = vmatpush1.bf16.msra.mxu1 %v11746_v3  ;;  %v18059_v45 = vld [vmem:[#allocation7_spill] sm:$0xff] }
 0x690   :  { %18052 = vst [vmem:[#allocation77_spill] sm:$0xff] %v16261_v35  ;;  %v16264_v33 = vpop.f32.mrb[191].mxu0  ;;  %8645 = vmatprep.subr.bf16.mxu1 %v17756_v30  ;;  %v11747_v35 = vld [vmem:[%s17264_s4 + $0x158] sm:$0xff]  }
 0x691   :  { %18054 = vst [vmem:[#allocation176_spill] sm:$0xff] %v16264_v33 }
 0x693   :  { %8646 = vmatpush1.bf16.msra.mxu1 %v11747_v35 }
 0x694   :  { %8647 = vmatprep.subr.bf16.mxu1 %v17756_v30 }
 0x695   :  { %v16267_v54 = vpop.f32.mrb[192].mxu0 }
 0x696   :  { %18055 = vst [vmem:[#allocation177_spill] sm:$0xff] %v16267_v54  ;;  %v16269_v16 = vpop.f32.mrb[193].mxu0  ;;  %8415 = vmatmul.mubr.bf16.gmra.mrb[128].mxu1 %v18057_v11 }
 0x697   :  { %18056 = vst [vmem:[#allocation178_spill] sm:$0xff] %v16269_v16  ;;  %v16272_v23 = vpop.f32.mrb[194].mxu0  ;;  %8422 = vmatprep.mubr.bf16.mxu1 %v18059_v45  ;;  %v18063_v16 = vld [vmem:[#allocation85_spill] sm:$0xff] }
 0x698   :  { %18058 = vst [vmem:[#allocation81_spill] sm:$0xff] %v16272_v23  ;;  %v16278_v4 = vpop.f32.mrb[195].mxu0  ;;  %v18065_v23 = vld [vmem:[#allocation96_spill] sm:$0xff] }
 0x699   :  { %18060 = vst [vmem:[#allocation179_spill] sm:$0xff] %v16278_v4  ;;  %v18069_v4 = vld [vmem:[#allocation88_spill] sm:$0xff] }
 0x69d   :  { %v16281_v3 = vpop.f32.mrb[196].mxu0 }
 0x69e   :  { %18061 = vst [vmem:[#allocation180_spill] sm:$0xff] %v16281_v3  ;;  %v16283_v54 = vpop.f32.mrb[197].mxu0  ;;  %8423 = vmatmul.mubr.bf16.gmra.mrb[132].mxu1 %v18063_v16  ;;  %v11748_v3 = vld [vmem:[%s17264_s4 + $0x160] sm:$0xff]  }
 0x69f   :  { %18062 = vst [vmem:[#allocation181_spill] sm:$0xff] %v16283_v54  ;;  %v16286_v33 = vpop.f32.mrb[198].mxu0  ;;  %8430 = vmatprep.mubr.bf16.mxu1 %v18065_v23  ;;  %8648 = vmatpush1.bf16.msra.mxu1 %v11748_v3  ;;  %v18083_v23 = vld [vmem:[#allocation121_spill] sm:$0xff] }
 0x6a0   :  { %18064 = vst [vmem:[#allocation85_spill] sm:$0xff] %v16286_v33  ;;  %v16289_v56 = vpop.f32.mrb[199].mxu0  ;;  %8649 = vmatprep.subr.bf16.mxu1 %v17756_v30 }
 0x6a1   :  { %18066 = vst [vmem:[#allocation182_spill] sm:$0xff] %v16289_v56 }
 0x6a5   :  { %v16291_v37 = vpop.f32.mrb[200].mxu0 }
 0x6a6   :  { %18067 = vst [vmem:[#allocation183_spill] sm:$0xff] %v16291_v37  ;;  %v16293_v6 = vpop.f32.mrb[201].mxu0  ;;  %8431 = vmatmul.mubr.bf16.gmra.mrb[136].mxu1 %v18069_v4 }
 0x6a7   :  { %18068 = vst [vmem:[#allocation184_spill] sm:$0xff] %v16293_v6  ;;  %v16296_v35 = vpop.f32.mrb[202].mxu0  ;;  %8438 = vmatprep.mubr.bf16.mxu1 %v18071_v46  ;;  %v18075_v6 = vld [vmem:[#allocation11_spill] sm:$0xff] }
 0x6a8   :  { %18070 = vst [vmem:[#allocation88_spill] sm:$0xff] %v16296_v35  ;;  %v16302_v54 = vpop.f32.mrb[203].mxu0  ;;  %v18077_v35 = vld [vmem:[#allocation109_spill] sm:$0xff] }
 0x6a9   :  { %18072 = vst [vmem:[#allocation185_spill] sm:$0xff] %v16302_v54  ;;  %v18081_v54 = vld [vmem:[#allocation21_spill] sm:$0xff] }
 0x6ad   :  { %v16305_v33 = vpop.f32.mrb[204].mxu0 }
 0x6ae   :  { %18073 = vst [vmem:[#allocation186_spill] sm:$0xff] %v16305_v33  ;;  %v16307_v37 = vpop.f32.mrb[205].mxu0  ;;  %8439 = vmatmul.mubr.bf16.gmra.mrb[140].mxu1 %v18075_v6  ;;  %v11749_v33 = vld [vmem:[%s17264_s4 + $0x168] sm:$0xff]  }
 0x6af   :  { %18074 = vst [vmem:[#allocation187_spill] sm:$0xff] %v16307_v37  ;;  %v16310_v56 = vpop.f32.mrb[206].mxu0  ;;  %8446 = vmatprep.mubr.bf16.mxu1 %v18077_v35  ;;  %8650 = vmatpush1.bf16.msra.mxu1 %v11749_v33  ;;  %v16339_v33 = vld [vmem:[#allocation2 + $0xc4] sm:$0xf]  ;;  %v11752_v35 = vld [vmem:[%s17264_s4 + $0x178] sm:$0xff]  }
 0x6b0   :  { %18076 = vst [vmem:[#allocation11_spill] sm:$0xff] %v16310_v56  ;;  %v16313_v18 = vpop.f32.mrb[207].mxu0  ;;  %8651 = vmatprep.subr.bf16.mxu1 %v17756_v30  ;;  %v18085_v56 = vld [vmem:[#allocation46_spill] sm:$0xff] }
 0x6b1   :  { %18078 = vst [vmem:[#allocation188_spill] sm:$0xff] %v16313_v18  ;;  %v18088_v18 = vld [vmem:[#allocation25_spill] sm:$0xff] }
 0x6b5   :  { %v16315_v58 = vpop.f32.mrb[208].mxu0 }
 0x6b6   :  { %18079 = vst [vmem:[#allocation189_spill] sm:$0xff] %v16315_v58  ;;  %v16317_v46 = vpop.f32.mrb[209].mxu0  ;;  %8447 = vmatmul.mubr.bf16.gmra.mrb[144].mxu1 %v18081_v54  ;;  %v18086_v58 = vld [vmem:[#allocation113_spill] sm:$0xff] }
 0x6b7   :  { %18080 = vst [vmem:[#allocation190_spill] sm:$0xff] %v16317_v46  ;;  %v16320_v3 = vpop.f32.mrb[210].mxu0  ;;  %8454 = vmatprep.mubr.bf16.mxu1 %v18083_v23  ;;  %v18087_v46 = vld [vmem:[#allocation45_spill] sm:$0xff]  ;;  %v11851_v23 = vld [vmem:[#allocation2 + $0xdc] sm:$0xf] }
 0x6b8   :  { %18082 = vst [vmem:[#allocation21_spill] sm:$0xff] %v16320_v3  ;;  %v16326_v37 = vpop.f32.mrb[211].mxu0  ;;  %v11750_v3 = vld [vmem:[%s17264_s4 + $0x170] sm:$0xff]  }
 0x6b9   :  { %18084 = vst [vmem:[#allocation191_spill] sm:$0xff] %v16326_v37  ;;  %8652 = vmatpush1.bf16.msra.mxu1 %v11750_v3  ;;  %v16341_v37 = vld [vmem:[#allocation2 + $0xc0] sm:$0xf]  ;;  %v6791_v3 = vrot.slane %v11851_v23, 5 }
 0x6ba   :  { %8653 = vmatprep.subr.bf16.mxu1 %v17756_v30 }
 0x6bb   :  { %v6793_v12 = vrot.slane %v6791_v3, 4 }
 0x6bd   :  { %8654 = vmatpush1.bf16.msra.mxu1 %v11752_v35  ;;  %v6795_v23 = vsel %vm12075_vm4, %v6793_v12, %v6794_v34  ;;  %v18093_v12 = vld [vmem:[#allocation99_spill] sm:$0xff]  ;;  %v18099_v34 = vld [vmem:[#allocation124_spill] sm:$0xff] }
 0x6be   :  { %8455 = vmatmul.mubr.bf16.gmra.mrb[148].mxu1 %v18085_v56  ;;  %8912 = vmatprep.subr.bf16.mxu1 %v17756_v30 }
 0x6bf   :  { %8462 = vmatprep.mubr.bf16.mxu1 %v18086_v58  ;;  %v16345_v58 = vcombine.low %v16341_v37, %v16339_v33 }
 0x6c1   :  { %18089 = vst [vmem:[#allocation46_spill] sm:$0xff] %v16345_v58 }
 0x6c6   :  { %8463 = vmatmul.mubr.bf16.gmra.mrb[152].mxu1 %v18087_v46 }
 0x6c7   :  { %8470 = vmatprep.mubr.bf16.mxu1 %v15780_v1  ;;  %v18090_v1 = vld [vmem:[#allocation8_spill] sm:$0xff] }
 0x6ce   :  { %8471 = vmatmul.mubr.bf16.gmra.mrb[156].mxu1 %v18088_v18 }
 0x6cf   :  { %8478 = vmatprep.mubr.bf16.mxu1 %v15841_v41  ;;  %v11852_v41 = vld [vmem:[#allocation2 + $0xd8] sm:$0xf] }
 0x6d0   :  { %v10136_v45 = vrot.slane %v11852_v41, 9  ;;  %v6801_v41 = vrot.slane %v15844_v26, 5  ;;  %v18094_v26 = vld [vmem:[#allocation102_spill] sm:$0xff] }
 0x6d6   :  { %8479 = vmatmul.mubr.bf16.gmra.mrb[160].mxu1 %v18090_v1 }
 0x6d7   :  { %8486 = vmatprep.mubr.bf16.mxu1 %v16345_v58  ;;  %v6792_v58 = vsel %vm12075_vm4, %v10136_v45, %v6791_v3  ;;  %v6799_v45 = vsel %vm12075_vm4, %v10137_v9, %v6798_v15  ;;  %v18096_v9 = vld [vmem:[#allocation107_spill] sm:$0xff]  ;;  %v18097_v15 = vld [vmem:[#allocation114_spill] sm:$0xff] }
 0x6d8   :  { %v10236_v35 = vcombine.low %v6792_v58, %v6795_v23  ;;  %v18092_v58 = vld [vmem:[#allocation94_spill] sm:$0xff] }
 0x6d9   :  { %v18100_v23 = vld [vmem:[#allocation126_spill] sm:$0xff] }
 0x6de   :  { %8487 = vmatmul.mubr.bf16.gmra.mrb[164].mxu1 %v18091_v8 }
 0x6df   :  { %8494 = vmatprep.mubr.bf16.mxu1 %v15895_v14  ;;  %v6802_v14 = vsel %vm12075_vm4, %v6800_v24, %v6801_v41  ;;  %v18095_v24 = vld [vmem:[#allocation106_spill] sm:$0xff] }
 0x6e0   :  { %v16365_v3 = vcombine.low %v6799_v45, %v6802_v14  ;;  %v18102_v41 = vld [vmem:[#allocation134_spill] sm:$0xff]  ;;  %v16393_v14 = vld [vmem:[#allocation2 + $0x19c] sm:$0xf] }
 0x6e1   :  { %v18104_v45 = vld [vmem:[#allocation140_spill] sm:$0xff] }
 0x6e6   :  { %8495 = vmatmul.mubr.bf16.gmra.mrb[168].mxu1 %v10236_v35  ;;  %v18101_v35 = vld [vmem:[#allocation131_spill] sm:$0xff] }
 0x6e7   :  { %8502 = vmatprep.mubr.bf16.mxu1 %v15910_v47 }
 0x6ee   :  { %8503 = vmatmul.mubr.bf16.gmra.mrb[172].mxu1 %v16365_v3 }
 0x6ef   :  { %8510 = vmatprep.mubr.bf16.mxu1 %v15927_v36 }
 0x6f6   :  { %8511 = vmatmul.mubr.bf16.gmra.mrb[176].mxu1 %v18092_v58 }
 0x6f7   :  { %8518 = vmatprep.mubr.bf16.mxu1 %v15944_v21 }
 0x6fe   :  { %8519 = vmatmul.mubr.bf16.gmra.mrb[180].mxu1 %v18093_v12 }
 0x6ff   :  { %8526 = vmatprep.mubr.bf16.mxu1 %v15963_v28  ;;  %v11857_v28 = vld [vmem:[#allocation2 + $0xc8] sm:$0x1] }
 0x700   :  { %v6921_v21 = vshll.u32 %v11857_v28, 16 }
 0x702   :  { %v6923_v47 = vrot.slane %v6921_v21, 5 }
 0x706   :  { %8527 = vmatmul.mubr.bf16.gmra.mrb[184].mxu1 %v18094_v26 }
 0x707   :  { %8534 = vmatprep.mubr.bf16.mxu1 %v15978_v51 }
 0x70e   :  { %8535 = vmatmul.mubr.bf16.gmra.mrb[188].mxu1 %v18095_v24 }
 0x70f   :  { %8542 = vmatprep.mubr.bf16.mxu1 %v15995_v25 }
 0x716   :  { %8543 = vmatmul.mubr.bf16.gmra.mrb[192].mxu1 %v18096_v9 }
 0x717   :  { %8550 = vmatprep.mubr.bf16.mxu1 %v16012_v49 }
 0x71e   :  { %8551 = vmatmul.mubr.bf16.gmra.mrb[196].mxu1 %v18097_v15 }
 0x71f   :  { %8558 = vmatprep.mubr.bf16.mxu1 %v16029_v50  ;;  %v18120_v50 = vld [vmem:[#allocation128_spill] sm:$0xff] }
 0x726   :  { %8559 = vmatmul.mubr.bf16.gmra.mrb[200].mxu1 %v18098_v19 }
 0x727   :  { %8566 = vmatprep.mubr.bf16.mxu1 %v16046_v17  ;;  %v18106_v17 = vld [vmem:[#allocation138_spill] sm:$0xff] }
 0x72e   :  { %8567 = vmatmul.mubr.bf16.gmra.mrb[204].mxu1 %v18099_v34 }
 0x72f   :  { %8574 = vmatprep.mubr.bf16.mxu1 %v16063_v43  ;;  %v16397_v43 = vcombine.low %v18104_v45, %v16393_v14  ;;  %v11754_v45 = vld [vmem:[%s17264_s4 + $0x188] sm:$0xff]  }
 0x731   :  { %18105 = vst [vmem:[#allocation45_spill] sm:$0xff] %v16397_v43 }
 0x736   :  { %8575 = vmatmul.mubr.bf16.gmra.mrb[208].mxu1 %v18100_v23 }
 0x737   :  { %8582 = vmatprep.mubr.bf16.mxu1 %v16084_v42 }
 0x73e   :  { %8583 = vmatmul.mubr.bf16.gmra.mrb[212].mxu1 %v18101_v35 }
 0x73f   :  { %8590 = vmatprep.mubr.bf16.mxu1 %v16105_v60  ;;  %v18107_v60 = vld [vmem:[#allocation52_spill] sm:$0xff] }
 0x746   :  { %8591 = vmatmul.mubr.bf16.gmra.mrb[216].mxu1 %v18102_v41 }
 0x747   :  { %8598 = vmatprep.mubr.bf16.mxu1 %v16124_v5  ;;  %v11753_v5 = vld [vmem:[%s17264_s4 + $0x180] sm:$0xff]  }
 0x74e   :  { %8599 = vmatmul.mubr.bf16.gmra.mrb[220].mxu1 %v18103_v55 }
 0x74f   :  { %8606 = vmatprep.mubr.bf16.mxu1 %v16142_v63  ;;  %v6905_v63 = vshll.u32 %v16341_v37, 16 }
 0x751   :  { %v6907_v49 = vrot.slane %v6905_v63, 5 }
 0x756   :  { %8607 = vmatmul.mubr.bf16.gmra.mrb[224].mxu1 %v18106_v17 }
 0x757   :  { %8614 = vmatprep.mubr.bf16.mxu1 %v16397_v43  ;;  %v18108_v43 = vld [vmem:[#allocation66_spill] sm:$0xff] }
 0x75e   :  { %8615 = vmatmul.mubr.bf16.gmra.mrb[228].mxu1 %v15865_v48 }
 0x75f   :  { %8655 = vmatprep.mubr.bf16.mxu1 %v16181_v53  ;;  %v11755_v53 = vld [vmem:[%s17264_s4 + $0x190] sm:$0xff]  }
 0x766   :  { %8656 = vmatmul.mubr.bf16.vlgmr.msra.gmra.mrb[104].mxu1 %v18107_v60  ;;  %v11756_v60 = vld [vmem:[%s17264_s4 + $0x198] sm:$0xff]  }
 0x767   :  { %8663 = vmatprep.mubr.bf16.mxu1 %v18033_v40  ;;  %8913 = vmatpush1.bf16.msra.mxu1 %v11753_v5  ;;  %v11757_v5 = vld [vmem:[%s17264_s4 + $0x1a0] sm:$0xff]   ;;  %v18109_v40 = vld [vmem:[#allocation79_spill] sm:$0xff] }
 0x768   :  { %8914 = vmatprep.subr.bf16.mxu1 %v17756_v30 }
 0x76b   :  { %8915 = vmatpush1.bf16.msra.mxu1 %v11754_v45  ;;  %v11759_v45 = vld [vmem:[%s17264_s4 + $0x1b0] sm:$0xff]  }
 0x76c   :  { %8916 = vmatprep.subr.bf16.mxu1 %v17756_v30 }
 0x76e   :  { %8664 = vmatmul.mubr.bf16.gmra.mrb[108].mxu1 %v18108_v43 }
 0x76f   :  { %8671 = vmatprep.mubr.bf16.mxu1 %v18038_v52  ;;  %8917 = vmatpush1.bf16.msra.mxu1 %v11755_v53  ;;  %v11758_v52 = vld [vmem:[%s17264_s4 + $0x1a8] sm:$0xff]   ;;  %v18110_v53 = vld [vmem:[#allocation87_spill] sm:$0xff] }
 0x770   :  { %8918 = vmatprep.subr.bf16.mxu1 %v17756_v30 }
 0x773   :  { %8919 = vmatpush1.bf16.msra.mxu1 %v11756_v60  ;;  %v11761_v60 = vld [vmem:[%s17264_s4 + $0x1c0] sm:$0xff]  }
 0x774   :  { %8920 = vmatprep.subr.bf16.mxu1 %v17756_v30 }
 0x776   :  { %8672 = vmatmul.mubr.bf16.gmra.mrb[112].mxu1 %v18109_v40 }
 0x777   :  { %8679 = vmatprep.mubr.bf16.mxu1 %v18045_v59  ;;  %8921 = vmatpush1.bf16.msra.mxu1 %v11757_v5  ;;  %v11760_v59 = vld [vmem:[%s17264_s4 + $0x1b8] sm:$0xff]  }
 0x778   :  { %8922 = vmatprep.subr.bf16.mxu1 %v17756_v30  ;;  %v18111_v5 = vld [vmem:[#allocation40_spill] sm:$0xff] }
 0x77b   :  { %8923 = vmatpush1.bf16.msra.mxu1 %v11758_v52  ;;  %v11763_v52 = vld [vmem:[%s17264_s4 + $0x1d0] sm:$0xff]  }
 0x77c   :  { %8924 = vmatprep.subr.bf16.mxu1 %v17756_v30 }
 0x77e   :  { %8680 = vmatmul.mubr.bf16.gmra.mrb[116].mxu1 %v18110_v53 }
 0x77f   :  { %8687 = vmatprep.mubr.bf16.mxu1 %v18051_v31  ;;  %8925 = vmatpush1.bf16.msra.mxu1 %v11759_v45  ;;  %v11762_v31 = vld [vmem:[%s17264_s4 + $0x1c8] sm:$0xff]   ;;  %v18112_v45 = vld [vmem:[#allocation43_spill] sm:$0xff] }
 0x780   :  { %8926 = vmatprep.subr.bf16.mxu1 %v17756_v30 }
 0x783   :  { %8927 = vmatpush1.bf16.msra.mxu1 %v11760_v59  ;;  %v11764_v59 = vld [vmem:[%s17264_s4 + $0x1d8] sm:$0xff]  }
 0x784   :  { %8928 = vmatprep.subr.bf16.mxu1 %v17756_v30 }
 0x786   :  { %8688 = vmatmul.mubr.bf16.gmra.mrb[120].mxu1 %v18111_v5 }
 0x787   :  { %8695 = vmatprep.mubr.bf16.mxu1 %v18057_v11  ;;  %8929 = vmatpush1.bf16.msra.mxu1 %v11761_v60  ;;  %v18113_v11 = vld [vmem:[#allocation61_spill] sm:$0xff]  ;;  %v18114_v60 = vld [vmem:[#allocation63_spill] sm:$0xff] }
 0x788   :  { %8930 = vmatprep.subr.bf16.mxu1 %v17756_v30 }
 0x78b   :  { %8931 = vmatpush1.bf16.msra.mxu1 %v11762_v31  ;;  %v18115_v31 = vld [vmem:[#allocation15_spill] sm:$0xff] }
 0x78c   :  { %8932 = vmatprep.subr.bf16.mxu1 %v17756_v30 }
 0x78e   :  { %8696 = vmatmul.mubr.bf16.gmra.mrb[124].mxu1 %v18112_v45 }
 0x78f   :  { %8703 = vmatprep.mubr.bf16.mxu1 %v18063_v16  ;;  %8933 = vmatpush1.bf16.msra.mxu1 %v11763_v52  ;;  %v11765_v16 = vld [vmem:[%s17264_s4 + $0x1e0] sm:$0xff]  }
 0x790   :  { %8934 = vmatprep.subr.bf16.mxu1 %v17756_v30  ;;  %v18117_v52 = vld [vmem:[#allocation105_spill] sm:$0xff] }
 0x793   :  { %8935 = vmatpush1.bf16.msra.mxu1 %v11764_v59  ;;  %v18119_v59 = vld [vmem:[#allocation115_spill] sm:$0xff] }
 0x794   :  { %8936 = vmatprep.subr.bf16.mxu1 %v17756_v30 }
 0x796   :  { %8704 = vmatmul.mubr.bf16.gmra.mrb[128].mxu1 %v18113_v11 }
 0x797   :  { %8711 = vmatprep.mubr.bf16.mxu1 %v18069_v4  ;;  %8937 = vmatpush1.bf16.msra.mxu1 %v11765_v16  ;;  %v18116_v4 = vld [vmem:[#allocation97_spill] sm:$0xff]  ;;  %v6915_v16 = vshrl.u32 %v16339_v33, 16 }
 0x798   :  { %8938 = vmatprep.subr.bf16.mxu1 %v17756_v30 }
 0x799   :  { %v6917_v42 = vrot.slane %v6915_v16, 4  ;;  %v18129_v16 = vld [vmem:[#allocation57_spill] sm:$0xff] }
 0x79e   :  { %8712 = vmatmul.mubr.bf16.gmra.mrb[132].mxu1 %v18114_v60 }
 0x79f   :  { %8719 = vmatprep.mubr.bf16.mxu1 %v18075_v6  ;;  %v11766_v6 = vld [vmem:[%s17264_s4 + $0x1e8] sm:$0xff]  }
 0x7a0   :  { %8939 = vmatpush1.bf16.msra.mxu1 %v11766_v6  ;;  %v6902_v6 = vshrl.u32 %v16341_v37, 16  ;;  %v11768_v37 = vld [vmem:[%s17264_s4 + $0x1f8] sm:$0xff]  }
 0x7a1   :  { %8940 = vmatprep.subr.bf16.mxu1 %v17756_v30 }
 0x7a6   :  { %8720 = vmatmul.mubr.bf16.gmra.mrb[136].mxu1 %v18115_v31 }
 0x7a7   :  { %8727 = vmatprep.mubr.bf16.mxu1 %v18081_v54  ;;  %v18118_v54 = vld [vmem:[#allocation110_spill] sm:$0xff] }
 0x7ae   :  { %8728 = vmatmul.mubr.bf16.gmra.mrb[140].mxu1 %v18116_v4 }
 0x7af   :  { %8735 = vmatprep.mubr.bf16.mxu1 %v18085_v56  ;;  %v11767_v56 = vld [vmem:[%s17264_s4 + $0x1f0] sm:$0xff]  }
 0x7b0   :  { %8941 = vmatpush1.bf16.msra.mxu1 %v11767_v56  ;;  %v18121_v56 = vld [vmem:[#allocation136_spill] sm:$0xff] }
 0x7b1   :  { %8942 = vmatprep.subr.bf16.mxu1 %v17756_v30  ;;  %v18122_v30 = vld [vmem:[#allocation5_spill] sm:$0xff] }
 0x7b4   :  { %8943 = vmatpush1.bf16.msra.mxu1 %v11768_v37 }
 0x7b6   :  { %8736 = vmatmul.mubr.bf16.gmra.mrb[144].mxu1 %v18117_v52 }
 0x7b7   :  { %8743 = vmatprep.mubr.bf16.mxu1 %v18087_v46  ;;  %v6911_v46 = vshll.u32 %v16339_v33, 16 }
 0x7be   :  { %8744 = vmatmul.mubr.bf16.gmra.mrb[148].mxu1 %v18118_v54 }
 0x7bf   :  { %8751 = vmatprep.mubr.bf16.mxu1 %v18088_v18  ;;  %v6913_v18 = vrot.slane %v6911_v46, 5  ;;  %v18128_v46 = vld [vmem:[#allocation19_spill] sm:$0xff] }
 0x7c1   :  { %v6918_v25 = vor.u32 %v6917_v42, %v6913_v18 }
 0x7c3   :  { %v6919_v33 = vrot.slane %v6918_v25, 4 }
 0x7c6   :  { %8752 = vmatmul.mubr.bf16.gmra.mrb[152].mxu1 %v18119_v59 }
 0x7c7   :  { %8759 = vmatprep.mubr.bf16.mxu1 %v18090_v1  ;;  %v6904_v1 = vrot.slane %v6902_v6, 4 }
 0x7c9   :  { %v6908_v51 = vor.u32 %v6907_v49, %v6904_v1 }
 0x7cb   :  { %v6909_v36 = vrot.slane %v6908_v51, 4 }
 0x7cd   :  { %v6914_v49 = vsel %vm12086_vm5, %v6909_v36, %v6913_v18  ;;  %v11858_v36 = vld [vmem:[#allocation2 + $0x198] sm:$0xf] }
 0x7ce   :  { %8760 = vmatmul.mubr.bf16.gmra.mrb[156].mxu1 %v18120_v50  ;;  %v6926_v21 = vshrl.u32 %v11858_v36, 16  ;;  %v6929_v28 = vshll.u32 %v11858_v36, 16 }
 0x7cf   :  { %8767 = vmatprep.mubr.bf16.mxu1 %v18091_v8  ;;  %v6924_v8 = vsel %vm12086_vm5, %v6919_v33, %v6923_v47  ;;  %v6939_v47 = vshrl.u32 %v16393_v14, 16 }
 0x7d0   :  { %v16504_v42 = vcombine.low %v6914_v49, %v6924_v8  ;;  %v6928_v63 = vrot.slane %v6926_v21, 4  ;;  %v18137_v49 = vld [vmem:[#allocation132_spill] sm:$0xff] }
 0x7d1   :  { %v6941_v25 = vrot.slane %v6939_v47, 4 }
 0x7d6   :  { %8768 = vmatmul.mubr.bf16.gmra.mrb[160].mxu1 %v18121_v56 }
 0x7d7   :  { %8775 = vmatprep.mubr.bf16.mxu1 %v18122_v30 }
 0x7de   :  { %8776 = vmatmul.mubr.bf16.gmra.mrb[164].mxu1 %v16504_v42 }
 0x7df   :  { %8783 = vmatprep.mubr.bf16.mxu1 %v16365_v3  ;;  %v6931_v3 = vrot.slane %v6929_v28, 5  ;;  %v18138_v28 = vld [vmem:[#allocation139_spill] sm:$0xff] }
 0x7e6   :  { %8784 = vmatmul.mubr.bf16.gmra.mrb[168].mxu1 %v15884_v0  ;;  %v6935_v0 = vshll.u32 %v16393_v14, 16  ;;  %v18127_v14 = vld [vmem:[#allocation89_spill] sm:$0xff] }
 0x7e7   :  { %8791 = vmatprep.mubr.bf16.mxu1 %v18092_v58 }
 0x7e8   :  { %v6937_v51 = vrot.slane %v6935_v0, 5  ;;  %v11862_v0 = vld [vmem:[#allocation2 + $0xd4] sm:$0x1] }
 0x7e9   :  { %v6989_v47 = vshll.u32 %v11862_v0, 16  ;;  %v18153_v0 = vld [vmem:[#allocation18_spill] sm:$0xff] }
 0x7ea   :  { %v6942_v58 = vor.u32 %v6941_v25, %v6937_v51 }
 0x7eb   :  { %v6991_v21 = vrot.slane %v6989_v47, 5 }
 0x7ee   :  { %8792 = vmatmul.mubr.bf16.gmra.mrb[172].mxu1 %v15900_v29 }
 0x7ef   :  { %8799 = vmatprep.mubr.bf16.mxu1 %v18093_v12  ;;  %v6932_v12 = vor.u32 %v6931_v3, %v6928_v63  ;;  %v18139_v3 = vld [vmem:[#allocation46_spill] sm:$0xff] }
 0x7f6   :  { %8800 = vmatmul.mubr.bf16.gmra.mrb[176].mxu1 %v15917_v57 }
 0x7f7   :  { %8807 = vmatprep.mubr.bf16.mxu1 %v18094_v26  ;;  %v11859_v26 = vld [vmem:[#allocation2 + $0x1a0] sm:$0x1] }
 0x7fe   :  { %8808 = vmatmul.mubr.bf16.gmra.mrb[180].mxu1 %v15934_v13 }
 0x7ff   :  { %8815 = vmatprep.mubr.bf16.mxu1 %v18095_v24  ;;  %v6945_v24 = vshll.u32 %v11859_v26, 16  ;;  %v5812_v26 = vld [vmem:[#allocation2 + $0x1ac] sm:$0x1] }
 0x806   :  { %8816 = vmatmul.mubr.bf16.gmra.mrb[184].mxu1 %v15951_v22 }
 0x807   :  { %8823 = vmatprep.mubr.bf16.mxu1 %v18096_v9  ;;  %v18123_v9 = vld [vmem:[#allocation149_spill] sm:$0xff] }
 0x80e   :  { %8824 = vmatmul.mubr.bf16.gmra.mrb[188].mxu1 %v15968_v10 }
 0x80f   :  { %8831 = vmatprep.mubr.bf16.mxu1 %v18097_v15  ;;  %v18124_v15 = vld [vmem:[#allocation141_spill] sm:$0xff] }
 0x816   :  { %8832 = vmatmul.mubr.bf16.gmra.mrb[192].mxu1 %v15985_v62 }
 0x817   :  { %8839 = vmatprep.mubr.bf16.mxu1 %v18098_v19  ;;  %v6933_v19 = vrot.slane %v6932_v12, 4  ;;  %v16583_v12 = vld [vmem:[#allocation2 + $0x1a8] sm:$0xf] }
 0x81e   :  { %8840 = vmatmul.mubr.bf16.gmra.mrb[196].mxu1 %v16002_v38 }
 0x81f   :  { %8847 = vmatprep.mubr.bf16.mxu1 %v18099_v34  ;;  %v6947_v34 = vrot.slane %v6945_v24, 5  ;;  %v7032_v24 = vrot.slane %v16583_v12, 5 }
 0x826   :  { %8848 = vmatmul.mubr.bf16.gmra.mrb[200].mxu1 %v16019_v61 }
 0x827   :  { %8855 = vmatprep.mubr.bf16.mxu1 %v18100_v23 }
 0x82e   :  { %8856 = vmatmul.mubr.bf16.gmra.mrb[204].mxu1 %v16036_v20 }
 0x82f   :  { %8863 = vmatprep.mubr.bf16.mxu1 %v18101_v35  ;;  %v6938_v35 = vsel %vm12086_vm5, %v6933_v19, %v6937_v51  ;;  %v7034_v19 = vrot.slane %v7032_v24, 4 }
 0x836   :  { %8864 = vmatmul.mubr.bf16.gmra.mrb[208].mxu1 %v16053_v2 }
 0x837   :  { %8871 = vmatprep.mubr.bf16.mxu1 %v18102_v41  ;;  %v18125_v41 = vld [vmem:[#allocation68_spill] sm:$0xff] }
 0x83e   :  { %8872 = vmatmul.mubr.bf16.gmra.mrb[212].mxu1 %v16070_v44 }
 0x83f   :  { %8879 = vmatprep.mubr.bf16.mxu1 %v18103_v55  ;;  %v18126_v55 = vld [vmem:[#allocation82_spill] sm:$0xff] }
 0x846   :  { %8880 = vmatmul.mubr.bf16.gmra.mrb[216].mxu1 %v16095_v7 }
 0x847   :  { %8887 = vmatprep.mubr.bf16.mxu1 %v18106_v17  ;;  %v6943_v17 = vrot.slane %v6942_v58, 4  ;;  %v16581_v58 = vld [vmem:[#allocation2 + $0x1a4] sm:$0xf] }
 0x849   :  { %v6948_v23 = vsel %vm12086_vm5, %v6943_v17, %v6947_v34  ;;  %v7035_v17 = vrot.slane %v5812_v26, 5 }
 0x84b   :  { %v7036_v34 = vsel %vm12075_vm4, %v7034_v19, %v7035_v17  ;;  %v18156_v17 = vld [vmem:[#allocation12_spill] sm:$0xff] }
 0x84e   :  { %8888 = vmatmul.mubr.bf16.gmra.mrb[220].mxu1 %v16112_v39 }
 0x84f   :  { %8895 = vmatprep.mubr.bf16.mxu1 %v15865_v48  ;;  %v16544_v48 = vcombine.low %v6938_v35, %v6948_v23  ;;  %v18140_v35 = vld [vmem:[#allocation142_spill] sm:$0xff] }
 0x856   :  { %8896 = vmatmul.mubr.bf16.gmra.mrb[224].mxu1 %v18123_v9 }
 0x857   :  { %8903 = vmatprep.mubr.bf16.mxu1 %v18124_v15 }
 0x85e   :  { %8904 = vmatmul.mubr.bf16.gmra.mrb[228].mxu1 %v16544_v48 }
 0x85f   :  { %8944 = vmatprep.mubr.bf16.mxu1 %v18108_v43  ;;  %v18130_v43 = vld [vmem:[#allocation65_spill] sm:$0xff] }
 0x866   :  { %8945 = vmatmul.mubr.bf16.vlgmr.msra.gmra.mrb[104].mxu1 %v18125_v41  ;;  %v6994_v41 = vshrl.u32 %v16581_v58, 16 }
 0x867   :  { %8952 = vmatprep.mubr.bf16.mxu1 %v18109_v40  ;;  %v18131_v40 = vld [vmem:[#allocation7_spill] sm:$0xff] }
 0x868   :  { %v6996_v32 = vrot.slane %v6994_v41, 4 }
 0x86e   :  { %8953 = vmatmul.mubr.bf16.gmra.mrb[108].mxu1 %v18126_v55  ;;  %v7003_v55 = vshll.u32 %v16583_v12, 16 }
 0x86f   :  { %8960 = vmatprep.mubr.bf16.mxu1 %v18110_v53  ;;  %v18132_v53 = vld [vmem:[#allocation96_spill] sm:$0xff] }
 0x876   :  { %8961 = vmatmul.mubr.bf16.gmra.mrb[112].mxu1 %v18127_v14  ;;  %v7007_v14 = vshrl.u32 %v16583_v12, 16 }
 0x877   :  { %8968 = vmatprep.mubr.bf16.mxu1 %v18111_v5  ;;  %v18133_v5 = vld [vmem:[#allocation104_spill] sm:$0xff] }
 0x87e   :  { %8969 = vmatmul.mubr.bf16.gmra.mrb[116].mxu1 %v18128_v46  ;;  %v7013_v46 = vshll.u32 %v5812_v26, 16 }
 0x87f   :  { %8976 = vmatprep.mubr.bf16.mxu1 %v18112_v45  ;;  %v18134_v45 = vld [vmem:[#allocation109_spill] sm:$0xff] }
 0x886   :  { %8977 = vmatmul.mubr.bf16.gmra.mrb[120].mxu1 %v18129_v16  ;;  %v10259_v16 = vcombine.low %v16581_v58, %v16583_v12 }
 0x887   :  { %8984 = vmatprep.mubr.bf16.mxu1 %v18113_v11  ;;  %v18135_v11 = vld [vmem:[#allocation121_spill] sm:$0xff] }
 0x88e   :  { %8985 = vmatmul.mubr.bf16.gmra.mrb[124].mxu1 %v18130_v43 }
 0x88f   :  { %8992 = vmatprep.mubr.bf16.mxu1 %v18114_v60  ;;  %v18136_v60 = vld [vmem:[#allocation113_spill] sm:$0xff] }
 0x896   :  { %8993 = vmatmul.mubr.bf16.gmra.mrb[128].mxu1 %v18131_v40  ;;  %v7005_v40 = vrot.slane %v7003_v55, 5  ;;  %v18158_v55 = vld [vmem:[#allocation16_spill] sm:$0xff] }
 0x897   :  { %9000 = vmatprep.mubr.bf16.mxu1 %v18115_v31  ;;  %v11860_v31 = vld [vmem:[#allocation2 + $0xcc] sm:$0xf] }
 0x898   :  { %v6970_v6 = vshrl.u32 %v11860_v31, 16  ;;  %v6973_v18 = vshll.u32 %v11860_v31, 16 }
 0x89a   :  { %v6972_v30 = vrot.slane %v6970_v6, 4  ;;  %v18141_v6 = vld [vmem:[#allocation143_spill] sm:$0xff] }
 0x89e   :  { %9001 = vmatmul.mubr.bf16.gmra.mrb[132].mxu1 %v18132_v53  ;;  %v7009_v53 = vrot.slane %v7007_v14, 4 }
 0x89f   :  { %9008 = vmatprep.mubr.bf16.mxu1 %v18116_v4  ;;  %v11861_v4 = vld [vmem:[#allocation2 + $0xd0] sm:$0xf] }
 0x8a0   :  { %v6979_v1 = vshll.u32 %v11861_v4, 16  ;;  %v6983_v33 = vshrl.u32 %v11861_v4, 16 }
 0x8a2   :  { %v6981_v37 = vrot.slane %v6979_v1, 5  ;;  %v6985_v8 = vrot.slane %v6983_v33, 4  ;;  %v18142_v1 = vld [vmem:[#allocation144_spill] sm:$0xff]  ;;  %v18143_v33 = vld [vmem:[#allocation145_spill] sm:$0xff] }
 0x8a6   :  { %9009 = vmatmul.mubr.bf16.gmra.mrb[136].mxu1 %v18133_v5 }
 0x8a7   :  { %9016 = vmatprep.mubr.bf16.mxu1 %v18117_v52  ;;  %v6975_v52 = vrot.slane %v6973_v18, 5 }
 0x8ae   :  { %9017 = vmatmul.mubr.bf16.gmra.mrb[140].mxu1 %v18134_v45  ;;  %v7010_v45 = vor.u32 %v7009_v53, %v7005_v40 }
 0x8af   :  { %9024 = vmatprep.mubr.bf16.mxu1 %v18118_v54  ;;  %v6976_v54 = vor.u32 %v6975_v52, %v6972_v30  ;;  %v18144_v30 = vld [vmem:[#allocation146_spill] sm:$0xff]  ;;  %v18145_v52 = vld [vmem:[#allocation111_spill] sm:$0xff] }
 0x8b1   :  { %v6977_v36 = vrot.slane %v6976_v54, 4  ;;  %v16642_v54 = vld [vmem:[%s17269_s9] ss:$0 sm:$0xff] }
 0x8b3   :  { %v6982_v51 = vsel %vm12086_vm5, %v6977_v36, %v6981_v37 }
 0x8b6   :  { %9025 = vmatmul.mubr.bf16.gmra.mrb[144].mxu1 %v18135_v11  ;;  %v7015_v11 = vrot.slane %v7013_v46, 5 }
 0x8b7   :  { %9032 = vmatprep.mubr.bf16.mxu1 %v18119_v59  ;;  %v6986_v59 = vor.u32 %v6985_v8, %v6981_v37  ;;  %v18152_v8 = vld [vmem:[#allocation122_spill] sm:$0xff] }
 0x8be   :  { %9033 = vmatmul.mubr.bf16.gmra.mrb[148].mxu1 %v18136_v60 }
 0x8bf   :  { %9040 = vmatprep.mubr.bf16.mxu1 %v18120_v50  ;;  %v6987_v50 = vrot.slane %v6986_v59, 4 }
 0x8c1   :  { %v6992_v25 = vsel %vm12086_vm5, %v6987_v50, %v6991_v21  ;;  %v18154_v50 = vld [vmem:[#allocation125_spill] sm:$0xff] }
 0x8c2   :  { %v10260_v63 = vcombine.low %v6982_v51, %v6992_v25 }
 0x8c6   :  { %9041 = vmatmul.mubr.bf16.gmra.mrb[152].mxu1 %v18137_v49 }
 0x8c7   :  { %9048 = vmatprep.mubr.bf16.mxu1 %v18121_v56  ;;  %v10258_v56 = vcombine.low %v11860_v31, %v11861_v4  ;;  %v7011_v31 = vrot.slane %v7010_v45, 4 }
 0x8ce   :  { %9049 = vmatmul.mubr.bf16.gmra.mrb[156].mxu1 %v18138_v28 }
 0x8cf   :  { %9056 = vmatprep.mubr.bf16.mxu1 %v16504_v42  ;;  %v10155_v42 = vrot.slane %v16581_v58, 9 }
 0x8d1   :  { %v7033_v15 = vsel %vm12075_vm4, %v10155_v42, %v7032_v24 }
 0x8d2   :  { %v10263_v23 = vcombine.low %v7033_v15, %v7036_v34 }
 0x8d4   :  { %10759 = vmatmul.mubr.bf16.gmra.mrb[212].mxu0 %v10263_v23  ;;  %v18157_v23 = vld [vmem:[#allocation116_spill] sm:$0xff] }
 0x8d6   :  { %9057 = vmatmul.mubr.bf16.gmra.mrb[160].mxu1 %v18139_v3  ;;  %v18155_v3 = vld [vmem:[#allocation127_spill] sm:$0xff] }
 0x8d7   :  { %9064 = vmatprep.mubr.bf16.mxu1 %v10260_v63 }
 0x8de   :  { %9065 = vmatmul.mubr.bf16.gmra.mrb[164].mxu1 %v10258_v56 }
 0x8df   :  { %9072 = vmatprep.mubr.bf16.mxu1 %v15900_v29  ;;  %v6997_v29 = vshll.u32 %v16581_v58, 16 }
 0x8e1   :  { %v6999_v43 = vrot.slane %v6997_v29, 5 }
 0x8e3   :  { %v7000_v5 = vor.u32 %v6999_v43, %v6996_v32  ;;  %v18159_v32 = vld [vmem:[#allocation123_spill] sm:$0xff] }
 0x8e5   :  { %v7001_v60 = vrot.slane %v7000_v5, 4 }
 0x8e6   :  { %9073 = vmatmul.mubr.bf16.gmra.mrb[168].mxu1 %v18140_v35 }
 0x8e7   :  { %9080 = vmatprep.mubr.bf16.mxu1 %v15917_v57  ;;  %v7006_v18 = vsel %vm12086_vm5, %v7001_v60, %v7005_v40  ;;  %v7016_v57 = vsel %vm12086_vm5, %v7011_v31, %v7015_v11  ;;  %v18160_v11 = vld [vmem:[#allocation147_spill] sm:$0xff] }
 0x8e8   :  { %v16606_v4 = vcombine.low %v7006_v18, %v7016_v57  ;;  %v18161_v57 = vld [vmem:[#allocation22_spill] sm:$0xff] }
 0x8ee   :  { %9081 = vmatmul.mubr.bf16.gmra.mrb[172].mxu1 %v18141_v6 }
 0x8ef   :  { %9088 = vmatprep.mubr.bf16.mxu1 %v15934_v13  ;;  %v18147_v13 = vld [vmem:[#allocation112_spill] sm:$0xff] }
 0x8f6   :  { %9089 = vmatmul.mubr.bf16.gmra.mrb[176].mxu1 %v18142_v1 }
 0x8f7   :  { %9096 = vmatprep.mubr.bf16.mxu1 %v15951_v22  ;;  %v18148_v22 = vld [vmem:[#allocation119_spill] sm:$0xff] }
 0x8fe   :  { %9097 = vmatmul.mubr.bf16.gmra.mrb[180].mxu1 %v18143_v33 }
 0x8ff   :  { %9104 = vmatprep.mubr.bf16.mxu1 %v15968_v10  ;;  %v18149_v10 = vld [vmem:[#allocation117_spill] sm:$0xff] }
 0x906   :  { %9105 = vmatmul.mubr.bf16.gmra.mrb[184].mxu1 %v18144_v30 }
 0x907   :  { %9112 = vmatprep.mubr.bf16.mxu1 %v15985_v62  ;;  %v18150_v62 = vld [vmem:[#allocation120_spill] sm:$0xff] }
 0x90e   :  { %9113 = vmatmul.mubr.bf16.gmra.mrb[188].mxu1 %v18145_v52  ;;  %v18162_v52 = vld [vmem:[#allocation130_spill] sm:$0xff] }
 0x90f   :  { %9120 = vmatprep.mubr.bf16.mxu1 %v16002_v38  ;;  %v16628_v38 = vld [vmem:[%s17267_s8] ss:$0 sm:$0xff] }
 0x910   :  { %v4506_v47 = vmul.f32 %v16628_v38, %v18153_v0  ;;  %v4507_v15 = vmul.f32 %v18156_v17, %v16628_v38  ;;  %v4508_v14 = vmul.f32 %v18158_v55, %v16628_v38  ;;  %v4509_v1 = vmul.f32 %v16628_v38, %v18161_v57  ;;  %v18165_v0 = vld [vmem:[#allocation153_spill] sm:$0xff] }
 0x911   :  { %v18170_v55 = vld [vmem:[#allocation45_spill] sm:$0xff] }
 0x912   :  { %v4577_v56 = vadd.f32 %v16642_v54, %v4506_v47  ;;  %v4578_v53 = vadd.f32 %v16642_v54, %v4507_v15  ;;  %v4579_v60 = vadd.f32 %v16642_v54, %v4508_v14 }
 0x916   :  { %9121 = vmatmul.mubr.bf16.gmra.mrb[192].mxu1 %v18146_v27 }
 0x917   :  { %9128 = vmatprep.mubr.bf16.mxu1 %v16019_v61 }
 0x91e   :  { %9129 = vmatmul.mubr.bf16.gmra.mrb[196].mxu1 %v18147_v13 }
 0x91f   :  { %9136 = vmatprep.mubr.bf16.mxu1 %v16036_v20  ;;  %v16634_v20 = vld [vmem:[%s17268_s5] ss:$0 sm:$0xff] }
 0x926   :  { %9137 = vmatmul.mubr.bf16.gmra.mrb[200].mxu1 %v18148_v22 }
 0x927   :  { %9144 = vmatprep.mubr.bf16.mxu1 %v16053_v2  ;;  %v18151_v2 = vld [vmem:[#allocation14_spill] sm:$0xff] }
 0x928   :  { %v4505_v37 = vmul.f32 %v16628_v38, %v18151_v2  ;;  %v18164_v2 = vld [vmem:[#allocation133_spill] sm:$0xff] }
 0x92a   :  { %v4576_v51 = vadd.f32 %v16642_v54, %v4505_v37 }
 0x92e   :  { %9145 = vmatmul.mubr.bf16.gmra.mrb[204].mxu1 %v18149_v10  ;;  %v18163_v10 = vld [vmem:[#allocation26_spill] sm:$0xff] }
 0x92f   :  { %9152 = vmatprep.mubr.bf16.mxu1 %v16070_v44 }
 0x936   :  { %9153 = vmatmul.mubr.bf16.gmra.mrb[208].mxu1 %v18150_v62  ;;  %v4510_v62 = vmul.f32 %v16628_v38, %v18163_v10 }
 0x937   :  { %9160 = vmatprep.mubr.bf16.mxu1 %v16095_v7  ;;  %v16647_v7 = vld [vmem:[%s17270_s6] ss:$0 sm:$0xff] }
 0x938   :  { %v4581_v47 = vadd.f32 %v16642_v54, %v4510_v62 }
 0x939   :  { %v8946_v61 = vpop.f32.mrb[104].mxu1 }
 0x93a   :  { %v9236_v44 = vadd.f32 %v18152_v8, %v8946_v61  ;;  %v8948_v49 = vpop.f32.mrb[105].mxu1 }
 0x93b   :  { %v8949_v59 = vpop.f32.mrb[106].mxu1 }
 0x93c   :  { %v9497_v36 = vmul.f32 %v16634_v20, %v9236_v44  ;;  %v9239_v21 = vadd.f32 %v18154_v50, %v8949_v59  ;;  %v8951_v28 = vpop.f32.mrb[107].mxu1  ;;  %v4580_v44 = vadd.f32 %v16642_v54, %v4509_v1  ;;  %v18174_v1 = vld [vmem:[#allocation152_spill] sm:$0xff] }
 0x93d   :  { %v18166_v28 = vld [vmem:[#allocation20_spill] sm:$0xff] }
 0x93e   :  { %v9568_v25 = vadd.f32 %v16647_v7, %v9497_v36  ;;  %v9498_v63 = vmul.f32 %v16634_v20, %v9239_v21  ;;  %9161 = vmatmul.mubr.bf16.gmra.mrb[212].mxu1 %v18155_v3  ;;  %v18167_v3 = vld [vmem:[#allocation129_spill] sm:$0xff] }
 0x93f   :  { %9168 = vmatprep.mubr.bf16.mxu1 %v16112_v39 }
 0x940   :  { %v9632_v26 = vadd.f32 %v9568_v25, %v4576_v51  ;;  %v9569_v42 = vadd.f32 %v16647_v7, %v9498_v63  ;;  %v4511_v51 = vmul.f32 %v18166_v28, %v16628_v38 }
 0x941   :  { %v8954_v24 = vpop.f32.mrb[108].mxu1 }
 0x942   :  { %v9696_v19 = vmax.f32 %v9632_v26, 0.0  ;;  %v9633_v34 = vadd.f32 %v9569_v42, %v4577_v56  ;;  %v9244_v35 = vadd.f32 %v18157_v23, %v8954_v24  ;;  %v8956_v41 = vpop.f32.mrb[109].mxu1  ;;  %v18168_v24 = vld [vmem:[#allocation24_spill] sm:$0xff] }
 0x943   :  { %v8957_v29 = vpop.f32.mrb[110].mxu1  ;;  %v4512_v17 = vmul.f32 %v18168_v24, %v16628_v38 }
 0x944   :  { %9760 = vst [vmem:[%s17271_s10] sm:$0xff] %v9696_v19  ;;  %v9697_v39 = vmax.f32 %v9633_v34, 0.0  ;;  %v9499_v46 = vmul.f32 %v16634_v20, %v9244_v35  ;;  %v9247_v43 = vadd.f32 %v18159_v32, %v8957_v29  ;;  %v8959_v40 = vpop.f32.mrb[111].mxu1  ;;  %v18169_v19 = vld [vmem:[#allocation135_spill] sm:$0xff]  ;;  %v4582_v35 = vadd.f32 %v16642_v54, %v4511_v51 }
 0x945   :  { %v4583_v14 = vadd.f32 %v16642_v54, %v4512_v17 }
 0x946   :  { %9761 = vst [vmem:[%s17271_s10 + $0x8] sm:$0xff] %v9697_v39  ;;  %v9570_v5 = vadd.f32 %v16647_v7, %v9499_v46  ;;  %v9500_v45 = vmul.f32 %v16634_v20, %v9247_v43  ;;  %9169 = vmatmul.mubr.bf16.gmra.mrb[216].mxu1 %v18160_v11  ;;  %v18171_v43 = vld [vmem:[#allocation28_spill] sm:$0xff] }
 0x947   :  { %9176 = vmatprep.mubr.bf16.mxu1 %v18123_v9  ;;  %v4513_v40 = vmul.f32 %v16628_v38, %v18171_v43 }
 0x948   :  { %v9634_v31 = vadd.f32 %v9570_v5, %v4578_v53  ;;  %v9571_v6 = vadd.f32 %v16647_v7, %v9500_v45  ;;  %v18172_v45 = vld [vmem:[#allocation150_spill] sm:$0xff] }
 0x949   :  { %v8962_v18 = vpop.f32.mrb[112].mxu1 }
 0x94a   :  { %v9698_v33 = vmax.f32 %v9634_v31, 0.0  ;;  %v9635_v30 = vadd.f32 %v9571_v6, %v4579_v60  ;;  %v9252_v27 = vadd.f32 %v18162_v52, %v8962_v18  ;;  %v8964_v13 = vpop.f32.mrb[113].mxu1  ;;  %v18173_v6 = vld [vmem:[#allocation30_spill] sm:$0xff]  ;;  %v4584_v52 = vadd.f32 %v16642_v54, %v4513_v40 }
 0x94b   :  { %v8965_v22 = vpop.f32.mrb[114].mxu1  ;;  %v4514_v18 = vmul.f32 %v16628_v38, %v18173_v6 }
 0x94c   :  { %9762 = vst [vmem:[%s17271_s10 + $0x10] sm:$0xff] %v9698_v33  ;;  %v9699_v9 = vmax.f32 %v9635_v30, 0.0  ;;  %v9501_v61 = vmul.f32 %v16634_v20, %v9252_v27  ;;  %v9255_v37 = vadd.f32 %v18164_v2, %v8965_v22  ;;  %v8967_v8 = vpop.f32.mrb[115].mxu1 }
 0x94d   :  { %v4585_v22 = vadd.f32 %v16642_v54, %v4514_v18 }
 0x94e   :  { %9763 = vst [vmem:[%s17271_s10 + $0x18] sm:$0xff] %v9699_v9  ;;  %v9572_v49 = vadd.f32 %v16647_v7, %v9501_v61  ;;  %v9502_v59 = vmul.f32 %v16634_v20, %v9255_v37  ;;  %9177 = vmatmul.mubr.bf16.gmra.mrb[220].mxu1 %v18165_v0  ;;  %v18175_v61 = vld [vmem:[#allocation27_spill] sm:$0xff] }
 0x94f   :  { %9184 = vmatprep.mubr.bf16.mxu1 %v16544_v48  ;;  %v4515_v2 = vmul.f32 %v18175_v61, %v16628_v38 }
 0x950   :  { %v9636_v36 = vadd.f32 %v9572_v49, %v4580_v44  ;;  %v9573_v50 = vadd.f32 %v16647_v7, %v9502_v59  ;;  %v18176_v44 = vld [vmem:[#allocation148_spill] sm:$0xff] }
 0x951   :  { %v8970_v21 = vpop.f32.mrb[116].mxu1  ;;  %v4586_v28 = vadd.f32 %v16642_v54, %v4515_v2 }
 0x952   :  { %v9700_v25 = vmax.f32 %v9636_v36, 0.0  ;;  %v9637_v63 = vadd.f32 %v9573_v50, %v4581_v47  ;;  %v9260_v56 = vadd.f32 %v18167_v3, %v8970_v21  ;;  %v8972_v26 = vpop.f32.mrb[117].mxu1  ;;  %v18177_v47 = vld [vmem:[#allocation29_spill] sm:$0xff] }
 0x953   :  { %v8973_v42 = vpop.f32.mrb[118].mxu1  ;;  %v4516_v36 = vmul.f32 %v18177_v47, %v16628_v38 }
 0x954   :  { %9764 = vst [vmem:[%s17271_s10 + $0x20] sm:$0xff] %v9700_v25  ;;  %v9701_v48 = vmax.f32 %v9637_v63, 0.0  ;;  %v9503_v15 = vmul.f32 %v16634_v20, %v9260_v56  ;;  %v9263_v34 = vadd.f32 %v18169_v19, %v8973_v42  ;;  %v8975_v23 = vpop.f32.mrb[119].mxu1  ;;  %v18179_v42 = vld [vmem:[#allocation91_spill] sm:$0xff] }
 0x955   :  { %v4587_v63 = vadd.f32 %v16642_v54, %v4516_v36  ;;  %v4517_v24 = vmul.f32 %v16628_v38, %v18179_v42 }
 0x956   :  { %9765 = vst [vmem:[%s17271_s10 + $0x28] sm:$0xff] %v9701_v48  ;;  %v9574_v41 = vadd.f32 %v16647_v7, %v9503_v15  ;;  %v9504_v29 = vmul.f32 %v16634_v20, %v9263_v34  ;;  %9185 = vmatmul.mubr.bf16.gmra.mrb[224].mxu1 %v18170_v55  ;;  %v18180_v15 = vld [vmem:[#allocation155_spill] sm:$0xff] }
 0x957   :  { %9192 = vmatprep.mubr.bf16.mxu1 %v16606_v4 }
 0x958   :  { %v9638_v39 = vadd.f32 %v9574_v41, %v4582_v35  ;;  %v9575_v46 = vadd.f32 %v16647_v7, %v9504_v29  ;;  %v18181_v35 = vld [vmem:[#allocation32_spill] sm:$0xff] }
 0x959   :  { %v8978_v32 = vpop.f32.mrb[120].mxu1  ;;  %v4518_v41 = vmul.f32 %v16628_v38, %v18181_v35 }
 0x95a   :  { %v9702_v53 = vmax.f32 %v9638_v39, 0.0  ;;  %v9639_v5 = vadd.f32 %v9575_v46, %v4583_v14  ;;  %v9268_v11 = vadd.f32 %v18172_v45, %v8978_v32  ;;  %v8980_v60 = vpop.f32.mrb[121].mxu1  ;;  %v18182_v14 = vld [vmem:[#allocation55_spill] sm:$0xff]  ;;  %v4588_v32 = vadd.f32 %v16642_v54, %v4517_v24 }
 0x95b   :  { %v8981_v31 = vpop.f32.mrb[122].mxu1  ;;  %v18183_v60 = vld [vmem:[#allocation35_spill] sm:$0xff] }
 0x95c   :  { %9766 = vst [vmem:[%s17271_s10 + $0x30] sm:$0xff] %v9702_v53  ;;  %v9703_v4 = vmax.f32 %v9639_v5, 0.0  ;;  %v9505_v57 = vmul.f32 %v16634_v20, %v9268_v11  ;;  %v9271_v33 = vadd.f32 %v18174_v1, %v8981_v31  ;;  %v8983_v30 = vpop.f32.mrb[123].mxu1  ;;  %v4589_v53 = vadd.f32 %v16642_v54, %v4518_v41 }
 0x95d   :  { %v4519_v31 = vmul.f32 %v18183_v60, %v16628_v38  ;;  %v18185_v30 = vld [vmem:[#allocation4_spill] sm:$0xff] }
 0x95e   :  { %9767 = vst [vmem:[%s17271_s10 + $0x38] sm:$0xff] %v9703_v4  ;;  %v9576_v27 = vadd.f32 %v16647_v7, %v9505_v57  ;;  %v9506_v13 = vmul.f32 %v16634_v20, %v9271_v33  ;;  %9193 = vmatmul.mubr.bf16.gmra.mrb[228].mxu1 %v10259_v16  ;;  %v18178_v16 = vld [vmem:[#allocation151_spill] sm:$0xff]  ;;  %v18184_v4 = vld [vmem:[#allocation154_spill] sm:$0xff] }
 0x960   :  { %v9640_v10 = vadd.f32 %v9576_v27, %v4584_v52  ;;  %v9577_v62 = vadd.f32 %v16647_v7, %v9506_v13  ;;  %v4520_v52 = vmul.f32 %v18185_v30, %v16628_v38 }
 0x961   :  { %v8986_v9 = vpop.f32.mrb[124].mxu1 }
 0x962   :  { %v9704_v37 = vmax.f32 %v9640_v10, 0.0  ;;  %v9641_v8 = vadd.f32 %v9577_v62, %v4585_v22  ;;  %v9276_v49 = vadd.f32 %v18176_v44, %v8986_v9  ;;  %v8988_v59 = vpop.f32.mrb[125].mxu1  ;;  %v18186_v22 = vld [vmem:[#allocation156_spill] sm:$0xff]  ;;  %v4590_v9 = vadd.f32 %v16642_v54, %v4519_v31 }
 0x963   :  { %v8989_v0 = vpop.f32.mrb[126].mxu1  ;;  %v18187_v59 = vld [vmem:[#allocation37_spill] sm:$0xff] }
 0x964   :  { %9768 = vst [vmem:[%s17271_s10 + $0x40] sm:$0xff] %v9704_v37  ;;  %v9705_v58 = vmax.f32 %v9641_v8, 0.0  ;;  %v9507_v12 = vmul.f32 %v16634_v20, %v9276_v49  ;;  %v9279_v50 = vadd.f32 %v18178_v16, %v8989_v0  ;;  %v8991_v21 = vpop.f32.mrb[127].mxu1  ;;  %v4591_v37 = vadd.f32 %v16642_v54, %v4520_v52 }
 0x965   :  { %v4521_v0 = vmul.f32 %v16628_v38, %v18187_v59  ;;  %v18189_v21 = vld [vmem:[#allocation42_spill] sm:$0xff] }
 0x966   :  { %9769 = vst [vmem:[%s17271_s10 + $0x48] sm:$0xff] %v9705_v58  ;;  %v9578_v51 = vadd.f32 %v16647_v7, %v9507_v12  ;;  %v9508_v25 = vmul.f32 %v16634_v20, %v9279_v50  ;;  %v18188_v58 = vld [vmem:[#allocation158_spill] sm:$0xff] }
 0x968   :  { %v9642_v3 = vadd.f32 %v9578_v51, %v4586_v28  ;;  %v9579_v56 = vadd.f32 %v16647_v7, %v9508_v25  ;;  %v4522_v28 = vmul.f32 %v16628_v38, %v18189_v21 }
 0x969   :  { %v8994_v26 = vpop.f32.mrb[128].mxu1 }
 0x96a   :  { %v9706_v17 = vmax.f32 %v9642_v3, 0.0  ;;  %v9643_v48 = vadd.f32 %v9579_v56, %v4587_v63  ;;  %v9284_v19 = vadd.f32 %v18180_v15, %v8994_v26  ;;  %v8996_v34 = vpop.f32.mrb[129].mxu1  ;;  %v18190_v63 = vld [vmem:[#allocation160_spill] sm:$0xff]  ;;  %v4592_v26 = vadd.f32 %v16642_v54, %v4521_v0 }
 0x96b   :  { %v8997_v23 = vpop.f32.mrb[130].mxu1  ;;  %v18191_v34 = vld [vmem:[#allocation33_spill] sm:$0xff] }
 0x96c   :  { %9770 = vst [vmem:[%s17271_s10 + $0x50] sm:$0xff] %v9706_v17  ;;  %v9707_v29 = vmax.f32 %v9643_v48, 0.0  ;;  %v9509_v55 = vmul.f32 %v16634_v20, %v9284_v19  ;;  %v9287_v39 = vadd.f32 %v18182_v14, %v8997_v23  ;;  %v8999_v46 = vpop.f32.mrb[131].mxu1  ;;  %v4593_v17 = vadd.f32 %v16642_v54, %v4522_v28 }
 0x96d   :  { %v4523_v23 = vmul.f32 %v18191_v34, %v16628_v38  ;;  %v18193_v46 = vld [vmem:[#allocation38_spill] sm:$0xff] }
 0x96e   :  { %9771 = vst [vmem:[%s17271_s10 + $0x58] sm:$0xff] %v9707_v29  ;;  %v9580_v43 = vadd.f32 %v16647_v7, %v9509_v55  ;;  %v9510_v40 = vmul.f32 %v16634_v20, %v9287_v39  ;;  %v18192_v29 = vld [vmem:[#allocation157_spill] sm:$0xff] }
 0x970   :  { %v9644_v5 = vadd.f32 %v9580_v43, %v4588_v32  ;;  %v9581_v45 = vadd.f32 %v16647_v7, %v9510_v40  ;;  %v4524_v32 = vmul.f32 %v18193_v46, %v16628_v38 }
 0x971   :  { %v9002_v11 = vpop.f32.mrb[132].mxu1 }
 0x972   :  { %v9708_v6 = vmax.f32 %v9644_v5, 0.0  ;;  %v9645_v18 = vadd.f32 %v9581_v45, %v4589_v53  ;;  %v9292_v57 = vadd.f32 %v18184_v4, %v9002_v11  ;;  %v9004_v1 = vpop.f32.mrb[133].mxu1  ;;  %v18194_v53 = vld [vmem:[#allocation159_spill] sm:$0xff]  ;;  %v4594_v11 = vadd.f32 %v16642_v54, %v4523_v23 }
 0x973   :  { %v9005_v33 = vpop.f32.mrb[134].mxu1  ;;  %v18195_v1 = vld [vmem:[#allocation47_spill] sm:$0xff] }
 0x974   :  { %9772 = vst [vmem:[%s17271_s10 + $0x60] sm:$0xff] %v9708_v6  ;;  %v9709_v27 = vmax.f32 %v9645_v18, 0.0  ;;  %v9511_v13 = vmul.f32 %v16634_v20, %v9292_v57  ;;  %v9295_v10 = vadd.f32 %v18186_v22, %v9005_v33  ;;  %v9007_v62 = vpop.f32.mrb[135].mxu1  ;;  %v4595_v6 = vadd.f32 %v16642_v54, %v4524_v32 }
 0x975   :  { %v4525_v33 = vmul.f32 %v16628_v38, %v18195_v1  ;;  %v18197_v62 = vld [vmem:[#allocation54_spill] sm:$0xff] }
 0x976   :  { %9773 = vst [vmem:[%s17271_s10 + $0x68] sm:$0xff] %v9709_v27  ;;  %v9582_v61 = vadd.f32 %v16647_v7, %v9511_v13  ;;  %v9512_v2 = vmul.f32 %v16634_v20, %v9295_v10  ;;  %v18196_v27 = vld [vmem:[#allocation162_spill] sm:$0xff] }
 0x978   :  { %v9646_v8 = vadd.f32 %v9582_v61, %v4590_v9  ;;  %v9583_v44 = vadd.f32 %v16647_v7, %v9512_v2  ;;  %v4526_v9 = vmul.f32 %v16628_v38, %v18197_v62 }
 0x979   :  { %v9010_v49 = vpop.f32.mrb[136].mxu1 }
 0x97a   :  { %v9710_v47 = vmax.f32 %v9646_v8, 0.0  ;;  %v9647_v36 = vadd.f32 %v9583_v44, %v4591_v37  ;;  %v9300_v12 = vadd.f32 %v18188_v58, %v9010_v49  ;;  %v9012_v16 = vpop.f32.mrb[137].mxu1  ;;  %v18198_v37 = vld [vmem:[#allocation164_spill] sm:$0xff]  ;;  %v4596_v49 = vadd.f32 %v16642_v54, %v4525_v33 }
 0x97b   :  { %v9013_v50 = vpop.f32.mrb[138].mxu1  ;;  %v18199_v16 = vld [vmem:[#allocation44_spill] sm:$0xff] }
 0x97c   :  { %9774 = vst [vmem:[%s17271_s10 + $0x70] sm:$0xff] %v9710_v47  ;;  %v9711_v51 = vmax.f32 %v9647_v36, 0.0  ;;  %v9513_v25 = vmul.f32 %v16634_v20, %v9300_v12  ;;  %v9303_v3 = vadd.f32 %v18190_v63, %v9013_v50  ;;  %v9015_v56 = vpop.f32.mrb[139].mxu1  ;;  %v4597_v47 = vadd.f32 %v16642_v54, %v4526_v9 }
 0x97d   :  { %v4527_v50 = vmul.f32 %v18199_v16, %v16628_v38  ;;  %v18201_v56 = vld [vmem:[#allocation49_spill] sm:$0xff] }
 0x97e   :  { %9775 = vst [vmem:[%s17271_s10 + $0x78] sm:$0xff] %v9711_v51  ;;  %v9584_v42 = vadd.f32 %v16647_v7, %v9513_v25  ;;  %v9514_v24 = vmul.f32 %v16634_v20, %v9303_v3  ;;  %v18200_v51 = vld [vmem:[#allocation161_spill] sm:$0xff] }
 0x980   :  { %v9648_v48 = vadd.f32 %v9584_v42, %v4592_v26  ;;  %v9585_v15 = vadd.f32 %v16647_v7, %v9514_v24  ;;  %v4528_v26 = vmul.f32 %v18201_v56, %v16628_v38 }
 0x981   :  { %v9018_v19 = vpop.f32.mrb[140].mxu1 }
 0x982   :  { %v9712_v35 = vmax.f32 %v9648_v48, 0.0  ;;  %v9649_v41 = vadd.f32 %v9585_v15, %v4593_v17  ;;  %v9308_v55 = vadd.f32 %v18192_v29, %v9018_v19  ;;  %v9020_v14 = vpop.f32.mrb[141].mxu1  ;;  %v18202_v17 = vld [vmem:[#allocation163_spill] sm:$0xff]  ;;  %v4598_v19 = vadd.f32 %v16642_v54, %v4527_v50 }
 0x983   :  { %v9021_v39 = vpop.f32.mrb[142].mxu1  ;;  %v18203_v14 = vld [vmem:[#allocation60_spill] sm:$0xff] }
 0x984   :  { %9776 = vst [vmem:[%s17271_s10 + $0x80] sm:$0xff] %v9712_v35  ;;  %v9713_v43 = vmax.f32 %v9649_v41, 0.0  ;;  %v9515_v40 = vmul.f32 %v16634_v20, %v9308_v55  ;;  %v9311_v5 = vadd.f32 %v18194_v53, %v9021_v39  ;;  %v9023_v45 = vpop.f32.mrb[143].mxu1  ;;  %v4599_v35 = vadd.f32 %v16642_v54, %v4528_v26 }
 0x985   :  { %v4529_v39 = vmul.f32 %v16628_v38, %v18203_v14  ;;  %v18205_v45 = vld [vmem:[#allocation64_spill] sm:$0xff] }
 0x986   :  { %9777 = vst [vmem:[%s17271_s10 + $0x88] sm:$0xff] %v9713_v43  ;;  %v9586_v60 = vadd.f32 %v16647_v7, %v9515_v40  ;;  %v9516_v31 = vmul.f32 %v16634_v20, %v9311_v5  ;;  %v18204_v43 = vld [vmem:[#allocation166_spill] sm:$0xff] }
 0x988   :  { %v9650_v18 = vadd.f32 %v9586_v60, %v4594_v11  ;;  %v9587_v4 = vadd.f32 %v16647_v7, %v9516_v31  ;;  %v4530_v11 = vmul.f32 %v16628_v38, %v18205_v45 }
 0x989   :  { %v9026_v57 = vpop.f32.mrb[144].mxu1 }
 0x98a   :  { %v9714_v30 = vmax.f32 %v9650_v18, 0.0  ;;  %v9651_v52 = vadd.f32 %v9587_v4, %v4595_v6  ;;  %v9316_v13 = vadd.f32 %v18196_v27, %v9026_v57  ;;  %v9028_v22 = vpop.f32.mrb[145].mxu1  ;;  %v18206_v6 = vld [vmem:[#allocation167_spill] sm:$0xff]  ;;  %v4600_v57 = vadd.f32 %v16642_v54, %v4529_v39 }
 0x98b   :  { %v9029_v10 = vpop.f32.mrb[146].mxu1  ;;  %v18207_v22 = vld [vmem:[#allocation56_spill] sm:$0xff] }
 0x98c   :  { %9778 = vst [vmem:[%s17271_s10 + $0x90] sm:$0xff] %v9714_v30  ;;  %v9715_v61 = vmax.f32 %v9651_v52, 0.0  ;;  %v9517_v2 = vmul.f32 %v16634_v20, %v9316_v13  ;;  %v9319_v8 = vadd.f32 %v18198_v37, %v9029_v10  ;;  %v9031_v44 = vpop.f32.mrb[147].mxu1  ;;  %v4601_v30 = vadd.f32 %v16642_v54, %v4530_v11 }
 0x98d   :  { %v4531_v10 = vmul.f32 %v18207_v22, %v16628_v38  ;;  %v18209_v44 = vld [vmem:[#allocation62_spill] sm:$0xff] }
 0x98e   :  { %9779 = vst [vmem:[%s17271_s10 + $0x98] sm:$0xff] %v9715_v61  ;;  %v9588_v59 = vadd.f32 %v16647_v7, %v9517_v2  ;;  %v9518_v0 = vmul.f32 %v16634_v20, %v9319_v8  ;;  %v18208_v61 = vld [vmem:[#allocation165_spill] sm:$0xff] }
 0x990   :  { %v9652_v36 = vadd.f32 %v9588_v59, %v4596_v49  ;;  %v9589_v58 = vadd.f32 %v16647_v7, %v9518_v0  ;;  %v4532_v49 = vmul.f32 %v18209_v44, %v16628_v38 }
 0x991   :  { %v9034_v12 = vpop.f32.mrb[148].mxu1 }
 0x992   :  { %v9716_v21 = vmax.f32 %v9652_v36, 0.0  ;;  %v9653_v28 = vadd.f32 %v9589_v58, %v4597_v47  ;;  %v9324_v25 = vadd.f32 %v18200_v51, %v9034_v12  ;;  %v9036_v63 = vpop.f32.mrb[149].mxu1  ;;  %v18210_v47 = vld [vmem:[#allocation34_spill] sm:$0xff]  ;;  %v4602_v12 = vadd.f32 %v16642_v54, %v4531_v10 }
 0x993   :  { %v9037_v3 = vpop.f32.mrb[150].mxu1  ;;  %v18211_v63 = vld [vmem:[#allocation71_spill] sm:$0xff] }
 0x994   :  { %9780 = vst [vmem:[%s17271_s10 + $0xa0] sm:$0xff] %v9716_v21  ;;  %v9717_v42 = vmax.f32 %v9653_v28, 0.0  ;;  %v9519_v24 = vmul.f32 %v16634_v20, %v9324_v25  ;;  %v9327_v48 = vadd.f32 %v18202_v17, %v9037_v3  ;;  %v9039_v15 = vpop.f32.mrb[151].mxu1  ;;  %v4603_v21 = vadd.f32 %v16642_v54, %v4532_v49 }
 0x995   :  { %v4533_v3 = vmul.f32 %v16628_v38, %v18211_v63  ;;  %v18213_v15 = vld [vmem:[#allocation75_spill] sm:$0xff] }
 0x996   :  { %9781 = vst [vmem:[%s17271_s10 + $0xa8] sm:$0xff] %v9717_v42  ;;  %v9590_v34 = vadd.f32 %v16647_v7, %v9519_v24  ;;  %v9520_v23 = vmul.f32 %v16634_v20, %v9327_v48  ;;  %v18212_v42 = vld [vmem:[#allocation67_spill] sm:$0xff] }
 0x998   :  { %v9654_v41 = vadd.f32 %v9590_v34, %v4598_v19  ;;  %v9591_v29 = vadd.f32 %v16647_v7, %v9520_v23  ;;  %v4534_v19 = vmul.f32 %v16628_v38, %v18213_v15 }
 0x999   :  { %v9042_v55 = vpop.f32.mrb[152].mxu1 }
 0x99a   :  { %v9718_v46 = vmax.f32 %v9654_v41, 0.0  ;;  %v9655_v32 = vadd.f32 %v9591_v29, %v4599_v35  ;;  %v9332_v40 = vadd.f32 %v18204_v43, %v9042_v55  ;;  %v9044_v53 = vpop.f32.mrb[153].mxu1  ;;  %v18214_v35 = vld [vmem:[#allocation170_spill] sm:$0xff]  ;;  %v4604_v55 = vadd.f32 %v16642_v54, %v4533_v3 }
 0x99b   :  { %v9045_v5 = vpop.f32.mrb[154].mxu1  ;;  %v18215_v53 = vld [vmem:[#allocation70_spill] sm:$0xff] }
 0x99c   :  { %9782 = vst [vmem:[%s17271_s10 + $0xb0] sm:$0xff] %v9718_v46  ;;  %v9719_v60 = vmax.f32 %v9655_v32, 0.0  ;;  %v9521_v31 = vmul.f32 %v16634_v20, %v9332_v40  ;;  %v9335_v18 = vadd.f32 %v18206_v6, %v9045_v5  ;;  %v9047_v4 = vpop.f32.mrb[155].mxu1  ;;  %v4605_v46 = vadd.f32 %v16642_v54, %v4534_v19 }
 0x99d   :  { %v4535_v5 = vmul.f32 %v18215_v53, %v16628_v38  ;;  %v18217_v4 = vld [vmem:[#allocation74_spill] sm:$0xff]  ;;  %v18226_v53 = vld [vmem:[#allocation73_spill] sm:$0xff] }
 0x99e   :  { %9783 = vst [vmem:[%s17271_s10 + $0xb8] sm:$0xff] %v9719_v60  ;;  %v9592_v1 = vadd.f32 %v16647_v7, %v9521_v31  ;;  %v9522_v33 = vmul.f32 %v16634_v20, %v9335_v18  ;;  %v18216_v60 = vld [vmem:[#allocation168_spill] sm:$0xff] }
 0x9a0   :  { %v9656_v52 = vadd.f32 %v9592_v1, %v4600_v57  ;;  %v9593_v27 = vadd.f32 %v16647_v7, %v9522_v33  ;;  %v4536_v57 = vmul.f32 %v18217_v4, %v16628_v38 }
 0x9a1   :  { %v9050_v13 = vpop.f32.mrb[156].mxu1 }
 0x9a2   :  { %v9720_v62 = vmax.f32 %v9656_v52, 0.0  ;;  %v9657_v9 = vadd.f32 %v9593_v27, %v4601_v30  ;;  %v9340_v2 = vadd.f32 %v18208_v61, %v9050_v13  ;;  %v9052_v37 = vpop.f32.mrb[157].mxu1  ;;  %v18218_v30 = vld [vmem:[#allocation169_spill] sm:$0xff]  ;;  %v4606_v13 = vadd.f32 %v16642_v54, %v4535_v5 }
 0x9a3   :  { %v9053_v8 = vpop.f32.mrb[158].mxu1 }
 0x9a4   :  { %9784 = vst [vmem:[%s17271_s10 + $0xc0] sm:$0xff] %v9720_v62  ;;  %v9721_v59 = vmax.f32 %v9657_v9, 0.0  ;;  %v9523_v0 = vmul.f32 %v16634_v20, %v9340_v2  ;;  %v9343_v36 = vadd.f32 %v18210_v47, %v9053_v8  ;;  %v9055_v58 = vpop.f32.mrb[159].mxu1  ;;  %v4607_v62 = vadd.f32 %v16642_v54, %v4536_v57  ;;  %v18219_v8 = vld [vmem:[#allocation78_spill] sm:$0xff] }
 0x9a5   :  { %v4537_v44 = vmul.f32 %v16628_v38, %v18219_v8  ;;  %v18230_v8 = vld [vmem:[#allocation176_spill] sm:$0xff] }
 0x9a6   :  { %9785 = vst [vmem:[%s17271_s10 + $0xc8] sm:$0xff] %v9721_v59  ;;  %v9594_v16 = vadd.f32 %v16647_v7, %v9523_v0  ;;  %v9524_v50 = vmul.f32 %v16634_v20, %v9343_v36  ;;  %v18220_v0 = vld [vmem:[#allocation172_spill] sm:$0xff] }
 0x9a7   :  { %v16939_v37 = vpop.f32.mrb[212].mxu0 }
 0x9a8   :  { %v9658_v28 = vadd.f32 %v9594_v16, %v4602_v12  ;;  %v9595_v51 = vadd.f32 %v16647_v7, %v9524_v50  ;;  %v16944_v58 = vpop.f32.mrb[213].mxu0  ;;  %v18221_v50 = vld [vmem:[#allocation80_spill] sm:$0xff] }
 0x9a9   :  { %v9058_v25 = vpop.f32.mrb[160].mxu1  ;;  %v16946_v16 = vpop.f32.mrb[214].mxu0 }
 0x9aa   :  { %v9722_v56 = vmax.f32 %v9658_v28, 0.0  ;;  %v9659_v26 = vadd.f32 %v9595_v51, %v4603_v21  ;;  %v9348_v24 = vadd.f32 %v18212_v42, %v9058_v25  ;;  %v9060_v17 = vpop.f32.mrb[161].mxu1  ;;  %v4538_v21 = vmul.f32 %v16628_v38, %v18221_v50  ;;  %v18222_v25 = vld [vmem:[#allocation173_spill] sm:$0xff] }
 0x9ab   :  { %v9061_v48 = vpop.f32.mrb[162].mxu1 }
 0x9ac   :  { %9786 = vst [vmem:[%s17271_s10 + $0xd0] sm:$0xff] %v9722_v56  ;;  %v9723_v34 = vmax.f32 %v9659_v26, 0.0  ;;  %v9525_v23 = vmul.f32 %v16634_v20, %v9348_v24  ;;  %v9351_v41 = vadd.f32 %v18214_v35, %v9061_v48  ;;  %v9063_v29 = vpop.f32.mrb[163].mxu1  ;;  %v16955_v56 = vpop.f32.mrb[215].mxu0  ;;  %v4608_v26 = vadd.f32 %v16642_v54, %v4537_v44 }
 0x9ad   :  { %v4609_v17 = vadd.f32 %v16642_v54, %v4538_v21  ;;  %v18224_v29 = vld [vmem:[#allocation171_spill] sm:$0xff] }
 0x9ae   :  { %9787 = vst [vmem:[%s17271_s10 + $0xd8] sm:$0xff] %v9723_v34  ;;  %v9596_v14 = vadd.f32 %v16647_v7, %v9525_v23  ;;  %v9526_v39 = vmul.f32 %v16634_v20, %v9351_v41  ;;  %v18223_v34 = vld [vmem:[#allocation76_spill] sm:$0xff] }
 0x9af   :  { %v4539_v23 = vmul.f32 %v18223_v34, %v16628_v38  ;;  %v18234_v34 = vld [vmem:[#allocation77_spill] sm:$0xff] }
 0x9b0   :  { %v9660_v32 = vadd.f32 %v9596_v14, %v4604_v55  ;;  %v9597_v43 = vadd.f32 %v16647_v7, %v9526_v39 }
 0x9b1   :  { %v9066_v40 = vpop.f32.mrb[164].mxu1 }
 0x9b2   :  { %v9724_v45 = vmax.f32 %v9660_v32, 0.0  ;;  %v9661_v11 = vadd.f32 %v9597_v43, %v4605_v46  ;;  %v9356_v31 = vadd.f32 %v18216_v60, %v9066_v40  ;;  %v9068_v6 = vpop.f32.mrb[165].mxu1  ;;  %v18225_v46 = vld [vmem:[#allocation36_spill] sm:$0xff] }
 0x9b3   :  { %v9069_v18 = vpop.f32.mrb[166].mxu1  ;;  %v4540_v32 = vmul.f32 %v18225_v46, %v16628_v38 }
 0x9b4   :  { %9788 = vst [vmem:[%s17271_s10 + $0xe0] sm:$0xff] %v9724_v45  ;;  %v9725_v1 = vmax.f32 %v9661_v11, 0.0  ;;  %v9527_v33 = vmul.f32 %v16634_v20, %v9356_v31  ;;  %v9359_v52 = vadd.f32 %v18218_v30, %v9069_v18  ;;  %v9071_v27 = vpop.f32.mrb[167].mxu1  ;;  %v4610_v11 = vadd.f32 %v16642_v54, %v4539_v23 }
 0x9b5   :  { %v4611_v6 = vadd.f32 %v16642_v54, %v4540_v32  ;;  %v18228_v27 = vld [vmem:[#allocation175_spill] sm:$0xff] }
 0x9b6   :  { %9789 = vst [vmem:[%s17271_s10 + $0xe8] sm:$0xff] %v9725_v1  ;;  %v9598_v22 = vadd.f32 %v16647_v7, %v9527_v33  ;;  %v9528_v10 = vmul.f32 %v16634_v20, %v9359_v52  ;;  %v18227_v1 = vld [vmem:[#allocation84_spill] sm:$0xff] }
 0x9b7   :  { %v4541_v33 = vmul.f32 %v16628_v38, %v18227_v1  ;;  %v18238_v1 = vld [vmem:[#allocation179_spill] sm:$0xff] }
 0x9b8   :  { %v9662_v9 = vadd.f32 %v9598_v22, %v4606_v13  ;;  %v9599_v61 = vadd.f32 %v16647_v7, %v9528_v10 }
 0x9b9   :  { %v9074_v2 = vpop.f32.mrb[168].mxu1 }
 0x9ba   :  { %v9726_v49 = vmax.f32 %v9662_v9, 0.0  ;;  %v9663_v59 = vadd.f32 %v9599_v61, %v4607_v62  ;;  %v9364_v47 = vadd.f32 %v18220_v0, %v9074_v2  ;;  %v9076_v36 = vpop.f32.mrb[169].mxu1  ;;  %v18229_v62 = vld [vmem:[#allocation90_spill] sm:$0xff] }
 0x9bb   :  { %v9077_v12 = vpop.f32.mrb[170].mxu1  ;;  %v4542_v9 = vmul.f32 %v16628_v38, %v18229_v62 }
 0x9bc   :  { %9790 = vst [vmem:[%s17271_s10 + $0xf0] sm:$0xff] %v9726_v49  ;;  %v9727_v28 = vmax.f32 %v9663_v59, 0.0  ;;  %v9529_v51 = vmul.f32 %v16634_v20, %v9364_v47  ;;  %v9367_v63 = vadd.f32 %v18222_v25, %v9077_v12  ;;  %v9079_v3 = vpop.f32.mrb[171].mxu1  ;;  %v4612_v59 = vadd.f32 %v16642_v54, %v4541_v33 }
 0x9bd   :  { %v4613_v36 = vadd.f32 %v16642_v54, %v4542_v9  ;;  %v18232_v3 = vld [vmem:[#allocation174_spill] sm:$0xff] }
 0x9be   :  { %9791 = vst [vmem:[%s17271_s10 + $0xf8] sm:$0xff] %v9727_v28  ;;  %v9600_v42 = vadd.f32 %v16647_v7, %v9529_v51  ;;  %v9530_v24 = vmul.f32 %v16634_v20, %v9367_v63  ;;  %v18231_v28 = vld [vmem:[#allocation83_spill] sm:$0xff] }
 0x9bf   :  { %v4543_v51 = vmul.f32 %v18231_v28, %v16628_v38  ;;  %v18242_v28 = vld [vmem:[#allocation81_spill] sm:$0xff] }
 0x9c0   :  { %v9664_v48 = vadd.f32 %v9600_v42, %v4608_v26  ;;  %v9601_v15 = vadd.f32 %v16647_v7, %v9530_v24 }
 0x9c1   :  { %v9082_v19 = vpop.f32.mrb[172].mxu1 }
 0x9c2   :  { %v9728_v35 = vmax.f32 %v9664_v48, 0.0  ;;  %v9665_v41 = vadd.f32 %v9601_v15, %v4609_v17  ;;  %v9372_v55 = vadd.f32 %v18224_v29, %v9082_v19  ;;  %v9084_v14 = vpop.f32.mrb[173].mxu1  ;;  %v18233_v17 = vld [vmem:[#allocation86_spill] sm:$0xff] }
 0x9c3   :  { %v9085_v39 = vpop.f32.mrb[174].mxu1  ;;  %v4544_v48 = vmul.f32 %v18233_v17, %v16628_v38 }
 0x9c4   :  { %9792 = vst [vmem:[%s17271_s10 + $0x100] sm:$0xff] %v9728_v35  ;;  %v9729_v43 = vmax.f32 %v9665_v41, 0.0  ;;  %v9531_v40 = vmul.f32 %v16634_v20, %v9372_v55  ;;  %v9375_v5 = vadd.f32 %v18226_v53, %v9085_v39  ;;  %v9087_v45 = vpop.f32.mrb[175].mxu1  ;;  %v4614_v41 = vadd.f32 %v16642_v54, %v4543_v51 }
 0x9c5   :  { %v4615_v14 = vadd.f32 %v16642_v54, %v4544_v48  ;;  %v18236_v45 = vld [vmem:[#allocation178_spill] sm:$0xff] }
 0x9c6   :  { %9793 = vst [vmem:[%s17271_s10 + $0x108] sm:$0xff] %v9729_v43  ;;  %v9602_v60 = vadd.f32 %v16647_v7, %v9531_v40  ;;  %v9532_v31 = vmul.f32 %v16634_v20, %v9375_v5  ;;  %v18235_v43 = vld [vmem:[#allocation23_spill] sm:$0xff] }
 0x9c7   :  { %v4545_v40 = vmul.f32 %v16628_v38, %v18235_v43  ;;  %v18246_v43 = vld [vmem:[#allocation182_spill] sm:$0xff] }
 0x9c8   :  { %v9666_v18 = vadd.f32 %v9602_v60, %v4610_v11  ;;  %v9603_v4 = vadd.f32 %v16647_v7, %v9532_v31 }
 0x9c9   :  { %v9090_v57 = vpop.f32.mrb[176].mxu1 }
 0x9ca   :  { %v9730_v30 = vmax.f32 %v9666_v18, 0.0  ;;  %v9667_v52 = vadd.f32 %v9603_v4, %v4611_v6  ;;  %v9380_v13 = vadd.f32 %v18228_v27, %v9090_v57  ;;  %v9092_v22 = vpop.f32.mrb[177].mxu1  ;;  %v18237_v6 = vld [vmem:[#allocation3_spill] sm:$0xff] }
 0x9cb   :  { %v9093_v10 = vpop.f32.mrb[178].mxu1  ;;  %v4546_v18 = vmul.f32 %v16628_v38, %v18237_v6 }
 0x9cc   :  { %9794 = vst [vmem:[%s17271_s10 + $0x110] sm:$0xff] %v9730_v30  ;;  %v9731_v61 = vmax.f32 %v9667_v52, 0.0  ;;  %v9533_v2 = vmul.f32 %v16634_v20, %v9380_v13  ;;  %v9383_v44 = vadd.f32 %v18230_v8, %v9093_v10  ;;  %v9095_v49 = vpop.f32.mrb[179].mxu1  ;;  %v4616_v52 = vadd.f32 %v16642_v54, %v4545_v40 }
 0x9cd   :  { %v4617_v22 = vadd.f32 %v16642_v54, %v4546_v18  ;;  %v18240_v49 = vld [vmem:[#allocation177_spill] sm:$0xff] }
 0x9ce   :  { %9795 = vst [vmem:[%s17271_s10 + $0x118] sm:$0xff] %v9731_v61  ;;  %v9604_v0 = vadd.f32 %v16647_v7, %v9533_v2  ;;  %v9534_v47 = vmul.f32 %v16634_v20, %v9383_v44  ;;  %v18239_v61 = vld [vmem:[#allocation31_spill] sm:$0xff] }
 0x9cf   :  { %v4547_v2 = vmul.f32 %v18239_v61, %v16628_v38  ;;  %v18250_v61 = vld [vmem:[#allocation85_spill] sm:$0xff] }
 0x9d0   :  { %v9668_v12 = vadd.f32 %v9604_v0, %v4612_v59  ;;  %v9605_v50 = vadd.f32 %v16647_v7, %v9534_v47 }
 0x9d1   :  { %v9098_v21 = vpop.f32.mrb[180].mxu1 }
 0x9d2   :  { %v9732_v25 = vmax.f32 %v9668_v12, 0.0  ;;  %v9669_v63 = vadd.f32 %v9605_v50, %v4613_v36  ;;  %v9388_v26 = vadd.f32 %v18232_v3, %v9098_v21  ;;  %v9100_v42 = vpop.f32.mrb[181].mxu1  ;;  %v18241_v36 = vld [vmem:[#allocation17_spill] sm:$0xff] }
 0x9d3   :  { %v9101_v24 = vpop.f32.mrb[182].mxu1  ;;  %v4548_v12 = vmul.f32 %v18241_v36, %v16628_v38 }
 0x9d4   :  { %9796 = vst [vmem:[%s17271_s10 + $0x120] sm:$0xff] %v9732_v25  ;;  %v9733_v15 = vmax.f32 %v9669_v63, 0.0  ;;  %v9535_v19 = vmul.f32 %v16634_v20, %v9388_v26  ;;  %v9391_v23 = vadd.f32 %v18234_v34, %v9101_v24  ;;  %v9103_v35 = vpop.f32.mrb[183].mxu1  ;;  %v4618_v63 = vadd.f32 %v16642_v54, %v4547_v2 }
 0x9d5   :  { %v4619_v42 = vadd.f32 %v16642_v54, %v4548_v12  ;;  %v18244_v35 = vld [vmem:[#allocation181_spill] sm:$0xff] }
 0x9d6   :  { %9797 = vst [vmem:[%s17271_s10 + $0x128] sm:$0xff] %v9733_v15  ;;  %v9606_v29 = vadd.f32 %v16647_v7, %v9535_v19  ;;  %v9536_v55 = vmul.f32 %v16634_v20, %v9391_v23  ;;  %v18243_v15 = vld [vmem:[#allocation41_spill] sm:$0xff] }
 0x9d7   :  { %v4549_v19 = vmul.f32 %v16628_v38, %v18243_v15  ;;  %v18254_v15 = vld [vmem:[#allocation185_spill] sm:$0xff] }
 0x9d8   :  { %v9670_v39 = vadd.f32 %v9606_v29, %v4614_v41  ;;  %v9607_v46 = vadd.f32 %v16647_v7, %v9536_v55 }
 0x9d9   :  { %v9106_v32 = vpop.f32.mrb[184].mxu1 }
 0x9da   :  { %v9734_v53 = vmax.f32 %v9670_v39, 0.0  ;;  %v9671_v5 = vadd.f32 %v9607_v46, %v4615_v14  ;;  %v9396_v11 = vadd.f32 %v18236_v45, %v9106_v32  ;;  %v9108_v60 = vpop.f32.mrb[185].mxu1  ;;  %v18245_v14 = vld [vmem:[#allocation51_spill] sm:$0xff] }
 0x9db   :  { %v9109_v31 = vpop.f32.mrb[186].mxu1  ;;  %v4550_v39 = vmul.f32 %v16628_v38, %v18245_v14 }
 0x9dc   :  { %9798 = vst [vmem:[%s17271_s10 + $0x130] sm:$0xff] %v9734_v53  ;;  %v9735_v4 = vmax.f32 %v9671_v5, 0.0  ;;  %v9537_v57 = vmul.f32 %v16634_v20, %v9396_v11  ;;  %v9399_v33 = vadd.f32 %v18238_v1, %v9109_v31  ;;  %v9111_v30 = vpop.f32.mrb[187].mxu1  ;;  %v4620_v5 = vadd.f32 %v16642_v54, %v4549_v19 }
 0x9dd   :  { %v4621_v60 = vadd.f32 %v16642_v54, %v4550_v39  ;;  %v18248_v30 = vld [vmem:[#allocation180_spill] sm:$0xff]  ;;  %v17112_v39 = vld [vmem:[%s17267_s8] ss:$0 sm:$0xff] }
 0x9de   :  { %9799 = vst [vmem:[%s17271_s10 + $0x138] sm:$0xff] %v9735_v4  ;;  %v9608_v27 = vadd.f32 %v16647_v7, %v9537_v57  ;;  %v9538_v13 = vmul.f32 %v16634_v20, %v9399_v33  ;;  %v18247_v4 = vld [vmem:[#allocation39_spill] sm:$0xff] }
 0x9df   :  { %v4551_v57 = vmul.f32 %v18247_v4, %v16628_v38 }
 0x9e0   :  { %v9672_v10 = vadd.f32 %v9608_v27, %v4616_v52  ;;  %v9609_v62 = vadd.f32 %v16647_v7, %v9538_v13 }
 0x9e1   :  { %v9114_v9 = vpop.f32.mrb[188].mxu1 }
 0x9e2   :  { %v9736_v8 = vmax.f32 %v9672_v10, 0.0  ;;  %v9673_v44 = vadd.f32 %v9609_v62, %v4617_v22  ;;  %v9404_v59 = vadd.f32 %v18240_v49, %v9114_v9  ;;  %v9116_v0 = vpop.f32.mrb[189].mxu1  ;;  %v18249_v22 = vld [vmem:[#allocation48_spill] sm:$0xff] }
 0x9e3   :  { %v9117_v47 = vpop.f32.mrb[190].mxu1  ;;  %v4552_v10 = vmul.f32 %v18249_v22, %v16628_v38 }
 0x9e4   :  { %9800 = vst [vmem:[%s17271_s10 + $0x140] sm:$0xff] %v9736_v8  ;;  %v9737_v50 = vmax.f32 %v9673_v44, 0.0  ;;  %v9539_v21 = vmul.f32 %v16634_v20, %v9404_v59  ;;  %v9407_v51 = vadd.f32 %v18242_v28, %v9117_v47  ;;  %v9119_v25 = vpop.f32.mrb[191].mxu1  ;;  %v4622_v44 = vadd.f32 %v16642_v54, %v4551_v57  ;;  %v17132_v57 = vld [vmem:[%s17269_s9] ss:$0 sm:$0xff] }
 0x9e5   :  { %v4623_v0 = vadd.f32 %v16642_v54, %v4552_v10  ;;  %v18252_v25 = vld [vmem:[#allocation184_spill] sm:$0xff] }
 0x9e6   :  { %9801 = vst [vmem:[%s17271_s10 + $0x148] sm:$0xff] %v9737_v50  ;;  %v9610_v3 = vadd.f32 %v16647_v7, %v9539_v21  ;;  %v9540_v26 = vmul.f32 %v16634_v20, %v9407_v51  ;;  %v18251_v50 = vld [vmem:[#allocation59_spill] sm:$0xff] }
 0x9e7   :  { %v4553_v21 = vmul.f32 %v16628_v38, %v18251_v50  ;;  %v18262_v50 = vld [vmem:[#allocation188_spill] sm:$0xff] }
 0x9e8   :  { %v9674_v24 = vadd.f32 %v9610_v3, %v4618_v63  ;;  %v9611_v17 = vadd.f32 %v16647_v7, %v9540_v26 }
 0x9e9   :  { %v9122_v48 = vpop.f32.mrb[192].mxu1 }
 0x9ea   :  { %v9738_v34 = vmax.f32 %v9674_v24, 0.0  ;;  %v9675_v23 = vadd.f32 %v9611_v17, %v4619_v42  ;;  %v9412_v41 = vadd.f32 %v18244_v35, %v9122_v48  ;;  %v9124_v29 = vpop.f32.mrb[193].mxu1  ;;  %v18253_v42 = vld [vmem:[#allocation58_spill] sm:$0xff] }
 0x9eb   :  { %v9125_v55 = vpop.f32.mrb[194].mxu1  ;;  %v4554_v24 = vmul.f32 %v16628_v38, %v18253_v42 }
 0x9ec   :  { %9802 = vst [vmem:[%s17271_s10 + $0x150] sm:$0xff] %v9738_v34  ;;  %v9739_v46 = vmax.f32 %v9675_v23, 0.0  ;;  %v9541_v32 = vmul.f32 %v16634_v20, %v9412_v41  ;;  %v9415_v40 = vadd.f32 %v18246_v43, %v9125_v55  ;;  %v9127_v53 = vpop.f32.mrb[195].mxu1  ;;  %v4624_v23 = vadd.f32 %v16642_v54, %v4553_v21 }
 0x9ed   :  { %v4625_v41 = vadd.f32 %v16642_v54, %v4554_v24  ;;  %v18256_v53 = vld [vmem:[#allocation183_spill] sm:$0xff] }
 0x9ee   :  { %9803 = vst [vmem:[%s17271_s10 + $0x158] sm:$0xff] %v9739_v46  ;;  %v9612_v45 = vadd.f32 %v16647_v7, %v9541_v32  ;;  %v9542_v11 = vmul.f32 %v16634_v20, %v9415_v40  ;;  %v18255_v46 = vld [vmem:[#allocation50_spill] sm:$0xff] }
 0x9ef   :  { %v4555_v32 = vmul.f32 %v17112_v39, %v18255_v46  ;;  %v18266_v46 = vld [vmem:[#allocation11_spill] sm:$0xff] }
 0x9f0   :  { %v9676_v31 = vadd.f32 %v9612_v45, %v4620_v5  ;;  %v9613_v6 = vadd.f32 %v16647_v7, %v9542_v11  ;;  %v18257_v11 = vld [vmem:[#allocation53_spill] sm:$0xff] }
 0x9f1   :  { %v9130_v18 = vpop.f32.mrb[196].mxu1  ;;  %v4556_v54 = vmul.f32 %v17112_v39, %v18257_v11 }
 0x9f2   :  { %v9740_v1 = vmax.f32 %v9676_v31, 0.0  ;;  %v9677_v33 = vadd.f32 %v9613_v6, %v4621_v60  ;;  %v9420_v52 = vadd.f32 %v18248_v30, %v9130_v18  ;;  %v9132_v27 = vpop.f32.mrb[197].mxu1  ;;  %v17125_v60 = vld [vmem:[%s17268_s5] ss:$0 sm:$0xff]  ;;  %v18258_v6 = vld [vmem:[#allocation88_spill] sm:$0xff] }
 0x9f3   :  { %v9133_v13 = vpop.f32.mrb[198].mxu1  ;;  %v4627_v27 = vadd.f32 %v17132_v57, %v4556_v54 }
 0x9f4   :  { %9804 = vst [vmem:[%s17271_s10 + $0x160] sm:$0xff] %v9740_v1  ;;  %v9741_v62 = vmax.f32 %v9677_v33, 0.0  ;;  %v9543_v9 = vmul.f32 %v16634_v20, %v9420_v52  ;;  %v9423_v2 = vadd.f32 %v18250_v61, %v9133_v13  ;;  %v9135_v8 = vpop.f32.mrb[199].mxu1  ;;  %v4626_v1 = vadd.f32 %v17132_v57, %v4555_v32  ;;  %v17141_v33 = vld [vmem:[%s17270_s6] ss:$0 sm:$0xff] }
 0x9f5   :  { %v18260_v8 = vld [vmem:[#allocation187_spill] sm:$0xff] }
 0x9f6   :  { %9805 = vst [vmem:[%s17271_s10 + $0x168] sm:$0xff] %v9741_v62  ;;  %v9614_v49 = vadd.f32 %v16647_v7, %v9543_v9  ;;  %v9544_v59 = vmul.f32 %v16634_v20, %v9423_v2  ;;  %v18259_v62 = vld [vmem:[#allocation6_spill] sm:$0xff] }
 0x9f7   :  { %v4557_v9 = vmul.f32 %v17112_v39, %v18259_v62  ;;  %v18270_v62 = vld [vmem:[#allocation191_spill] sm:$0xff] }
 0x9f8   :  { %v9678_v47 = vadd.f32 %v9614_v49, %v4622_v44  ;;  %v9615_v36 = vadd.f32 %v16647_v7, %v9544_v59 }
 0x9f9   :  { %v9138_v12 = vpop.f32.mrb[200].mxu1 }
 0x9fa   :  { %v9742_v28 = vmax.f32 %v9678_v47, 0.0  ;;  %v9679_v51 = vadd.f32 %v9615_v36, %v4623_v0  ;;  %v9428_v63 = vadd.f32 %v18252_v25, %v9138_v12  ;;  %v9140_v3 = vpop.f32.mrb[201].mxu1  ;;  %v18261_v0 = vld [vmem:[#allocation13_spill] sm:$0xff] }
 0x9fb   :  { %v9141_v26 = vpop.f32.mrb[202].mxu1  ;;  %v4558_v47 = vmul.f32 %v17112_v39, %v18261_v0 }
 0x9fc   :  { %9806 = vst [vmem:[%s17271_s10 + $0x170] sm:$0xff] %v9742_v28  ;;  %v9743_v17 = vmax.f32 %v9679_v51, 0.0  ;;  %v9545_v48 = vmul.f32 %v16634_v20, %v9428_v63  ;;  %v9431_v19 = vadd.f32 %v18254_v15, %v9141_v26  ;;  %v9143_v34 = vpop.f32.mrb[203].mxu1  ;;  %v4628_v51 = vadd.f32 %v17132_v57, %v4557_v9 }
 0x9fd   :  { %v4629_v3 = vadd.f32 %v17132_v57, %v4558_v47  ;;  %v18264_v34 = vld [vmem:[#allocation186_spill] sm:$0xff] }
 0x9fe   :  { %9807 = vst [vmem:[%s17271_s10 + $0x178] sm:$0xff] %v9743_v17  ;;  %v9616_v35 = vadd.f32 %v16647_v7, %v9545_v48  ;;  %v9546_v38 = vmul.f32 %v16634_v20, %v9431_v19  ;;  %v18263_v17 = vld [vmem:[#allocation69_spill] sm:$0xff] }
 0x9ff   :  { %v4559_v48 = vmul.f32 %v17112_v39, %v18263_v17  ;;  %v18274_v17 = vld [vmem:[#allocation21_spill] sm:$0xff] }
 0xa00   :  { %v9680_v29 = vadd.f32 %v9616_v35, %v4624_v23  ;;  %v9617_v55 = vadd.f32 %v16647_v7, %v9546_v38 }
 0xa01   :  { %v9146_v14 = vpop.f32.mrb[204].mxu1 }
 0xa02   :  { %v9744_v43 = vmax.f32 %v9680_v29, 0.0  ;;  %v9681_v40 = vadd.f32 %v9617_v55, %v4625_v41  ;;  %v9436_v5 = vadd.f32 %v18256_v53, %v9146_v14  ;;  %v9148_v45 = vpop.f32.mrb[205].mxu1  ;;  %v18265_v41 = vld [vmem:[#allocation72_spill] sm:$0xff] }
 0xa03   :  { %v9149_v20 = vpop.f32.mrb[206].mxu1  ;;  %v4560_v29 = vmul.f32 %v17112_v39, %v18265_v41 }
 0xa04   :  { %9808 = vst [vmem:[%s17271_s10 + $0x180] sm:$0xff] %v9744_v43  ;;  %v9745_v7 = vmax.f32 %v9681_v40, 0.0  ;;  %v9547_v31 = vmul.f32 %v17125_v60, %v9436_v5  ;;  %v9439_v18 = vadd.f32 %v18258_v6, %v9149_v20  ;;  %v9151_v4 = vpop.f32.mrb[207].mxu1  ;;  %v4630_v40 = vadd.f32 %v17132_v57, %v4559_v48 }
 0xa05   :  { %v4631_v45 = vadd.f32 %v17132_v57, %v4560_v29  ;;  %v18268_v4 = vld [vmem:[#allocation190_spill] sm:$0xff] }
 0xa06   :  { %9809 = vst [vmem:[%s17271_s10 + $0x188] sm:$0xff] %v9745_v7  ;;  %v9618_v30 = vadd.f32 %v17141_v33, %v9547_v31  ;;  %v9548_v52 = vmul.f32 %v17125_v60, %v9439_v18  ;;  %v18267_v7 = vld [vmem:[#allocation92_spill] sm:$0xff] }
 0xa07   :  { %v4561_v31 = vmul.f32 %v17112_v39, %v18267_v7 }
 0xa08   :  { %v9682_v13 = vadd.f32 %v9618_v30, %v4626_v1  ;;  %v9619_v22 = vadd.f32 %v17141_v33, %v9548_v52 }
 0xa09   :  { %v9154_v10 = vpop.f32.mrb[208].mxu1 }
 0xa0a   :  { %v9746_v61 = vmax.f32 %v9682_v13, 0.0  ;;  %v9683_v2 = vadd.f32 %v9619_v22, %v4627_v27  ;;  %v9444_v44 = vadd.f32 %v18260_v8, %v9154_v10  ;;  %v9156_v49 = vpop.f32.mrb[209].mxu1  ;;  %v18269_v27 = vld [vmem:[#allocation95_spill] sm:$0xff] }
 0xa0b   :  { %v9157_v59 = vpop.f32.mrb[210].mxu1  ;;  %v4562_v13 = vmul.f32 %v17112_v39, %v18269_v27 }
 0xa0c   :  { %9810 = vst [vmem:[%s17271_s10 + $0x190] sm:$0xff] %v9746_v61  ;;  %v9747_v36 = vmax.f32 %v9683_v2, 0.0  ;;  %v9549_v12 = vmul.f32 %v17125_v60, %v9444_v44  ;;  %v9447_v21 = vadd.f32 %v18262_v50, %v9157_v59  ;;  %v9159_v28 = vpop.f32.mrb[211].mxu1  ;;  %v4632_v2 = vadd.f32 %v17132_v57, %v4561_v31 }
 0xa0d   :  { %v4633_v49 = vadd.f32 %v17132_v57, %v4562_v13  ;;  %v18272_v28 = vld [vmem:[#allocation189_spill] sm:$0xff] }
 0xa0e   :  { %9811 = vst [vmem:[%s17271_s10 + $0x198] sm:$0xff] %v9747_v36  ;;  %v9620_v25 = vadd.f32 %v17141_v33, %v9549_v12  ;;  %v9550_v63 = vmul.f32 %v17125_v60, %v9447_v21  ;;  %v18271_v36 = vld [vmem:[#allocation9_spill] sm:$0xff] }
 0xa0f   :  { %v4563_v12 = vmul.f32 %v17112_v39, %v18271_v36 }
 0xa10   :  { %v9684_v26 = vadd.f32 %v9620_v25, %v4628_v51  ;;  %v9621_v42 = vadd.f32 %v17141_v33, %v9550_v63 }
 0xa11   :  { %v9162_v24 = vpop.f32.mrb[212].mxu1 }
 0xa12   :  { %v9748_v15 = vmax.f32 %v9684_v26, 0.0  ;;  %v9685_v19 = vadd.f32 %v9621_v42, %v4629_v3  ;;  %v9452_v23 = vadd.f32 %v18264_v34, %v9162_v24  ;;  %v9164_v35 = vpop.f32.mrb[213].mxu1  ;;  %v18273_v3 = vld [vmem:[#allocation93_spill] sm:$0xff] }
 0xa13   :  { %v9165_v38 = vpop.f32.mrb[214].mxu1  ;;  %v4564_v26 = vmul.f32 %v17112_v39, %v18273_v3 }
 0xa14   :  { %9812 = vst [vmem:[%s17271_s10 + $0x1a0] sm:$0xff] %v9748_v15  ;;  %v9749_v55 = vmax.f32 %v9685_v19, 0.0  ;;  %v9551_v14 = vmul.f32 %v17125_v60, %v9452_v23  ;;  %v9455_v32 = vadd.f32 %v18266_v46, %v9165_v38  ;;  %v9167_v43 = vpop.f32.mrb[215].mxu1  ;;  %v4634_v19 = vadd.f32 %v17132_v57, %v4563_v12 }
 0xa15   :  { %v4635_v35 = vadd.f32 %v17132_v57, %v4564_v26 }
 0xa16   :  { %9813 = vst [vmem:[%s17271_s10 + $0x1a8] sm:$0xff] %v9749_v55  ;;  %v9622_v53 = vadd.f32 %v17141_v33, %v9551_v14  ;;  %v9552_v5 = vmul.f32 %v17125_v60, %v9455_v32  ;;  %v18275_v55 = vld [vmem:[#allocation100_spill] sm:$0xff] }
 0xa17   :  { %v4565_v14 = vmul.f32 %v17112_v39, %v18275_v55 }
 0xa18   :  { %v9686_v20 = vadd.f32 %v9622_v53, %v4630_v40  ;;  %v9623_v11 = vadd.f32 %v17141_v33, %v9552_v5  ;;  %v18276_v5 = vld [vmem:[#allocation103_spill] sm:$0xff] }
 0xa19   :  { %v9170_v54 = vpop.f32.mrb[216].mxu1  ;;  %v4636_v31 = vadd.f32 %v17132_v57, %v4565_v14 }
 0xa1a   :  { %v9750_v6 = vmax.f32 %v9686_v20, 0.0  ;;  %v9687_v18 = vadd.f32 %v9623_v11, %v4631_v45  ;;  %v9460_v1 = vadd.f32 %v18268_v4, %v9170_v54  ;;  %v9172_v30 = vpop.f32.mrb[217].mxu1  ;;  %v4566_v45 = vmul.f32 %v17112_v39, %v18276_v5 }
 0xa1b   :  { %v9173_v52 = vpop.f32.mrb[218].mxu1 }
 0xa1c   :  { %9814 = vst [vmem:[%s17271_s10 + $0x1b0] sm:$0xff] %v9750_v6  ;;  %v9751_v22 = vmax.f32 %v9687_v18, 0.0  ;;  %v9553_v10 = vmul.f32 %v17125_v60, %v9460_v1  ;;  %v9463_v9 = vadd.f32 %v18270_v62, %v9173_v52  ;;  %v9175_v61 = vpop.f32.mrb[219].mxu1  ;;  %v4637_v18 = vadd.f32 %v17132_v57, %v4566_v45  ;;  %v18277_v52 = vld [vmem:[#allocation98_spill] sm:$0xff] }
 0xa1e   :  { %9815 = vst [vmem:[%s17271_s10 + $0x1b8] sm:$0xff] %v9751_v22  ;;  %v9624_v8 = vadd.f32 %v17141_v33, %v9553_v10  ;;  %v9554_v44 = vmul.f32 %v17125_v60, %v9463_v9  ;;  %v18278_v9 = vld [vmem:[#allocation101_spill] sm:$0xff] }
 0xa1f   :  { %v4568_v61 = vmul.f32 %v17112_v39, %v18278_v9 }
 0xa20   :  { %v9688_v59 = vadd.f32 %v9624_v8, %v4632_v2  ;;  %v9625_v0 = vadd.f32 %v17141_v33, %v9554_v44 }
 0xa21   :  { %v9178_v47 = vpop.f32.mrb[220].mxu1 }
 0xa22   :  { %v9752_v50 = vmax.f32 %v9688_v59, 0.0  ;;  %v9689_v21 = vadd.f32 %v9625_v0, %v4633_v49  ;;  %v9468_v51 = vadd.f32 %v18272_v28, %v9178_v47  ;;  %v9180_v25 = vpop.f32.mrb[221].mxu1  ;;  %v4639_v0 = vadd.f32 %v17132_v57, %v4568_v61 }
 0xa23   :  { %v9181_v63 = vpop.f32.mrb[222].mxu1 }
 0xa24   :  { %9816 = vst [vmem:[%s17271_s10 + $0x1c0] sm:$0xff] %v9752_v50  ;;  %v9753_v42 = vmax.f32 %v9689_v21, 0.0  ;;  %v9555_v24 = vmul.f32 %v17125_v60, %v9468_v51  ;;  %v9471_v48 = vadd.f32 %v18274_v17, %v9181_v63  ;;  %v9183_v15 = vpop.f32.mrb[223].mxu1 }
 0xa26   :  { %9817 = vst [vmem:[%s17271_s10 + $0x1c8] sm:$0xff] %v9753_v42  ;;  %v9626_v34 = vadd.f32 %v17141_v33, %v9555_v24  ;;  %v9556_v23 = vmul.f32 %v17125_v60, %v9471_v48 }
 0xa28   :  { %v9690_v38 = vadd.f32 %v9626_v34, %v4634_v19  ;;  %v9627_v41 = vadd.f32 %v17141_v33, %v9556_v23 }
 0xa29   :  { %v9186_v29 = vpop.f32.mrb[224].mxu1 }
 0xa2a   :  { %v9754_v46 = vmax.f32 %v9690_v38, 0.0  ;;  %v9691_v32 = vadd.f32 %v9627_v41, %v4635_v35  ;;  %v9476_v43 = vadd.f32 %v16944_v58, %v9186_v29  ;;  %v9188_v40 = vpop.f32.mrb[225].mxu1 }
 0xa2b   :  { %v9189_v53 = vpop.f32.mrb[226].mxu1 }
 0xa2c   :  { %9818 = vst [vmem:[%s17271_s10 + $0x1d0] sm:$0xff] %v9754_v46  ;;  %v9755_v20 = vmax.f32 %v9691_v32, 0.0  ;;  %v9557_v11 = vmul.f32 %v17125_v60, %v9476_v43  ;;  %v9479_v54 = vadd.f32 %v16955_v56, %v9189_v53  ;;  %v9191_v7 = vpop.f32.mrb[227].mxu1  ;;  %v4567_v56 = vmul.f32 %v17112_v39, %v18277_v52 }
 0xa2e   :  { %9819 = vst [vmem:[%s17271_s10 + $0x1d8] sm:$0xff] %v9755_v20  ;;  %v9628_v58 = vadd.f32 %v17141_v33, %v9557_v11  ;;  %v9558_v6 = vmul.f32 %v17125_v60, %v9479_v54  ;;  %v4638_v59 = vadd.f32 %v17132_v57, %v4567_v56 }
 0xa30   :  { %v9692_v4 = vadd.f32 %v9628_v58, %v4636_v31  ;;  %v9629_v1 = vadd.f32 %v17141_v33, %v9558_v6 }
 0xa31   :  { %v9194_v30 = vpop.f32.mrb[228].mxu1 }
 0xa32   :  { %v9756_v27 = vmax.f32 %v9692_v4, 0.0  ;;  %v9693_v13 = vadd.f32 %v9629_v1, %v4637_v18  ;;  %v9484_v22 = vadd.f32 %v16939_v37, %v9194_v30  ;;  %v9196_v10 = vpop.f32.mrb[229].mxu1 }
 0xa33   :  { %v9197_v62 = vpop.f32.mrb[230].mxu1 }
 0xa34   :  { %9820 = vst [vmem:[%s17271_s10 + $0x1e0] sm:$0xff] %v9756_v27  ;;  %v9757_v2 = vmax.f32 %v9693_v13, 0.0  ;;  %v9559_v8 = vmul.f32 %v17125_v60, %v9484_v22  ;;  %v9487_v44 = vadd.f32 %v16946_v16, %v9197_v62  ;;  %v9199_v49 = vpop.f32.mrb[231].mxu1 }
 0xa36   :  { %9821 = vst [vmem:[%s17271_s10 + $0x1e8] sm:$0xff] %v9757_v2  ;;  %v9630_v37 = vadd.f32 %v17141_v33, %v9559_v8  ;;  %v9560_v39 = vmul.f32 %v17125_v60, %v9487_v44 }
 0xa38   :  { %v9694_v47 = vadd.f32 %v9630_v37, %v4638_v59  ;;  %v9631_v36 = vadd.f32 %v17141_v33, %v9560_v39 }
 0xa3a   :  { %v9758_v12 = vmax.f32 %v9694_v47, 0.0  ;;  %v9695_v50 = vadd.f32 %v9631_v36, %v4639_v0 }
 0xa3c   :  { %9822 = vst [vmem:[%s17271_s10 + $0x1f0] sm:$0xff] %v9758_v12  ;;  %v9759_v16 = vmax.f32 %v9695_v50, 0.0 }
 0xa3e   :  { %9823 = vst [vmem:[%s17271_s10 + $0x1f8] sm:$0xff] %v9759_v16 }

</bundles_post_ra>
